<compile_context>
chip_gen: v5e
topology: v5e:2x2
jax: 0.10.0
libtpu: 0.0.40
codegen_flags: <defaults>
</compile_context>

<pallas_src>
import functools

import numpy as np

import jax
import jax.numpy as jnp
from jax import lax
from jax.experimental import pallas as pl
from jax.experimental.pallas import tpu as pltpu

EPS = 1e-8       # asteroid GlobLN epsilon
KSIZE = 5        # depthwise kernel size
PAD = KSIZE - 1  # causal padding (conv pads k-1, then crops trailing k-1)


# -----------------------------------------------------------------------------
# Host-side precomputed selection matrices (built once, DMA'd once)
# -----------------------------------------------------------------------------
def _make_conv_sel(tin, tout, stride, B):
    """Stacked 5-tap, batch-block-diagonal causal-conv gather matrix.

    Shape (B*tin, KSIZE*B*tout); column block k holds tap k:
      out[c, b*tout + j] (tap k) = x[c, b*tin + (j*stride + k - PAD)]   (0 if <0)
    """
    s = np.zeros((B * tin, KSIZE * B * tout), np.float32)
    for k in range(KSIZE):
        for b in range(B):
            for j in range(tout):
                p = j * stride + k - PAD
                if 0 <= p < tin:
                    s[b * tin + p, (k * B + b) * tout + j] = 1.0
    return jnp.asarray(s)


def _make_interp_sel(lin, lout, B):
    """Nearest-neighbour interpolation matrix, batch-block-diagonal.

    Shape (B*lin, B*lout); out[:, b*lout + j] = x[:, b*lin + (j*lin)//lout].
    """
    s = np.zeros((B * lin, B * lout), np.float32)
    for b in range(B):
        for j in range(lout):
            s[b * lin + (j * lin) // lout, b * lout + j] = 1.0
    return jnp.asarray(s)


# -----------------------------------------------------------------------------
# Parameter packing
# -----------------------------------------------------------------------------
def _pack_param_table(p, depth):
    """One dense (C, Nparams) table: C on sublanes, param index on lanes.

    Columns: for each norm layer l (order: proj, spp[0..d-1], fuse[1..d-1],
    concat[0..d-1], last): [bias, gamma, beta]; then for each depthwise conv
    (order: spp[0..d-1], fuse[1..d-1]): 5 tap-weight columns.
    """
    norm_layers = ([p["proj"]] + [p["spp"][k] for k in range(depth)]
                   + [p["fuse"][i] for i in range(1, depth)]
                   + [p["concat"][i] for i in range(depth)] + [p["last"]])
    cols = []
    for d in norm_layers:
        cols += [d["b"], d["g"], d["bt"]]
    dw_layers = ([p["spp"][k] for k in range(depth)]
                 + [p["fuse"][i] for i in range(1, depth)])
    for d in dw_layers:
        cols += [d["w"][k, :, 0] for k in range(KSIZE)]
    return jnp.stack(cols, axis=1)            # (C, 3*(3d+1) + 5*(2d-1))


# -----------------------------------------------------------------------------
# Fused forward
# -----------------------------------------------------------------------------
def visual_subnetwork_forward(x, p, *, depth):
    B, Cin, T = x.shape
    C = p["proj"]["w"].shape[0]

    # ---- static per-level time lengths (causal conv arithmetic) ----
    def conv_out(t, stride):
        return (t + 2 * PAD - KSIZE) // stride + 1 - PAD

    lens = [conv_out(T, 1)]                    # stride-1 conv preserves length
    for _ in range(1, depth):
        lens.append(conv_out(lens[-1], 2))
    conv_in = [T] + lens[:-1]

    # ---- packed parameters ----
    par = _pack_param_table(p, depth)          # (C, 74) for depth=4
    n_norm = 3 * depth + 1
    dw_base = 3 * n_norm

    pw_cat = jnp.concatenate([p["concat"][i]["w"] for i in range(depth)]
                             + [p["last"]["w"]], axis=1)          # (C, 14C)
    pw_off = [0]
    for i in range(depth):
        pw_off.append(pw_off[-1] + p["concat"][i]["w"].shape[1])

    alphas = jnp.concatenate([p["proj"]["a"].reshape(1)]
                             + [p["concat"][i]["a"].reshape(1)
                                for i in range(depth)]
                             + [p["last"]["a"].reshape(1)])        # (depth+2,)
    res_b = p["res"]["b"].reshape(Cin, 1)

    # ---- precomputed selection matrices (deduped) ----
    conv_sels = [_make_conv_sel(conv_in[l], lens[l], 1 if l == 0 else 2, B)
                 for l in range(depth)]        # fuse level i reuses conv_sels[i]
    interp_map, interp_sels = {}, []

    def _add_interp(lin, lout):
        if lin != lout and (lin, lout) not in interp_map:
            interp_map[(lin, lout)] = len(interp_sels)
            interp_sels.append(_make_interp_sel(lin, lout, B))

    for i in range(depth - 1):
        _add_interp(lens[i + 1], lens[i])      # fuse-stage upsample
    for i in range(1, depth):
        _add_interp(lens[i], lens[0])          # last-stage upsample
    n_sel = depth + len(interp_sels)

    # ---- lane-dense input slab: (Cin, B*T) ----
    x2d = jnp.transpose(x, (1, 0, 2)).reshape(Cin, B * T)

    # =========================================================================
    # Kernel body (closure over all static config)
    # =========================================================================
    def kernel(*refs):
        (x_ref, proj_w_ref, pw_ref, res_w_ref, res_b_ref,
         par_ref, alpha_ref) = refs[:7]
        sel_refs = refs[7:7 + n_sel]
        o_ref = refs[7 + n_sel]

        x_in = x_ref[...]                      # (Cin, B*T) input + residual
        par_v = par_ref[...]                   # (C, NP) dense param table
        pw_v = pw_ref[...]                     # (C, 14C) pointwise weights

        def ncol(l, j):                        # norm param column -> (C, 1)
            c = 3 * l + j
            return par_v[:, c:c + 1]

        def gln(y, l, t):
            # per-batch global LayerNorm with folded affine (scale, shift)
            g, bt = ncol(l, 1), ncol(l, 2)
            n = float(C * t)
            chunks = []
            for b in range(B):
                yb = y[:, b * t:(b + 1) * t]
                s1 = jnp.sum(yb)               # both reductions issued before
                s2 = jnp.sum(yb * yb)          # either is consumed
                mean = s1 / n
                var = jnp.maximum(s2 / n - mean * mean, 0.0)
                scale = g * lax.rsqrt(var + EPS)       # (C,1)
                shift = bt - mean * scale              # (C,1)
                chunks.append(yb * scale + shift)
            return chunks[0] if B == 1 else jnp.concatenate(chunks, axis=1)

        def prelu(y, idx):
            a = alpha_ref[idx]                 # scalar from SMEM
            return jnp.where(y > 0, y, a * y)

        def dw_conv_gln(xv, lvl, dw_idx, norm_idx):
            # depthwise causal conv (stride 1/2) = ONE matmul against the
            # stacked 5-tap selection matrix + 5 broadcast multiply-adds.
            tout = lens[lvl]
            w_lanes = B * tout
            y_all = jnp.dot(xv, sel_refs[lvl][...],
                            preferred_element_type=jnp.float32)  # (C, 5*B*tout)
            w = par_v[:, dw_base + KSIZE * dw_idx:
                      dw_base + KSIZE * dw_idx + KSIZE]           # (C, 5)
            acc = w[:, 0:1] * y_all[:, 0:w_lanes]
            for k in range(1, KSIZE):
                acc = acc + w[:, k:k + 1] * y_all[:, k * w_lanes:(k + 1) * w_lanes]
            return gln(acc + ncol(norm_idx, 0), norm_idx, tout)

        def interp(xv, lin, lout):
            if lin == lout:
                return xv
            sel = sel_refs[depth + interp_map[(lin, lout)]][...]
            return jnp.dot(xv, sel, preferred_element_type=jnp.float32)

        # ---------------- proj_1x1: Conv1d(k=1) + gLN + PReLU ----------------
        y = jnp.dot(proj_w_ref[...], x_in,
                    preferred_element_type=jnp.float32) + ncol(0, 0)
        out1 = prelu(gln(y, 0, T), 0)

        # ---------------- spp_dw pyramid (stride 1 then stride 2) ------------
        outputs = [dw_conv_gln(out1, 0, 0, 1)]
        for k in range(1, depth):
            outputs.append(dw_conv_gln(outputs[-1], k, k, 1 + k))

        # -------- fuse (down / self / up): real concat + ONE matmul ----------
        x_fuse = []
        for i in range(depth):
            parts = []
            if i >= 1:   # fuse_layers[i][0]: depthwise stride-2 downsample
                parts.append(dw_conv_gln(outputs[i - 1], i,
                                         depth + (i - 1), depth + i))
            parts.append(outputs[i])
            if i + 1 < depth:
                parts.append(interp(outputs[i + 1], lens[i + 1], lens[i]))
            cat = parts[0] if len(parts) == 1 else jnp.concatenate(parts, axis=0)
            wgt = pw_v[:, pw_off[i]: pw_off[i] + len(parts) * C]
            yb = jnp.dot(wgt, cat, preferred_element_type=jnp.float32)
            norm_idx = 2 * depth + i
            x_fuse.append(prelu(gln(yb + ncol(norm_idx, 0), norm_idx, lens[i]),
                                1 + i))

        # -------- upsample to top scale + last ConvNormAct (K = depth*C) -----
        ups = [x_fuse[0]] + [interp(x_fuse[i], lens[i], lens[0])
                             for i in range(1, depth)]
        cat = ups[0] if depth == 1 else jnp.concatenate(ups, axis=0)
        wgt = pw_v[:, pw_off[depth]: pw_off[depth] + depth * C]
        y = jnp.dot(wgt, cat, preferred_element_type=jnp.float32) + ncol(3 * depth, 0)
        y = prelu(gln(y, 3 * depth, lens[0]), 1 + depth)

        # -------- final Conv1d(out_chan -> in_chan, k=1) + residual add ------
        out = jnp.dot(res_w_ref[...], y,
                      preferred_element_type=jnp.float32) + res_b_ref[...] + x_in
        o_ref[...] = out.astype(o_ref.dtype)

    # =========================================================================
    # pallas_call: one grid step, all blocks full-extent (DMA'd once)
    # =========================================================================
    def fullspec(a):
        nd = a.ndim
        return pl.BlockSpec(a.shape, lambda i, _n=nd: (0,) * _n)

    inputs = ([x2d, p["proj"]["w"], pw_cat, p["res"]["w"], res_b, par, alphas]
              + conv_sels + interp_sels)
    in_specs = ([fullspec(x2d), fullspec(p["proj"]["w"]), fullspec(pw_cat),
                 fullspec(p["res"]["w"]), fullspec(res_b), fullspec(par),
                 pl.BlockSpec(memory_space=pltpu.MemorySpace.SMEM)]
                + [fullspec(s) for s in conv_sels + interp_sels])

    out2d = pl.pallas_call(
        kernel,
        out_shape=jax.ShapeDtypeStruct((Cin, B * T), jnp.float32),
        grid=(1,),
        in_specs=in_specs,
        out_specs=pl.BlockSpec((Cin, B * T), lambda i: (0, 0)),
        compiler_params=pltpu.CompilerParams(
            dimension_semantics=("arbitrary",),
        ),
    )(*inputs)

    return jnp.transpose(out2d.reshape(Cin, B, T), (1, 0, 2))


# -----------------------------------------------------------------------------
# Deterministic synthetic params and a plain-JAX reference (sanity check)
# -----------------------------------------------------------------------------
def init_params(key, in_chan, out_chan, depth):
    ks = iter(jax.random.split(key, 64))

    def rnd(shape, scale=0.1):
        return scale * jax.random.normal(next(ks), shape, jnp.float32)

    p = {}
    p["proj"] = dict(w=rnd((out_chan, in_chan)), b=rnd((out_chan,)),
                     g=1.0 + rnd((out_chan,)), bt=rnd((out_chan,)),
                     a=jnp.full((1, 1), 0.25, jnp.float32))
    p["spp"] = [dict(w=rnd((KSIZE, out_chan, 1)), b=rnd((out_chan,)),
                     g=1.0 + rnd((out_chan,)), bt=rnd((out_chan,)))
                for _ in range(depth)]
    p["fuse"] = {i: dict(w=rnd((KSIZE, out_chan, 1)), b=rnd((out_chan,)),
                         g=1.0 + rnd((out_chan,)), bt=rnd((out_chan,)))
                 for i in range(1, depth)}
    p["concat"] = []
    for i in range(depth):
        mult = 2 if (i == 0 or i == depth - 1) else 3
        p["concat"].append(dict(w=rnd((out_chan, mult * out_chan)),
                                b=rnd((out_chan,)), g=1.0 + rnd((out_chan,)),
                                bt=rnd((out_chan,)),
                                a=jnp.full((1, 1), 0.25, jnp.float32)))
    p["last"] = dict(w=rnd((out_chan, depth * out_chan)), b=rnd((out_chan,)),
                     g=1.0 + rnd((out_chan,)), bt=rnd((out_chan,)),
                     a=jnp.full((1, 1), 0.25, jnp.float32))
    p["res"] = dict(w=rnd((in_chan, out_chan)), b=rnd((in_chan,)))
    return p


def _reference_forward(x, p, *, depth):
    def gln(y, g, bt):
        mean = jnp.mean(y, axis=(1, 2), keepdims=True)
        var = jnp.mean((y - mean) ** 2, axis=(1, 2), keepdims=True)
        return g[None, :, None] * ((y - mean) / jnp.sqrt(var + EPS)) + bt[None, :, None]

    def pw(x, d, act):
        y = jnp.einsum("oc,bct->bot", d["w"], x) + d["b"][None, :, None]
        y = gln(y, d["g"], d["bt"])
        if act:
            a = d["a"].reshape(())
            y = jnp.where(y > 0, y, a * y)
        return y

    def dw(x, d, stride):
        tin = x.shape[-1]
        lconv = (tin + 2 * PAD - KSIZE) // stride + 1
        tout = lconv - PAD
        xp = jnp.pad(x, ((0, 0), (0, 0), (PAD, 0)))
        y = sum(d["w"][k][None] * xp[:, :, k:k + stride * (tout - 1) + 1:stride]
                for k in range(KSIZE))
        y = y + d["b"][None, :, None]
        return gln(y, d["g"], d["bt"])

    def interp(x, size):
        lin = x.shape[-1]
        idx = (jnp.arange(size) * lin) // size
        return x[:, :, idx]

    res = x
    out1 = pw(x, p["proj"], act=True)
    outputs = [dw(out1, p["spp"][0], stride=1)]
    for k in range(1, depth):
        outputs.append(dw(outputs[-1], p["spp"][k], stride=2))
    x_fuse = []
    for i in range(depth):
        t_i = outputs[i].shape[-1]
        parts = []
        if i - 1 >= 0:
            parts.append(dw(outputs[i - 1], p["fuse"][i], stride=2))
        parts.append(outputs[i])
        if i + 1 < depth:
            parts.append(interp(outputs[i + 1], t_i))
        x_fuse.append(pw(jnp.concatenate(parts, axis=1), p["concat"][i], act=True))
    t_top = outputs[0].shape[-1]
    x_fuse = [x_fuse[0]] + [interp(xf, t_top) for xf in x_fuse[1:]]
    y = pw(jnp.concatenate(x_fuse, axis=1), p["last"], act=True)
    out = jnp.einsum("oc,bct->bot", p["res"]["w"], y) + p["res"]["b"][None, :, None]
    return res + out


# -----------------------------------------------------------------------------
if __name__ == "__main__":
    key = jax.random.PRNGKey(0)
    kx, kp = jax.random.split(key)

    # Small shapes consistent with the module (in_chan=16, out_chan=32, depth=4).
    B, in_chan, out_chan, depth, T = 2, 16, 32, 4, 32
    x = jax.random.normal(kx, (B, in_chan, T), jnp.float32)
    params = init_params(kp, in_chan, out_chan, depth)

    fwd = jax.jit(functools.partial(visual_subnetwork_forward, depth=depth))
    y = jax.block_until_ready(fwd(x, params))

    assert y.shape == (B, in_chan, T), y.shape
    assert bool(jnp.all(jnp.isfinite(y)))

    # plain-JAX reference of the same forward pass (loose tol: MXU default
    # precision does bf16 passes for f32 matmuls)
    y_ref = _reference_forward(x, params, depth=depth)
    scale = float(jnp.max(jnp.abs(y_ref)))
    err = float(jnp.max(jnp.abs(y - y_ref))) / max(scale, 1e-6)
    assert err < 3e-2, f"max relative error {err}"

    # TODO(synk): nn.Dropout (only active when dropout > 0 and training) is not
    # modeled; the module default (dropout=-1) makes it an identity.
    print("KERNEL_OK")
</pallas_src>

<mosaic_0001>
module attributes {stable_mosaic.version = 11 : i64} {
  func.func @kernel(%arg0: i32, %arg1: memref<16x64xf32, #tpu.memory_space<vmem>>, %arg2: memref<32x16xf32, #tpu.memory_space<vmem>>, %arg3: memref<32x448xf32, #tpu.memory_space<vmem>>, %arg4: memref<16x32xf32, #tpu.memory_space<vmem>>, %arg5: memref<16x1xf32, #tpu.memory_space<vmem>>, %arg6: memref<32x74xf32, #tpu.memory_space<vmem>>, %arg7: memref<6xf32, #tpu.memory_space<smem>>, %arg8: memref<64x320xf32, #tpu.memory_space<vmem>>, %arg9: memref<64x140xf32, #tpu.memory_space<vmem>>, %arg10: memref<28x50xf32, #tpu.memory_space<vmem>>, %arg11: memref<10x10xf32, #tpu.memory_space<vmem>>, %arg12: memref<28x64xf32, #tpu.memory_space<vmem>>, %arg13: memref<10x28xf32, #tpu.memory_space<vmem>>, %arg14: memref<2x10xf32, #tpu.memory_space<vmem>>, %arg15: memref<10x64xf32, #tpu.memory_space<vmem>>, %arg16: memref<2x64xf32, #tpu.memory_space<vmem>>, %arg17: memref<16x64xf32, #tpu.memory_space<vmem>>) attributes {dimension_semantics = [#tpu.dimension_semantics<arbitrary>], iteration_bounds = array<i64: 1>, scalar_prefetch = 0 : i64, scratch_operands = 0 : i64, tpu.core_type = #tpu.core_type<tc>, window_params = [{pipeline_mode = #tpu.pipeline_mode<synchronous>, transform_indices = @transform_0, window_bounds = array<i64: 16, 64>}, {pipeline_mode = #tpu.pipeline_mode<synchronous>, transform_indices = @transform_1, window_bounds = array<i64: 32, 16>}, {pipeline_mode = #tpu.pipeline_mode<synchronous>, transform_indices = @transform_2, window_bounds = array<i64: 32, 448>}, {pipeline_mode = #tpu.pipeline_mode<synchronous>, transform_indices = @transform_3, window_bounds = array<i64: 16, 32>}, {pipeline_mode = #tpu.pipeline_mode<synchronous>, transform_indices = @transform_4, window_bounds = array<i64: 16, 1>}, {pipeline_mode = #tpu.pipeline_mode<synchronous>, transform_indices = @transform_5, window_bounds = array<i64: 32, 74>}, {transform_indices = @transform_6, window_bounds = array<i64: 6>}, {pipeline_mode = #tpu.pipeline_mode<synchronous>, transform_indices = @transform_7, window_bounds = array<i64: 64, 320>}, {pipeline_mode = #tpu.pipeline_mode<synchronous>, transform_indices = @transform_8, window_bounds = array<i64: 64, 140>}, {pipeline_mode = #tpu.pipeline_mode<synchronous>, transform_indices = @transform_9, window_bounds = array<i64: 28, 50>}, {pipeline_mode = #tpu.pipeline_mode<synchronous>, transform_indices = @transform_10, window_bounds = array<i64: 10, 10>}, {pipeline_mode = #tpu.pipeline_mode<synchronous>, transform_indices = @transform_11, window_bounds = array<i64: 28, 64>}, {pipeline_mode = #tpu.pipeline_mode<synchronous>, transform_indices = @transform_12, window_bounds = array<i64: 10, 28>}, {pipeline_mode = #tpu.pipeline_mode<synchronous>, transform_indices = @transform_13, window_bounds = array<i64: 2, 10>}, {pipeline_mode = #tpu.pipeline_mode<synchronous>, transform_indices = @transform_14, window_bounds = array<i64: 10, 64>}, {pipeline_mode = #tpu.pipeline_mode<synchronous>, transform_indices = @transform_15, window_bounds = array<i64: 2, 64>}, {pipeline_mode = #tpu.pipeline_mode<synchronous>, transform_indices = @transform_16, window_bounds = array<i64: 16, 64>}]} {
    %c0 = arith.constant 0 : index
    %c0_0 = arith.constant 0 : index
    %0 = vector.load %arg1[%c0, %c0_0] : memref<16x64xf32, #tpu.memory_space<vmem>>, vector<16x64xf32>
    %c0_1 = arith.constant 0 : index
    %c0_2 = arith.constant 0 : index
    %1 = vector.load %arg6[%c0_1, %c0_2] : memref<32x74xf32, #tpu.memory_space<vmem>>, vector<32x74xf32>
    %c0_3 = arith.constant 0 : index
    %c0_4 = arith.constant 0 : index
    %2 = vector.load %arg3[%c0_3, %c0_4] : memref<32x448xf32, #tpu.memory_space<vmem>>, vector<32x448xf32>
    %c0_5 = arith.constant 0 : index
    %c0_6 = arith.constant 0 : index
    %3 = vector.load %arg2[%c0_5, %c0_6] : memref<32x16xf32, #tpu.memory_space<vmem>>, vector<32x16xf32>
    %cst = arith.constant dense<0.000000e+00> : vector<32x64xf32>
    %4 = tpu.matmul %3, %0, %cst {dimension_numbers = #tpu.dot_dimension_numbers<[1], [0], [0], [1], [0, 0, 1, 1], [], []>} : vector<32x16xf32>, vector<16x64xf32>, vector<32x64xf32> -> vector<32x64xf32>
    %5 = vector.extract_strided_slice %1 {offsets = [0, 0], sizes = [32, 1], strides = [1, 1]} : vector<32x74xf32> to vector<32x1xf32>
    %6 = vector.broadcast %5 : vector<32x1xf32> to vector<32x64xf32>
    %7 = arith.addf %4, %6 : vector<32x64xf32>
    %8 = vector.extract_strided_slice %1 {offsets = [0, 1], sizes = [32, 1], strides = [1, 1]} : vector<32x74xf32> to vector<32x1xf32>
    %9 = vector.extract_strided_slice %1 {offsets = [0, 2], sizes = [32, 1], strides = [1, 1]} : vector<32x74xf32> to vector<32x1xf32>
    %10 = vector.extract_strided_slice %7 {offsets = [0, 0], sizes = [32, 32], strides = [1, 1]} : vector<32x64xf32> to vector<32x32xf32>
    %11 = vector.shape_cast %10 : vector<32x32xf32> to vector<1x32x32xf32>
    %cst_7 = arith.constant dense<0.000000e+00> : vector<1xf32>
    %12 = vector.multi_reduction <add>, %11, %cst_7 [1, 2] : vector<1x32x32xf32> to vector<1xf32>
    %13 = vector.shape_cast %12 : vector<1xf32> to vector<1x1x1xf32>
    %14 = vector.extract %13[0, 0, 0] : f32 from vector<1x1x1xf32>
    %15 = arith.mulf %10, %10 : vector<32x32xf32>
    %16 = vector.shape_cast %15 : vector<32x32xf32> to vector<1x32x32xf32>
    %cst_8 = arith.constant dense<0.000000e+00> : vector<1xf32>
    %17 = vector.multi_reduction <add>, %16, %cst_8 [1, 2] : vector<1x32x32xf32> to vector<1xf32>
    %18 = vector.shape_cast %17 : vector<1xf32> to vector<1x1x1xf32>
    %19 = vector.extract %18[0, 0, 0] : f32 from vector<1x1x1xf32>
    %cst_9 = arith.constant 1.024000e+03 : f32
    %20 = arith.divf %14, %cst_9 : f32
    %cst_10 = arith.constant 1.024000e+03 : f32
    %21 = arith.divf %19, %cst_10 : f32
    %22 = arith.mulf %20, %20 : f32
    %23 = arith.subf %21, %22 : f32
    %cst_11 = arith.constant 0.000000e+00 : f32
    %24 = arith.maximumf %23, %cst_11 : f32
    %cst_12 = arith.constant 9.99999993E-9 : f32
    %25 = arith.addf %24, %cst_12 : f32
    %26 = math.rsqrt %25 : f32
    %27 = vector.broadcast %26 : f32 to vector<32x1xf32>
    %28 = arith.mulf %8, %27 : vector<32x1xf32>
    %29 = vector.broadcast %20 : f32 to vector<32x1xf32>
    %30 = arith.mulf %29, %28 : vector<32x1xf32>
    %31 = arith.subf %9, %30 : vector<32x1xf32>
    %32 = vector.broadcast %28 : vector<32x1xf32> to vector<32x32xf32>
    %33 = arith.mulf %10, %32 : vector<32x32xf32>
    %34 = vector.broadcast %31 : vector<32x1xf32> to vector<32x32xf32>
    %35 = arith.addf %33, %34 : vector<32x32xf32>
    %36 = vector.extract_strided_slice %7 {offsets = [0, 32], sizes = [32, 32], strides = [1, 1]} : vector<32x64xf32> to vector<32x32xf32>
    %37 = vector.shape_cast %36 : vector<32x32xf32> to vector<1x32x32xf32>
    %cst_13 = arith.constant dense<0.000000e+00> : vector<1xf32>
    %38 = vector.multi_reduction <add>, %37, %cst_13 [1, 2] : vector<1x32x32xf32> to vector<1xf32>
    %39 = vector.shape_cast %38 : vector<1xf32> to vector<1x1x1xf32>
    %40 = vector.extract %39[0, 0, 0] : f32 from vector<1x1x1xf32>
    %41 = arith.mulf %36, %36 : vector<32x32xf32>
    %42 = vector.shape_cast %41 : vector<32x32xf32> to vector<1x32x32xf32>
    %cst_14 = arith.constant dense<0.000000e+00> : vector<1xf32>
    %43 = vector.multi_reduction <add>, %42, %cst_14 [1, 2] : vector<1x32x32xf32> to vector<1xf32>
    %44 = vector.shape_cast %43 : vector<1xf32> to vector<1x1x1xf32>
    %45 = vector.extract %44[0, 0, 0] : f32 from vector<1x1x1xf32>
    %cst_15 = arith.constant 1.024000e+03 : f32
    %46 = arith.divf %40, %cst_15 : f32
    %cst_16 = arith.constant 1.024000e+03 : f32
    %47 = arith.divf %45, %cst_16 : f32
    %48 = arith.mulf %46, %46 : f32
    %49 = arith.subf %47, %48 : f32
    %cst_17 = arith.constant 0.000000e+00 : f32
    %50 = arith.maximumf %49, %cst_17 : f32
    %cst_18 = arith.constant 9.99999993E-9 : f32
    %51 = arith.addf %50, %cst_18 : f32
    %52 = math.rsqrt %51 : f32
    %53 = vector.broadcast %52 : f32 to vector<32x1xf32>
    %54 = arith.mulf %8, %53 : vector<32x1xf32>
    %55 = vector.broadcast %46 : f32 to vector<32x1xf32>
    %56 = arith.mulf %55, %54 : vector<32x1xf32>
    %57 = arith.subf %9, %56 : vector<32x1xf32>
    %58 = vector.broadcast %54 : vector<32x1xf32> to vector<32x32xf32>
    %59 = arith.mulf %36, %58 : vector<32x32xf32>
    %60 = vector.broadcast %57 : vector<32x1xf32> to vector<32x32xf32>
    %61 = arith.addf %59, %60 : vector<32x32xf32>
    %62 = tpu.concatenate %35, %61 in 1 : vector<32x32xf32>, vector<32x32xf32> -> vector<32x64xf32>
    %c0_19 = arith.constant 0 : index
    %63 = memref.load %arg7[%c0_19] : memref<6xf32, #tpu.memory_space<smem>>
    %cst_20 = arith.constant 0.000000e+00 : f32
    %64 = vector.broadcast %cst_20 : f32 to vector<32x64xf32>
    %65 = arith.cmpf ogt, %62, %64 : vector<32x64xf32>
    %66 = vector.broadcast %63 : f32 to vector<32x64xf32>
    %67 = arith.mulf %66, %62 : vector<32x64xf32>
    %68 = arith.select %65, %62, %67 : vector<32x64xi1>, vector<32x64xf32>
    %c0_21 = arith.constant 0 : index
    %c0_22 = arith.constant 0 : index
    %69 = vector.load %arg8[%c0_21, %c0_22] : memref<64x320xf32, #tpu.memory_space<vmem>>, vector<64x320xf32>
    %cst_23 = arith.constant dense<0.000000e+00> : vector<32x320xf32>
    %70 = tpu.matmul %68, %69, %cst_23 {dimension_numbers = #tpu.dot_dimension_numbers<[1], [0], [0], [1], [0, 0, 1, 1], [], []>} : vector<32x64xf32>, vector<64x320xf32>, vector<32x320xf32> -> vector<32x320xf32>
    %71 = vector.extract_strided_slice %1 {offsets = [0, 39], sizes = [32, 5], strides = [1, 1]} : vector<32x74xf32> to vector<32x5xf32>
    %72 = vector.extract_strided_slice %71 {offsets = [0, 0], sizes = [32, 1], strides = [1, 1]} : vector<32x5xf32> to vector<32x1xf32>
    %73 = vector.extract_strided_slice %70 {offsets = [0, 0], sizes = [32, 64], strides = [1, 1]} : vector<32x320xf32> to vector<32x64xf32>
    %74 = vector.broadcast %72 : vector<32x1xf32> to vector<32x64xf32>
    %75 = arith.mulf %74, %73 : vector<32x64xf32>
    %76 = vector.extract_strided_slice %71 {offsets = [0, 1], sizes = [32, 1], strides = [1, 1]} : vector<32x5xf32> to vector<32x1xf32>
    %77 = vector.extract_strided_slice %70 {offsets = [0, 64], sizes = [32, 64], strides = [1, 1]} : vector<32x320xf32> to vector<32x64xf32>
    %78 = vector.broadcast %76 : vector<32x1xf32> to vector<32x64xf32>
    %79 = arith.mulf %78, %77 : vector<32x64xf32>
    %80 = arith.addf %75, %79 : vector<32x64xf32>
    %81 = vector.extract_strided_slice %71 {offsets = [0, 2], sizes = [32, 1], strides = [1, 1]} : vector<32x5xf32> to vector<32x1xf32>
    %82 = vector.extract_strided_slice %70 {offsets = [0, 128], sizes = [32, 64], strides = [1, 1]} : vector<32x320xf32> to vector<32x64xf32>
    %83 = vector.broadcast %81 : vector<32x1xf32> to vector<32x64xf32>
    %84 = arith.mulf %83, %82 : vector<32x64xf32>
    %85 = arith.addf %80, %84 : vector<32x64xf32>
    %86 = vector.extract_strided_slice %71 {offsets = [0, 3], sizes = [32, 1], strides = [1, 1]} : vector<32x5xf32> to vector<32x1xf32>
    %87 = vector.extract_strided_slice %70 {offsets = [0, 192], sizes = [32, 64], strides = [1, 1]} : vector<32x320xf32> to vector<32x64xf32>
    %88 = vector.broadcast %86 : vector<32x1xf32> to vector<32x64xf32>
    %89 = arith.mulf %88, %87 : vector<32x64xf32>
    %90 = arith.addf %85, %89 : vector<32x64xf32>
    %91 = vector.extract_strided_slice %71 {offsets = [0, 4], sizes = [32, 1], strides = [1, 1]} : vector<32x5xf32> to vector<32x1xf32>
    %92 = vector.extract_strided_slice %70 {offsets = [0, 256], sizes = [32, 64], strides = [1, 1]} : vector<32x320xf32> to vector<32x64xf32>
    %93 = vector.broadcast %91 : vector<32x1xf32> to vector<32x64xf32>
    %94 = arith.mulf %93, %92 : vector<32x64xf32>
    %95 = arith.addf %90, %94 : vector<32x64xf32>
    %96 = vector.extract_strided_slice %1 {offsets = [0, 3], sizes = [32, 1], strides = [1, 1]} : vector<32x74xf32> to vector<32x1xf32>
    %97 = vector.broadcast %96 : vector<32x1xf32> to vector<32x64xf32>
    %98 = arith.addf %95, %97 : vector<32x64xf32>
    %99 = vector.extract_strided_slice %1 {offsets = [0, 4], sizes = [32, 1], strides = [1, 1]} : vector<32x74xf32> to vector<32x1xf32>
    %100 = vector.extract_strided_slice %1 {offsets = [0, 5], sizes = [32, 1], strides = [1, 1]} : vector<32x74xf32> to vector<32x1xf32>
    %101 = vector.extract_strided_slice %98 {offsets = [0, 0], sizes = [32, 32], strides = [1, 1]} : vector<32x64xf32> to vector<32x32xf32>
    %102 = vector.shape_cast %101 : vector<32x32xf32> to vector<1x32x32xf32>
    %cst_24 = arith.constant dense<0.000000e+00> : vector<1xf32>
    %103 = vector.multi_reduction <add>, %102, %cst_24 [1, 2] : vector<1x32x32xf32> to vector<1xf32>
    %104 = vector.shape_cast %103 : vector<1xf32> to vector<1x1x1xf32>
    %105 = vector.extract %104[0, 0, 0] : f32 from vector<1x1x1xf32>
    %106 = arith.mulf %101, %101 : vector<32x32xf32>
    %107 = vector.shape_cast %106 : vector<32x32xf32> to vector<1x32x32xf32>
    %cst_25 = arith.constant dense<0.000000e+00> : vector<1xf32>
    %108 = vector.multi_reduction <add>, %107, %cst_25 [1, 2] : vector<1x32x32xf32> to vector<1xf32>
    %109 = vector.shape_cast %108 : vector<1xf32> to vector<1x1x1xf32>
    %110 = vector.extract %109[0, 0, 0] : f32 from vector<1x1x1xf32>
    %cst_26 = arith.constant 1.024000e+03 : f32
    %111 = arith.divf %105, %cst_26 : f32
    %cst_27 = arith.constant 1.024000e+03 : f32
    %112 = arith.divf %110, %cst_27 : f32
    %113 = arith.mulf %111, %111 : f32
    %114 = arith.subf %112, %113 : f32
    %cst_28 = arith.constant 0.000000e+00 : f32
    %115 = arith.maximumf %114, %cst_28 : f32
    %cst_29 = arith.constant 9.99999993E-9 : f32
    %116 = arith.addf %115, %cst_29 : f32
    %117 = math.rsqrt %116 : f32
    %118 = vector.broadcast %117 : f32 to vector<32x1xf32>
    %119 = arith.mulf %99, %118 : vector<32x1xf32>
    %120 = vector.broadcast %111 : f32 to vector<32x1xf32>
    %121 = arith.mulf %120, %119 : vector<32x1xf32>
    %122 = arith.subf %100, %121 : vector<32x1xf32>
    %123 = vector.broadcast %119 : vector<32x1xf32> to vector<32x32xf32>
    %124 = arith.mulf %101, %123 : vector<32x32xf32>
    %125 = vector.broadcast %122 : vector<32x1xf32> to vector<32x32xf32>
    %126 = arith.addf %124, %125 : vector<32x32xf32>
    %127 = vector.extract_strided_slice %98 {offsets = [0, 32], sizes = [32, 32], strides = [1, 1]} : vector<32x64xf32> to vector<32x32xf32>
    %128 = vector.shape_cast %127 : vector<32x32xf32> to vector<1x32x32xf32>
    %cst_30 = arith.constant dense<0.000000e+00> : vector<1xf32>
    %129 = vector.multi_reduction <add>, %128, %cst_30 [1, 2] : vector<1x32x32xf32> to vector<1xf32>
    %130 = vector.shape_cast %129 : vector<1xf32> to vector<1x1x1xf32>
    %131 = vector.extract %130[0, 0, 0] : f32 from vector<1x1x1xf32>
    %132 = arith.mulf %127, %127 : vector<32x32xf32>
    %133 = vector.shape_cast %132 : vector<32x32xf32> to vector<1x32x32xf32>
    %cst_31 = arith.constant dense<0.000000e+00> : vector<1xf32>
    %134 = vector.multi_reduction <add>, %133, %cst_31 [1, 2] : vector<1x32x32xf32> to vector<1xf32>
    %135 = vector.shape_cast %134 : vector<1xf32> to vector<1x1x1xf32>
    %136 = vector.extract %135[0, 0, 0] : f32 from vector<1x1x1xf32>
    %cst_32 = arith.constant 1.024000e+03 : f32
    %137 = arith.divf %131, %cst_32 : f32
    %cst_33 = arith.constant 1.024000e+03 : f32
    %138 = arith.divf %136, %cst_33 : f32
    %139 = arith.mulf %137, %137 : f32
    %140 = arith.subf %138, %139 : f32
    %cst_34 = arith.constant 0.000000e+00 : f32
    %141 = arith.maximumf %140, %cst_34 : f32
    %cst_35 = arith.constant 9.99999993E-9 : f32
    %142 = arith.addf %141, %cst_35 : f32
    %143 = math.rsqrt %142 : f32
    %144 = vector.broadcast %143 : f32 to vector<32x1xf32>
    %145 = arith.mulf %99, %144 : vector<32x1xf32>
    %146 = vector.broadcast %137 : f32 to vector<32x1xf32>
    %147 = arith.mulf %146, %145 : vector<32x1xf32>
    %148 = arith.subf %100, %147 : vector<32x1xf32>
    %149 = vector.broadcast %145 : vector<32x1xf32> to vector<32x32xf32>
    %150 = arith.mulf %127, %149 : vector<32x32xf32>
    %151 = vector.broadcast %148 : vector<32x1xf32> to vector<32x32xf32>
    %152 = arith.addf %150, %151 : vector<32x32xf32>
    %153 = tpu.concatenate %126, %152 in 1 : vector<32x32xf32>, vector<32x32xf32> -> vector<32x64xf32>
    %c0_36 = arith.constant 0 : index
    %c0_37 = arith.constant 0 : index
    %154 = vector.load %arg9[%c0_36, %c0_37] : memref<64x140xf32, #tpu.memory_space<vmem>>, vector<64x140xf32>
    %cst_38 = arith.constant dense<0.000000e+00> : vector<32x140xf32>
    %155 = tpu.matmul %153, %154, %cst_38 {dimension_numbers = #tpu.dot_dimension_numbers<[1], [0], [0], [1], [0, 0, 1, 1], [], []>} : vector<32x64xf32>, vector<64x140xf32>, vector<32x140xf32> -> vector<32x140xf32>
    %156 = vector.extract_strided_slice %1 {offsets = [0, 44], sizes = [32, 5], strides = [1, 1]} : vector<32x74xf32> to vector<32x5xf32>
    %157 = vector.extract_strided_slice %156 {offsets = [0, 0], sizes = [32, 1], strides = [1, 1]} : vector<32x5xf32> to vector<32x1xf32>
    %158 = vector.extract_strided_slice %155 {offsets = [0, 0], sizes = [32, 28], strides = [1, 1]} : vector<32x140xf32> to vector<32x28xf32>
    %159 = vector.broadcast %157 : vector<32x1xf32> to vector<32x28xf32>
    %160 = arith.mulf %159, %158 : vector<32x28xf32>
    %161 = vector.extract_strided_slice %156 {offsets = [0, 1], sizes = [32, 1], strides = [1, 1]} : vector<32x5xf32> to vector<32x1xf32>
    %162 = vector.extract_strided_slice %155 {offsets = [0, 28], sizes = [32, 28], strides = [1, 1]} : vector<32x140xf32> to vector<32x28xf32>
    %163 = vector.broadcast %161 : vector<32x1xf32> to vector<32x28xf32>
    %164 = arith.mulf %163, %162 : vector<32x28xf32>
    %165 = arith.addf %160, %164 : vector<32x28xf32>
    %166 = vector.extract_strided_slice %156 {offsets = [0, 2], sizes = [32, 1], strides = [1, 1]} : vector<32x5xf32> to vector<32x1xf32>
    %167 = vector.extract_strided_slice %155 {offsets = [0, 56], sizes = [32, 28], strides = [1, 1]} : vector<32x140xf32> to vector<32x28xf32>
    %168 = vector.broadcast %166 : vector<32x1xf32> to vector<32x28xf32>
    %169 = arith.mulf %168, %167 : vector<32x28xf32>
    %170 = arith.addf %165, %169 : vector<32x28xf32>
    %171 = vector.extract_strided_slice %156 {offsets = [0, 3], sizes = [32, 1], strides = [1, 1]} : vector<32x5xf32> to vector<32x1xf32>
    %172 = vector.extract_strided_slice %155 {offsets = [0, 84], sizes = [32, 28], strides = [1, 1]} : vector<32x140xf32> to vector<32x28xf32>
    %173 = vector.broadcast %171 : vector<32x1xf32> to vector<32x28xf32>
    %174 = arith.mulf %173, %172 : vector<32x28xf32>
    %175 = arith.addf %170, %174 : vector<32x28xf32>
    %176 = vector.extract_strided_slice %156 {offsets = [0, 4], sizes = [32, 1], strides = [1, 1]} : vector<32x5xf32> to vector<32x1xf32>
    %177 = vector.extract_strided_slice %155 {offsets = [0, 112], sizes = [32, 28], strides = [1, 1]} : vector<32x140xf32> to vector<32x28xf32>
    %178 = vector.broadcast %176 : vector<32x1xf32> to vector<32x28xf32>
    %179 = arith.mulf %178, %177 : vector<32x28xf32>
    %180 = arith.addf %175, %179 : vector<32x28xf32>
    %181 = vector.extract_strided_slice %1 {offsets = [0, 6], sizes = [32, 1], strides = [1, 1]} : vector<32x74xf32> to vector<32x1xf32>
    %182 = vector.broadcast %181 : vector<32x1xf32> to vector<32x28xf32>
    %183 = arith.addf %180, %182 : vector<32x28xf32>
    %184 = vector.extract_strided_slice %1 {offsets = [0, 7], sizes = [32, 1], strides = [1, 1]} : vector<32x74xf32> to vector<32x1xf32>
    %185 = vector.extract_strided_slice %1 {offsets = [0, 8], sizes = [32, 1], strides = [1, 1]} : vector<32x74xf32> to vector<32x1xf32>
    %186 = vector.extract_strided_slice %183 {offsets = [0, 0], sizes = [32, 14], strides = [1, 1]} : vector<32x28xf32> to vector<32x14xf32>
    %187 = vector.shape_cast %186 : vector<32x14xf32> to vector<1x32x14xf32>
    %cst_39 = arith.constant dense<0.000000e+00> : vector<1xf32>
    %188 = vector.multi_reduction <add>, %187, %cst_39 [1, 2] : vector<1x32x14xf32> to vector<1xf32>
    %189 = vector.shape_cast %188 : vector<1xf32> to vector<1x1x1xf32>
    %190 = vector.extract %189[0, 0, 0] : f32 from vector<1x1x1xf32>
    %191 = arith.mulf %186, %186 : vector<32x14xf32>
    %192 = vector.shape_cast %191 : vector<32x14xf32> to vector<1x32x14xf32>
    %cst_40 = arith.constant dense<0.000000e+00> : vector<1xf32>
    %193 = vector.multi_reduction <add>, %192, %cst_40 [1, 2] : vector<1x32x14xf32> to vector<1xf32>
    %194 = vector.shape_cast %193 : vector<1xf32> to vector<1x1x1xf32>
    %195 = vector.extract %194[0, 0, 0] : f32 from vector<1x1x1xf32>
    %cst_41 = arith.constant 4.480000e+02 : f32
    %196 = arith.divf %190, %cst_41 : f32
    %cst_42 = arith.constant 4.480000e+02 : f32
    %197 = arith.divf %195, %cst_42 : f32
    %198 = arith.mulf %196, %196 : f32
    %199 = arith.subf %197, %198 : f32
    %cst_43 = arith.constant 0.000000e+00 : f32
    %200 = arith.maximumf %199, %cst_43 : f32
    %cst_44 = arith.constant 9.99999993E-9 : f32
    %201 = arith.addf %200, %cst_44 : f32
    %202 = math.rsqrt %201 : f32
    %203 = vector.broadcast %202 : f32 to vector<32x1xf32>
    %204 = arith.mulf %184, %203 : vector<32x1xf32>
    %205 = vector.broadcast %196 : f32 to vector<32x1xf32>
    %206 = arith.mulf %205, %204 : vector<32x1xf32>
    %207 = arith.subf %185, %206 : vector<32x1xf32>
    %208 = vector.broadcast %204 : vector<32x1xf32> to vector<32x14xf32>
    %209 = arith.mulf %186, %208 : vector<32x14xf32>
    %210 = vector.broadcast %207 : vector<32x1xf32> to vector<32x14xf32>
    %211 = arith.addf %209, %210 : vector<32x14xf32>
    %212 = vector.extract_strided_slice %183 {offsets = [0, 14], sizes = [32, 14], strides = [1, 1]} : vector<32x28xf32> to vector<32x14xf32>
    %213 = vector.shape_cast %212 : vector<32x14xf32> to vector<1x32x14xf32>
    %cst_45 = arith.constant dense<0.000000e+00> : vector<1xf32>
    %214 = vector.multi_reduction <add>, %213, %cst_45 [1, 2] : vector<1x32x14xf32> to vector<1xf32>
    %215 = vector.shape_cast %214 : vector<1xf32> to vector<1x1x1xf32>
    %216 = vector.extract %215[0, 0, 0] : f32 from vector<1x1x1xf32>
    %217 = arith.mulf %212, %212 : vector<32x14xf32>
    %218 = vector.shape_cast %217 : vector<32x14xf32> to vector<1x32x14xf32>
    %cst_46 = arith.constant dense<0.000000e+00> : vector<1xf32>
    %219 = vector.multi_reduction <add>, %218, %cst_46 [1, 2] : vector<1x32x14xf32> to vector<1xf32>
    %220 = vector.shape_cast %219 : vector<1xf32> to vector<1x1x1xf32>
    %221 = vector.extract %220[0, 0, 0] : f32 from vector<1x1x1xf32>
    %cst_47 = arith.constant 4.480000e+02 : f32
    %222 = arith.divf %216, %cst_47 : f32
    %cst_48 = arith.constant 4.480000e+02 : f32
    %223 = arith.divf %221, %cst_48 : f32
    %224 = arith.mulf %222, %222 : f32
    %225 = arith.subf %223, %224 : f32
    %cst_49 = arith.constant 0.000000e+00 : f32
    %226 = arith.maximumf %225, %cst_49 : f32
    %cst_50 = arith.constant 9.99999993E-9 : f32
    %227 = arith.addf %226, %cst_50 : f32
    %228 = math.rsqrt %227 : f32
    %229 = vector.broadcast %228 : f32 to vector<32x1xf32>
    %230 = arith.mulf %184, %229 : vector<32x1xf32>
    %231 = vector.broadcast %222 : f32 to vector<32x1xf32>
    %232 = arith.mulf %231, %230 : vector<32x1xf32>
    %233 = arith.subf %185, %232 : vector<32x1xf32>
    %234 = vector.broadcast %230 : vector<32x1xf32> to vector<32x14xf32>
    %235 = arith.mulf %212, %234 : vector<32x14xf32>
    %236 = vector.broadcast %233 : vector<32x1xf32> to vector<32x14xf32>
    %237 = arith.addf %235, %236 : vector<32x14xf32>
    %238 = tpu.concatenate %211, %237 in 1 : vector<32x14xf32>, vector<32x14xf32> -> vector<32x28xf32>
    %c0_51 = arith.constant 0 : index
    %c0_52 = arith.constant 0 : index
    %239 = vector.load %arg10[%c0_51, %c0_52] : memref<28x50xf32, #tpu.memory_space<vmem>>, vector<28x50xf32>
    %cst_53 = arith.constant dense<0.000000e+00> : vector<32x50xf32>
    %240 = tpu.matmul %238, %239, %cst_53 {dimension_numbers = #tpu.dot_dimension_numbers<[1], [0], [0], [1], [0, 0, 1, 1], [], []>} : vector<32x28xf32>, vector<28x50xf32>, vector<32x50xf32> -> vector<32x50xf32>
    %241 = vector.extract_strided_slice %1 {offsets = [0, 49], sizes = [32, 5], strides = [1, 1]} : vector<32x74xf32> to vector<32x5xf32>
    %242 = vector.extract_strided_slice %241 {offsets = [0, 0], sizes = [32, 1], strides = [1, 1]} : vector<32x5xf32> to vector<32x1xf32>
    %243 = vector.extract_strided_slice %240 {offsets = [0, 0], sizes = [32, 10], strides = [1, 1]} : vector<32x50xf32> to vector<32x10xf32>
    %244 = vector.broadcast %242 : vector<32x1xf32> to vector<32x10xf32>
    %245 = arith.mulf %244, %243 : vector<32x10xf32>
    %246 = vector.extract_strided_slice %241 {offsets = [0, 1], sizes = [32, 1], strides = [1, 1]} : vector<32x5xf32> to vector<32x1xf32>
    %247 = vector.extract_strided_slice %240 {offsets = [0, 10], sizes = [32, 10], strides = [1, 1]} : vector<32x50xf32> to vector<32x10xf32>
    %248 = vector.broadcast %246 : vector<32x1xf32> to vector<32x10xf32>
    %249 = arith.mulf %248, %247 : vector<32x10xf32>
    %250 = arith.addf %245, %249 : vector<32x10xf32>
    %251 = vector.extract_strided_slice %241 {offsets = [0, 2], sizes = [32, 1], strides = [1, 1]} : vector<32x5xf32> to vector<32x1xf32>
    %252 = vector.extract_strided_slice %240 {offsets = [0, 20], sizes = [32, 10], strides = [1, 1]} : vector<32x50xf32> to vector<32x10xf32>
    %253 = vector.broadcast %251 : vector<32x1xf32> to vector<32x10xf32>
    %254 = arith.mulf %253, %252 : vector<32x10xf32>
    %255 = arith.addf %250, %254 : vector<32x10xf32>
    %256 = vector.extract_strided_slice %241 {offsets = [0, 3], sizes = [32, 1], strides = [1, 1]} : vector<32x5xf32> to vector<32x1xf32>
    %257 = vector.extract_strided_slice %240 {offsets = [0, 30], sizes = [32, 10], strides = [1, 1]} : vector<32x50xf32> to vector<32x10xf32>
    %258 = vector.broadcast %256 : vector<32x1xf32> to vector<32x10xf32>
    %259 = arith.mulf %258, %257 : vector<32x10xf32>
    %260 = arith.addf %255, %259 : vector<32x10xf32>
    %261 = vector.extract_strided_slice %241 {offsets = [0, 4], sizes = [32, 1], strides = [1, 1]} : vector<32x5xf32> to vector<32x1xf32>
    %262 = vector.extract_strided_slice %240 {offsets = [0, 40], sizes = [32, 10], strides = [1, 1]} : vector<32x50xf32> to vector<32x10xf32>
    %263 = vector.broadcast %261 : vector<32x1xf32> to vector<32x10xf32>
    %264 = arith.mulf %263, %262 : vector<32x10xf32>
    %265 = arith.addf %260, %264 : vector<32x10xf32>
    %266 = vector.extract_strided_slice %1 {offsets = [0, 9], sizes = [32, 1], strides = [1, 1]} : vector<32x74xf32> to vector<32x1xf32>
    %267 = vector.broadcast %266 : vector<32x1xf32> to vector<32x10xf32>
    %268 = arith.addf %265, %267 : vector<32x10xf32>
    %269 = vector.extract_strided_slice %1 {offsets = [0, 10], sizes = [32, 1], strides = [1, 1]} : vector<32x74xf32> to vector<32x1xf32>
    %270 = vector.extract_strided_slice %1 {offsets = [0, 11], sizes = [32, 1], strides = [1, 1]} : vector<32x74xf32> to vector<32x1xf32>
    %271 = vector.extract_strided_slice %268 {offsets = [0, 0], sizes = [32, 5], strides = [1, 1]} : vector<32x10xf32> to vector<32x5xf32>
    %272 = vector.shape_cast %271 : vector<32x5xf32> to vector<1x32x5xf32>
    %cst_54 = arith.constant dense<0.000000e+00> : vector<1xf32>
    %273 = vector.multi_reduction <add>, %272, %cst_54 [1, 2] : vector<1x32x5xf32> to vector<1xf32>
    %274 = vector.shape_cast %273 : vector<1xf32> to vector<1x1x1xf32>
    %275 = vector.extract %274[0, 0, 0] : f32 from vector<1x1x1xf32>
    %276 = arith.mulf %271, %271 : vector<32x5xf32>
    %277 = vector.shape_cast %276 : vector<32x5xf32> to vector<1x32x5xf32>
    %cst_55 = arith.constant dense<0.000000e+00> : vector<1xf32>
    %278 = vector.multi_reduction <add>, %277, %cst_55 [1, 2] : vector<1x32x5xf32> to vector<1xf32>
    %279 = vector.shape_cast %278 : vector<1xf32> to vector<1x1x1xf32>
    %280 = vector.extract %279[0, 0, 0] : f32 from vector<1x1x1xf32>
    %cst_56 = arith.constant 1.600000e+02 : f32
    %281 = arith.divf %275, %cst_56 : f32
    %cst_57 = arith.constant 1.600000e+02 : f32
    %282 = arith.divf %280, %cst_57 : f32
    %283 = arith.mulf %281, %281 : f32
    %284 = arith.subf %282, %283 : f32
    %cst_58 = arith.constant 0.000000e+00 : f32
    %285 = arith.maximumf %284, %cst_58 : f32
    %cst_59 = arith.constant 9.99999993E-9 : f32
    %286 = arith.addf %285, %cst_59 : f32
    %287 = math.rsqrt %286 : f32
    %288 = vector.broadcast %287 : f32 to vector<32x1xf32>
    %289 = arith.mulf %269, %288 : vector<32x1xf32>
    %290 = vector.broadcast %281 : f32 to vector<32x1xf32>
    %291 = arith.mulf %290, %289 : vector<32x1xf32>
    %292 = arith.subf %270, %291 : vector<32x1xf32>
    %293 = vector.broadcast %289 : vector<32x1xf32> to vector<32x5xf32>
    %294 = arith.mulf %271, %293 : vector<32x5xf32>
    %295 = vector.broadcast %292 : vector<32x1xf32> to vector<32x5xf32>
    %296 = arith.addf %294, %295 : vector<32x5xf32>
    %297 = vector.extract_strided_slice %268 {offsets = [0, 5], sizes = [32, 5], strides = [1, 1]} : vector<32x10xf32> to vector<32x5xf32>
    %298 = vector.shape_cast %297 : vector<32x5xf32> to vector<1x32x5xf32>
    %cst_60 = arith.constant dense<0.000000e+00> : vector<1xf32>
    %299 = vector.multi_reduction <add>, %298, %cst_60 [1, 2] : vector<1x32x5xf32> to vector<1xf32>
    %300 = vector.shape_cast %299 : vector<1xf32> to vector<1x1x1xf32>
    %301 = vector.extract %300[0, 0, 0] : f32 from vector<1x1x1xf32>
    %302 = arith.mulf %297, %297 : vector<32x5xf32>
    %303 = vector.shape_cast %302 : vector<32x5xf32> to vector<1x32x5xf32>
    %cst_61 = arith.constant dense<0.000000e+00> : vector<1xf32>
    %304 = vector.multi_reduction <add>, %303, %cst_61 [1, 2] : vector<1x32x5xf32> to vector<1xf32>
    %305 = vector.shape_cast %304 : vector<1xf32> to vector<1x1x1xf32>
    %306 = vector.extract %305[0, 0, 0] : f32 from vector<1x1x1xf32>
    %cst_62 = arith.constant 1.600000e+02 : f32
    %307 = arith.divf %301, %cst_62 : f32
    %cst_63 = arith.constant 1.600000e+02 : f32
    %308 = arith.divf %306, %cst_63 : f32
    %309 = arith.mulf %307, %307 : f32
    %310 = arith.subf %308, %309 : f32
    %cst_64 = arith.constant 0.000000e+00 : f32
    %311 = arith.maximumf %310, %cst_64 : f32
    %cst_65 = arith.constant 9.99999993E-9 : f32
    %312 = arith.addf %311, %cst_65 : f32
    %313 = math.rsqrt %312 : f32
    %314 = vector.broadcast %313 : f32 to vector<32x1xf32>
    %315 = arith.mulf %269, %314 : vector<32x1xf32>
    %316 = vector.broadcast %307 : f32 to vector<32x1xf32>
    %317 = arith.mulf %316, %315 : vector<32x1xf32>
    %318 = arith.subf %270, %317 : vector<32x1xf32>
    %319 = vector.broadcast %315 : vector<32x1xf32> to vector<32x5xf32>
    %320 = arith.mulf %297, %319 : vector<32x5xf32>
    %321 = vector.broadcast %318 : vector<32x1xf32> to vector<32x5xf32>
    %322 = arith.addf %320, %321 : vector<32x5xf32>
    %323 = tpu.concatenate %296, %322 in 1 : vector<32x5xf32>, vector<32x5xf32> -> vector<32x10xf32>
    %c0_66 = arith.constant 0 : index
    %c0_67 = arith.constant 0 : index
    %324 = vector.load %arg11[%c0_66, %c0_67] : memref<10x10xf32, #tpu.memory_space<vmem>>, vector<10x10xf32>
    %cst_68 = arith.constant dense<0.000000e+00> : vector<32x10xf32>
    %325 = tpu.matmul %323, %324, %cst_68 {dimension_numbers = #tpu.dot_dimension_numbers<[1], [0], [0], [1], [0, 0, 1, 1], [], []>} : vector<32x10xf32>, vector<10x10xf32>, vector<32x10xf32> -> vector<32x10xf32>
    %326 = vector.extract_strided_slice %1 {offsets = [0, 54], sizes = [32, 5], strides = [1, 1]} : vector<32x74xf32> to vector<32x5xf32>
    %327 = vector.extract_strided_slice %326 {offsets = [0, 0], sizes = [32, 1], strides = [1, 1]} : vector<32x5xf32> to vector<32x1xf32>
    %328 = vector.extract_strided_slice %325 {offsets = [0, 0], sizes = [32, 2], strides = [1, 1]} : vector<32x10xf32> to vector<32x2xf32>
    %329 = vector.broadcast %327 : vector<32x1xf32> to vector<32x2xf32>
    %330 = arith.mulf %329, %328 : vector<32x2xf32>
    %331 = vector.extract_strided_slice %326 {offsets = [0, 1], sizes = [32, 1], strides = [1, 1]} : vector<32x5xf32> to vector<32x1xf32>
    %332 = vector.extract_strided_slice %325 {offsets = [0, 2], sizes = [32, 2], strides = [1, 1]} : vector<32x10xf32> to vector<32x2xf32>
    %333 = vector.broadcast %331 : vector<32x1xf32> to vector<32x2xf32>
    %334 = arith.mulf %333, %332 : vector<32x2xf32>
    %335 = arith.addf %330, %334 : vector<32x2xf32>
    %336 = vector.extract_strided_slice %326 {offsets = [0, 2], sizes = [32, 1], strides = [1, 1]} : vector<32x5xf32> to vector<32x1xf32>
    %337 = vector.extract_strided_slice %325 {offsets = [0, 4], sizes = [32, 2], strides = [1, 1]} : vector<32x10xf32> to vector<32x2xf32>
    %338 = vector.broadcast %336 : vector<32x1xf32> to vector<32x2xf32>
    %339 = arith.mulf %338, %337 : vector<32x2xf32>
    %340 = arith.addf %335, %339 : vector<32x2xf32>
    %341 = vector.extract_strided_slice %326 {offsets = [0, 3], sizes = [32, 1], strides = [1, 1]} : vector<32x5xf32> to vector<32x1xf32>
    %342 = vector.extract_strided_slice %325 {offsets = [0, 6], sizes = [32, 2], strides = [1, 1]} : vector<32x10xf32> to vector<32x2xf32>
    %343 = vector.broadcast %341 : vector<32x1xf32> to vector<32x2xf32>
    %344 = arith.mulf %343, %342 : vector<32x2xf32>
    %345 = arith.addf %340, %344 : vector<32x2xf32>
    %346 = vector.extract_strided_slice %326 {offsets = [0, 4], sizes = [32, 1], strides = [1, 1]} : vector<32x5xf32> to vector<32x1xf32>
    %347 = vector.extract_strided_slice %325 {offsets = [0, 8], sizes = [32, 2], strides = [1, 1]} : vector<32x10xf32> to vector<32x2xf32>
    %348 = vector.broadcast %346 : vector<32x1xf32> to vector<32x2xf32>
    %349 = arith.mulf %348, %347 : vector<32x2xf32>
    %350 = arith.addf %345, %349 : vector<32x2xf32>
    %351 = vector.extract_strided_slice %1 {offsets = [0, 12], sizes = [32, 1], strides = [1, 1]} : vector<32x74xf32> to vector<32x1xf32>
    %352 = vector.broadcast %351 : vector<32x1xf32> to vector<32x2xf32>
    %353 = arith.addf %350, %352 : vector<32x2xf32>
    %354 = vector.extract_strided_slice %1 {offsets = [0, 13], sizes = [32, 1], strides = [1, 1]} : vector<32x74xf32> to vector<32x1xf32>
    %355 = vector.extract_strided_slice %1 {offsets = [0, 14], sizes = [32, 1], strides = [1, 1]} : vector<32x74xf32> to vector<32x1xf32>
    %356 = vector.extract_strided_slice %353 {offsets = [0, 0], sizes = [32, 1], strides = [1, 1]} : vector<32x2xf32> to vector<32x1xf32>
    %357 = vector.shape_cast %356 : vector<32x1xf32> to vector<1x32x1xf32>
    %cst_69 = arith.constant dense<0.000000e+00> : vector<1xf32>
    %358 = vector.multi_reduction <add>, %357, %cst_69 [1, 2] : vector<1x32x1xf32> to vector<1xf32>
    %359 = vector.shape_cast %358 : vector<1xf32> to vector<1x1x1xf32>
    %360 = vector.extract %359[0, 0, 0] : f32 from vector<1x1x1xf32>
    %361 = arith.mulf %356, %356 : vector<32x1xf32>
    %362 = vector.shape_cast %361 : vector<32x1xf32> to vector<1x32x1xf32>
    %cst_70 = arith.constant dense<0.000000e+00> : vector<1xf32>
    %363 = vector.multi_reduction <add>, %362, %cst_70 [1, 2] : vector<1x32x1xf32> to vector<1xf32>
    %364 = vector.shape_cast %363 : vector<1xf32> to vector<1x1x1xf32>
    %365 = vector.extract %364[0, 0, 0] : f32 from vector<1x1x1xf32>
    %cst_71 = arith.constant 3.200000e+01 : f32
    %366 = arith.divf %360, %cst_71 : f32
    %cst_72 = arith.constant 3.200000e+01 : f32
    %367 = arith.divf %365, %cst_72 : f32
    %368 = arith.mulf %366, %366 : f32
    %369 = arith.subf %367, %368 : f32
    %cst_73 = arith.constant 0.000000e+00 : f32
    %370 = arith.maximumf %369, %cst_73 : f32
    %cst_74 = arith.constant 9.99999993E-9 : f32
    %371 = arith.addf %370, %cst_74 : f32
    %372 = math.rsqrt %371 : f32
    %373 = vector.broadcast %372 : f32 to vector<32x1xf32>
    %374 = arith.mulf %354, %373 : vector<32x1xf32>
    %375 = vector.broadcast %366 : f32 to vector<32x1xf32>
    %376 = arith.mulf %375, %374 : vector<32x1xf32>
    %377 = arith.subf %355, %376 : vector<32x1xf32>
    %378 = arith.mulf %356, %374 : vector<32x1xf32>
    %379 = arith.addf %378, %377 : vector<32x1xf32>
    %380 = vector.extract_strided_slice %353 {offsets = [0, 1], sizes = [32, 1], strides = [1, 1]} : vector<32x2xf32> to vector<32x1xf32>
    %381 = vector.shape_cast %380 : vector<32x1xf32> to vector<1x32x1xf32>
    %cst_75 = arith.constant dense<0.000000e+00> : vector<1xf32>
    %382 = vector.multi_reduction <add>, %381, %cst_75 [1, 2] : vector<1x32x1xf32> to vector<1xf32>
    %383 = vector.shape_cast %382 : vector<1xf32> to vector<1x1x1xf32>
    %384 = vector.extract %383[0, 0, 0] : f32 from vector<1x1x1xf32>
    %385 = arith.mulf %380, %380 : vector<32x1xf32>
    %386 = vector.shape_cast %385 : vector<32x1xf32> to vector<1x32x1xf32>
    %cst_76 = arith.constant dense<0.000000e+00> : vector<1xf32>
    %387 = vector.multi_reduction <add>, %386, %cst_76 [1, 2] : vector<1x32x1xf32> to vector<1xf32>
    %388 = vector.shape_cast %387 : vector<1xf32> to vector<1x1x1xf32>
    %389 = vector.extract %388[0, 0, 0] : f32 from vector<1x1x1xf32>
    %cst_77 = arith.constant 3.200000e+01 : f32
    %390 = arith.divf %384, %cst_77 : f32
    %cst_78 = arith.constant 3.200000e+01 : f32
    %391 = arith.divf %389, %cst_78 : f32
    %392 = arith.mulf %390, %390 : f32
    %393 = arith.subf %391, %392 : f32
    %cst_79 = arith.constant 0.000000e+00 : f32
    %394 = arith.maximumf %393, %cst_79 : f32
    %cst_80 = arith.constant 9.99999993E-9 : f32
    %395 = arith.addf %394, %cst_80 : f32
    %396 = math.rsqrt %395 : f32
    %397 = vector.broadcast %396 : f32 to vector<32x1xf32>
    %398 = arith.mulf %354, %397 : vector<32x1xf32>
    %399 = vector.broadcast %390 : f32 to vector<32x1xf32>
    %400 = arith.mulf %399, %398 : vector<32x1xf32>
    %401 = arith.subf %355, %400 : vector<32x1xf32>
    %402 = arith.mulf %380, %398 : vector<32x1xf32>
    %403 = arith.addf %402, %401 : vector<32x1xf32>
    %404 = tpu.concatenate %379, %403 in 1 : vector<32x1xf32>, vector<32x1xf32> -> vector<32x2xf32>
    %c0_81 = arith.constant 0 : index
    %c0_82 = arith.constant 0 : index
    %405 = vector.load %arg12[%c0_81, %c0_82] : memref<28x64xf32, #tpu.memory_space<vmem>>, vector<28x64xf32>
    %cst_83 = arith.constant dense<0.000000e+00> : vector<32x64xf32>
    %406 = tpu.matmul %238, %405, %cst_83 {dimension_numbers = #tpu.dot_dimension_numbers<[1], [0], [0], [1], [0, 0, 1, 1], [], []>} : vector<32x28xf32>, vector<28x64xf32>, vector<32x64xf32> -> vector<32x64xf32>
    %407 = tpu.concatenate %153, %406 in 0 : vector<32x64xf32>, vector<32x64xf32> -> vector<64x64xf32>
    %408 = vector.extract_strided_slice %2 {offsets = [0, 0], sizes = [32, 64], strides = [1, 1]} : vector<32x448xf32> to vector<32x64xf32>
    %cst_84 = arith.constant dense<0.000000e+00> : vector<32x64xf32>
    %409 = tpu.matmul %408, %407, %cst_84 {dimension_numbers = #tpu.dot_dimension_numbers<[1], [0], [0], [1], [0, 0, 1, 1], [], []>} : vector<32x64xf32>, vector<64x64xf32>, vector<32x64xf32> -> vector<32x64xf32>
    %410 = vector.extract_strided_slice %1 {offsets = [0, 24], sizes = [32, 1], strides = [1, 1]} : vector<32x74xf32> to vector<32x1xf32>
    %411 = vector.broadcast %410 : vector<32x1xf32> to vector<32x64xf32>
    %412 = arith.addf %409, %411 : vector<32x64xf32>
    %413 = vector.extract_strided_slice %1 {offsets = [0, 25], sizes = [32, 1], strides = [1, 1]} : vector<32x74xf32> to vector<32x1xf32>
    %414 = vector.extract_strided_slice %1 {offsets = [0, 26], sizes = [32, 1], strides = [1, 1]} : vector<32x74xf32> to vector<32x1xf32>
    %415 = vector.extract_strided_slice %412 {offsets = [0, 0], sizes = [32, 32], strides = [1, 1]} : vector<32x64xf32> to vector<32x32xf32>
    %416 = vector.shape_cast %415 : vector<32x32xf32> to vector<1x32x32xf32>
    %cst_85 = arith.constant dense<0.000000e+00> : vector<1xf32>
    %417 = vector.multi_reduction <add>, %416, %cst_85 [1, 2] : vector<1x32x32xf32> to vector<1xf32>
    %418 = vector.shape_cast %417 : vector<1xf32> to vector<1x1x1xf32>
    %419 = vector.extract %418[0, 0, 0] : f32 from vector<1x1x1xf32>
    %420 = arith.mulf %415, %415 : vector<32x32xf32>
    %421 = vector.shape_cast %420 : vector<32x32xf32> to vector<1x32x32xf32>
    %cst_86 = arith.constant dense<0.000000e+00> : vector<1xf32>
    %422 = vector.multi_reduction <add>, %421, %cst_86 [1, 2] : vector<1x32x32xf32> to vector<1xf32>
    %423 = vector.shape_cast %422 : vector<1xf32> to vector<1x1x1xf32>
    %424 = vector.extract %423[0, 0, 0] : f32 from vector<1x1x1xf32>
    %cst_87 = arith.constant 1.024000e+03 : f32
    %425 = arith.divf %419, %cst_87 : f32
    %cst_88 = arith.constant 1.024000e+03 : f32
    %426 = arith.divf %424, %cst_88 : f32
    %427 = arith.mulf %425, %425 : f32
    %428 = arith.subf %426, %427 : f32
    %cst_89 = arith.constant 0.000000e+00 : f32
    %429 = arith.maximumf %428, %cst_89 : f32
    %cst_90 = arith.constant 9.99999993E-9 : f32
    %430 = arith.addf %429, %cst_90 : f32
    %431 = math.rsqrt %430 : f32
    %432 = vector.broadcast %431 : f32 to vector<32x1xf32>
    %433 = arith.mulf %413, %432 : vector<32x1xf32>
    %434 = vector.broadcast %425 : f32 to vector<32x1xf32>
    %435 = arith.mulf %434, %433 : vector<32x1xf32>
    %436 = arith.subf %414, %435 : vector<32x1xf32>
    %437 = vector.broadcast %433 : vector<32x1xf32> to vector<32x32xf32>
    %438 = arith.mulf %415, %437 : vector<32x32xf32>
    %439 = vector.broadcast %436 : vector<32x1xf32> to vector<32x32xf32>
    %440 = arith.addf %438, %439 : vector<32x32xf32>
    %441 = vector.extract_strided_slice %412 {offsets = [0, 32], sizes = [32, 32], strides = [1, 1]} : vector<32x64xf32> to vector<32x32xf32>
    %442 = vector.shape_cast %441 : vector<32x32xf32> to vector<1x32x32xf32>
    %cst_91 = arith.constant dense<0.000000e+00> : vector<1xf32>
    %443 = vector.multi_reduction <add>, %442, %cst_91 [1, 2] : vector<1x32x32xf32> to vector<1xf32>
    %444 = vector.shape_cast %443 : vector<1xf32> to vector<1x1x1xf32>
    %445 = vector.extract %444[0, 0, 0] : f32 from vector<1x1x1xf32>
    %446 = arith.mulf %441, %441 : vector<32x32xf32>
    %447 = vector.shape_cast %446 : vector<32x32xf32> to vector<1x32x32xf32>
    %cst_92 = arith.constant dense<0.000000e+00> : vector<1xf32>
    %448 = vector.multi_reduction <add>, %447, %cst_92 [1, 2] : vector<1x32x32xf32> to vector<1xf32>
    %449 = vector.shape_cast %448 : vector<1xf32> to vector<1x1x1xf32>
    %450 = vector.extract %449[0, 0, 0] : f32 from vector<1x1x1xf32>
    %cst_93 = arith.constant 1.024000e+03 : f32
    %451 = arith.divf %445, %cst_93 : f32
    %cst_94 = arith.constant 1.024000e+03 : f32
    %452 = arith.divf %450, %cst_94 : f32
    %453 = arith.mulf %451, %451 : f32
    %454 = arith.subf %452, %453 : f32
    %cst_95 = arith.constant 0.000000e+00 : f32
    %455 = arith.maximumf %454, %cst_95 : f32
    %cst_96 = arith.constant 9.99999993E-9 : f32
    %456 = arith.addf %455, %cst_96 : f32
    %457 = math.rsqrt %456 : f32
    %458 = vector.broadcast %457 : f32 to vector<32x1xf32>
    %459 = arith.mulf %413, %458 : vector<32x1xf32>
    %460 = vector.broadcast %451 : f32 to vector<32x1xf32>
    %461 = arith.mulf %460, %459 : vector<32x1xf32>
    %462 = arith.subf %414, %461 : vector<32x1xf32>
    %463 = vector.broadcast %459 : vector<32x1xf32> to vector<32x32xf32>
    %464 = arith.mulf %441, %463 : vector<32x32xf32>
    %465 = vector.broadcast %462 : vector<32x1xf32> to vector<32x32xf32>
    %466 = arith.addf %464, %465 : vector<32x32xf32>
    %467 = tpu.concatenate %440, %466 in 1 : vector<32x32xf32>, vector<32x32xf32> -> vector<32x64xf32>
    %c1 = arith.constant 1 : index
    %468 = memref.load %arg7[%c1] : memref<6xf32, #tpu.memory_space<smem>>
    %cst_97 = arith.constant 0.000000e+00 : f32
    %469 = vector.broadcast %cst_97 : f32 to vector<32x64xf32>
    %470 = arith.cmpf ogt, %467, %469 : vector<32x64xf32>
    %471 = vector.broadcast %468 : f32 to vector<32x64xf32>
    %472 = arith.mulf %471, %467 : vector<32x64xf32>
    %473 = arith.select %470, %467, %472 : vector<32x64xi1>, vector<32x64xf32>
    %c0_98 = arith.constant 0 : index
    %c0_99 = arith.constant 0 : index
    %474 = vector.load %arg9[%c0_98, %c0_99] : memref<64x140xf32, #tpu.memory_space<vmem>>, vector<64x140xf32>
    %cst_100 = arith.constant dense<0.000000e+00> : vector<32x140xf32>
    %475 = tpu.matmul %153, %474, %cst_100 {dimension_numbers = #tpu.dot_dimension_numbers<[1], [0], [0], [1], [0, 0, 1, 1], [], []>} : vector<32x64xf32>, vector<64x140xf32>, vector<32x140xf32> -> vector<32x140xf32>
    %476 = vector.extract_strided_slice %1 {offsets = [0, 59], sizes = [32, 5], strides = [1, 1]} : vector<32x74xf32> to vector<32x5xf32>
    %477 = vector.extract_strided_slice %476 {offsets = [0, 0], sizes = [32, 1], strides = [1, 1]} : vector<32x5xf32> to vector<32x1xf32>
    %478 = vector.extract_strided_slice %475 {offsets = [0, 0], sizes = [32, 28], strides = [1, 1]} : vector<32x140xf32> to vector<32x28xf32>
    %479 = vector.broadcast %477 : vector<32x1xf32> to vector<32x28xf32>
    %480 = arith.mulf %479, %478 : vector<32x28xf32>
    %481 = vector.extract_strided_slice %476 {offsets = [0, 1], sizes = [32, 1], strides = [1, 1]} : vector<32x5xf32> to vector<32x1xf32>
    %482 = vector.extract_strided_slice %475 {offsets = [0, 28], sizes = [32, 28], strides = [1, 1]} : vector<32x140xf32> to vector<32x28xf32>
    %483 = vector.broadcast %481 : vector<32x1xf32> to vector<32x28xf32>
    %484 = arith.mulf %483, %482 : vector<32x28xf32>
    %485 = arith.addf %480, %484 : vector<32x28xf32>
    %486 = vector.extract_strided_slice %476 {offsets = [0, 2], sizes = [32, 1], strides = [1, 1]} : vector<32x5xf32> to vector<32x1xf32>
    %487 = vector.extract_strided_slice %475 {offsets = [0, 56], sizes = [32, 28], strides = [1, 1]} : vector<32x140xf32> to vector<32x28xf32>
    %488 = vector.broadcast %486 : vector<32x1xf32> to vector<32x28xf32>
    %489 = arith.mulf %488, %487 : vector<32x28xf32>
    %490 = arith.addf %485, %489 : vector<32x28xf32>
    %491 = vector.extract_strided_slice %476 {offsets = [0, 3], sizes = [32, 1], strides = [1, 1]} : vector<32x5xf32> to vector<32x1xf32>
    %492 = vector.extract_strided_slice %475 {offsets = [0, 84], sizes = [32, 28], strides = [1, 1]} : vector<32x140xf32> to vector<32x28xf32>
    %493 = vector.broadcast %491 : vector<32x1xf32> to vector<32x28xf32>
    %494 = arith.mulf %493, %492 : vector<32x28xf32>
    %495 = arith.addf %490, %494 : vector<32x28xf32>
    %496 = vector.extract_strided_slice %476 {offsets = [0, 4], sizes = [32, 1], strides = [1, 1]} : vector<32x5xf32> to vector<32x1xf32>
    %497 = vector.extract_strided_slice %475 {offsets = [0, 112], sizes = [32, 28], strides = [1, 1]} : vector<32x140xf32> to vector<32x28xf32>
    %498 = vector.broadcast %496 : vector<32x1xf32> to vector<32x28xf32>
    %499 = arith.mulf %498, %497 : vector<32x28xf32>
    %500 = arith.addf %495, %499 : vector<32x28xf32>
    %501 = vector.extract_strided_slice %1 {offsets = [0, 15], sizes = [32, 1], strides = [1, 1]} : vector<32x74xf32> to vector<32x1xf32>
    %502 = vector.broadcast %501 : vector<32x1xf32> to vector<32x28xf32>
    %503 = arith.addf %500, %502 : vector<32x28xf32>
    %504 = vector.extract_strided_slice %1 {offsets = [0, 16], sizes = [32, 1], strides = [1, 1]} : vector<32x74xf32> to vector<32x1xf32>
    %505 = vector.extract_strided_slice %1 {offsets = [0, 17], sizes = [32, 1], strides = [1, 1]} : vector<32x74xf32> to vector<32x1xf32>
    %506 = vector.extract_strided_slice %503 {offsets = [0, 0], sizes = [32, 14], strides = [1, 1]} : vector<32x28xf32> to vector<32x14xf32>
    %507 = vector.shape_cast %506 : vector<32x14xf32> to vector<1x32x14xf32>
    %cst_101 = arith.constant dense<0.000000e+00> : vector<1xf32>
    %508 = vector.multi_reduction <add>, %507, %cst_101 [1, 2] : vector<1x32x14xf32> to vector<1xf32>
    %509 = vector.shape_cast %508 : vector<1xf32> to vector<1x1x1xf32>
    %510 = vector.extract %509[0, 0, 0] : f32 from vector<1x1x1xf32>
    %511 = arith.mulf %506, %506 : vector<32x14xf32>
    %512 = vector.shape_cast %511 : vector<32x14xf32> to vector<1x32x14xf32>
    %cst_102 = arith.constant dense<0.000000e+00> : vector<1xf32>
    %513 = vector.multi_reduction <add>, %512, %cst_102 [1, 2] : vector<1x32x14xf32> to vector<1xf32>
    %514 = vector.shape_cast %513 : vector<1xf32> to vector<1x1x1xf32>
    %515 = vector.extract %514[0, 0, 0] : f32 from vector<1x1x1xf32>
    %cst_103 = arith.constant 4.480000e+02 : f32
    %516 = arith.divf %510, %cst_103 : f32
    %cst_104 = arith.constant 4.480000e+02 : f32
    %517 = arith.divf %515, %cst_104 : f32
    %518 = arith.mulf %516, %516 : f32
    %519 = arith.subf %517, %518 : f32
    %cst_105 = arith.constant 0.000000e+00 : f32
    %520 = arith.maximumf %519, %cst_105 : f32
    %cst_106 = arith.constant 9.99999993E-9 : f32
    %521 = arith.addf %520, %cst_106 : f32
    %522 = math.rsqrt %521 : f32
    %523 = vector.broadcast %522 : f32 to vector<32x1xf32>
    %524 = arith.mulf %504, %523 : vector<32x1xf32>
    %525 = vector.broadcast %516 : f32 to vector<32x1xf32>
    %526 = arith.mulf %525, %524 : vector<32x1xf32>
    %527 = arith.subf %505, %526 : vector<32x1xf32>
    %528 = vector.broadcast %524 : vector<32x1xf32> to vector<32x14xf32>
    %529 = arith.mulf %506, %528 : vector<32x14xf32>
    %530 = vector.broadcast %527 : vector<32x1xf32> to vector<32x14xf32>
    %531 = arith.addf %529, %530 : vector<32x14xf32>
    %532 = vector.extract_strided_slice %503 {offsets = [0, 14], sizes = [32, 14], strides = [1, 1]} : vector<32x28xf32> to vector<32x14xf32>
    %533 = vector.shape_cast %532 : vector<32x14xf32> to vector<1x32x14xf32>
    %cst_107 = arith.constant dense<0.000000e+00> : vector<1xf32>
    %534 = vector.multi_reduction <add>, %533, %cst_107 [1, 2] : vector<1x32x14xf32> to vector<1xf32>
    %535 = vector.shape_cast %534 : vector<1xf32> to vector<1x1x1xf32>
    %536 = vector.extract %535[0, 0, 0] : f32 from vector<1x1x1xf32>
    %537 = arith.mulf %532, %532 : vector<32x14xf32>
    %538 = vector.shape_cast %537 : vector<32x14xf32> to vector<1x32x14xf32>
    %cst_108 = arith.constant dense<0.000000e+00> : vector<1xf32>
    %539 = vector.multi_reduction <add>, %538, %cst_108 [1, 2] : vector<1x32x14xf32> to vector<1xf32>
    %540 = vector.shape_cast %539 : vector<1xf32> to vector<1x1x1xf32>
    %541 = vector.extract %540[0, 0, 0] : f32 from vector<1x1x1xf32>
    %cst_109 = arith.constant 4.480000e+02 : f32
    %542 = arith.divf %536, %cst_109 : f32
    %cst_110 = arith.constant 4.480000e+02 : f32
    %543 = arith.divf %541, %cst_110 : f32
    %544 = arith.mulf %542, %542 : f32
    %545 = arith.subf %543, %544 : f32
    %cst_111 = arith.constant 0.000000e+00 : f32
    %546 = arith.maximumf %545, %cst_111 : f32
    %cst_112 = arith.constant 9.99999993E-9 : f32
    %547 = arith.addf %546, %cst_112 : f32
    %548 = math.rsqrt %547 : f32
    %549 = vector.broadcast %548 : f32 to vector<32x1xf32>
    %550 = arith.mulf %504, %549 : vector<32x1xf32>
    %551 = vector.broadcast %542 : f32 to vector<32x1xf32>
    %552 = arith.mulf %551, %550 : vector<32x1xf32>
    %553 = arith.subf %505, %552 : vector<32x1xf32>
    %554 = vector.broadcast %550 : vector<32x1xf32> to vector<32x14xf32>
    %555 = arith.mulf %532, %554 : vector<32x14xf32>
    %556 = vector.broadcast %553 : vector<32x1xf32> to vector<32x14xf32>
    %557 = arith.addf %555, %556 : vector<32x14xf32>
    %558 = tpu.concatenate %531, %557 in 1 : vector<32x14xf32>, vector<32x14xf32> -> vector<32x28xf32>
    %c0_113 = arith.constant 0 : index
    %c0_114 = arith.constant 0 : index
    %559 = vector.load %arg13[%c0_113, %c0_114] : memref<10x28xf32, #tpu.memory_space<vmem>>, vector<10x28xf32>
    %cst_115 = arith.constant dense<0.000000e+00> : vector<32x28xf32>
    %560 = tpu.matmul %323, %559, %cst_115 {dimension_numbers = #tpu.dot_dimension_numbers<[1], [0], [0], [1], [0, 0, 1, 1], [], []>} : vector<32x10xf32>, vector<10x28xf32>, vector<32x28xf32> -> vector<32x28xf32>
    %561 = tpu.concatenate %558, %238, %560 in 0 : vector<32x28xf32>, vector<32x28xf32>, vector<32x28xf32> -> vector<96x28xf32>
    %562 = vector.extract_strided_slice %2 {offsets = [0, 64], sizes = [32, 96], strides = [1, 1]} : vector<32x448xf32> to vector<32x96xf32>
    %cst_116 = arith.constant dense<0.000000e+00> : vector<32x28xf32>
    %563 = tpu.matmul %562, %561, %cst_116 {dimension_numbers = #tpu.dot_dimension_numbers<[1], [0], [0], [1], [0, 0, 1, 1], [], []>} : vector<32x96xf32>, vector<96x28xf32>, vector<32x28xf32> -> vector<32x28xf32>
    %564 = vector.extract_strided_slice %1 {offsets = [0, 27], sizes = [32, 1], strides = [1, 1]} : vector<32x74xf32> to vector<32x1xf32>
    %565 = vector.broadcast %564 : vector<32x1xf32> to vector<32x28xf32>
    %566 = arith.addf %563, %565 : vector<32x28xf32>
    %567 = vector.extract_strided_slice %1 {offsets = [0, 28], sizes = [32, 1], strides = [1, 1]} : vector<32x74xf32> to vector<32x1xf32>
    %568 = vector.extract_strided_slice %1 {offsets = [0, 29], sizes = [32, 1], strides = [1, 1]} : vector<32x74xf32> to vector<32x1xf32>
    %569 = vector.extract_strided_slice %566 {offsets = [0, 0], sizes = [32, 14], strides = [1, 1]} : vector<32x28xf32> to vector<32x14xf32>
    %570 = vector.shape_cast %569 : vector<32x14xf32> to vector<1x32x14xf32>
    %cst_117 = arith.constant dense<0.000000e+00> : vector<1xf32>
    %571 = vector.multi_reduction <add>, %570, %cst_117 [1, 2] : vector<1x32x14xf32> to vector<1xf32>
    %572 = vector.shape_cast %571 : vector<1xf32> to vector<1x1x1xf32>
    %573 = vector.extract %572[0, 0, 0] : f32 from vector<1x1x1xf32>
    %574 = arith.mulf %569, %569 : vector<32x14xf32>
    %575 = vector.shape_cast %574 : vector<32x14xf32> to vector<1x32x14xf32>
    %cst_118 = arith.constant dense<0.000000e+00> : vector<1xf32>
    %576 = vector.multi_reduction <add>, %575, %cst_118 [1, 2] : vector<1x32x14xf32> to vector<1xf32>
    %577 = vector.shape_cast %576 : vector<1xf32> to vector<1x1x1xf32>
    %578 = vector.extract %577[0, 0, 0] : f32 from vector<1x1x1xf32>
    %cst_119 = arith.constant 4.480000e+02 : f32
    %579 = arith.divf %573, %cst_119 : f32
    %cst_120 = arith.constant 4.480000e+02 : f32
    %580 = arith.divf %578, %cst_120 : f32
    %581 = arith.mulf %579, %579 : f32
    %582 = arith.subf %580, %581 : f32
    %cst_121 = arith.constant 0.000000e+00 : f32
    %583 = arith.maximumf %582, %cst_121 : f32
    %cst_122 = arith.constant 9.99999993E-9 : f32
    %584 = arith.addf %583, %cst_122 : f32
    %585 = math.rsqrt %584 : f32
    %586 = vector.broadcast %585 : f32 to vector<32x1xf32>
    %587 = arith.mulf %567, %586 : vector<32x1xf32>
    %588 = vector.broadcast %579 : f32 to vector<32x1xf32>
    %589 = arith.mulf %588, %587 : vector<32x1xf32>
    %590 = arith.subf %568, %589 : vector<32x1xf32>
    %591 = vector.broadcast %587 : vector<32x1xf32> to vector<32x14xf32>
    %592 = arith.mulf %569, %591 : vector<32x14xf32>
    %593 = vector.broadcast %590 : vector<32x1xf32> to vector<32x14xf32>
    %594 = arith.addf %592, %593 : vector<32x14xf32>
    %595 = vector.extract_strided_slice %566 {offsets = [0, 14], sizes = [32, 14], strides = [1, 1]} : vector<32x28xf32> to vector<32x14xf32>
    %596 = vector.shape_cast %595 : vector<32x14xf32> to vector<1x32x14xf32>
    %cst_123 = arith.constant dense<0.000000e+00> : vector<1xf32>
    %597 = vector.multi_reduction <add>, %596, %cst_123 [1, 2] : vector<1x32x14xf32> to vector<1xf32>
    %598 = vector.shape_cast %597 : vector<1xf32> to vector<1x1x1xf32>
    %599 = vector.extract %598[0, 0, 0] : f32 from vector<1x1x1xf32>
    %600 = arith.mulf %595, %595 : vector<32x14xf32>
    %601 = vector.shape_cast %600 : vector<32x14xf32> to vector<1x32x14xf32>
    %cst_124 = arith.constant dense<0.000000e+00> : vector<1xf32>
    %602 = vector.multi_reduction <add>, %601, %cst_124 [1, 2] : vector<1x32x14xf32> to vector<1xf32>
    %603 = vector.shape_cast %602 : vector<1xf32> to vector<1x1x1xf32>
    %604 = vector.extract %603[0, 0, 0] : f32 from vector<1x1x1xf32>
    %cst_125 = arith.constant 4.480000e+02 : f32
    %605 = arith.divf %599, %cst_125 : f32
    %cst_126 = arith.constant 4.480000e+02 : f32
    %606 = arith.divf %604, %cst_126 : f32
    %607 = arith.mulf %605, %605 : f32
    %608 = arith.subf %606, %607 : f32
    %cst_127 = arith.constant 0.000000e+00 : f32
    %609 = arith.maximumf %608, %cst_127 : f32
    %cst_128 = arith.constant 9.99999993E-9 : f32
    %610 = arith.addf %609, %cst_128 : f32
    %611 = math.rsqrt %610 : f32
    %612 = vector.broadcast %611 : f32 to vector<32x1xf32>
    %613 = arith.mulf %567, %612 : vector<32x1xf32>
    %614 = vector.broadcast %605 : f32 to vector<32x1xf32>
    %615 = arith.mulf %614, %613 : vector<32x1xf32>
    %616 = arith.subf %568, %615 : vector<32x1xf32>
    %617 = vector.broadcast %613 : vector<32x1xf32> to vector<32x14xf32>
    %618 = arith.mulf %595, %617 : vector<32x14xf32>
    %619 = vector.broadcast %616 : vector<32x1xf32> to vector<32x14xf32>
    %620 = arith.addf %618, %619 : vector<32x14xf32>
    %621 = tpu.concatenate %594, %620 in 1 : vector<32x14xf32>, vector<32x14xf32> -> vector<32x28xf32>
    %c2 = arith.constant 2 : index
    %622 = memref.load %arg7[%c2] : memref<6xf32, #tpu.memory_space<smem>>
    %cst_129 = arith.constant 0.000000e+00 : f32
    %623 = vector.broadcast %cst_129 : f32 to vector<32x28xf32>
    %624 = arith.cmpf ogt, %621, %623 : vector<32x28xf32>
    %625 = vector.broadcast %622 : f32 to vector<32x28xf32>
    %626 = arith.mulf %625, %621 : vector<32x28xf32>
    %627 = arith.select %624, %621, %626 : vector<32x28xi1>, vector<32x28xf32>
    %c0_130 = arith.constant 0 : index
    %c0_131 = arith.constant 0 : index
    %628 = vector.load %arg10[%c0_130, %c0_131] : memref<28x50xf32, #tpu.memory_space<vmem>>, vector<28x50xf32>
    %cst_132 = arith.constant dense<0.000000e+00> : vector<32x50xf32>
    %629 = tpu.matmul %238, %628, %cst_132 {dimension_numbers = #tpu.dot_dimension_numbers<[1], [0], [0], [1], [0, 0, 1, 1], [], []>} : vector<32x28xf32>, vector<28x50xf32>, vector<32x50xf32> -> vector<32x50xf32>
    %630 = vector.extract_strided_slice %1 {offsets = [0, 64], sizes = [32, 5], strides = [1, 1]} : vector<32x74xf32> to vector<32x5xf32>
    %631 = vector.extract_strided_slice %630 {offsets = [0, 0], sizes = [32, 1], strides = [1, 1]} : vector<32x5xf32> to vector<32x1xf32>
    %632 = vector.extract_strided_slice %629 {offsets = [0, 0], sizes = [32, 10], strides = [1, 1]} : vector<32x50xf32> to vector<32x10xf32>
    %633 = vector.broadcast %631 : vector<32x1xf32> to vector<32x10xf32>
    %634 = arith.mulf %633, %632 : vector<32x10xf32>
    %635 = vector.extract_strided_slice %630 {offsets = [0, 1], sizes = [32, 1], strides = [1, 1]} : vector<32x5xf32> to vector<32x1xf32>
    %636 = vector.extract_strided_slice %629 {offsets = [0, 10], sizes = [32, 10], strides = [1, 1]} : vector<32x50xf32> to vector<32x10xf32>
    %637 = vector.broadcast %635 : vector<32x1xf32> to vector<32x10xf32>
    %638 = arith.mulf %637, %636 : vector<32x10xf32>
    %639 = arith.addf %634, %638 : vector<32x10xf32>
    %640 = vector.extract_strided_slice %630 {offsets = [0, 2], sizes = [32, 1], strides = [1, 1]} : vector<32x5xf32> to vector<32x1xf32>
    %641 = vector.extract_strided_slice %629 {offsets = [0, 20], sizes = [32, 10], strides = [1, 1]} : vector<32x50xf32> to vector<32x10xf32>
    %642 = vector.broadcast %640 : vector<32x1xf32> to vector<32x10xf32>
    %643 = arith.mulf %642, %641 : vector<32x10xf32>
    %644 = arith.addf %639, %643 : vector<32x10xf32>
    %645 = vector.extract_strided_slice %630 {offsets = [0, 3], sizes = [32, 1], strides = [1, 1]} : vector<32x5xf32> to vector<32x1xf32>
    %646 = vector.extract_strided_slice %629 {offsets = [0, 30], sizes = [32, 10], strides = [1, 1]} : vector<32x50xf32> to vector<32x10xf32>
    %647 = vector.broadcast %645 : vector<32x1xf32> to vector<32x10xf32>
    %648 = arith.mulf %647, %646 : vector<32x10xf32>
    %649 = arith.addf %644, %648 : vector<32x10xf32>
    %650 = vector.extract_strided_slice %630 {offsets = [0, 4], sizes = [32, 1], strides = [1, 1]} : vector<32x5xf32> to vector<32x1xf32>
    %651 = vector.extract_strided_slice %629 {offsets = [0, 40], sizes = [32, 10], strides = [1, 1]} : vector<32x50xf32> to vector<32x10xf32>
    %652 = vector.broadcast %650 : vector<32x1xf32> to vector<32x10xf32>
    %653 = arith.mulf %652, %651 : vector<32x10xf32>
    %654 = arith.addf %649, %653 : vector<32x10xf32>
    %655 = vector.extract_strided_slice %1 {offsets = [0, 18], sizes = [32, 1], strides = [1, 1]} : vector<32x74xf32> to vector<32x1xf32>
    %656 = vector.broadcast %655 : vector<32x1xf32> to vector<32x10xf32>
    %657 = arith.addf %654, %656 : vector<32x10xf32>
    %658 = vector.extract_strided_slice %1 {offsets = [0, 19], sizes = [32, 1], strides = [1, 1]} : vector<32x74xf32> to vector<32x1xf32>
    %659 = vector.extract_strided_slice %1 {offsets = [0, 20], sizes = [32, 1], strides = [1, 1]} : vector<32x74xf32> to vector<32x1xf32>
    %660 = vector.extract_strided_slice %657 {offsets = [0, 0], sizes = [32, 5], strides = [1, 1]} : vector<32x10xf32> to vector<32x5xf32>
    %661 = vector.shape_cast %660 : vector<32x5xf32> to vector<1x32x5xf32>
    %cst_133 = arith.constant dense<0.000000e+00> : vector<1xf32>
    %662 = vector.multi_reduction <add>, %661, %cst_133 [1, 2] : vector<1x32x5xf32> to vector<1xf32>
    %663 = vector.shape_cast %662 : vector<1xf32> to vector<1x1x1xf32>
    %664 = vector.extract %663[0, 0, 0] : f32 from vector<1x1x1xf32>
    %665 = arith.mulf %660, %660 : vector<32x5xf32>
    %666 = vector.shape_cast %665 : vector<32x5xf32> to vector<1x32x5xf32>
    %cst_134 = arith.constant dense<0.000000e+00> : vector<1xf32>
    %667 = vector.multi_reduction <add>, %666, %cst_134 [1, 2] : vector<1x32x5xf32> to vector<1xf32>
    %668 = vector.shape_cast %667 : vector<1xf32> to vector<1x1x1xf32>
    %669 = vector.extract %668[0, 0, 0] : f32 from vector<1x1x1xf32>
    %cst_135 = arith.constant 1.600000e+02 : f32
    %670 = arith.divf %664, %cst_135 : f32
    %cst_136 = arith.constant 1.600000e+02 : f32
    %671 = arith.divf %669, %cst_136 : f32
    %672 = arith.mulf %670, %670 : f32
    %673 = arith.subf %671, %672 : f32
    %cst_137 = arith.constant 0.000000e+00 : f32
    %674 = arith.maximumf %673, %cst_137 : f32
    %cst_138 = arith.constant 9.99999993E-9 : f32
    %675 = arith.addf %674, %cst_138 : f32
    %676 = math.rsqrt %675 : f32
    %677 = vector.broadcast %676 : f32 to vector<32x1xf32>
    %678 = arith.mulf %658, %677 : vector<32x1xf32>
    %679 = vector.broadcast %670 : f32 to vector<32x1xf32>
    %680 = arith.mulf %679, %678 : vector<32x1xf32>
    %681 = arith.subf %659, %680 : vector<32x1xf32>
    %682 = vector.broadcast %678 : vector<32x1xf32> to vector<32x5xf32>
    %683 = arith.mulf %660, %682 : vector<32x5xf32>
    %684 = vector.broadcast %681 : vector<32x1xf32> to vector<32x5xf32>
    %685 = arith.addf %683, %684 : vector<32x5xf32>
    %686 = vector.extract_strided_slice %657 {offsets = [0, 5], sizes = [32, 5], strides = [1, 1]} : vector<32x10xf32> to vector<32x5xf32>
    %687 = vector.shape_cast %686 : vector<32x5xf32> to vector<1x32x5xf32>
    %cst_139 = arith.constant dense<0.000000e+00> : vector<1xf32>
    %688 = vector.multi_reduction <add>, %687, %cst_139 [1, 2] : vector<1x32x5xf32> to vector<1xf32>
    %689 = vector.shape_cast %688 : vector<1xf32> to vector<1x1x1xf32>
    %690 = vector.extract %689[0, 0, 0] : f32 from vector<1x1x1xf32>
    %691 = arith.mulf %686, %686 : vector<32x5xf32>
    %692 = vector.shape_cast %691 : vector<32x5xf32> to vector<1x32x5xf32>
    %cst_140 = arith.constant dense<0.000000e+00> : vector<1xf32>
    %693 = vector.multi_reduction <add>, %692, %cst_140 [1, 2] : vector<1x32x5xf32> to vector<1xf32>
    %694 = vector.shape_cast %693 : vector<1xf32> to vector<1x1x1xf32>
    %695 = vector.extract %694[0, 0, 0] : f32 from vector<1x1x1xf32>
    %cst_141 = arith.constant 1.600000e+02 : f32
    %696 = arith.divf %690, %cst_141 : f32
    %cst_142 = arith.constant 1.600000e+02 : f32
    %697 = arith.divf %695, %cst_142 : f32
    %698 = arith.mulf %696, %696 : f32
    %699 = arith.subf %697, %698 : f32
    %cst_143 = arith.constant 0.000000e+00 : f32
    %700 = arith.maximumf %699, %cst_143 : f32
    %cst_144 = arith.constant 9.99999993E-9 : f32
    %701 = arith.addf %700, %cst_144 : f32
    %702 = math.rsqrt %701 : f32
    %703 = vector.broadcast %702 : f32 to vector<32x1xf32>
    %704 = arith.mulf %658, %703 : vector<32x1xf32>
    %705 = vector.broadcast %696 : f32 to vector<32x1xf32>
    %706 = arith.mulf %705, %704 : vector<32x1xf32>
    %707 = arith.subf %659, %706 : vector<32x1xf32>
    %708 = vector.broadcast %704 : vector<32x1xf32> to vector<32x5xf32>
    %709 = arith.mulf %686, %708 : vector<32x5xf32>
    %710 = vector.broadcast %707 : vector<32x1xf32> to vector<32x5xf32>
    %711 = arith.addf %709, %710 : vector<32x5xf32>
    %712 = tpu.concatenate %685, %711 in 1 : vector<32x5xf32>, vector<32x5xf32> -> vector<32x10xf32>
    %c0_145 = arith.constant 0 : index
    %c0_146 = arith.constant 0 : index
    %713 = vector.load %arg14[%c0_145, %c0_146] : memref<2x10xf32, #tpu.memory_space<vmem>>, vector<2x10xf32>
    %cst_147 = arith.constant dense<0.000000e+00> : vector<32x10xf32>
    %714 = tpu.matmul %404, %713, %cst_147 {dimension_numbers = #tpu.dot_dimension_numbers<[1], [0], [0], [1], [0, 0, 1, 1], [], []>} : vector<32x2xf32>, vector<2x10xf32>, vector<32x10xf32> -> vector<32x10xf32>
    %715 = tpu.concatenate %712, %323, %714 in 0 : vector<32x10xf32>, vector<32x10xf32>, vector<32x10xf32> -> vector<96x10xf32>
    %716 = vector.extract_strided_slice %2 {offsets = [0, 160], sizes = [32, 96], strides = [1, 1]} : vector<32x448xf32> to vector<32x96xf32>
    %cst_148 = arith.constant dense<0.000000e+00> : vector<32x10xf32>
    %717 = tpu.matmul %716, %715, %cst_148 {dimension_numbers = #tpu.dot_dimension_numbers<[1], [0], [0], [1], [0, 0, 1, 1], [], []>} : vector<32x96xf32>, vector<96x10xf32>, vector<32x10xf32> -> vector<32x10xf32>
    %718 = vector.extract_strided_slice %1 {offsets = [0, 30], sizes = [32, 1], strides = [1, 1]} : vector<32x74xf32> to vector<32x1xf32>
    %719 = vector.broadcast %718 : vector<32x1xf32> to vector<32x10xf32>
    %720 = arith.addf %717, %719 : vector<32x10xf32>
    %721 = vector.extract_strided_slice %1 {offsets = [0, 31], sizes = [32, 1], strides = [1, 1]} : vector<32x74xf32> to vector<32x1xf32>
    %722 = vector.extract_strided_slice %1 {offsets = [0, 32], sizes = [32, 1], strides = [1, 1]} : vector<32x74xf32> to vector<32x1xf32>
    %723 = vector.extract_strided_slice %720 {offsets = [0, 0], sizes = [32, 5], strides = [1, 1]} : vector<32x10xf32> to vector<32x5xf32>
    %724 = vector.shape_cast %723 : vector<32x5xf32> to vector<1x32x5xf32>
    %cst_149 = arith.constant dense<0.000000e+00> : vector<1xf32>
    %725 = vector.multi_reduction <add>, %724, %cst_149 [1, 2] : vector<1x32x5xf32> to vector<1xf32>
    %726 = vector.shape_cast %725 : vector<1xf32> to vector<1x1x1xf32>
    %727 = vector.extract %726[0, 0, 0] : f32 from vector<1x1x1xf32>
    %728 = arith.mulf %723, %723 : vector<32x5xf32>
    %729 = vector.shape_cast %728 : vector<32x5xf32> to vector<1x32x5xf32>
    %cst_150 = arith.constant dense<0.000000e+00> : vector<1xf32>
    %730 = vector.multi_reduction <add>, %729, %cst_150 [1, 2] : vector<1x32x5xf32> to vector<1xf32>
    %731 = vector.shape_cast %730 : vector<1xf32> to vector<1x1x1xf32>
    %732 = vector.extract %731[0, 0, 0] : f32 from vector<1x1x1xf32>
    %cst_151 = arith.constant 1.600000e+02 : f32
    %733 = arith.divf %727, %cst_151 : f32
    %cst_152 = arith.constant 1.600000e+02 : f32
    %734 = arith.divf %732, %cst_152 : f32
    %735 = arith.mulf %733, %733 : f32
    %736 = arith.subf %734, %735 : f32
    %cst_153 = arith.constant 0.000000e+00 : f32
    %737 = arith.maximumf %736, %cst_153 : f32
    %cst_154 = arith.constant 9.99999993E-9 : f32
    %738 = arith.addf %737, %cst_154 : f32
    %739 = math.rsqrt %738 : f32
    %740 = vector.broadcast %739 : f32 to vector<32x1xf32>
    %741 = arith.mulf %721, %740 : vector<32x1xf32>
    %742 = vector.broadcast %733 : f32 to vector<32x1xf32>
    %743 = arith.mulf %742, %741 : vector<32x1xf32>
    %744 = arith.subf %722, %743 : vector<32x1xf32>
    %745 = vector.broadcast %741 : vector<32x1xf32> to vector<32x5xf32>
    %746 = arith.mulf %723, %745 : vector<32x5xf32>
    %747 = vector.broadcast %744 : vector<32x1xf32> to vector<32x5xf32>
    %748 = arith.addf %746, %747 : vector<32x5xf32>
    %749 = vector.extract_strided_slice %720 {offsets = [0, 5], sizes = [32, 5], strides = [1, 1]} : vector<32x10xf32> to vector<32x5xf32>
    %750 = vector.shape_cast %749 : vector<32x5xf32> to vector<1x32x5xf32>
    %cst_155 = arith.constant dense<0.000000e+00> : vector<1xf32>
    %751 = vector.multi_reduction <add>, %750, %cst_155 [1, 2] : vector<1x32x5xf32> to vector<1xf32>
    %752 = vector.shape_cast %751 : vector<1xf32> to vector<1x1x1xf32>
    %753 = vector.extract %752[0, 0, 0] : f32 from vector<1x1x1xf32>
    %754 = arith.mulf %749, %749 : vector<32x5xf32>
    %755 = vector.shape_cast %754 : vector<32x5xf32> to vector<1x32x5xf32>
    %cst_156 = arith.constant dense<0.000000e+00> : vector<1xf32>
    %756 = vector.multi_reduction <add>, %755, %cst_156 [1, 2] : vector<1x32x5xf32> to vector<1xf32>
    %757 = vector.shape_cast %756 : vector<1xf32> to vector<1x1x1xf32>
    %758 = vector.extract %757[0, 0, 0] : f32 from vector<1x1x1xf32>
    %cst_157 = arith.constant 1.600000e+02 : f32
    %759 = arith.divf %753, %cst_157 : f32
    %cst_158 = arith.constant 1.600000e+02 : f32
    %760 = arith.divf %758, %cst_158 : f32
    %761 = arith.mulf %759, %759 : f32
    %762 = arith.subf %760, %761 : f32
    %cst_159 = arith.constant 0.000000e+00 : f32
    %763 = arith.maximumf %762, %cst_159 : f32
    %cst_160 = arith.constant 9.99999993E-9 : f32
    %764 = arith.addf %763, %cst_160 : f32
    %765 = math.rsqrt %764 : f32
    %766 = vector.broadcast %765 : f32 to vector<32x1xf32>
    %767 = arith.mulf %721, %766 : vector<32x1xf32>
    %768 = vector.broadcast %759 : f32 to vector<32x1xf32>
    %769 = arith.mulf %768, %767 : vector<32x1xf32>
    %770 = arith.subf %722, %769 : vector<32x1xf32>
    %771 = vector.broadcast %767 : vector<32x1xf32> to vector<32x5xf32>
    %772 = arith.mulf %749, %771 : vector<32x5xf32>
    %773 = vector.broadcast %770 : vector<32x1xf32> to vector<32x5xf32>
    %774 = arith.addf %772, %773 : vector<32x5xf32>
    %775 = tpu.concatenate %748, %774 in 1 : vector<32x5xf32>, vector<32x5xf32> -> vector<32x10xf32>
    %c3 = arith.constant 3 : index
    %776 = memref.load %arg7[%c3] : memref<6xf32, #tpu.memory_space<smem>>
    %cst_161 = arith.constant 0.000000e+00 : f32
    %777 = vector.broadcast %cst_161 : f32 to vector<32x10xf32>
    %778 = arith.cmpf ogt, %775, %777 : vector<32x10xf32>
    %779 = vector.broadcast %776 : f32 to vector<32x10xf32>
    %780 = arith.mulf %779, %775 : vector<32x10xf32>
    %781 = arith.select %778, %775, %780 : vector<32x10xi1>, vector<32x10xf32>
    %c0_162 = arith.constant 0 : index
    %c0_163 = arith.constant 0 : index
    %782 = vector.load %arg11[%c0_162, %c0_163] : memref<10x10xf32, #tpu.memory_space<vmem>>, vector<10x10xf32>
    %cst_164 = arith.constant dense<0.000000e+00> : vector<32x10xf32>
    %783 = tpu.matmul %323, %782, %cst_164 {dimension_numbers = #tpu.dot_dimension_numbers<[1], [0], [0], [1], [0, 0, 1, 1], [], []>} : vector<32x10xf32>, vector<10x10xf32>, vector<32x10xf32> -> vector<32x10xf32>
    %784 = vector.extract_strided_slice %1 {offsets = [0, 69], sizes = [32, 5], strides = [1, 1]} : vector<32x74xf32> to vector<32x5xf32>
    %785 = vector.extract_strided_slice %784 {offsets = [0, 0], sizes = [32, 1], strides = [1, 1]} : vector<32x5xf32> to vector<32x1xf32>
    %786 = vector.extract_strided_slice %783 {offsets = [0, 0], sizes = [32, 2], strides = [1, 1]} : vector<32x10xf32> to vector<32x2xf32>
    %787 = vector.broadcast %785 : vector<32x1xf32> to vector<32x2xf32>
    %788 = arith.mulf %787, %786 : vector<32x2xf32>
    %789 = vector.extract_strided_slice %784 {offsets = [0, 1], sizes = [32, 1], strides = [1, 1]} : vector<32x5xf32> to vector<32x1xf32>
    %790 = vector.extract_strided_slice %783 {offsets = [0, 2], sizes = [32, 2], strides = [1, 1]} : vector<32x10xf32> to vector<32x2xf32>
    %791 = vector.broadcast %789 : vector<32x1xf32> to vector<32x2xf32>
    %792 = arith.mulf %791, %790 : vector<32x2xf32>
    %793 = arith.addf %788, %792 : vector<32x2xf32>
    %794 = vector.extract_strided_slice %784 {offsets = [0, 2], sizes = [32, 1], strides = [1, 1]} : vector<32x5xf32> to vector<32x1xf32>
    %795 = vector.extract_strided_slice %783 {offsets = [0, 4], sizes = [32, 2], strides = [1, 1]} : vector<32x10xf32> to vector<32x2xf32>
    %796 = vector.broadcast %794 : vector<32x1xf32> to vector<32x2xf32>
    %797 = arith.mulf %796, %795 : vector<32x2xf32>
    %798 = arith.addf %793, %797 : vector<32x2xf32>
    %799 = vector.extract_strided_slice %784 {offsets = [0, 3], sizes = [32, 1], strides = [1, 1]} : vector<32x5xf32> to vector<32x1xf32>
    %800 = vector.extract_strided_slice %783 {offsets = [0, 6], sizes = [32, 2], strides = [1, 1]} : vector<32x10xf32> to vector<32x2xf32>
    %801 = vector.broadcast %799 : vector<32x1xf32> to vector<32x2xf32>
    %802 = arith.mulf %801, %800 : vector<32x2xf32>
    %803 = arith.addf %798, %802 : vector<32x2xf32>
    %804 = vector.extract_strided_slice %784 {offsets = [0, 4], sizes = [32, 1], strides = [1, 1]} : vector<32x5xf32> to vector<32x1xf32>
    %805 = vector.extract_strided_slice %783 {offsets = [0, 8], sizes = [32, 2], strides = [1, 1]} : vector<32x10xf32> to vector<32x2xf32>
    %806 = vector.broadcast %804 : vector<32x1xf32> to vector<32x2xf32>
    %807 = arith.mulf %806, %805 : vector<32x2xf32>
    %808 = arith.addf %803, %807 : vector<32x2xf32>
    %809 = vector.extract_strided_slice %1 {offsets = [0, 21], sizes = [32, 1], strides = [1, 1]} : vector<32x74xf32> to vector<32x1xf32>
    %810 = vector.broadcast %809 : vector<32x1xf32> to vector<32x2xf32>
    %811 = arith.addf %808, %810 : vector<32x2xf32>
    %812 = vector.extract_strided_slice %1 {offsets = [0, 22], sizes = [32, 1], strides = [1, 1]} : vector<32x74xf32> to vector<32x1xf32>
    %813 = vector.extract_strided_slice %1 {offsets = [0, 23], sizes = [32, 1], strides = [1, 1]} : vector<32x74xf32> to vector<32x1xf32>
    %814 = vector.extract_strided_slice %811 {offsets = [0, 0], sizes = [32, 1], strides = [1, 1]} : vector<32x2xf32> to vector<32x1xf32>
    %815 = vector.shape_cast %814 : vector<32x1xf32> to vector<1x32x1xf32>
    %cst_165 = arith.constant dense<0.000000e+00> : vector<1xf32>
    %816 = vector.multi_reduction <add>, %815, %cst_165 [1, 2] : vector<1x32x1xf32> to vector<1xf32>
    %817 = vector.shape_cast %816 : vector<1xf32> to vector<1x1x1xf32>
    %818 = vector.extract %817[0, 0, 0] : f32 from vector<1x1x1xf32>
    %819 = arith.mulf %814, %814 : vector<32x1xf32>
    %820 = vector.shape_cast %819 : vector<32x1xf32> to vector<1x32x1xf32>
    %cst_166 = arith.constant dense<0.000000e+00> : vector<1xf32>
    %821 = vector.multi_reduction <add>, %820, %cst_166 [1, 2] : vector<1x32x1xf32> to vector<1xf32>
    %822 = vector.shape_cast %821 : vector<1xf32> to vector<1x1x1xf32>
    %823 = vector.extract %822[0, 0, 0] : f32 from vector<1x1x1xf32>
    %cst_167 = arith.constant 3.200000e+01 : f32
    %824 = arith.divf %818, %cst_167 : f32
    %cst_168 = arith.constant 3.200000e+01 : f32
    %825 = arith.divf %823, %cst_168 : f32
    %826 = arith.mulf %824, %824 : f32
    %827 = arith.subf %825, %826 : f32
    %cst_169 = arith.constant 0.000000e+00 : f32
    %828 = arith.maximumf %827, %cst_169 : f32
    %cst_170 = arith.constant 9.99999993E-9 : f32
    %829 = arith.addf %828, %cst_170 : f32
    %830 = math.rsqrt %829 : f32
    %831 = vector.broadcast %830 : f32 to vector<32x1xf32>
    %832 = arith.mulf %812, %831 : vector<32x1xf32>
    %833 = vector.broadcast %824 : f32 to vector<32x1xf32>
    %834 = arith.mulf %833, %832 : vector<32x1xf32>
    %835 = arith.subf %813, %834 : vector<32x1xf32>
    %836 = arith.mulf %814, %832 : vector<32x1xf32>
    %837 = arith.addf %836, %835 : vector<32x1xf32>
    %838 = vector.extract_strided_slice %811 {offsets = [0, 1], sizes = [32, 1], strides = [1, 1]} : vector<32x2xf32> to vector<32x1xf32>
    %839 = vector.shape_cast %838 : vector<32x1xf32> to vector<1x32x1xf32>
    %cst_171 = arith.constant dense<0.000000e+00> : vector<1xf32>
    %840 = vector.multi_reduction <add>, %839, %cst_171 [1, 2] : vector<1x32x1xf32> to vector<1xf32>
    %841 = vector.shape_cast %840 : vector<1xf32> to vector<1x1x1xf32>
    %842 = vector.extract %841[0, 0, 0] : f32 from vector<1x1x1xf32>
    %843 = arith.mulf %838, %838 : vector<32x1xf32>
    %844 = vector.shape_cast %843 : vector<32x1xf32> to vector<1x32x1xf32>
    %cst_172 = arith.constant dense<0.000000e+00> : vector<1xf32>
    %845 = vector.multi_reduction <add>, %844, %cst_172 [1, 2] : vector<1x32x1xf32> to vector<1xf32>
    %846 = vector.shape_cast %845 : vector<1xf32> to vector<1x1x1xf32>
    %847 = vector.extract %846[0, 0, 0] : f32 from vector<1x1x1xf32>
    %cst_173 = arith.constant 3.200000e+01 : f32
    %848 = arith.divf %842, %cst_173 : f32
    %cst_174 = arith.constant 3.200000e+01 : f32
    %849 = arith.divf %847, %cst_174 : f32
    %850 = arith.mulf %848, %848 : f32
    %851 = arith.subf %849, %850 : f32
    %cst_175 = arith.constant 0.000000e+00 : f32
    %852 = arith.maximumf %851, %cst_175 : f32
    %cst_176 = arith.constant 9.99999993E-9 : f32
    %853 = arith.addf %852, %cst_176 : f32
    %854 = math.rsqrt %853 : f32
    %855 = vector.broadcast %854 : f32 to vector<32x1xf32>
    %856 = arith.mulf %812, %855 : vector<32x1xf32>
    %857 = vector.broadcast %848 : f32 to vector<32x1xf32>
    %858 = arith.mulf %857, %856 : vector<32x1xf32>
    %859 = arith.subf %813, %858 : vector<32x1xf32>
    %860 = arith.mulf %838, %856 : vector<32x1xf32>
    %861 = arith.addf %860, %859 : vector<32x1xf32>
    %862 = tpu.concatenate %837, %861 in 1 : vector<32x1xf32>, vector<32x1xf32> -> vector<32x2xf32>
    %863 = tpu.concatenate %862, %404 in 0 : vector<32x2xf32>, vector<32x2xf32> -> vector<64x2xf32>
    %864 = vector.extract_strided_slice %2 {offsets = [0, 256], sizes = [32, 64], strides = [1, 1]} : vector<32x448xf32> to vector<32x64xf32>
    %cst_177 = arith.constant dense<0.000000e+00> : vector<32x2xf32>
    %865 = tpu.matmul %864, %863, %cst_177 {dimension_numbers = #tpu.dot_dimension_numbers<[1], [0], [0], [1], [0, 0, 1, 1], [], []>} : vector<32x64xf32>, vector<64x2xf32>, vector<32x2xf32> -> vector<32x2xf32>
    %866 = vector.extract_strided_slice %1 {offsets = [0, 33], sizes = [32, 1], strides = [1, 1]} : vector<32x74xf32> to vector<32x1xf32>
    %867 = vector.broadcast %866 : vector<32x1xf32> to vector<32x2xf32>
    %868 = arith.addf %865, %867 : vector<32x2xf32>
    %869 = vector.extract_strided_slice %1 {offsets = [0, 34], sizes = [32, 1], strides = [1, 1]} : vector<32x74xf32> to vector<32x1xf32>
    %870 = vector.extract_strided_slice %1 {offsets = [0, 35], sizes = [32, 1], strides = [1, 1]} : vector<32x74xf32> to vector<32x1xf32>
    %871 = vector.extract_strided_slice %868 {offsets = [0, 0], sizes = [32, 1], strides = [1, 1]} : vector<32x2xf32> to vector<32x1xf32>
    %872 = vector.shape_cast %871 : vector<32x1xf32> to vector<1x32x1xf32>
    %cst_178 = arith.constant dense<0.000000e+00> : vector<1xf32>
    %873 = vector.multi_reduction <add>, %872, %cst_178 [1, 2] : vector<1x32x1xf32> to vector<1xf32>
    %874 = vector.shape_cast %873 : vector<1xf32> to vector<1x1x1xf32>
    %875 = vector.extract %874[0, 0, 0] : f32 from vector<1x1x1xf32>
    %876 = arith.mulf %871, %871 : vector<32x1xf32>
    %877 = vector.shape_cast %876 : vector<32x1xf32> to vector<1x32x1xf32>
    %cst_179 = arith.constant dense<0.000000e+00> : vector<1xf32>
    %878 = vector.multi_reduction <add>, %877, %cst_179 [1, 2] : vector<1x32x1xf32> to vector<1xf32>
    %879 = vector.shape_cast %878 : vector<1xf32> to vector<1x1x1xf32>
    %880 = vector.extract %879[0, 0, 0] : f32 from vector<1x1x1xf32>
    %cst_180 = arith.constant 3.200000e+01 : f32
    %881 = arith.divf %875, %cst_180 : f32
    %cst_181 = arith.constant 3.200000e+01 : f32
    %882 = arith.divf %880, %cst_181 : f32
    %883 = arith.mulf %881, %881 : f32
    %884 = arith.subf %882, %883 : f32
    %cst_182 = arith.constant 0.000000e+00 : f32
    %885 = arith.maximumf %884, %cst_182 : f32
    %cst_183 = arith.constant 9.99999993E-9 : f32
    %886 = arith.addf %885, %cst_183 : f32
    %887 = math.rsqrt %886 : f32
    %888 = vector.broadcast %887 : f32 to vector<32x1xf32>
    %889 = arith.mulf %869, %888 : vector<32x1xf32>
    %890 = vector.broadcast %881 : f32 to vector<32x1xf32>
    %891 = arith.mulf %890, %889 : vector<32x1xf32>
    %892 = arith.subf %870, %891 : vector<32x1xf32>
    %893 = arith.mulf %871, %889 : vector<32x1xf32>
    %894 = arith.addf %893, %892 : vector<32x1xf32>
    %895 = vector.extract_strided_slice %868 {offsets = [0, 1], sizes = [32, 1], strides = [1, 1]} : vector<32x2xf32> to vector<32x1xf32>
    %896 = vector.shape_cast %895 : vector<32x1xf32> to vector<1x32x1xf32>
    %cst_184 = arith.constant dense<0.000000e+00> : vector<1xf32>
    %897 = vector.multi_reduction <add>, %896, %cst_184 [1, 2] : vector<1x32x1xf32> to vector<1xf32>
    %898 = vector.shape_cast %897 : vector<1xf32> to vector<1x1x1xf32>
    %899 = vector.extract %898[0, 0, 0] : f32 from vector<1x1x1xf32>
    %900 = arith.mulf %895, %895 : vector<32x1xf32>
    %901 = vector.shape_cast %900 : vector<32x1xf32> to vector<1x32x1xf32>
    %cst_185 = arith.constant dense<0.000000e+00> : vector<1xf32>
    %902 = vector.multi_reduction <add>, %901, %cst_185 [1, 2] : vector<1x32x1xf32> to vector<1xf32>
    %903 = vector.shape_cast %902 : vector<1xf32> to vector<1x1x1xf32>
    %904 = vector.extract %903[0, 0, 0] : f32 from vector<1x1x1xf32>
    %cst_186 = arith.constant 3.200000e+01 : f32
    %905 = arith.divf %899, %cst_186 : f32
    %cst_187 = arith.constant 3.200000e+01 : f32
    %906 = arith.divf %904, %cst_187 : f32
    %907 = arith.mulf %905, %905 : f32
    %908 = arith.subf %906, %907 : f32
    %cst_188 = arith.constant 0.000000e+00 : f32
    %909 = arith.maximumf %908, %cst_188 : f32
    %cst_189 = arith.constant 9.99999993E-9 : f32
    %910 = arith.addf %909, %cst_189 : f32
    %911 = math.rsqrt %910 : f32
    %912 = vector.broadcast %911 : f32 to vector<32x1xf32>
    %913 = arith.mulf %869, %912 : vector<32x1xf32>
    %914 = vector.broadcast %905 : f32 to vector<32x1xf32>
    %915 = arith.mulf %914, %913 : vector<32x1xf32>
    %916 = arith.subf %870, %915 : vector<32x1xf32>
    %917 = arith.mulf %895, %913 : vector<32x1xf32>
    %918 = arith.addf %917, %916 : vector<32x1xf32>
    %919 = tpu.concatenate %894, %918 in 1 : vector<32x1xf32>, vector<32x1xf32> -> vector<32x2xf32>
    %c4 = arith.constant 4 : index
    %920 = memref.load %arg7[%c4] : memref<6xf32, #tpu.memory_space<smem>>
    %cst_190 = arith.constant 0.000000e+00 : f32
    %921 = vector.broadcast %cst_190 : f32 to vector<32x2xf32>
    %922 = arith.cmpf ogt, %919, %921 : vector<32x2xf32>
    %923 = vector.broadcast %920 : f32 to vector<32x2xf32>
    %924 = arith.mulf %923, %919 : vector<32x2xf32>
    %925 = arith.select %922, %919, %924 : vector<32x2xi1>, vector<32x2xf32>
    %c0_191 = arith.constant 0 : index
    %c0_192 = arith.constant 0 : index
    %926 = vector.load %arg12[%c0_191, %c0_192] : memref<28x64xf32, #tpu.memory_space<vmem>>, vector<28x64xf32>
    %cst_193 = arith.constant dense<0.000000e+00> : vector<32x64xf32>
    %927 = tpu.matmul %627, %926, %cst_193 {dimension_numbers = #tpu.dot_dimension_numbers<[1], [0], [0], [1], [0, 0, 1, 1], [], []>} : vector<32x28xf32>, vector<28x64xf32>, vector<32x64xf32> -> vector<32x64xf32>
    %c0_194 = arith.constant 0 : index
    %c0_195 = arith.constant 0 : index
    %928 = vector.load %arg15[%c0_194, %c0_195] : memref<10x64xf32, #tpu.memory_space<vmem>>, vector<10x64xf32>
    %cst_196 = arith.constant dense<0.000000e+00> : vector<32x64xf32>
    %929 = tpu.matmul %781, %928, %cst_196 {dimension_numbers = #tpu.dot_dimension_numbers<[1], [0], [0], [1], [0, 0, 1, 1], [], []>} : vector<32x10xf32>, vector<10x64xf32>, vector<32x64xf32> -> vector<32x64xf32>
    %c0_197 = arith.constant 0 : index
    %c0_198 = arith.constant 0 : index
    %930 = vector.load %arg16[%c0_197, %c0_198] : memref<2x64xf32, #tpu.memory_space<vmem>>, vector<2x64xf32>
    %cst_199 = arith.constant dense<0.000000e+00> : vector<32x64xf32>
    %931 = tpu.matmul %925, %930, %cst_199 {dimension_numbers = #tpu.dot_dimension_numbers<[1], [0], [0], [1], [0, 0, 1, 1], [], []>} : vector<32x2xf32>, vector<2x64xf32>, vector<32x64xf32> -> vector<32x64xf32>
    %932 = tpu.concatenate %473, %927, %929, %931 in 0 : vector<32x64xf32>, vector<32x64xf32>, vector<32x64xf32>, vector<32x64xf32> -> vector<128x64xf32>
    %933 = vector.extract_strided_slice %2 {offsets = [0, 320], sizes = [32, 128], strides = [1, 1]} : vector<32x448xf32> to vector<32x128xf32>
    %cst_200 = arith.constant dense<0.000000e+00> : vector<32x64xf32>
    %934 = tpu.matmul %933, %932, %cst_200 {dimension_numbers = #tpu.dot_dimension_numbers<[1], [0], [0], [1], [0, 0, 1, 1], [], []>} : vector<32x128xf32>, vector<128x64xf32>, vector<32x64xf32> -> vector<32x64xf32>
    %935 = vector.extract_strided_slice %1 {offsets = [0, 36], sizes = [32, 1], strides = [1, 1]} : vector<32x74xf32> to vector<32x1xf32>
    %936 = vector.broadcast %935 : vector<32x1xf32> to vector<32x64xf32>
    %937 = arith.addf %934, %936 : vector<32x64xf32>
    %938 = vector.extract_strided_slice %1 {offsets = [0, 37], sizes = [32, 1], strides = [1, 1]} : vector<32x74xf32> to vector<32x1xf32>
    %939 = vector.extract_strided_slice %1 {offsets = [0, 38], sizes = [32, 1], strides = [1, 1]} : vector<32x74xf32> to vector<32x1xf32>
    %940 = vector.extract_strided_slice %937 {offsets = [0, 0], sizes = [32, 32], strides = [1, 1]} : vector<32x64xf32> to vector<32x32xf32>
    %941 = vector.shape_cast %940 : vector<32x32xf32> to vector<1x32x32xf32>
    %cst_201 = arith.constant dense<0.000000e+00> : vector<1xf32>
    %942 = vector.multi_reduction <add>, %941, %cst_201 [1, 2] : vector<1x32x32xf32> to vector<1xf32>
    %943 = vector.shape_cast %942 : vector<1xf32> to vector<1x1x1xf32>
    %944 = vector.extract %943[0, 0, 0] : f32 from vector<1x1x1xf32>
    %945 = arith.mulf %940, %940 : vector<32x32xf32>
    %946 = vector.shape_cast %945 : vector<32x32xf32> to vector<1x32x32xf32>
    %cst_202 = arith.constant dense<0.000000e+00> : vector<1xf32>
    %947 = vector.multi_reduction <add>, %946, %cst_202 [1, 2] : vector<1x32x32xf32> to vector<1xf32>
    %948 = vector.shape_cast %947 : vector<1xf32> to vector<1x1x1xf32>
    %949 = vector.extract %948[0, 0, 0] : f32 from vector<1x1x1xf32>
    %cst_203 = arith.constant 1.024000e+03 : f32
    %950 = arith.divf %944, %cst_203 : f32
    %cst_204 = arith.constant 1.024000e+03 : f32
    %951 = arith.divf %949, %cst_204 : f32
    %952 = arith.mulf %950, %950 : f32
    %953 = arith.subf %951, %952 : f32
    %cst_205 = arith.constant 0.000000e+00 : f32
    %954 = arith.maximumf %953, %cst_205 : f32
    %cst_206 = arith.constant 9.99999993E-9 : f32
    %955 = arith.addf %954, %cst_206 : f32
    %956 = math.rsqrt %955 : f32
    %957 = vector.broadcast %956 : f32 to vector<32x1xf32>
    %958 = arith.mulf %938, %957 : vector<32x1xf32>
    %959 = vector.broadcast %950 : f32 to vector<32x1xf32>
    %960 = arith.mulf %959, %958 : vector<32x1xf32>
    %961 = arith.subf %939, %960 : vector<32x1xf32>
    %962 = vector.broadcast %958 : vector<32x1xf32> to vector<32x32xf32>
    %963 = arith.mulf %940, %962 : vector<32x32xf32>
    %964 = vector.broadcast %961 : vector<32x1xf32> to vector<32x32xf32>
    %965 = arith.addf %963, %964 : vector<32x32xf32>
    %966 = vector.extract_strided_slice %937 {offsets = [0, 32], sizes = [32, 32], strides = [1, 1]} : vector<32x64xf32> to vector<32x32xf32>
    %967 = vector.shape_cast %966 : vector<32x32xf32> to vector<1x32x32xf32>
    %cst_207 = arith.constant dense<0.000000e+00> : vector<1xf32>
    %968 = vector.multi_reduction <add>, %967, %cst_207 [1, 2] : vector<1x32x32xf32> to vector<1xf32>
    %969 = vector.shape_cast %968 : vector<1xf32> to vector<1x1x1xf32>
    %970 = vector.extract %969[0, 0, 0] : f32 from vector<1x1x1xf32>
    %971 = arith.mulf %966, %966 : vector<32x32xf32>
    %972 = vector.shape_cast %971 : vector<32x32xf32> to vector<1x32x32xf32>
    %cst_208 = arith.constant dense<0.000000e+00> : vector<1xf32>
    %973 = vector.multi_reduction <add>, %972, %cst_208 [1, 2] : vector<1x32x32xf32> to vector<1xf32>
    %974 = vector.shape_cast %973 : vector<1xf32> to vector<1x1x1xf32>
    %975 = vector.extract %974[0, 0, 0] : f32 from vector<1x1x1xf32>
    %cst_209 = arith.constant 1.024000e+03 : f32
    %976 = arith.divf %970, %cst_209 : f32
    %cst_210 = arith.constant 1.024000e+03 : f32
    %977 = arith.divf %975, %cst_210 : f32
    %978 = arith.mulf %976, %976 : f32
    %979 = arith.subf %977, %978 : f32
    %cst_211 = arith.constant 0.000000e+00 : f32
    %980 = arith.maximumf %979, %cst_211 : f32
    %cst_212 = arith.constant 9.99999993E-9 : f32
    %981 = arith.addf %980, %cst_212 : f32
    %982 = math.rsqrt %981 : f32
    %983 = vector.broadcast %982 : f32 to vector<32x1xf32>
    %984 = arith.mulf %938, %983 : vector<32x1xf32>
    %985 = vector.broadcast %976 : f32 to vector<32x1xf32>
    %986 = arith.mulf %985, %984 : vector<32x1xf32>
    %987 = arith.subf %939, %986 : vector<32x1xf32>
    %988 = vector.broadcast %984 : vector<32x1xf32> to vector<32x32xf32>
    %989 = arith.mulf %966, %988 : vector<32x32xf32>
    %990 = vector.broadcast %987 : vector<32x1xf32> to vector<32x32xf32>
    %991 = arith.addf %989, %990 : vector<32x32xf32>
    %992 = tpu.concatenate %965, %991 in 1 : vector<32x32xf32>, vector<32x32xf32> -> vector<32x64xf32>
    %c5 = arith.constant 5 : index
    %993 = memref.load %arg7[%c5] : memref<6xf32, #tpu.memory_space<smem>>
    %cst_213 = arith.constant 0.000000e+00 : f32
    %994 = vector.broadcast %cst_213 : f32 to vector<32x64xf32>
    %995 = arith.cmpf ogt, %992, %994 : vector<32x64xf32>
    %996 = vector.broadcast %993 : f32 to vector<32x64xf32>
    %997 = arith.mulf %996, %992 : vector<32x64xf32>
    %998 = arith.select %995, %992, %997 : vector<32x64xi1>, vector<32x64xf32>
    %c0_214 = arith.constant 0 : index
    %c0_215 = arith.constant 0 : index
    %999 = vector.load %arg4[%c0_214, %c0_215] : memref<16x32xf32, #tpu.memory_space<vmem>>, vector<16x32xf32>
    %cst_216 = arith.constant dense<0.000000e+00> : vector<16x64xf32>
    %1000 = tpu.matmul %999, %998, %cst_216 {dimension_numbers = #tpu.dot_dimension_numbers<[1], [0], [0], [1], [0, 0, 1, 1], [], []>} : vector<16x32xf32>, vector<32x64xf32>, vector<16x64xf32> -> vector<16x64xf32>
    %c0_217 = arith.constant 0 : index
    %c0_218 = arith.constant 0 : index
    %1001 = vector.load %arg5[%c0_217, %c0_218] : memref<16x1xf32, #tpu.memory_space<vmem>>, vector<16x1xf32>
    %1002 = vector.broadcast %1001 : vector<16x1xf32> to vector<16x64xf32>
    %1003 = arith.addf %1000, %1002 : vector<16x64xf32>
    %1004 = arith.addf %1003, %0 : vector<16x64xf32>
    %c0_219 = arith.constant 0 : index
    %c0_220 = arith.constant 0 : index
    %1005 = vector.load %arg17[%c0_219, %c0_220] : memref<16x64xf32, #tpu.memory_space<vmem>>, vector<16x64xf32>
    tpu.vector_store %arg17[%c0_219, %c0_220], %1004 {strides = array<i32>} : memref<16x64xf32, #tpu.memory_space<vmem>>, vector<16x64xf32>,
    return
  }
  func.func @transform_0(%arg0: i32) -> (i32, i32) {
    %c0_i32 = arith.constant 0 : i32
    %c0_i32_0 = arith.constant 0 : i32
    %c0_i32_1 = arith.constant 0 : i32
    return %c0_i32, %c0_i32_0 : i32, i32
  }
  func.func @transform_1(%arg0: i32) -> (i32, i32) {
    %c0_i32 = arith.constant 0 : i32
    %c0_i32_0 = arith.constant 0 : i32
    %c0_i32_1 = arith.constant 0 : i32
    return %c0_i32, %c0_i32_0 : i32, i32
  }
  func.func @transform_2(%arg0: i32) -> (i32, i32) {
    %c0_i32 = arith.constant 0 : i32
    %c0_i32_0 = arith.constant 0 : i32
    %c0_i32_1 = arith.constant 0 : i32
    return %c0_i32, %c0_i32_0 : i32, i32
  }
  func.func @transform_3(%arg0: i32) -> (i32, i32) {
    %c0_i32 = arith.constant 0 : i32
    %c0_i32_0 = arith.constant 0 : i32
    %c0_i32_1 = arith.constant 0 : i32
    return %c0_i32, %c0_i32_0 : i32, i32
  }
  func.func @transform_4(%arg0: i32) -> (i32, i32) {
    %c0_i32 = arith.constant 0 : i32
    %c0_i32_0 = arith.constant 0 : i32
    %c0_i32_1 = arith.constant 0 : i32
    return %c0_i32, %c0_i32_0 : i32, i32
  }
  func.func @transform_5(%arg0: i32) -> (i32, i32) {
    %c0_i32 = arith.constant 0 : i32
    %c0_i32_0 = arith.constant 0 : i32
    %c0_i32_1 = arith.constant 0 : i32
    return %c0_i32, %c0_i32_0 : i32, i32
  }
  func.func @transform_6(%arg0: i32) -> i32 {
    %c0_i32 = arith.constant 0 : i32
    %c0_i32_0 = arith.constant 0 : i32
    return %c0_i32 : i32
  }
  func.func @transform_7(%arg0: i32) -> (i32, i32) {
    %c0_i32 = arith.constant 0 : i32
    %c0_i32_0 = arith.constant 0 : i32
    %c0_i32_1 = arith.constant 0 : i32
    return %c0_i32, %c0_i32_0 : i32, i32
  }
  func.func @transform_8(%arg0: i32) -> (i32, i32) {
    %c0_i32 = arith.constant 0 : i32
    %c0_i32_0 = arith.constant 0 : i32
    %c0_i32_1 = arith.constant 0 : i32
    return %c0_i32, %c0_i32_0 : i32, i32
  }
  func.func @transform_9(%arg0: i32) -> (i32, i32) {
    %c0_i32 = arith.constant 0 : i32
    %c0_i32_0 = arith.constant 0 : i32
    %c0_i32_1 = arith.constant 0 : i32
    return %c0_i32, %c0_i32_0 : i32, i32
  }
  func.func @transform_10(%arg0: i32) -> (i32, i32) {
    %c0_i32 = arith.constant 0 : i32
    %c0_i32_0 = arith.constant 0 : i32
    %c0_i32_1 = arith.constant 0 : i32
    return %c0_i32, %c0_i32_0 : i32, i32
  }
  func.func @transform_11(%arg0: i32) -> (i32, i32) {
    %c0_i32 = arith.constant 0 : i32
    %c0_i32_0 = arith.constant 0 : i32
    %c0_i32_1 = arith.constant 0 : i32
    return %c0_i32, %c0_i32_0 : i32, i32
  }
  func.func @transform_12(%arg0: i32) -> (i32, i32) {
    %c0_i32 = arith.constant 0 : i32
    %c0_i32_0 = arith.constant 0 : i32
    %c0_i32_1 = arith.constant 0 : i32
    return %c0_i32, %c0_i32_0 : i32, i32
  }
  func.func @transform_13(%arg0: i32) -> (i32, i32) {
    %c0_i32 = arith.constant 0 : i32
    %c0_i32_0 = arith.constant 0 : i32
    %c0_i32_1 = arith.constant 0 : i32
    return %c0_i32, %c0_i32_0 : i32, i32
  }
  func.func @transform_14(%arg0: i32) -> (i32, i32) {
    %c0_i32 = arith.constant 0 : i32
    %c0_i32_0 = arith.constant 0 : i32
    %c0_i32_1 = arith.constant 0 : i32
    return %c0_i32, %c0_i32_0 : i32, i32
  }
  func.func @transform_15(%arg0: i32) -> (i32, i32) {
    %c0_i32 = arith.constant 0 : i32
    %c0_i32_0 = arith.constant 0 : i32
    %c0_i32_1 = arith.constant 0 : i32
    return %c0_i32, %c0_i32_0 : i32, i32
  }
  func.func @transform_16(%arg0: i32) -> (i32, i32) {
    %c0_i32 = arith.constant 0 : i32
    %c0_i32_0 = arith.constant 0 : i32
    %c0_i32_1 = arith.constant 0 : i32
    return %c0_i32, %c0_i32_0 : i32, i32
  }
}

</mosaic_0001>

<bundles_post_ra>
// kernel: visual_subnetwork_forward.1
= control target key start
LH: loop header
LB: loop body
LE: loop exit
PB: predicated region body
PF: predicated region fallthrough
CT: control target
= control target key end

     0   :  { %s10683_s0 = inlined_call_operand.vmem [shape: f32[16,64], index: 0, kind: input, shape index: {}]   ;;  %s10684_s1 = inlined_call_operand.vmem [shape: f32[32,16], index: 1, kind: input, shape index: {}]   ;;  %s10685_s2 = inlined_call_operand.vmem [shape: f32[32,448], index: 2, kind: input, shape index: {}]   ;;  %s10686_s3 = inlined_call_operand.vmem [shape: f32[16,32], index: 3, kind: input, shape index: {}]   ;;  %s10687_s4 = inlined_call_operand.vmem [shape: f32[16,1], index: 4, kind: input, shape index: {}]   ;;  %s10688_s5 = inlined_call_operand.vmem [shape: f32[32,74], index: 5, kind: input, shape index: {}]   ;;  %s10689_s6 = inlined_call_operand.vmem [shape: f32[6], index: 6, kind: input, shape index: {}]   ;;  %s10690_s7 = inlined_call_operand.vmem [shape: f32[64,320], index: 7, kind: input, shape index: {}]   ;;  %s10691_s8 = inlined_call_operand.vmem [shape: f32[64,140], index: 8, kind: input, shape index: {}]   ;;  %s10692_s9 = inlined_call_operand.vmem [shape: f32[28,50], index: 9, kind: input, shape index: {}]   ;;  %s10693_s10 = inlined_call_operand.vmem [shape: f32[10,10], index: 10, kind: input, shape index: {}]   ;;  %s10694_s11 = inlined_call_operand.vmem [shape: f32[28,64], index: 11, kind: input, shape index: {}]   ;;  %s10695_s12 = inlined_call_operand.vmem [shape: f32[10,28], index: 12, kind: input, shape index: {}]   ;;  %s10696_s13 = inlined_call_operand.vmem [shape: f32[2,10], index: 13, kind: input, shape index: {}]   ;;  %s10697_s14 = inlined_call_operand.vmem [shape: f32[10,64], index: 14, kind: input, shape index: {}]   ;;  %s10698_s15 = inlined_call_operand.vmem [shape: f32[2,64], index: 15, kind: input, shape index: {}]   ;;  %s10699_s16 = inlined_call_operand.vmem [shape: f32[16,64], index: 16, kind: output, shape index: {}]  }
   0x1   :  { %10750 = sst [smem:[#allocation23_spill]] %s10683_s0 }
   0x2   :  { %21 = vsyncpa [#allocation3], 0  ;;  %s39_s23 = sshll.u32 %s10689_s6, 4  ;;  %s7524_s24 = smov [#allocation2]   ;;  %s40_s23 = int_to_ptr.vmem [resolvable:$true] %s39_s23 }
   0x3   :  { %42 = dma.vmem_to_smem %s40_s23, 16, %s7524_s24, [#allocation3]  }
   0x4   :  { %7522 = dma.done.wait [#allocation3], 16  }
   0x5   :  { %7523 = vsyncadd [#allocation3], 4294967280 }
   0x6   :  { %65 = sfence }
   0x7   :  { %s10751_s27 = sld [smem:[#allocation23_spill]]  ;;  %v88_v2 = vld [vmem:[%s10684_s1] sm:$0xff]  ;;  %vm112_vm0 = vcmask 130048   ;;  %v10713_v3 = vmov 0   ;;  %v7732_v5 = vld [vmem:[%s10688_s5 + $0x10] sm:$0xff]  ;;  %v7739_v6 = vld [vmem:[%s10688_s5 + $0x8] sm:$0xff] }
   0x8   :  { %7151 = vset.pattern.permute.xlu0 %v10713_v3  ;;  %v7725_v4 = vld [vmem:[%s10688_s5] sm:$0xff]  ;;  %7152 = vset.pattern.permute.xlu1 %v10713_v3  ;;  %v7744_v7 = vld [vmem:[%s10688_s5 + $0x18] sm:$0xff]  ;;  %v89_v8 = vld [vmem:[%s10684_s1 + $0x8] sm:$0xff]  ;;  %s7526_s0 = smov 96   ;;  %vm154_vm1 = vcmask 261120   ;;  %v7527_v45 = vmov 1024.0  }
   0x9   :  { %94 = vperm.xlu0 %7151, %v7725_v4   ;;  %104 = vperm.xlu1 %7152, %v7732_v5   ;;  %v90_v9 = vld [vmem:[%s10684_s1 + $0x10] sm:$0xff]  ;;  %v91_v10 = vld [vmem:[%s10684_s1 + $0x18] sm:$0xff]  ;;  %7400 = vrcp.f32 %v7527_v45  ;;  %s7528_s22 = smov 0.0   ;;  %s7529_s26 = smov 1   ;;  %vm521_vm10 = vcmask 523264  }
   0xd   :  { %v67_v0 = vld [vmem:[%s10751_s27 + $0x8] sm:$0xff]  ;;  %v66_v1 = vld [vmem:[%s10751_s27] sm:$0xff] }
   0xe   :  { %139 = vmatpush.msra.mxu0 %v67_v0 }
   0xf   :  { %v7401_v49 = vpop.eup %7400 }
  0x10   :  { %140 = vmatpush.msra.mxu0 %v66_v1  ;;  %v192_v56 = vmul.f32 1024.0, %v7401_v49  ;;  %vm196_vm2 = vweird.f32 %v7401_v49 }
  0x11   :  { %6800 = vmatmul.msk.f32.vlgmr.msra.gmra.mxu0 %vm112_vm0, %v88_v2  ;;  %99 = vperm.xlu0 %7151, %v7739_v6  }
  0x12   :  { %109 = vperm.xlu1 %7152, %v7744_v7   ;;  %v193_v63 = vsub.f32 1.0, %v192_v56 }
  0x19   :  { %6801 = vmatmul.msk.f32.gmra.mxu0 %vm112_vm0, %v89_v8 }
  0x21   :  { %6802 = vmatmul.msk.f32.gmra.mxu0 %vm112_vm0, %v90_v9 }
  0x29   :  { %6803 = vmatmul.msk.f32.gmra.mxu0 %vm112_vm0, %v91_v10  ;;  %v194_v10 = vmul.f32 %v7401_v49, %v193_v63 }
  0x7b   :  { %v95_v11 = vpop.permute.xlu0 %94  ;;  %v105_v18 = vpop.permute.xlu1 %104 }
  0x83   :  { %v100_v14 = vpop.permute.xlu0 %99 }
  0x84   :  { %v110_v25 = vpop.permute.xlu1 %109 }
  0x8e   :  { %v142_v12 = vpop.f32.mrf.mxu0 }
  0x8f   :  { %v7760_v13 = vadd.f32 %v142_v12, %v95_v11 }
  0x91   :  { %307 = vrot.lane.b32.xlu0 %v7760_v13, %s7526_s0  ;;  %v171_v17 = vmul.f32 %v7760_v13, %v7760_v13  ;;  %v155_v23 = vsel %vm154_vm1, %v7760_v13, 0.0 }
  0x93   :  { %v175_v35 = vsel %vm154_vm1, %v171_v17, 0.0 }
  0x96   :  { %v145_v15 = vpop.f32.mrf.mxu0 }
  0x97   :  { %v7764_v16 = vadd.f32 %v145_v15, %v100_v14 }
  0x99   :  { %309 = vrot.lane.b32.xlu1 %v7764_v16, %s7526_s0  ;;  %339 = vrot.lane.b32.xlu0 %v171_v17, %s7526_s0  ;;  %v172_v20 = vmul.f32 %v7764_v16, %v7764_v16  ;;  %v156_v22 = vsel %vm154_vm1, %v7764_v16, 0.0  ;;  %v195_v17 = vadd.f32 %v7401_v49, %v194_v10  ;;  %v7530_v10 = vmov 1  }
  0x9a   :  { %v157_v27 = vadd.f32 %v156_v22, %v155_v23  ;;  %7155 = vset.pattern.permute.xlu1 %v7530_v10  ;;  %7154 = vset.pattern.permute.xlu2 %v7530_v10 }
  0x9b   :  { %v176_v33 = vsel %vm154_vm1, %v172_v20, 0.0  ;;  %7153 = vset.pattern.permute.xlu0 %v7530_v10 }
  0x9c   :  { %v177_v37 = vadd.f32 %v176_v33, %v175_v35 }
  0x9e   :  { %v148_v19 = vpop.f32.mrf.mxu0 }
  0x9f   :  { %v7773_v21 = vadd.f32 %v148_v19, %v105_v18 }
  0xa1   :  { %341 = vrot.lane.b32.xlu1 %v172_v20, %s7526_s0  ;;  %v158_v24 = vsel %vm154_vm1, %v7773_v21, 0.0  ;;  %v173_v29 = vmul.f32 %v7773_v21, %v7773_v21 }
  0xa2   :  { %v159_v30 = vadd.f32 %v158_v24, %v157_v27 }
  0xa3   :  { %v178_v36 = vsel %vm154_vm1, %v173_v29, 0.0 }
  0xa4   :  { %v179_v39 = vadd.f32 %v178_v36, %v177_v37 }
  0xa6   :  { %v151_v26 = vpop.f32.mrf.mxu0 }
  0xa7   :  { %v7782_v28 = vadd.f32 %v151_v26, %v110_v25  ;;  %v197_v26 = vsel %vm196_vm2, %v7401_v49, %v195_v17 }
  0xa9   :  { %343 = vrot.lane.b32.xlu1 %v173_v29, %s7526_s0  ;;  %313 = vrot.lane.b32.xlu0 %v7782_v28, %s7526_s0  ;;  %v160_v31 = vsel %vm154_vm1, %v7782_v28, 0.0  ;;  %v174_v34 = vmul.f32 %v7782_v28, %v7782_v28 }
  0xaa   :  { %v161_v32 = vadd.f32 %v160_v31, %v159_v30 }
  0xab   :  { %v180_v38 = vsel %vm154_vm1, %v174_v34, 0.0 }
  0xac   :  { %162 = vadd.xlane.f32.xlu2 %v161_v32  ;;  %v181_v40 = vadd.f32 %v180_v38, %v179_v39 }
  0xb1   :  { %345 = vrot.lane.b32.xlu0 %v174_v34, %s7526_s0 }
  0xb4   :  { %182 = vadd.xlane.f32.xlu2 %v181_v40 }
  0xcc   :  { %311 = vrot.lane.b32.xlu2 %v7773_v21, %s7526_s0 }
 0x103   :  { %v308_v41 = vpop.permute.xlu0 %307 }
 0x104   :  { %v319_v14 = vsel %vm154_vm1, %v308_v41, 0.0 }
 0x10b   :  { %v310_v42 = vpop.permute.xlu1 %309  ;;  %v340_v43 = vpop.permute.xlu0 %339 }
 0x10c   :  { %v351_v51 = vsel %vm154_vm1, %v340_v43, 0.0  ;;  %v320_v11 = vsel %vm154_vm1, %v310_v42, 0.0 }
 0x10d   :  { %v321_v18 = vadd.f32 %v320_v11, %v319_v14 }
 0x113   :  { %v342_v44 = vpop.permute.xlu1 %341 }
 0x114   :  { %v352_v48 = vsel %vm154_vm1, %v342_v44, 0.0 }
 0x115   :  { %v353_v54 = vadd.f32 %v352_v48, %v351_v51 }
 0x11b   :  { %v314_v46 = vpop.permute.xlu0 %313  ;;  %v344_v47 = vpop.permute.xlu1 %343 }
 0x11c   :  { %v354_v52 = vsel %vm154_vm1, %v344_v47, 0.0  ;;  %v324_v24 = vsel %vm154_vm1, %v314_v46, 0.0 }
 0x11d   :  { %v355_v57 = vadd.f32 %v354_v52, %v353_v54 }
 0x11f   :  { %v163_v50 = vpop.xlane.xlu2 %162 }
 0x120   :  { %v164_v53 = vrot.slane %v163_v50, 4 }
 0x122   :  { %v165_v55 = vadd.f32 %v164_v53, %v163_v50 }
 0x123   :  { %v346_v58 = vpop.permute.xlu0 %345 }
 0x124   :  { %v356_v59 = vsel %vm154_vm1, %v346_v58, 0.0  ;;  %v166_v60 = vrot.slane %v165_v55, 2 }
 0x125   :  { %v357_v61 = vadd.f32 %v356_v59, %v355_v57 }
 0x126   :  { %v167_v62 = vadd.f32 %v166_v60, %v165_v55 }
 0x127   :  { %358 = vadd.xlane.f32.xlu2 %v357_v61  ;;  %v183_v0 = vpop.xlane.xlu2 %182 }
 0x128   :  { %v184_v1 = vrot.slane %v183_v0, 4  ;;  %v168_v2 = vrot.slane %v167_v62, 1 }
 0x12a   :  { %v185_v8 = vadd.f32 %v184_v1, %v183_v0  ;;  %v169_v9 = vadd.f32 %v168_v2, %v167_v62 }
 0x12c   :  { %6887 = vpush %v169_v9  ;;  %v186_v12 = vrot.slane %v185_v8, 2 }
 0x12e   :  { %v187_v15 = vadd.f32 %v186_v12, %v185_v8 }
 0x12f   :  { %v312_v19 = vpop.permute.xlu2 %311 }
 0x130   :  { %v322_v20 = vsel %vm154_vm1, %v312_v19, 0.0  ;;  %v188_v22 = vrot.slane %v187_v15, 1 }
 0x131   :  { %v323_v23 = vadd.f32 %v322_v20, %v321_v18 }
 0x132   :  { %v189_v25 = vadd.f32 %v188_v22, %v187_v15 }
 0x133   :  { %v325_v27 = vadd.f32 %v324_v24, %v323_v23  ;;  %v7531_v24 = vmov 2  }
 0x134   :  { %6889 = vpush %v189_v25 }
 0x135   :  { %6891 = vpush %v197_v26  ;;  %326 = vadd.xlane.f32.xlu1 %v325_v27 }
 0x15d   :  { %s6888_s1 = spop %6887 }
 0x165   :  { %s6890_s6 = spop %6889 }
 0x166   :  { %s7808_s17 = spop %6891 }
 0x167   :  { %s7811_s18 = smul.f32 %s7808_s17, %s6888_s1 }
 0x168   :  { %s208_s19 = smul.f32 %s7808_s17, %s6890_s6 }
 0x169   :  { %s209_s20 = smul.f32 %s7811_s18, %s7811_s18  ;;  %v230_v54 = vstv %s7811_s18 }
 0x16b   :  { %s210_s21 = ssub.f32 %s208_s19, %s209_s20 }
 0x16d   :  { %s211_s23 = smax.f32 %s7528_s22, %s210_s21 }
 0x16e   :  { %s212_s24 = sadd.f32 1e-08, %s211_s23  ;;  %s10701_s23 = smov 64  }
 0x170   :  { %v213_v29 = vstv %s212_s24 }
 0x171   :  { %7402 = vrsqrt.f32 %v213_v29  ;;  %vm220_vm4 = vweird.f32 %v213_v29 }
 0x177   :  { %v7403_v30 = vpop.eup %7402 }
 0x178   :  { %v215_v31 = vmul.f32 %v7403_v30, %v213_v29  ;;  %vm221_vm3 = vweird.f32 %v7403_v30 }
 0x179   :  { %vm222_vm5 = vmor %vm220_vm4, %vm221_vm3 }
 0x17a   :  { %v216_v32 = vmul.f32 %v7403_v30, %v215_v31 }
 0x17c   :  { %v217_v33 = vmul.f32 0.5, %v216_v32 }
 0x17e   :  { %v218_v34 = vsub.f32 1.5, %v217_v33 }
 0x180   :  { %v219_v35 = vmul.f32 %v7403_v30, %v218_v34 }
 0x182   :  { %v223_v36 = vsel %vm222_vm5, %v7403_v30, %v219_v35 }
 0x183   :  { %6893 = vpush %v223_v36 }
 0x19a   :  { %v359_v37 = vpop.xlane.xlu2 %358 }
 0x19b   :  { %v360_v38 = vrot.slane %v359_v37, 4 }
 0x19d   :  { %v361_v39 = vadd.f32 %v360_v38, %v359_v37 }
 0x19f   :  { %v362_v41 = vrot.slane %v361_v39, 2 }
 0x1a1   :  { %v363_v44 = vadd.f32 %v362_v41, %v361_v39 }
 0x1a3   :  { %v364_v47 = vrot.slane %v363_v44, 1 }
 0x1a5   :  { %v365_v50 = vadd.f32 %v364_v47, %v363_v44  ;;  %v520_v44 = vld [vmem:[%s10690_s7 + $0xb8] sm:$0xff] }
 0x1a6   :  { %v516_v47 = vld [vmem:[%s10690_s7 + $0x98] sm:$0xff]  ;;  %600 = vmatpush.msra.mxu3 %v520_v44 }
 0x1a8   :  { %v327_v40 = vpop.xlane.xlu1 %326 }
 0x1a9   :  { %v328_v42 = vrot.slane %v327_v40, 4 }
 0x1ab   :  { %v329_v43 = vadd.f32 %v328_v42, %v327_v40  ;;  %v518_v42 = vld [vmem:[%s10690_s7 + $0xa8] sm:$0xff] }
 0x1ac   :  { %542 = vmatpush.msra.mxu1 %v518_v42 }
 0x1ad   :  { %v330_v45 = vrot.slane %v329_v43, 2 }
 0x1af   :  { %v331_v46 = vadd.f32 %v330_v45, %v329_v43  ;;  %v519_v43 = vld [vmem:[%s10690_s7 + $0xb0] sm:$0xff]  ;;  %v7532_v45 = vmov 40  }
 0x1b0   :  { %571 = vmatpush.msra.mxu2 %v519_v43 }
 0x1b1   :  { %v332_v48 = vrot.slane %v331_v46, 1 }
 0x1b2   :  { %572 = vmatpush.msra.mxu2 %v516_v47 }
 0x1b3   :  { %v333_v49 = vadd.f32 %v332_v48, %v331_v46  ;;  %v515_v46 = vld [vmem:[%s10690_s7 + $0x90] sm:$0xff]  ;;  %v517_v48 = vld [vmem:[%s10690_s7 + $0xa0] sm:$0xff] }
 0x1b4   :  { %s6894_s25 = spop %6893  ;;  %543 = vmatpush.msra.mxu1 %v515_v46  ;;  %601 = vmatpush.msra.mxu3 %v517_v48 }
 0x1b5   :  { %v225_v51 = vstv %s6894_s25  ;;  %6895 = vpush %v333_v49  ;;  %v512_v49 = vld [vmem:[%s10690_s7 + $0x78] sm:$0xff] }
 0x1b6   :  { %v7818_v52 = vmul.f32 %v225_v51, %v7725_v4  ;;  %v7821_v53 = vmul.f32 %v225_v51, %v7744_v7  ;;  %6897 = vpush %v365_v50  ;;  %v227_v57 = vmul.f32 %v225_v51, %v7739_v6  ;;  %v7831_v59 = vmul.f32 %v225_v51, %v7732_v5  ;;  %v513_v50 = vld [vmem:[%s10690_s7 + $0x80] sm:$0xff]  ;;  %v514_v51 = vld [vmem:[%s10690_s7 + $0x88] sm:$0xff] }
 0x1b7   :  { %544 = vmatpush.msra.mxu1 %v512_v49  ;;  %573 = vmatpush.msra.mxu2 %v513_v50 }
 0x1b8   :  { %v231_v55 = vmul.f32 %v230_v54, %v7818_v52  ;;  %v234_v56 = vmul.f32 %v230_v54, %v7821_v53  ;;  %v232_v58 = vmul.f32 %v230_v54, %v227_v57  ;;  %v233_v60 = vmul.f32 %v230_v54, %v7831_v59  ;;  %v511_v54 = vld [vmem:[%s10690_s7 + $0x70] sm:$0xff]  ;;  %602 = vmatpush.msra.mxu3 %v514_v51 }
 0x1ba   :  { %239 = vrot.lane.b32.xlu0 %v231_v55, %s7529_s26  ;;  %245 = vrot.lane.b32.xlu1 %v234_v56, %s7529_s26  ;;  %v506_v55 = vld [vmem:[%s10690_s7 + $0x48] sm:$0xff]  ;;  %v507_v56 = vld [vmem:[%s10690_s7 + $0x50] sm:$0xff] }
 0x1bb   :  { %603 = vmatpush.msra.mxu3 %v511_v54 }
 0x1c2   :  { %241 = vrot.lane.b32.xlu0 %v232_v58, %s7529_s26  ;;  %v7533_v58 = vmov 42  }
 0x1ca   :  { %243 = vrot.lane.b32.xlu0 %v233_v60, %s7529_s26  ;;  %v504_v60 = vld [vmem:[%s10690_s7 + $0x38] sm:$0xff] }
 0x1e6   :  { %s6896_s28 = spop %6895 }
 0x1e7   :  { %s375_s29 = smul.f32 %s6896_s28, %s7808_s17  ;;  %s6898_s30 = spop %6897 }
 0x1e8   :  { %s384_s1 = smul.f32 %s6898_s30, %s7808_s17 }
 0x1e9   :  { %s385_s6 = smul.f32 %s375_s29, %s375_s29  ;;  %v406_v18 = vstv %s375_s29 }
 0x1eb   :  { %s386_s18 = ssub.f32 %s384_s1, %s385_s6 }
 0x1ed   :  { %s387_s19 = smax.f32 %s7528_s22, %s386_s18 }
 0x1ee   :  { %s388_s20 = sadd.f32 1e-08, %s387_s19 }
 0x1f0   :  { %v389_v61 = vstv %s388_s20 }
 0x1f1   :  { %7404 = vrsqrt.f32 %v389_v61  ;;  %vm396_vm7 = vweird.f32 %v389_v61 }
 0x1f7   :  { %v7405_v62 = vpop.eup %7404 }
 0x1f8   :  { %v391_v63 = vmul.f32 %v7405_v62, %v389_v61  ;;  %vm397_vm6 = vweird.f32 %v7405_v62  ;;  %v505_v61 = vld [vmem:[%s10690_s7 + $0x40] sm:$0xff] }
 0x1f9   :  { %vm398_vm8 = vmor %vm396_vm7, %vm397_vm6  ;;  %vm1423_vm6 = vcmask 113664  }
 0x1fa   :  { %v392_v0 = vmul.f32 %v7405_v62, %v391_v63  ;;  %v501_v63 = vld [vmem:[%s10690_s7 + $0x20] sm:$0xff] }
 0x1fc   :  { %v393_v1 = vmul.f32 0.5, %v392_v0  ;;  %v502_v0 = vld [vmem:[%s10690_s7 + $0x28] sm:$0xff] }
 0x1fe   :  { %v394_v2 = vsub.f32 1.5, %v393_v1  ;;  %v7534_v1 = vmov 39  }
 0x200   :  { %v395_v8 = vmul.f32 %v7405_v62, %v394_v2  ;;  %v497_v2 = vld [vmem:[%s10690_s7] sm:$0xff] }
 0x202   :  { %v399_v9 = vsel %vm398_vm8, %v7405_v62, %v395_v8  ;;  %v500_v62 = vld [vmem:[%s10690_s7 + $0x18] sm:$0xff]  ;;  %v498_v8 = vld [vmem:[%s10690_s7 + $0x8] sm:$0xff] }
 0x203   :  { %6899 = vpush %v399_v9 }
 0x22c   :  { %v240_v11 = vpop.permute.xlu0 %239  ;;  %v246_v34 = vpop.permute.xlu1 %245 }
 0x22d   :  { %v251_v23 = vsub.f32 %v7725_v4, %v240_v11  ;;  %v254_v35 = vsub.f32 %v7744_v7, %v246_v34 }
 0x234   :  { %s6900_s21 = spop %6899  ;;  %v242_v22 = vpop.permute.xlu0 %241 }
 0x235   :  { %v401_v12 = vstv %s6900_s21  ;;  %v252_v31 = vsub.f32 %v7739_v6, %v242_v22 }
 0x236   :  { %v402_v14 = vmul.f32 %v401_v12, %v7725_v4  ;;  %v404_v15 = vmul.f32 %v401_v12, %v7732_v5  ;;  %v403_v17 = vmul.f32 %v401_v12, %v7739_v6  ;;  %v405_v26 = vmul.f32 %v401_v12, %v7744_v7 }
 0x237   :  { %v7535_v12 = vmov 41  }
 0x238   :  { %438 = vperm.xlu1 %7155, %v403_v17   ;;  %v409_v19 = vmul.f32 %v406_v18, %v404_v15  ;;  %v407_v20 = vmul.f32 %v406_v18, %v402_v14  ;;  %v408_v25 = vmul.f32 %v406_v18, %v403_v17  ;;  %v410_v30 = vmul.f32 %v406_v18, %v405_v26 }
 0x23a   :  { %419 = vrot.lane.b32.xlu2 %v409_v19, %s7529_s26  ;;  %415 = vrot.lane.b32.xlu0 %v407_v20, %s7529_s26  ;;  %v7536_v19 = vmov 43  }
 0x23c   :  { %v244_v27 = vpop.permute.xlu0 %243 }
 0x23d   :  { %v253_v29 = vsub.f32 %v7732_v5, %v244_v27 }
 0x240   :  { %7156 = vset.pattern.permute.xlu1 %v7531_v24 }
 0x241   :  { %281 = vperm.xlu1 %7156, %v251_v23  }
 0x242   :  { %433 = vperm.xlu2 %7154, %v402_v14   ;;  %417 = vrot.lane.b32.xlu0 %v408_v25, %s7529_s26 }
 0x249   :  { %291 = vperm.xlu1 %7156, %v253_v29  }
 0x24a   :  { %262 = vperm.xlu2 %7154, %v227_v57   ;;  %421 = vrot.lane.b32.xlu0 %v410_v30, %s7529_s26  ;;  %v508_v57 = vld [vmem:[%s10690_s7 + $0x58] sm:$0xff] }
 0x24b   :  { %604 = vmatpush.msra.mxu3 %v508_v57 }
 0x24d   :  { %605 = vmatpush.msra.mxu3 %v505_v61 }
 0x24f   :  { %606 = vmatpush.msra.mxu3 %v502_v0 }
 0x252   :  { %7157 = vset.pattern.permute.xlu2 %v7531_v24  ;;  %257 = vperm.xlu0 %7153, %v7818_v52   ;;  %v509_v52 = vld [vmem:[%s10690_s7 + $0x60] sm:$0xff] }
 0x253   :  { %286 = vperm.xlu2 %7157, %v252_v31   ;;  %545 = vmatpush.msra.mxu1 %v509_v52 }
 0x255   :  { %546 = vmatpush.msra.mxu1 %v506_v55 }
 0x25a   :  { %7158 = vset.pattern.permute.xlu0 %v7531_v24 }
 0x25b   :  { %7160 = vset.pattern.permute.xlu2 %v7530_v10 }
 0x25c   :  { %443 = vperm.xlu2 %7160, %v404_v15  }
 0x264   :  { %7162 = vset.pattern.permute.xlu2 %v7531_v24 }
 0x294   :  { %v420_v32 = vpop.permute.xlu2 %419 }
 0x295   :  { %v429_v33 = vsub.f32 %v7732_v5, %v420_v32 }
 0x297   :  { %467 = vperm.xlu2 %7162, %v429_v33  }
 0x29c   :  { %v434_v9 = vpop.permute.xlu2 %433 }
 0x29d   :  { %v451_v22 = vmul.f32 %v434_v9, %v7760_v13 }
 0x29f   :  { %296 = vperm.xlu2 %7162, %v254_v35  }
 0x2a4   :  { %v263_v14 = vpop.permute.xlu2 %262 }
 0x2a5   :  { %v276_v33 = vmul.f32 %v263_v14, %v7764_v16 }
 0x2a7   :  { %7165 = vset.pattern.permute.xlu2 %v7532_v45 }
 0x2a8   :  { %646 = vperm.xlu2 %7165, %v7739_v6  }
 0x2aa   :  { %v439_v11 = vpop.permute.xlu1 %438 }
 0x2ac   :  { %v416_v36 = vpop.permute.xlu0 %415 }
 0x2ad   :  { %v427_v37 = vsub.f32 %v7725_v4, %v416_v36  ;;  %v287_v17 = vpop.permute.xlu2 %286 }
 0x2ae   :  { %v300_v35 = vadd.f32 %v287_v17, %v276_v33 }
 0x2af   :  { %457 = vperm.xlu0 %7158, %v427_v37  }
 0x2b0   :  { %654 = vperm.xlu2 %7165, %v7744_v7  }
 0x2b3   :  { %v282_v15 = vpop.permute.xlu1 %281 }
 0x2b4   :  { %v418_v38 = vpop.permute.xlu0 %417 }
 0x2b5   :  { %v428_v39 = vsub.f32 %v7739_v6, %v418_v38 }
 0x2b6   :  { %v444_v29 = vpop.permute.xlu2 %443 }
 0x2b7   :  { %7159 = vset.pattern.permute.xlu0 %v7530_v10  ;;  %462 = vperm.xlu1 %7156, %v428_v39  }
 0x2b8   :  { %267 = vperm.xlu0 %7159, %v7831_v59   ;;  %7169 = vset.pattern.permute.xlu2 %v7533_v58  ;;  %v503_v59 = vld [vmem:[%s10690_s7 + $0x30] sm:$0xff] }
 0x2b9   :  { %714 = vperm.xlu2 %7169, %v7732_v5   ;;  %547 = vmatpush.msra.mxu1 %v503_v59 }
 0x2bb   :  { %548 = vmatpush.msra.mxu1 %v500_v62  ;;  %v292_v23 = vpop.permute.xlu1 %291 }
 0x2bc   :  { %v422_v40 = vpop.permute.xlu0 %421 }
 0x2bd   :  { %v430_v41 = vsub.f32 %v7744_v7, %v422_v40  ;;  %549 = vmatpush.msra.mxu1 %v497_v2  ;;  %v453_v40 = vmul.f32 %v444_v29, %v7773_v21 }
 0x2bf   :  { %7161 = vset.pattern.permute.xlu1 %v7530_v10  ;;  %v499_v10 = vld [vmem:[%s10690_s7 + $0x10] sm:$0xff] }
 0x2c0   :  { %448 = vperm.xlu0 %7159, %v405_v26   ;;  %272 = vperm.xlu1 %7161, %v7821_v53   ;;  %v510_v53 = vld [vmem:[%s10690_s7 + $0x68] sm:$0xff]  ;;  %s483_s7 = sld [smem:[#allocation2]] }
 0x2c1   :  { %574 = vmatpush.msra.mxu2 %v510_v53  ;;  %607 = vmatpush.msra.mxu3 %v499_v10 }
 0x2c2   :  { %7170 = vset.pattern.permute.xlu2 %v7534_v1 }
 0x2c3   :  { %575 = vmatpush.msra.mxu2 %v507_v56  ;;  %622 = vperm.xlu2 %7170, %v7725_v4  }
 0x2c4   :  { %v258_v18 = vpop.permute.xlu0 %257 }
 0x2c5   :  { %576 = vmatpush.msra.mxu2 %v504_v60  ;;  %v275_v20 = vmul.f32 %v258_v18, %v7760_v13  ;;  %v452_v13 = vmul.f32 %v439_v11, %v7764_v16 }
 0x2c6   :  { %v488_v27 = vstv %s483_s7 }
 0x2c7   :  { %577 = vmatpush.msra.mxu2 %v501_v63  ;;  %v299_v25 = vadd.f32 %v282_v15, %v275_v20 }
 0x2c8   :  { %7163 = vset.pattern.permute.xlu1 %v7531_v24  ;;  %7164 = vset.pattern.permute.xlu0 %v7532_v45 }
 0x2c9   :  { %472 = vperm.xlu1 %7163, %v430_v41   ;;  %642 = vperm.xlu0 %7164, %v7725_v4  }
 0x2ca   :  { %578 = vmatpush.msra.mxu2 %v498_v8 }
 0x2cb   :  { %7173 = vset.pattern.permute.xlu2 %v7535_v12 }
 0x2cc   :  { %682 = vperm.xlu2 %7173, %v7725_v4  }
 0x2d1   :  { %7166 = vset.pattern.permute.xlu1 %v7532_v45  ;;  %7168 = vset.pattern.permute.xlu0 %v7533_v58 }
 0x2d2   :  { %650 = vperm.xlu1 %7166, %v7732_v5   ;;  %710 = vperm.xlu0 %7168, %v7739_v6  }
 0x2d4   :  { %694 = vperm.xlu2 %7173, %v7744_v7  }
 0x2da   :  { %7167 = vset.pattern.permute.xlu1 %v7533_v58  ;;  %7172 = vset.pattern.permute.xlu0 %v7534_v1  ;;  %v7537_v58 = vmov 3  }
 0x2db   :  { %706 = vperm.xlu1 %7167, %v7725_v4   ;;  %630 = vperm.xlu0 %7172, %v7732_v5  }
 0x2dc   :  { %7175 = vset.pattern.permute.xlu2 %v7536_v19 }
 0x2dd   :  { %746 = vperm.xlu2 %7175, %v7725_v4  }
 0x2e3   :  { %718 = vperm.xlu1 %7167, %v7744_v7   ;;  %634 = vperm.xlu0 %7172, %v7744_v7  }
 0x2e5   :  { %754 = vperm.xlu2 %7175, %v7732_v5  }
 0x2eb   :  { %7171 = vset.pattern.permute.xlu1 %v7534_v1  ;;  %7177 = vset.pattern.permute.xlu0 %v7536_v19 }
 0x2ec   :  { %626 = vperm.xlu1 %7171, %v7739_v6  }
 0x2ed   :  { %7178 = vset.pattern.permute.xlu2 %v7537_v58 }
 0x2f1   :  { %v468_v38 = vpop.permute.xlu2 %467 }
 0x2f2   :  { %v477_v43 = vadd.f32 %v468_v38, %v453_v40 }
 0x2f4   :  { %7174 = vset.pattern.permute.xlu1 %v7535_v12 }
 0x2f5   :  { %686 = vperm.xlu1 %7174, %v7739_v6  }
 0x2f9   :  { %v297_v51 = vpop.permute.xlu2 %296 }
 0x2fd   :  { %690 = vperm.xlu1 %7174, %v7732_v5  }
 0x302   :  { %v647_v62 = vpop.permute.xlu2 %646 }
 0x305   :  { %7176 = vset.pattern.permute.xlu1 %v7536_v19 }
 0x306   :  { %750 = vperm.xlu1 %7176, %v7739_v6  }
 0x30a   :  { %v655_v8 = vpop.permute.xlu2 %654 }
 0x30e   :  { %7179 = vset.pattern.permute.xlu1 %v7537_v58 }
 0x313   :  { %v715_v17 = vpop.permute.xlu2 %714 }
 0x321   :  { %v458_v24 = vpop.permute.xlu0 %457 }
 0x322   :  { %v475_v26 = vadd.f32 %v458_v24, %v451_v22 }
 0x324   :  { %v479_v30 = vsel %vm154_vm1, %v299_v25, %v475_v26 }
 0x325   :  { %vm484_vm9 = vcmp.gt.f32.partialorder %v479_v30, 0.0  ;;  %v489_v31 = vmul.f32 %v488_v27, %v479_v30 }
 0x327   :  { %v493_v32 = vsel %vm484_vm9, %v479_v30, %v489_v31 }
 0x328   :  { %6804 = vmatmul.msk.f32.vlgmr.msra.gmra.mxu1 %vm521_vm10, %v493_v32  ;;  %6808 = vmatmul.msk.f32.vlgmr.msra.gmra.mxu2 %vm521_vm10, %v493_v32 }
 0x329   :  { %6812 = vmatmul.msk.f32.vlgmr.msra.gmra.mxu3 %vm521_vm10, %v493_v32  ;;  %v463_v34 = vpop.permute.xlu1 %462 }
 0x32a   :  { %v476_v36 = vadd.f32 %v463_v34, %v452_v13  ;;  %v268_v37 = vpop.permute.xlu0 %267 }
 0x32b   :  { %v277_v39 = vmul.f32 %v268_v37, %v7773_v21 }
 0x32c   :  { %v480_v41 = vsel %vm154_vm1, %v300_v35, %v476_v36 }
 0x32d   :  { %v301_v16 = vadd.f32 %v292_v23, %v277_v39  ;;  %vm485_vm11 = vcmp.gt.f32.partialorder %v480_v41, 0.0  ;;  %v490_v42 = vmul.f32 %v488_v27, %v480_v41 }
 0x32f   :  { %v494_v44 = vsel %vm485_vm11, %v480_v41, %v490_v42  ;;  %v481_v45 = vsel %vm154_vm1, %v301_v16, %v477_v43 }
 0x330   :  { %6805 = vmatmul.msk.f32.gmra.mxu1 %vm521_vm10, %v494_v44  ;;  %6809 = vmatmul.msk.f32.gmra.mxu2 %vm521_vm10, %v494_v44  ;;  %v491_v47 = vmul.f32 %v488_v27, %v481_v45  ;;  %vm486_vm12 = vcmp.gt.f32.partialorder %v481_v45, 0.0 }
 0x331   :  { %6813 = vmatmul.msk.f32.gmra.mxu3 %vm521_vm10, %v494_v44 }
 0x332   :  { %v273_v46 = vpop.permute.xlu1 %272  ;;  %v449_v48 = vpop.permute.xlu0 %448  ;;  %v495_v21 = vsel %vm486_vm12, %v481_v45, %v491_v47 }
 0x333   :  { %v278_v49 = vmul.f32 %v273_v46, %v7782_v28  ;;  %v454_v50 = vmul.f32 %v449_v48, %v7782_v28 }
 0x335   :  { %v302_v53 = vadd.f32 %v297_v51, %v278_v49 }
 0x338   :  { %6806 = vmatmul.msk.f32.gmra.mxu1 %vm521_vm10, %v495_v21  ;;  %6810 = vmatmul.msk.f32.gmra.mxu2 %vm521_vm10, %v495_v21 }
 0x339   :  { %6814 = vmatmul.msk.f32.gmra.mxu3 %vm521_vm10, %v495_v21 }
 0x33b   :  { %v473_v52 = vpop.permute.xlu1 %472  ;;  %v643_v28 = vpop.permute.xlu0 %642 }
 0x33c   :  { %v478_v54 = vadd.f32 %v473_v52, %v454_v50 }
 0x33e   :  { %v482_v55 = vsel %vm154_vm1, %v302_v53, %v478_v54 }
 0x33f   :  { %vm487_vm13 = vcmp.gt.f32.partialorder %v482_v55, 0.0  ;;  %v492_v56 = vmul.f32 %v488_v27, %v482_v55 }
 0x341   :  { %v496_v57 = vsel %vm487_vm13, %v482_v55, %v492_v56 }
 0x342   :  { %6807 = vmatmul.msk.f32.gmra.mxu1 %vm521_vm10, %v496_v57  ;;  %6811 = vmatmul.msk.f32.gmra.mxu2 %vm521_vm10, %v496_v57 }
 0x343   :  { %6815 = vmatmul.msk.f32.gmra.mxu3 %vm521_vm10, %v496_v57 }
 0x344   :  { %v651_v59 = vpop.permute.xlu1 %650  ;;  %v711_v9 = vpop.permute.xlu0 %710 }
 0x34d   :  { %v707_v63 = vpop.permute.xlu1 %706  ;;  %v631_v37 = vpop.permute.xlu0 %630 }
 0x355   :  { %v719_v23 = vpop.permute.xlu1 %718  ;;  %v635_v42 = vpop.permute.xlu0 %634 }
 0x3a5   :  { %v551_v60 = vpop.f32.mrf.mxu1 }
 0x3a6   :  { %v657_v61 = vmul.f32 %v643_v28, %v551_v60 }
 0x3a8   :  { %665 = vrot.lane.b32.xlu2 %v657_v61, %s10701_s23 }
 0x3ab   :  { %v580_v0 = vpop.f32.mrf.mxu2 }
 0x3ac   :  { %v721_v1 = vmul.f32 %v707_v63, %v580_v0  ;;  %v609_v16 = vpop.f32.mrf.mxu3 }
 0x3ad   :  { %v554_v2 = vpop.f32.mrf.mxu1 }
 0x3ae   :  { %729 = vrot.lane.b32.xlu1 %v721_v1, %s10701_s23  ;;  %v658_v11 = vmul.f32 %v647_v62, %v554_v2 }
 0x3b3   :  { %v583_v10 = vpop.f32.mrf.mxu2 }
 0x3b4   :  { %v722_v12 = vmul.f32 %v711_v9, %v583_v10  ;;  %v612_v53 = vpop.f32.mrf.mxu3 }
 0x3b5   :  { %v557_v14 = vpop.f32.mrf.mxu1 }
 0x3b6   :  { %v659_v15 = vmul.f32 %v651_v59, %v557_v14  ;;  %667 = vrot.lane.b32.xlu1 %v658_v11, %s10701_s23  ;;  %731 = vrot.lane.b32.xlu0 %v722_v12, %s10701_s23  ;;  %v639_v38 = vmul.f32 %v631_v37, %v557_v14 }
 0x3b8   :  { %669 = vrot.lane.b32.xlu2 %v659_v15, %s10701_s23 }
 0x3bb   :  { %v586_v18 = vpop.f32.mrf.mxu2 }
 0x3bc   :  { %v723_v19 = vmul.f32 %v715_v17, %v586_v18 }
 0x3be   :  { %774 = vperm.xlu1 %7179, %v7739_v6   ;;  %733 = vrot.lane.b32.xlu0 %v723_v19, %s10701_s23  ;;  %v623_v6 = vpop.permute.xlu2 %622 }
 0x3bf   :  { %v560_v20 = vpop.f32.mrf.mxu1  ;;  %v637_v31 = vmul.f32 %v623_v6, %v551_v60  ;;  %v615_v60 = vpop.f32.mrf.mxu3 }
 0x3c0   :  { %770 = vperm.xlu2 %7178, %v7725_v4   ;;  %v660_v22 = vmul.f32 %v655_v8, %v560_v20  ;;  %v627_v4 = vpop.permute.xlu1 %626 }
 0x3c1   :  { %v638_v21 = vmul.f32 %v627_v4, %v554_v2 }
 0x3c5   :  { %v589_v24 = vpop.f32.mrf.mxu2 }
 0x3c6   :  { %v724_v25 = vmul.f32 %v719_v23, %v589_v24  ;;  %671 = vrot.lane.b32.xlu0 %v660_v22, %s10701_s23  ;;  %v683_v26 = vpop.permute.xlu2 %682 }
 0x3c7   :  { %v697_v33 = vmul.f32 %v683_v26, %v580_v0  ;;  %v640_v0 = vmul.f32 %v635_v42, %v560_v20  ;;  %v618_v17 = vpop.f32.mrf.mxu3 }
 0x3c8   :  { %735 = vrot.lane.b32.xlu1 %v724_v25, %s10701_s23  ;;  %778 = vperm.xlu2 %7178, %v7732_v5   ;;  %v687_v34 = vpop.permute.xlu1 %686 }
 0x3c9   :  { %v698_v51 = vmul.f32 %v687_v34, %v583_v10 }
 0x3ce   :  { %758 = vperm.xlu0 %7177, %v7744_v7   ;;  %v695_v27 = vpop.permute.xlu2 %694 }
 0x3cf   :  { %v700_v11 = vmul.f32 %v695_v27, %v589_v24 }
 0x3d0   :  { %782 = vperm.xlu1 %7179, %v7744_v7   ;;  %v691_v36 = vpop.permute.xlu1 %690 }
 0x3d1   :  { %v699_v39 = vmul.f32 %v691_v36, %v586_v18 }
 0x3d6   :  { %v747_v29 = vpop.permute.xlu2 %746 }
 0x3d7   :  { %v761_v44 = vmul.f32 %v747_v29, %v609_v16 }
 0x3d8   :  { %v751_v7 = vpop.permute.xlu1 %750 }
 0x3d9   :  { %v762_v57 = vmul.f32 %v751_v7, %v612_v53 }
 0x3de   :  { %v755_v30 = vpop.permute.xlu2 %754 }
 0x3df   :  { %v763_v63 = vmul.f32 %v755_v30, %v615_v60 }
 0x402   :  { %v666_v32 = vpop.permute.xlu2 %665 }
 0x403   :  { %v677_v13 = vadd.f32 %v666_v32, %v637_v31 }
 0x405   :  { %v701_v35 = vadd.f32 %v697_v33, %v677_v13 }
 0x412   :  { %v670_v5 = vpop.permute.xlu2 %669 }
 0x413   :  { %v679_v40 = vadd.f32 %v670_v5, %v639_v38 }
 0x415   :  { %v703_v41 = vadd.f32 %v699_v39, %v679_v40 }
 0x41a   :  { %v771_v46 = vpop.permute.xlu2 %770 }
 0x420   :  { %v730_v43 = vpop.permute.xlu1 %729 }
 0x421   :  { %v741_v45 = vadd.f32 %v730_v43, %v701_v35 }
 0x422   :  { %v779_v9 = vpop.permute.xlu2 %778 }
 0x423   :  { %v765_v47 = vadd.f32 %v761_v44, %v741_v45 }
 0x425   :  { %v7985_v48 = vadd.f32 %v771_v46, %v765_v47 }
 0x427   :  { %941 = vrot.lane.b32.xlu1 %v7985_v48, %s7526_s0  ;;  %v805_v56 = vmul.f32 %v7985_v48, %v7985_v48  ;;  %v789_v6 = vsel %vm154_vm1, %v7985_v48, 0.0 }
 0x428   :  { %v668_v49 = vpop.permute.xlu1 %667  ;;  %v732_v50 = vpop.permute.xlu0 %731 }
 0x429   :  { %v678_v52 = vadd.f32 %v668_v49, %v638_v21  ;;  %v809_v4 = vsel %vm154_vm1, %v805_v56, 0.0 }
 0x42b   :  { %v702_v54 = vadd.f32 %v698_v51, %v678_v52 }
 0x42d   :  { %v742_v55 = vadd.f32 %v732_v50, %v702_v54 }
 0x42f   :  { %973 = vrot.lane.b32.xlu1 %v805_v56, %s7526_s0  ;;  %v766_v59 = vadd.f32 %v762_v57, %v742_v55 }
 0x430   :  { %v734_v58 = vpop.permute.xlu0 %733  ;;  %v775_v28 = vpop.permute.xlu1 %774 }
 0x431   :  { %v7992_v61 = vadd.f32 %v775_v28, %v766_v59  ;;  %v743_v62 = vadd.f32 %v734_v58, %v703_v41 }
 0x433   :  { %v767_v2 = vadd.f32 %v763_v63, %v743_v62  ;;  %v806_v15 = vmul.f32 %v7992_v61, %v7992_v61  ;;  %v790_v22 = vsel %vm154_vm1, %v7992_v61, 0.0 }
 0x434   :  { %v791_v29 = vadd.f32 %v790_v22, %v789_v6 }
 0x435   :  { %v7996_v12 = vadd.f32 %v779_v9, %v767_v2  ;;  %v810_v24 = vsel %vm154_vm1, %v806_v15, 0.0 }
 0x436   :  { %v811_v33 = vadd.f32 %v810_v24, %v809_v4 }
 0x437   :  { %943 = vrot.lane.b32.xlu1 %v7992_v61, %s7526_s0  ;;  %v807_v23 = vmul.f32 %v7996_v12, %v7996_v12  ;;  %v792_v26 = vsel %vm154_vm1, %v7996_v12, 0.0 }
 0x438   :  { %v672_v1 = vpop.permute.xlu0 %671  ;;  %v793_v32 = vadd.f32 %v792_v26, %v791_v29 }
 0x439   :  { %v680_v8 = vadd.f32 %v672_v1, %v640_v0  ;;  %v812_v31 = vsel %vm154_vm1, %v807_v23, 0.0 }
 0x43a   :  { %v736_v10 = vpop.permute.xlu1 %735  ;;  %v813_v36 = vadd.f32 %v812_v31, %v811_v33 }
 0x43b   :  { %v704_v14 = vadd.f32 %v700_v11, %v680_v8 }
 0x43d   :  { %v744_v19 = vadd.f32 %v736_v10, %v704_v14 }
 0x43f   :  { %975 = vrot.lane.b32.xlu1 %v806_v15, %s7526_s0 }
 0x440   :  { %v759_v18 = vpop.permute.xlu0 %758 }
 0x441   :  { %v764_v20 = vmul.f32 %v759_v18, %v618_v17 }
 0x442   :  { %v783_v27 = vpop.permute.xlu1 %782 }
 0x443   :  { %v768_v25 = vadd.f32 %v764_v20, %v744_v19 }
 0x445   :  { %v8011_v30 = vadd.f32 %v783_v27, %v768_v25  ;;  %v7539_v25 = vmov 4  }
 0x446   :  { %7181 = vset.pattern.permute.xlu1 %v7539_v25  ;;  %7180 = vset.pattern.permute.xlu2 %v7539_v25 }
 0x447   :  { %945 = vrot.lane.b32.xlu1 %v7996_v12, %s7526_s0  ;;  %v794_v13 = vsel %vm154_vm1, %v8011_v30, 0.0  ;;  %v808_v34 = vmul.f32 %v8011_v30, %v8011_v30 }
 0x448   :  { %v795_v35 = vadd.f32 %v794_v13, %v793_v32  ;;  %v8045_v13 = vld [vmem:[%s10688_s5] sm:$0xff] }
 0x449   :  { %v814_v37 = vsel %vm154_vm1, %v808_v34, 0.0 }
 0x44a   :  { %796 = vadd.xlane.f32.xlu0 %v795_v35  ;;  %v815_v38 = vadd.f32 %v814_v37, %v813_v36  ;;  %v8051_v35 = vld [vmem:[%s10688_s5 + $0x10] sm:$0xff]  ;;  %v8059_v37 = vld [vmem:[%s10688_s5 + $0x18] sm:$0xff] }
 0x44c   :  { %816 = vadd.xlane.f32.xlu2 %v815_v38 }
 0x44f   :  { %979 = vrot.lane.b32.xlu1 %v808_v34, %s7526_s0 }
 0x45e   :  { %947 = vrot.lane.b32.xlu0 %v8011_v30, %s7526_s0 }
 0x464   :  { %977 = vrot.lane.b32.xlu2 %v807_v23, %s7526_s0 }
 0x499   :  { %v942_v5 = vpop.permute.xlu1 %941 }
 0x49a   :  { %v953_v1 = vsel %vm154_vm1, %v942_v5, 0.0 }
 0x4a1   :  { %v974_v39 = vpop.permute.xlu1 %973 }
 0x4a2   :  { %v985_v51 = vsel %vm154_vm1, %v974_v39, 0.0 }
 0x4a9   :  { %v944_v40 = vpop.permute.xlu1 %943 }
 0x4aa   :  { %v954_v63 = vsel %vm154_vm1, %v944_v40, 0.0 }
 0x4ab   :  { %v955_v8 = vadd.f32 %v954_v63, %v953_v1 }
 0x4b1   :  { %v976_v41 = vpop.permute.xlu1 %975 }
 0x4b2   :  { %v986_v21 = vsel %vm154_vm1, %v976_v41, 0.0 }
 0x4b3   :  { %v987_v54 = vadd.f32 %v986_v21, %v985_v51 }
 0x4b9   :  { %v946_v7 = vpop.permute.xlu1 %945 }
 0x4ba   :  { %v956_v2 = vsel %vm154_vm1, %v946_v7, 0.0 }
 0x4bb   :  { %v957_v9 = vadd.f32 %v956_v2, %v955_v8 }
 0x4bd   :  { %v797_v16 = vpop.xlane.xlu0 %796 }
 0x4be   :  { %v798_v42 = vrot.slane %v797_v16, 4 }
 0x4bf   :  { %v817_v43 = vpop.xlane.xlu2 %816 }
 0x4c0   :  { %v799_v44 = vadd.f32 %v798_v42, %v797_v16  ;;  %v818_v45 = vrot.slane %v817_v43, 4 }
 0x4c1   :  { %v980_v55 = vpop.permute.xlu1 %979 }
 0x4c2   :  { %v819_v46 = vadd.f32 %v818_v45, %v817_v43  ;;  %v800_v47 = vrot.slane %v799_v44, 2  ;;  %v990_v60 = vsel %vm154_vm1, %v980_v55, 0.0  ;;  %v8073_v45 = vld [vmem:[%s10688_s5 + $0x8] sm:$0xff] }
 0x4c4   :  { %v801_v49 = vadd.f32 %v800_v47, %v799_v44  ;;  %v820_v50 = vrot.slane %v819_v46, 2 }
 0x4c6   :  { %v802_v52 = vrot.slane %v801_v49, 1  ;;  %v821_v53 = vadd.f32 %v820_v50, %v819_v46 }
 0x4c7   :  { %v978_v56 = vpop.permute.xlu2 %977 }
 0x4c8   :  { %v988_v57 = vsel %vm154_vm1, %v978_v56, 0.0  ;;  %v803_v58 = vadd.f32 %v802_v52, %v801_v49  ;;  %v822_v59 = vrot.slane %v821_v53, 1 }
 0x4c9   :  { %v989_v28 = vadd.f32 %v988_v57, %v987_v54 }
 0x4ca   :  { %6901 = vpush %v803_v58  ;;  %v823_v62 = vadd.f32 %v822_v59, %v821_v53  ;;  %v7540_v58 = vmov 5  }
 0x4cb   :  { %v991_v0 = vadd.f32 %v990_v60, %v989_v28  ;;  %7184 = vset.pattern.permute.xlu0 %v7540_v58 }
 0x4cc   :  { %6903 = vpush %v823_v62 }
 0x4cd   :  { %992 = vadd.xlane.f32.xlu0 %v991_v0 }
 0x4d0   :  { %v948_v10 = vpop.permute.xlu0 %947 }
 0x4d1   :  { %v958_v11 = vsel %vm154_vm1, %v948_v10, 0.0 }
 0x4d2   :  { %v959_v14 = vadd.f32 %v958_v11, %v957_v9 }
 0x4d4   :  { %960 = vadd.xlane.f32.xlu1 %v959_v14 }
 0x4fb   :  { %s6902_s24 = spop %6901 }
 0x4fc   :  { %s8034_s25 = smul.f32 %s6902_s24, %s7808_s17 }
 0x4fd   :  { %s6904_s28 = spop %6903 }
 0x4fe   :  { %s843_s29 = smul.f32 %s8034_s25, %s8034_s25  ;;  %v864_v39 = vstv %s8034_s25 }
 0x4ff   :  { %s842_s30 = smul.f32 %s6904_s28, %s7808_s17 }
 0x501   :  { %s844_s1 = ssub.f32 %s842_s30, %s843_s29 }
 0x503   :  { %s845_s6 = smax.f32 %s7528_s22, %s844_s1 }
 0x504   :  { %s846_s18 = sadd.f32 1e-08, %s845_s6 }
 0x506   :  { %v847_v15 = vstv %s846_s18 }
 0x507   :  { %7406 = vrsqrt.f32 %v847_v15  ;;  %vm854_vm15 = vweird.f32 %v847_v15 }
 0x50d   :  { %v7407_v17 = vpop.eup %7406 }
 0x50e   :  { %v849_v18 = vmul.f32 %v7407_v17, %v847_v15  ;;  %vm855_vm14 = vweird.f32 %v7407_v17 }
 0x50f   :  { %vm856_vm2 = vmor %vm854_vm15, %vm855_vm14  ;;  %vm1769_vm15 = vcmask 1043456  }
 0x510   :  { %v850_v19 = vmul.f32 %v7407_v17, %v849_v18 }
 0x512   :  { %v851_v20 = vmul.f32 0.5, %v850_v19 }
 0x514   :  { %v852_v22 = vsub.f32 1.5, %v851_v20 }
 0x516   :  { %v853_v23 = vmul.f32 %v7407_v17, %v852_v22 }
 0x518   :  { %v857_v24 = vsel %vm856_vm2, %v7407_v17, %v853_v23  ;;  %vm1756_vm2 = vcmask 228352  }
 0x519   :  { %6905 = vpush %v857_v24 }
 0x540   :  { %v993_v6 = vpop.xlane.xlu0 %992 }
 0x541   :  { %v994_v26 = vrot.slane %v993_v6, 4 }
 0x543   :  { %v995_v27 = vadd.f32 %v994_v26, %v993_v6 }
 0x545   :  { %v996_v31 = vrot.slane %v995_v27, 2 }
 0x547   :  { %v961_v29 = vpop.xlane.xlu1 %960  ;;  %v997_v5 = vadd.f32 %v996_v31, %v995_v27 }
 0x548   :  { %v962_v4 = vrot.slane %v961_v29, 4 }
 0x549   :  { %v998_v43 = vrot.slane %v997_v5, 1 }
 0x54a   :  { %v963_v32 = vadd.f32 %v962_v4, %v961_v29  ;;  %s6906_s19 = spop %6905 }
 0x54b   :  { %v859_v33 = vstv %s6906_s19  ;;  %v999_v21 = vadd.f32 %v998_v43, %v997_v5  ;;  %v1130_v5 = vld [vmem:[%s10691_s8 + $0x68] sm:$0xff]  ;;  %v1121_v43 = vld [vmem:[%s10691_s8 + $0x20] sm:$0xff] }
 0x54c   :  { %v860_v34 = vmul.f32 %v8045_v13, %v859_v33  ;;  %v8054_v36 = vmul.f32 %v8051_v35, %v859_v33  ;;  %v8062_v38 = vmul.f32 %v8059_v37, %v859_v33  ;;  %v964_v40 = vrot.slane %v963_v32, 2 }
 0x54d   :  { %v861_v46 = vmul.f32 %v8073_v45, %v859_v33  ;;  %v1131_v33 = vld [vmem:[%s10691_s8 + $0x70] sm:$0xff] }
 0x54e   :  { %v868_v41 = vmul.f32 %v864_v39, %v8062_v38  ;;  %v865_v7 = vmul.f32 %v864_v39, %v860_v34  ;;  %v867_v16 = vmul.f32 %v864_v39, %v8054_v36  ;;  %v965_v42 = vadd.f32 %v964_v40, %v963_v32  ;;  %1153 = vmatpush.msrb.mxu0 %v1131_v33  ;;  %v1128_v40 = vld [vmem:[%s10691_s8 + $0x58] sm:$0xff] }
 0x54f   :  { %v866_v49 = vmul.f32 %v864_v39, %v861_v46  ;;  %v7541_v32 = vmov 45   ;;  %v1127_v39 = vld [vmem:[%s10691_s8 + $0x50] sm:$0xff] }
 0x550   :  { %879 = vrot.lane.b32.xlu0 %v868_v41, %s7529_s26  ;;  %873 = vrot.lane.b32.xlu2 %v865_v7, %s7529_s26  ;;  %v966_v44 = vrot.slane %v965_v42, 1  ;;  %v1125_v41 = vld [vmem:[%s10691_s8 + $0x40] sm:$0xff]  ;;  %v1126_v7 = vld [vmem:[%s10691_s8 + $0x48] sm:$0xff] }
 0x551   :  { %877 = vrot.lane.b32.xlu1 %v867_v16, %s7529_s26  ;;  %v1123_v16 = vld [vmem:[%s10691_s8 + $0x30] sm:$0xff] }
 0x552   :  { %v967_v47 = vadd.f32 %v966_v44, %v965_v42  ;;  %v1124_v42 = vld [vmem:[%s10691_s8 + $0x38] sm:$0xff]  ;;  %v1122_v44 = vld [vmem:[%s10691_s8 + $0x28] sm:$0xff] }
 0x554   :  { %6907 = vpush %v967_v47  ;;  %v1120_v47 = vld [vmem:[%s10691_s8 + $0x18] sm:$0xff] }
 0x555   :  { %6909 = vpush %v999_v21  ;;  %v1117_v21 = vld [vmem:[%s10691_s8] sm:$0xff] }
 0x558   :  { %875 = vrot.lane.b32.xlu2 %v866_v49, %s7529_s26  ;;  %v1118_v49 = vld [vmem:[%s10691_s8 + $0x8] sm:$0xff] }
 0x559   :  { %896 = vperm.xlu1 %7181, %v861_v46   ;;  %v1119_v46 = vld [vmem:[%s10691_s8 + $0x10] sm:$0xff] }
 0x560   :  { %891 = vperm.xlu2 %7180, %v860_v34   ;;  %v1132_v34 = vld [vmem:[%s10691_s8 + $0x78] sm:$0xff] }
 0x561   :  { %1182 = vmatpush.msrb.mxu1 %v1132_v34 }
 0x563   :  { %1183 = vmatpush.msrb.mxu1 %v1130_v5 }
 0x565   :  { %1184 = vmatpush.msrb.mxu1 %v1128_v40 }
 0x567   :  { %1185 = vmatpush.msrb.mxu1 %v1126_v7 }
 0x569   :  { %1186 = vmatpush.msrb.mxu1 %v1124_v42 }
 0x56b   :  { %1187 = vmatpush.msrb.mxu1 %v1122_v44 }
 0x56d   :  { %1188 = vmatpush.msrb.mxu1 %v1120_v47 }
 0x56f   :  { %1189 = vmatpush.msrb.mxu1 %v1118_v49 }
 0x585   :  { %s6908_s25 = spop %6907 }
 0x586   :  { %s1009_s6 = smul.f32 %s6908_s25, %s7808_s17  ;;  %s6910_s18 = spop %6909 }
 0x587   :  { %s1018_s19 = smul.f32 %s6910_s18, %s7808_s17 }
 0x588   :  { %s1019_s20 = smul.f32 %s1009_s6, %s1009_s6  ;;  %v1040_v62 = vstv %s1009_s6 }
 0x58a   :  { %s1020_s21 = ssub.f32 %s1018_s19, %s1019_s20 }
 0x58c   :  { %s1021_s7 = smax.f32 %s7528_s22, %s1020_s21  ;;  %s7548_s21 = smov 100  }
 0x58d   :  { %s1022_s24 = sadd.f32 1e-08, %s1021_s7  ;;  %s7549_s7 = smov 16  }
 0x58f   :  { %v1023_v50 = vstv %s1022_s24  ;;  %s7550_s24 = smov 44  }
 0x590   :  { %7408 = vrsqrt.f32 %v1023_v50  ;;  %vm1030_vm4 = vweird.f32 %v1023_v50 }
 0x596   :  { %v7409_v51 = vpop.eup %7408 }
 0x597   :  { %v1025_v52 = vmul.f32 %v7409_v51, %v1023_v50  ;;  %vm1031_vm3 = vweird.f32 %v7409_v51  ;;  %v7544_v50 = vmov 47  }
 0x598   :  { %vm1032_vm5 = vmor %vm1030_vm4, %vm1031_vm3  ;;  %vm2002_vm3 = vcmask 39936  }
 0x599   :  { %v1026_v53 = vmul.f32 %v7409_v51, %v1025_v52 }
 0x59b   :  { %v1027_v54 = vmul.f32 0.5, %v1026_v53  ;;  %v7545_v53 = vmov 44  }
 0x59d   :  { %v1028_v55 = vsub.f32 1.5, %v1027_v54 }
 0x59f   :  { %v1029_v56 = vmul.f32 %v7409_v51, %v1028_v55 }
 0x5a1   :  { %v1033_v57 = vsel %vm1032_vm5, %v7409_v51, %v1029_v56 }
 0x5a2   :  { %6911 = vpush %v1033_v57 }
 0x5aa   :  { %v874_v59 = vpop.permute.xlu2 %873 }
 0x5ab   :  { %v885_v15 = vsub.f32 %v8045_v13, %v874_v59 }
 0x5b2   :  { %v876_v0 = vpop.permute.xlu2 %875 }
 0x5b3   :  { %v886_v2 = vsub.f32 %v8073_v45, %v876_v0 }
 0x5ba   :  { %v8092_v19 = vpop.permute.xlu2 %891 }
 0x5c2   :  { %v880_v27 = vpop.permute.xlu0 %879 }
 0x5c3   :  { %v878_v17 = vpop.permute.xlu1 %877  ;;  %v888_v4 = vsub.f32 %v8059_v37, %v880_v27 }
 0x5c4   :  { %v887_v18 = vsub.f32 %v8051_v35, %v878_v17 }
 0x5cb   :  { %v897_v52 = vpop.permute.xlu1 %896 }
 0x5d3   :  { %s6912_s28 = spop %6911 }
 0x5d4   :  { %v1035_v28 = vstv %s6912_s28  ;;  %s7551_s28 = smov 114  }
 0x5d5   :  { %v1036_v60 = vmul.f32 %v8045_v13, %v1035_v28  ;;  %v1037_v1 = vmul.f32 %v8073_v45, %v1035_v28  ;;  %v1038_v9 = vmul.f32 %v8051_v35, %v1035_v28  ;;  %v1039_v11 = vmul.f32 %v8059_v37, %v1035_v28 }
 0x5d7   :  { %1067 = vperm.xlu1 %7181, %v1036_v60   ;;  %v1041_v63 = vmul.f32 %v1040_v62, %v1036_v60  ;;  %v1042_v8 = vmul.f32 %v1040_v62, %v1037_v1  ;;  %v1043_v10 = vmul.f32 %v1040_v62, %v1038_v9  ;;  %v1044_v14 = vmul.f32 %v1040_v62, %v1039_v11 }
 0x5d9   :  { %1049 = vrot.lane.b32.xlu2 %v1041_v63, %s7529_s26 }
 0x5df   :  { %7183 = vset.pattern.permute.xlu1 %v7540_v58 }
 0x5e0   :  { %920 = vperm.xlu1 %7183, %v886_v2  }
 0x5e1   :  { %1051 = vrot.lane.b32.xlu2 %v1042_v8, %s7529_s26 }
 0x5e8   :  { %7186 = vset.pattern.permute.xlu1 %v7539_v25 }
 0x5e9   :  { %1077 = vperm.xlu1 %7186, %v1038_v9   ;;  %1053 = vrot.lane.b32.xlu2 %v1043_v10, %s7529_s26 }
 0x5f1   :  { %1055 = vrot.lane.b32.xlu2 %v1044_v14, %s7529_s26  ;;  %7188 = vset.pattern.permute.xlu1 %v7540_v58 }
 0x5f9   :  { %1072 = vperm.xlu2 %7180, %v1037_v1  }
 0x601   :  { %7182 = vset.pattern.permute.xlu2 %v7540_v58 }
 0x602   :  { %915 = vperm.xlu2 %7182, %v885_v15  }
 0x60a   :  { %925 = vperm.xlu2 %7182, %v887_v18  }
 0x633   :  { %v1050_v20 = vpop.permute.xlu2 %1049 }
 0x634   :  { %v1061_v22 = vsub.f32 %v8045_v13, %v1050_v20 }
 0x636   :  { %1091 = vperm.xlu0 %7184, %v1061_v22  }
 0x63b   :  { %v1052_v23 = vpop.permute.xlu2 %1051 }
 0x63c   :  { %v1062_v24 = vsub.f32 %v8073_v45, %v1052_v23 }
 0x63e   :  { %7185 = vset.pattern.permute.xlu0 %v7539_v25  ;;  %1096 = vperm.xlu2 %7182, %v1062_v24  }
 0x63f   :  { %901 = vperm.xlu0 %7185, %v8054_v36   ;;  %v1129_v36 = vld [vmem:[%s10691_s8 + $0x60] sm:$0xff]  ;;  %s7547_s8 = smov 72  }
 0x640   :  { %1154 = vmatpush.msrb.mxu0 %v1129_v36 }
 0x642   :  { %1155 = vmatpush.msrb.mxu0 %v1127_v39 }
 0x643   :  { %v1054_v6 = vpop.permute.xlu2 %1053 }
 0x644   :  { %v1063_v26 = vsub.f32 %v8051_v35, %v1054_v6  ;;  %1156 = vmatpush.msrb.mxu0 %v1125_v41 }
 0x646   :  { %7187 = vset.pattern.permute.xlu2 %v7539_v25  ;;  %1101 = vperm.xlu1 %7188, %v1063_v26   ;;  %v7542_v25 = vmov 46  }
 0x647   :  { %1082 = vperm.xlu0 %7185, %v1039_v11   ;;  %906 = vperm.xlu2 %7187, %v8062_v38   ;;  %v7543_v38 = vmov 48  }
 0x648   :  { %1157 = vmatpush.msrb.mxu0 %v1123_v16 }
 0x649   :  { %v1068_v55 = vpop.permute.xlu1 %1067 }
 0x64a   :  { %1158 = vmatpush.msrb.mxu0 %v1121_v43  ;;  %v1085_v59 = vmul.f32 %v1068_v55, %v7985_v48 }
 0x64b   :  { %v1056_v29 = vpop.permute.xlu2 %1055 }
 0x64c   :  { %v1064_v31 = vsub.f32 %v8059_v37, %v1056_v29  ;;  %1159 = vmatpush.msrb.mxu0 %v1119_v46 }
 0x64e   :  { %930 = vperm.xlu1 %7188, %v888_v4   ;;  %1160 = vmatpush.msrb.mxu0 %v1117_v21  ;;  %v7546_v4 = vmov 6  }
 0x64f   :  { %7189 = vset.pattern.permute.xlu2 %v7540_v58  ;;  %7190 = vset.pattern.permute.xlu0 %v7541_v32  ;;  %v909_v58 = vmul.f32 %v8092_v19, %v7985_v48  ;;  %v910_v48 = vmul.f32 %v897_v52, %v7992_v61 }
 0x650   :  { %1106 = vperm.xlu2 %7189, %v1064_v31   ;;  %1224 = vperm.xlu0 %7190, %v8045_v13  }
 0x652   :  { %v921_v57 = vpop.permute.xlu1 %920 }
 0x653   :  { %v1073_v51 = vpop.permute.xlu2 %1072  ;;  %v934_v9 = vadd.f32 %v921_v57, %v910_v48 }
 0x654   :  { %v1086_v1 = vmul.f32 %v1073_v51, %v7992_v61 }
 0x656   :  { %7191 = vset.pattern.permute.xlu1 %v7541_v32 }
 0x657   :  { %1228 = vperm.xlu1 %7191, %v8073_v45  }
 0x658   :  { %7192 = vset.pattern.permute.xlu2 %v7541_v32  ;;  %1236 = vperm.xlu0 %7190, %v8059_v37  }
 0x659   :  { %1232 = vperm.xlu2 %7192, %v8051_v35  }
 0x65b   :  { %v1078_v8 = vpop.permute.xlu1 %1077 }
 0x65c   :  { %v916_v54 = vpop.permute.xlu2 %915  ;;  %v1087_v61 = vmul.f32 %v1078_v8, %v7996_v12 }
 0x65d   :  { %v933_v60 = vadd.f32 %v916_v54, %v909_v58 }
 0x65f   :  { %7193 = vset.pattern.permute.xlu1 %v7542_v25 }
 0x660   :  { %1264 = vperm.xlu1 %7193, %v8045_v13   ;;  %7196 = vset.pattern.permute.xlu0 %v7544_v50 }
 0x661   :  { %7194 = vset.pattern.permute.xlu2 %v7542_v25  ;;  %1308 = vperm.xlu0 %7196, %v8073_v45  }
 0x662   :  { %1268 = vperm.xlu2 %7194, %v8073_v45  }
 0x664   :  { %v926_v56 = vpop.permute.xlu2 %925 }
 0x668   :  { %1272 = vperm.xlu1 %7193, %v8051_v35  }
 0x669   :  { %7201 = vset.pattern.permute.xlu0 %v7543_v38 }
 0x66a   :  { %7195 = vset.pattern.permute.xlu2 %v7544_v50  ;;  %1352 = vperm.xlu0 %7201, %v8051_v35  }
 0x66b   :  { %1304 = vperm.xlu2 %7195, %v8045_v13  }
 0x670   :  { %7197 = vset.pattern.permute.xlu1 %v7543_v38 }
 0x671   :  { %1344 = vperm.xlu1 %7197, %v8045_v13  }
 0x672   :  { %7206 = vset.pattern.permute.xlu0 %v7545_v53 }
 0x673   :  { %7198 = vset.pattern.permute.xlu2 %v7543_v38  ;;  %1212 = vperm.xlu0 %7206, %v8051_v35  }
 0x674   :  { %1348 = vperm.xlu2 %7198, %v8073_v45  }
 0x679   :  { %7199 = vset.pattern.permute.xlu1 %v7542_v25 }
 0x67a   :  { %1276 = vperm.xlu1 %7199, %v8059_v37  }
 0x67b   :  { %7207 = vset.pattern.permute.xlu0 %v7546_v4 }
 0x67c   :  { %7200 = vset.pattern.permute.xlu2 %v7544_v50  ;;  %1404 = vperm.xlu0 %7207, %v8045_v13  }
 0x67d   :  { %1312 = vperm.xlu2 %7200, %v8051_v35  }
 0x682   :  { %7202 = vset.pattern.permute.xlu1 %v7544_v50 }
 0x683   :  { %1316 = vperm.xlu1 %7202, %v8059_v37  }
 0x685   :  { %7203 = vset.pattern.permute.xlu2 %v7543_v38 }
 0x686   :  { %1356 = vperm.xlu2 %7203, %v8059_v37  }
 0x68b   :  { %7204 = vset.pattern.permute.xlu1 %v7545_v53 }
 0x68c   :  { %1204 = vperm.xlu1 %7204, %v8045_v13  }
 0x68e   :  { %7205 = vset.pattern.permute.xlu2 %v7545_v53 }
 0x68f   :  { %1208 = vperm.xlu2 %7205, %v8073_v45  }
 0x694   :  { %1216 = vperm.xlu1 %7204, %v8059_v37  }
 0x697   :  { %7209 = vset.pattern.permute.xlu2 %v7546_v4 }
 0x698   :  { %v1097_v0 = vpop.permute.xlu2 %1096 }
 0x699   :  { %v1110_v2 = vadd.f32 %v1097_v0, %v1086_v1 }
 0x69b   :  { %v8184_v11 = vsel %vm154_vm1, %v934_v9, %v1110_v2 }
 0x69c   :  { %7208 = vset.pattern.permute.xlu1 %v7546_v4 }
 0x69d   :  { %1408 = vperm.xlu1 %7208, %v8073_v45  }
 0x6a1   :  { %v907_v15 = vpop.permute.xlu2 %906 }
 0x6a2   :  { %v912_v24 = vmul.f32 %v907_v15, %v8011_v30 }
 0x6a8   :  { %v1092_v28 = vpop.permute.xlu0 %1091 }
 0x6a9   :  { %v1109_v62 = vadd.f32 %v1092_v28, %v1085_v59 }
 0x6aa   :  { %v1107_v6 = vpop.permute.xlu2 %1106 }
 0x6ab   :  { %v8174_v63 = vsel %vm154_vm1, %v933_v60, %v1109_v62 }
 0x6ac   :  { %6816 = vmatmul.msk.f32.vlgmr.msrb.gmra.mxu0 %vm521_vm10, %v8174_v63  ;;  %6820 = vmatmul.msk.f32.vlgmr.msrb.gmra.mxu1 %vm521_vm10, %v8174_v63 }
 0x6b1   :  { %v902_v10 = vpop.permute.xlu0 %901 }
 0x6b2   :  { %v911_v14 = vmul.f32 %v902_v10, %v7996_v12 }
 0x6b3   :  { %v1233_v31 = vpop.permute.xlu2 %1232 }
 0x6b4   :  { %6817 = vmatmul.msk.f32.gmra.mxu0 %vm521_vm10, %v8184_v11  ;;  %6821 = vmatmul.msk.f32.gmra.mxu1 %vm521_vm10, %v8184_v11  ;;  %v935_v18 = vadd.f32 %v926_v56, %v911_v14 }
 0x6b8   :  { %v1102_v17 = vpop.permute.xlu1 %1101 }
 0x6b9   :  { %v1111_v19 = vadd.f32 %v1102_v17, %v1087_v61  ;;  %v1083_v20 = vpop.permute.xlu0 %1082 }
 0x6ba   :  { %v1088_v23 = vmul.f32 %v1083_v20, %v8011_v30 }
 0x6bb   :  { %v8193_v22 = vsel %vm154_vm1, %v935_v18, %v1111_v19 }
 0x6bc   :  { %6818 = vmatmul.msk.f32.gmra.mxu0 %vm521_vm10, %v8193_v22  ;;  %6822 = vmatmul.msk.f32.gmra.mxu1 %vm521_vm10, %v8193_v22  ;;  %v1112_v12 = vadd.f32 %v1107_v6, %v1088_v23  ;;  %v1269_v25 = vpop.permute.xlu2 %1268 }
 0x6c0   :  { %v931_v26 = vpop.permute.xlu1 %930 }
 0x6c1   :  { %v936_v27 = vadd.f32 %v931_v26, %v912_v24 }
 0x6c2   :  { %v1225_v33 = vpop.permute.xlu0 %1224 }
 0x6c3   :  { %v8202_v29 = vsel %vm154_vm1, %v936_v27, %v1112_v12 }
 0x6c4   :  { %6819 = vmatmul.msk.f32.gmra.mxu0 %vm521_vm10, %v8202_v29  ;;  %6823 = vmatmul.msk.f32.gmra.mxu1 %vm521_vm10, %v8202_v29 }
 0x6c5   :  { %v1305_v40 = vpop.permute.xlu2 %1304 }
 0x6c9   :  { %v1229_v30 = vpop.permute.xlu1 %1228 }
 0x6ca   :  { %v1237_v41 = vpop.permute.xlu0 %1236 }
 0x6ce   :  { %v1349_v47 = vpop.permute.xlu2 %1348 }
 0x6d2   :  { %v1265_v32 = vpop.permute.xlu1 %1264 }
 0x6d3   :  { %v1309_v21 = vpop.permute.xlu0 %1308 }
 0x6d7   :  { %v1313_v60 = vpop.permute.xlu2 %1312 }
 0x6da   :  { %v1273_v34 = vpop.permute.xlu1 %1272 }
 0x6dc   :  { %v1353_v57 = vpop.permute.xlu0 %1352 }
 0x6e0   :  { %v1357_v8 = vpop.permute.xlu2 %1356 }
 0x6e3   :  { %v1345_v7 = vpop.permute.xlu1 %1344 }
 0x6e5   :  { %v1213_v20 = vpop.permute.xlu0 %1212 }
 0x6e9   :  { %v1209_v18 = vpop.permute.xlu2 %1208 }
 0x6ec   :  { %v1277_v0 = vpop.permute.xlu1 %1276 }
 0x6ee   :  { %v1405_v6 = vpop.permute.xlu0 %1404 }
 0x6f5   :  { %v1317_v14 = vpop.permute.xlu1 %1316 }
 0x6fe   :  { %v1205_v17 = vpop.permute.xlu1 %1204 }
 0x706   :  { %v1217_v19 = vpop.permute.xlu1 %1216 }
 0x70f   :  { %v1409_v24 = vpop.permute.xlu1 %1408 }
 0x729   :  { %v8210_v36 = vpop.f32.mrf.mxu0  ;;  %v8216_v39 = vpop.f32.mrf.mxu1 }
 0x72a   :  { %v1279_v38 = vmul.f32 %v1265_v32, %v8210_v36  ;;  %v1239_v5 = vmul.f32 %v1225_v33, %v8210_v36  ;;  %v1359_v42 = vmul.f32 %v1345_v7, %v8210_v36  ;;  %v1319_v44 = vmul.f32 %v1305_v40, %v8210_v36 }
 0x72b   :  { %v1360_v51 = vmul.f32 %v1345_v7, %v8216_v39 }
 0x72c   :  { %1287 = vrot.lane.b32.xlu0 %v1279_v38, %s7547_s8  ;;  %1247 = vrot.lane.b32.xlu1 %v1239_v5, %s7548_s21 }
 0x731   :  { %v8218_v16 = vpop.f32.mrf.mxu0  ;;  %v8226_v46 = vpop.f32.mrf.mxu1 }
 0x732   :  { %v1240_v43 = vmul.f32 %v1229_v30, %v8218_v16  ;;  %v1362_v49 = vmul.f32 %v1349_v47, %v8226_v46  ;;  %v1320_v50 = vmul.f32 %v1309_v21, %v8218_v16  ;;  %v1361_v54 = vmul.f32 %v1349_v47, %v8218_v16 }
 0x733   :  { %v1280_v55 = vmul.f32 %v1269_v25, %v8218_v16 }
 0x734   :  { %1375 = vrot.lane.b32.xlu0 %v1359_v42, %s7549_s7  ;;  %1249 = vrot.lane.b32.xlu2 %v1240_v43, %s7548_s21 }
 0x735   :  { %1327 = vrot.lane.b32.xlu1 %v1319_v44, %s7550_s24  ;;  %v1220_v44 = vmul.f32 %v1209_v18, %v8218_v16 }
 0x739   :  { %v8234_v52 = vpop.f32.mrf.mxu0  ;;  %v8242_v56 = vpop.f32.mrf.mxu1 }
 0x73a   :  { %v1281_v53 = vmul.f32 %v1273_v34, %v8234_v52  ;;  %v1241_v58 = vmul.f32 %v1233_v31, %v8234_v52  ;;  %v1363_v59 = vmul.f32 %v1353_v57, %v8234_v52  ;;  %v1364_v28 = vmul.f32 %v1353_v57, %v8242_v56 }
 0x73b   :  { %v1321_v1 = vmul.f32 %v1313_v60, %v8234_v52  ;;  %v1219_v31 = vmul.f32 %v1205_v17, %v8210_v36 }
 0x73c   :  { %1381 = vrot.lane.b32.xlu0 %v1362_v49, %s7549_s7  ;;  %1329 = vrot.lane.b32.xlu2 %v1320_v50, %s7550_s24 }
 0x73d   :  { %1377 = vrot.lane.b32.xlu1 %v1360_v51, %s7549_s7 }
 0x741   :  { %v8250_v62 = vpop.f32.mrf.mxu0  ;;  %v8257_v2 = vpop.f32.mrf.mxu1 }
 0x742   :  { %v1282_v48 = vmul.f32 %v1277_v0, %v8250_v62  ;;  %v1242_v9 = vmul.f32 %v1237_v41, %v8250_v62  ;;  %v1366_v10 = vmul.f32 %v1357_v8, %v8257_v2  ;;  %v1322_v15 = vmul.f32 %v1317_v14, %v8250_v62 }
 0x743   :  { %v1365_v61 = vmul.f32 %v1357_v8, %v8250_v62 }
 0x744   :  { %1291 = vrot.lane.b32.xlu0 %v1281_v53, %s7547_s8  ;;  %1379 = vrot.lane.b32.xlu2 %v1361_v54, %s7549_s7 }
 0x745   :  { %1289 = vrot.lane.b32.xlu1 %v1280_v55, %s7547_s8 }
 0x74c   :  { %1251 = vrot.lane.b32.xlu2 %v1241_v58, %s7548_s21  ;;  %1383 = vrot.lane.b32.xlu0 %v1363_v59, %s7549_s7 }
 0x74d   :  { %1385 = vrot.lane.b32.xlu1 %v1364_v28, %s7549_s7  ;;  %v1221_v28 = vmul.f32 %v1213_v20, %v8234_v52 }
 0x754   :  { %1331 = vrot.lane.b32.xlu2 %v1321_v1, %s7550_s24  ;;  %1416 = vperm.xlu0 %7207, %v8059_v37  }
 0x755   :  { %1293 = vrot.lane.b32.xlu1 %v1282_v48, %s7547_s8  ;;  %v1222_v48 = vmul.f32 %v1217_v19, %v8250_v62 }
 0x75c   :  { %1253 = vrot.lane.b32.xlu2 %v1242_v9, %s7548_s21 }
 0x75d   :  { %1389 = vrot.lane.b32.xlu1 %v1366_v10, %s7549_s7 }
 0x764   :  { %1333 = vrot.lane.b32.xlu2 %v1322_v15, %s7550_s24 }
 0x76c   :  { %1387 = vrot.lane.b32.xlu2 %v1365_v61, %s7549_s7 }
 0x774   :  { %1412 = vperm.xlu2 %7209, %v8051_v35  }
 0x78e   :  { %v1250_v23 = vpop.permute.xlu2 %1249 }
 0x78f   :  { %v1260_v47 = vadd.f32 %v1250_v23, %v1220_v44 }
 0x796   :  { %v1330_v26 = vpop.permute.xlu2 %1329 }
 0x79e   :  { %v1248_v12 = vpop.permute.xlu1 %1247  ;;  %v1380_v27 = vpop.permute.xlu2 %1379 }
 0x79f   :  { %v1288_v4 = vpop.permute.xlu0 %1287  ;;  %v1259_v25 = vadd.f32 %v1248_v12, %v1219_v31 }
 0x7a1   :  { %v1299_v34 = vadd.f32 %v1288_v4, %v1259_v25 }
 0x7a6   :  { %v1252_v30 = vpop.permute.xlu2 %1251 }
 0x7a7   :  { %v1328_v32 = vpop.permute.xlu1 %1327  ;;  %v1376_v33 = vpop.permute.xlu0 %1375  ;;  %v1261_v0 = vadd.f32 %v1252_v30, %v1221_v28 }
 0x7a8   :  { %v1339_v5 = vadd.f32 %v1328_v32, %v1299_v34 }
 0x7ae   :  { %v1332_v38 = vpop.permute.xlu2 %1331 }
 0x7af   :  { %v1378_v40 = vpop.permute.xlu1 %1377  ;;  %v1382_v43 = vpop.permute.xlu0 %1381 }
 0x7b0   :  { %v1391_v41 = vsel %vm112_vm0, %v1376_v33, %v1378_v40  ;;  %v1392_v55 = vsel %vm112_vm0, %v1380_v27, %v1382_v43 }
 0x7b1   :  { %v1399_v7 = vadd.f32 %v1391_v41, %v1339_v5 }
 0x7b3   :  { %v8270_v42 = vadd.f32 %v1405_v6, %v1399_v7 }
 0x7b5   :  { %1576 = vrot.lane.b32.xlu0 %v8270_v42, %s7551_s28  ;;  %v1440_v53 = vmul.f32 %v8270_v42, %v8270_v42  ;;  %v1424_v27 = vsel %vm1423_vm6, %v8270_v42, 0.0 }
 0x7b6   :  { %v1254_v21 = vpop.permute.xlu2 %1253 }
 0x7b7   :  { %v1290_v49 = vpop.permute.xlu1 %1289  ;;  %v1292_v54 = vpop.permute.xlu0 %1291  ;;  %v1262_v14 = vadd.f32 %v1254_v21, %v1222_v48  ;;  %v1444_v31 = vsel %vm1423_vm6, %v1440_v53, 0.0 }
 0x7b8   :  { %v1300_v50 = vadd.f32 %v1290_v49, %v1260_v47  ;;  %v1301_v8 = vadd.f32 %v1292_v54, %v1261_v0  ;;  %v7552_v54 = vmov 448.0  }
 0x7b9   :  { %7410 = vrcp.f32 %v7552_v54 }
 0x7ba   :  { %v1340_v51 = vadd.f32 %v1330_v26, %v1300_v50  ;;  %v1341_v61 = vadd.f32 %v1332_v38, %v1301_v8 }
 0x7bc   :  { %v1400_v58 = vadd.f32 %v1392_v55, %v1340_v51 }
 0x7bd   :  { %1608 = vrot.lane.b32.xlu0 %v1440_v53, %s7551_s28 }
 0x7be   :  { %v1334_v57 = vpop.permute.xlu2 %1333  ;;  %v8280_v60 = vadd.f32 %v1409_v24, %v1400_v58 }
 0x7bf   :  { %v1386_v59 = vpop.permute.xlu1 %1385  ;;  %v1384_v9 = vpop.permute.xlu0 %1383 }
 0x7c0   :  { %v1393_v15 = vsel %vm112_vm0, %v1384_v9, %v1386_v59  ;;  %v1441_v18 = vmul.f32 %v8280_v60, %v8280_v60  ;;  %v1425_v23 = vsel %vm1423_vm6, %v8280_v60, 0.0 }
 0x7c1   :  { %v1401_v20 = vadd.f32 %v1393_v15, %v1341_v61  ;;  %v1426_v30 = vadd.f32 %v1425_v23, %v1424_v27 }
 0x7c2   :  { %v1445_v6 = vsel %vm1423_vm6, %v1441_v18, 0.0 }
 0x7c3   :  { %v1446_v38 = vadd.f32 %v1445_v6, %v1444_v31 }
 0x7c5   :  { %1578 = vrot.lane.b32.xlu0 %v8280_v60, %s7551_s28 }
 0x7c6   :  { %v1388_v1 = vpop.permute.xlu2 %1387 }
 0x7c7   :  { %v1294_v10 = vpop.permute.xlu1 %1293  ;;  %v1417_v34 = vpop.permute.xlu0 %1416 }
 0x7c8   :  { %v1302_v17 = vadd.f32 %v1294_v10, %v1262_v14 }
 0x7ca   :  { %v1342_v19 = vadd.f32 %v1334_v57, %v1302_v17  ;;  %v7411_v57 = vpop.eup %7410 }
 0x7cb   :  { %v1461_v58 = vmul.f32 448.0, %v7411_v57  ;;  %vm1465_vm7 = vweird.f32 %v7411_v57 }
 0x7cd   :  { %1610 = vrot.lane.b32.xlu0 %v1441_v18, %s7551_s28 }
 0x7ce   :  { %v1413_v24 = vpop.permute.xlu2 %1412 }
 0x7cf   :  { %v8292_v26 = vadd.f32 %v1413_v24, %v1401_v20  ;;  %v1390_v12 = vpop.permute.xlu1 %1389 }
 0x7d0   :  { %v1394_v4 = vsel %vm112_vm0, %v1388_v1, %v1390_v12  ;;  %v1462_v1 = vsub.f32 1.0, %v1461_v58 }
 0x7d1   :  { %v1402_v32 = vadd.f32 %v1394_v4, %v1342_v19  ;;  %v1427_v25 = vsel %vm1423_vm6, %v8292_v26, 0.0  ;;  %v1442_v33 = vmul.f32 %v8292_v26, %v8292_v26 }
 0x7d2   :  { %v1428_v5 = vadd.f32 %v1427_v25, %v1426_v30  ;;  %v1463_v15 = vmul.f32 %v7411_v57, %v1462_v1 }
 0x7d3   :  { %v8302_v40 = vadd.f32 %v1417_v34, %v1402_v32  ;;  %v1447_v41 = vsel %vm1423_vm6, %v1442_v33, 0.0 }
 0x7d4   :  { %v1448_v7 = vadd.f32 %v1447_v41, %v1446_v38  ;;  %v1464_v19 = vadd.f32 %v7411_v57, %v1463_v15 }
 0x7d5   :  { %1580 = vrot.lane.b32.xlu0 %v8292_v26, %s7551_s28  ;;  %v1429_v43 = vsel %vm1423_vm6, %v8302_v40, 0.0  ;;  %v1443_v44 = vmul.f32 %v8302_v40, %v8302_v40 }
 0x7d6   :  { %v1430_v47 = vadd.f32 %v1429_v43, %v1428_v5  ;;  %v1466_v34 = vsel %vm1465_vm7, %v7411_v57, %v1464_v19 }
 0x7d7   :  { %v1449_v21 = vsel %vm1423_vm6, %v1443_v44, 0.0 }
 0x7d8   :  { %1431 = vadd.xlane.f32.xlu1 %v1430_v47  ;;  %v1450_v49 = vadd.f32 %v1449_v21, %v1448_v7 }
 0x7da   :  { %1451 = vadd.xlane.f32.xlu2 %v1450_v49 }
 0x7dd   :  { %1614 = vrot.lane.b32.xlu0 %v1443_v44, %s7551_s28 }
 0x7f1   :  { %1582 = vrot.lane.b32.xlu1 %v8302_v40, %s7551_s28 }
 0x7f2   :  { %1612 = vrot.lane.b32.xlu2 %v1442_v33, %s7551_s28 }
 0x827   :  { %v1577_v50 = vpop.permute.xlu0 %1576 }
 0x828   :  { %v1588_v41 = vsel %vm1423_vm6, %v1577_v50, 0.0 }
 0x82f   :  { %v1609_v51 = vpop.permute.xlu0 %1608 }
 0x830   :  { %v1620_v20 = vsel %vm1423_vm6, %v1609_v51, 0.0 }
 0x837   :  { %v1579_v53 = vpop.permute.xlu0 %1578 }
 0x838   :  { %v1589_v5 = vsel %vm1423_vm6, %v1579_v53, 0.0 }
 0x839   :  { %v1590_v43 = vadd.f32 %v1589_v5, %v1588_v41 }
 0x83f   :  { %v1611_v55 = vpop.permute.xlu0 %1610 }
 0x840   :  { %v1621_v61 = vsel %vm1423_vm6, %v1611_v55, 0.0 }
 0x841   :  { %v1622_v6 = vadd.f32 %v1621_v61, %v1620_v20 }
 0x847   :  { %v1581_v59 = vpop.permute.xlu0 %1580 }
 0x848   :  { %v1591_v7 = vsel %vm1423_vm6, %v1581_v59, 0.0 }
 0x849   :  { %v1592_v44 = vadd.f32 %v1591_v7, %v1590_v43  ;;  %v7554_v43 = vmov 8  }
 0x84b   :  { %v1432_v28 = vpop.xlane.xlu1 %1431 }
 0x84c   :  { %v1433_v0 = vrot.slane %v1432_v28, 4 }
 0x84d   :  { %v1452_v48 = vpop.xlane.xlu2 %1451 }
 0x84e   :  { %v1434_v8 = vadd.f32 %v1433_v0, %v1432_v28  ;;  %v1453_v9 = vrot.slane %v1452_v48, 4  ;;  %v7553_v28 = vmov 7  }
 0x84f   :  { %v1615_v12 = vpop.permute.xlu0 %1614  ;;  %7210 = vset.pattern.permute.xlu0 %v7553_v28  ;;  %7212 = vset.pattern.permute.xlu1 %v7553_v28 }
 0x850   :  { %v1454_v10 = vadd.f32 %v1453_v9, %v1452_v48  ;;  %v1435_v14 = vrot.slane %v1434_v8, 2  ;;  %v1625_v25 = vsel %vm1423_vm6, %v1615_v12, 0.0  ;;  %7211 = vset.pattern.permute.xlu2 %v7553_v28 }
 0x852   :  { %v1436_v17 = vadd.f32 %v1435_v14, %v1434_v8  ;;  %v1455_v18 = vrot.slane %v1454_v10, 2 }
 0x854   :  { %v1437_v23 = vrot.slane %v1436_v17, 1  ;;  %v1456_v24 = vadd.f32 %v1455_v18, %v1454_v10 }
 0x855   :  { %v1613_v27 = vpop.permute.xlu2 %1612 }
 0x856   :  { %v1623_v4 = vsel %vm1423_vm6, %v1613_v27, 0.0  ;;  %v1438_v30 = vadd.f32 %v1437_v23, %v1436_v17  ;;  %v1457_v31 = vrot.slane %v1456_v24, 1 }
 0x857   :  { %v1624_v32 = vadd.f32 %v1623_v4, %v1622_v6 }
 0x858   :  { %6913 = vpush %v1438_v30  ;;  %v1458_v33 = vadd.f32 %v1457_v31, %v1456_v24 }
 0x859   :  { %v1626_v38 = vadd.f32 %v1625_v25, %v1624_v32 }
 0x85a   :  { %6915 = vpush %v1458_v33 }
 0x85b   :  { %6917 = vpush %v1466_v34  ;;  %1627 = vadd.xlane.f32.xlu1 %v1626_v38 }
 0x863   :  { %v1583_v47 = vpop.permute.xlu1 %1582 }
 0x864   :  { %v1593_v21 = vsel %vm1423_vm6, %v1583_v47, 0.0  ;;  %v8357_v47 = vld [vmem:[%s10688_s5] sm:$0xff] }
 0x865   :  { %v1594_v49 = vadd.f32 %v1593_v21, %v1592_v44 }
 0x867   :  { %1595 = vadd.xlane.f32.xlu0 %v1594_v49 }
 0x889   :  { %s6914_s29 = spop %6913 }
 0x88b   :  { %s6916_s30 = spop %6915 }
 0x88c   :  { %s8324_s1 = spop %6917 }
 0x88d   :  { %s8327_s25 = smul.f32 %s8324_s1, %s6914_s29 }
 0x88e   :  { %s1477_s6 = smul.f32 %s8324_s1, %s6916_s30 }
 0x88f   :  { %s1478_s18 = smul.f32 %s8327_s25, %s8327_s25  ;;  %v1499_v18 = vstv %s8327_s25 }
 0x891   :  { %s1479_s19 = ssub.f32 %s1477_s6, %s1478_s18 }
 0x893   :  { %s1480_s20 = smax.f32 %s7528_s22, %s1479_s19 }
 0x894   :  { %s1481_s23 = sadd.f32 1e-08, %s1480_s20 }
 0x896   :  { %v1482_v50 = vstv %s1481_s23 }
 0x897   :  { %7412 = vrsqrt.f32 %v1482_v50  ;;  %vm1489_vm9 = vweird.f32 %v1482_v50 }
 0x89d   :  { %v7413_v51 = vpop.eup %7412 }
 0x89e   :  { %v1484_v53 = vmul.f32 %v7413_v51, %v1482_v50  ;;  %vm1490_vm8 = vweird.f32 %v7413_v51 }
 0x89f   :  { %vm1491_vm11 = vmor %vm1489_vm9, %vm1490_vm8 }
 0x8a0   :  { %v1485_v54 = vmul.f32 %v7413_v51, %v1484_v53  ;;  %v8364_v53 = vld [vmem:[%s10688_s5 + $0x10] sm:$0xff] }
 0x8a2   :  { %v1486_v55 = vmul.f32 0.5, %v1485_v54 }
 0x8a4   :  { %v1487_v57 = vsub.f32 1.5, %v1486_v55 }
 0x8a6   :  { %v1488_v58 = vmul.f32 %v7413_v51, %v1487_v57 }
 0x8a8   :  { %v1492_v59 = vsel %vm1491_vm11, %v7413_v51, %v1488_v58 }
 0x8a9   :  { %6919 = vpush %v1492_v59  ;;  %v8374_v59 = vld [vmem:[%s10688_s5 + $0x18] sm:$0xff] }
 0x8ce   :  { %v1628_v0 = vpop.xlane.xlu1 %1627 }
 0x8cf   :  { %v1629_v1 = vrot.slane %v1628_v0, 4 }
 0x8d1   :  { %v1630_v48 = vadd.f32 %v1629_v1, %v1628_v0 }
 0x8d3   :  { %v1631_v9 = vrot.slane %v1630_v48, 2 }
 0x8d5   :  { %v1632_v6 = vadd.f32 %v1631_v9, %v1630_v48 }
 0x8da   :  { %s6920_s23 = spop %6919  ;;  %v1596_v8 = vpop.xlane.xlu0 %1595 }
 0x8db   :  { %v1494_v10 = vstv %s6920_s23  ;;  %v1597_v14 = vrot.slane %v1596_v8, 4 }
 0x8dc   :  { %v1495_v15 = vmul.f32 %v8045_v13, %v1494_v10  ;;  %v8338_v61 = vmul.f32 %v8051_v35, %v1494_v10  ;;  %v8341_v17 = vmul.f32 %v8059_v37, %v1494_v10  ;;  %v1496_v35 = vmul.f32 %v8073_v45, %v1494_v10  ;;  %v8382_v10 = vld [vmem:[%s10688_s5 + $0x8] sm:$0xff] }
 0x8dd   :  { %v1598_v20 = vadd.f32 %v1597_v14, %v1596_v8  ;;  %v1633_v37 = vrot.slane %v1632_v6, 1 }
 0x8de   :  { %v1500_v23 = vmul.f32 %v1499_v18, %v1495_v15  ;;  %v1502_v24 = vmul.f32 %v1499_v18, %v8338_v61  ;;  %v1503_v19 = vmul.f32 %v1499_v18, %v8341_v17  ;;  %v1501_v30 = vmul.f32 %v1499_v18, %v1496_v35 }
 0x8df   :  { %v1599_v12 = vrot.slane %v1598_v20, 2  ;;  %v1634_v31 = vadd.f32 %v1633_v37, %v1632_v6 }
 0x8e0   :  { %1508 = vrot.lane.b32.xlu2 %v1500_v23, %s7529_s26  ;;  %1512 = vrot.lane.b32.xlu0 %v1502_v24, %s7529_s26 }
 0x8e1   :  { %1514 = vrot.lane.b32.xlu1 %v1503_v19, %s7529_s26  ;;  %v1600_v13 = vadd.f32 %v1599_v12, %v1598_v20 }
 0x8e3   :  { %v1601_v27 = vrot.slane %v1600_v13, 1 }
 0x8e5   :  { %v1602_v4 = vadd.f32 %v1601_v27, %v1600_v13  ;;  %v7555_v27 = vmov 50  }
 0x8e7   :  { %6921 = vpush %v1602_v4  ;;  %v1754_v4 = vld [vmem:[%s10692_s9 + $0x10] sm:$0xff] }
 0x8e8   :  { %1510 = vrot.lane.b32.xlu2 %v1501_v30, %s7529_s26  ;;  %1526 = vperm.xlu0 %7210, %v1495_v15   ;;  %6923 = vpush %v1634_v31  ;;  %v2894_v30 = vld [vmem:[%s10694_s11 + $0x10] sm:$0xff]  ;;  %v1753_v31 = vld [vmem:[%s10692_s9 + $0x8] sm:$0xff] }
 0x8f0   :  { %7214 = vset.pattern.permute.xlu0 %v7554_v43 }
 0x918   :  { %s6922_s29 = spop %6921 }
 0x919   :  { %s1644_s30 = smul.f32 %s6922_s29, %s8324_s1  ;;  %s6924_s25 = spop %6923 }
 0x91a   :  { %s1653_s6 = smul.f32 %s6924_s25, %s8324_s1  ;;  %s10709_s25 = smov 108  }
 0x91b   :  { %s1654_s18 = smul.f32 %s1644_s30, %s1644_s30  ;;  %v1675_v51 = vstv %s1644_s30 }
 0x91d   :  { %s1655_s19 = ssub.f32 %s1653_s6, %s1654_s18  ;;  %s10711_s6 = smov 118  }
 0x91e   :  { %s10707_s18 = smov 88  }
 0x91f   :  { %s1656_s20 = smax.f32 %s7528_s22, %s1655_s19  ;;  %s10703_s19 = smov 123  }
 0x920   :  { %s1657_s23 = sadd.f32 1e-08, %s1656_s20 }
 0x922   :  { %v1658_v32 = vstv %s1657_s23 }
 0x923   :  { %7414 = vrsqrt.f32 %v1658_v32  ;;  %vm1665_vm13 = vweird.f32 %v1658_v32 }
 0x929   :  { %v7415_v25 = vpop.eup %7414 }
 0x92a   :  { %v1660_v33 = vmul.f32 %v7415_v25, %v1658_v32  ;;  %vm1666_vm12 = vweird.f32 %v7415_v25  ;;  %v2893_v32 = vld [vmem:[%s10694_s11 + $0x8] sm:$0xff] }
 0x92b   :  { %vm1667_vm14 = vmor %vm1665_vm13, %vm1666_vm12  ;;  %vm2346_vm13 = vcmask 1041408  }
 0x92c   :  { %v1661_v34 = vmul.f32 %v7415_v25, %v1660_v33  ;;  %v2892_v33 = vld [vmem:[%s10694_s11] sm:$0xff] }
 0x92e   :  { %v1662_v38 = vmul.f32 0.5, %v1661_v34  ;;  %v7557_v34 = vmov 52  }
 0x930   :  { %v1663_v5 = vsub.f32 1.5, %v1662_v38 }
 0x932   :  { %v1664_v41 = vmul.f32 %v7415_v25, %v1663_v5 }
 0x934   :  { %v1668_v7 = vsel %vm1667_vm14, %v7415_v25, %v1664_v41  ;;  %v1752_v25 = vld [vmem:[%s10692_s9] sm:$0xff]  ;;  %v7558_v41 = vmov 53   ;;  %vm2333_vm14 = vcmask 80896  }
 0x935   :  { %6925 = vpush %v1668_v7  ;;  %v7559_v7 = vmov 49  }
 0x93a   :  { %v1509_v48 = vpop.permute.xlu2 %1508 }
 0x93b   :  { %v1520_v8 = vsub.f32 %v8357_v47, %v1509_v48 }
 0x942   :  { %v1511_v9 = vpop.permute.xlu2 %1510 }
 0x943   :  { %v1521_v14 = vsub.f32 %v8382_v10, %v1511_v9 }
 0x952   :  { %v1513_v50 = vpop.permute.xlu0 %1512 }
 0x953   :  { %v1522_v54 = vsub.f32 %v8364_v53, %v1513_v50  ;;  %v1515_v12 = vpop.permute.xlu1 %1514 }
 0x966   :  { %s6926_s29 = spop %6925 }
 0x967   :  { %v1670_v44 = vstv %s6926_s29 }
 0x968   :  { %v1671_v21 = vmul.f32 %v8357_v47, %v1670_v44  ;;  %v1672_v49 = vmul.f32 %v8073_v45, %v1670_v44  ;;  %v1673_v45 = vmul.f32 %v8364_v53, %v1670_v44  ;;  %v1674_v0 = vmul.f32 %v8374_v59, %v1670_v44  ;;  %v1527_v44 = vpop.permute.xlu0 %1526 }
 0x96a   :  { %1707 = vperm.xlu1 %7212, %v1672_v49   ;;  %1702 = vperm.xlu2 %7211, %v1671_v21   ;;  %v1676_v55 = vmul.f32 %v1675_v51, %v1671_v21  ;;  %v1677_v57 = vmul.f32 %v1675_v51, %v1672_v49  ;;  %v1678_v58 = vmul.f32 %v1675_v51, %v1673_v45 }
 0x96b   :  { %v1679_v1 = vmul.f32 %v1675_v51, %v1674_v0  ;;  %v1544_v49 = vmul.f32 %v1527_v44, %v8270_v42 }
 0x972   :  { %7217 = vset.pattern.permute.xlu1 %v7554_v43  ;;  %1684 = vrot.lane.b32.xlu2 %v1676_v55, %s7529_s26 }
 0x973   :  { %1560 = vperm.xlu1 %7217, %v1522_v54  }
 0x97a   :  { %1686 = vrot.lane.b32.xlu2 %v1677_v57, %s7529_s26 }
 0x982   :  { %1688 = vrot.lane.b32.xlu2 %v1678_v58, %s7529_s26 }
 0x98a   :  { %1690 = vrot.lane.b32.xlu2 %v1679_v1, %s7529_s26 }
 0x992   :  { %1531 = vperm.xlu2 %7211, %v1496_v35   ;;  %v1523_v35 = vsub.f32 %v8374_v59, %v1515_v12 }
 0x99a   :  { %7213 = vset.pattern.permute.xlu2 %v7554_v43 }
 0x99b   :  { %1550 = vperm.xlu2 %7213, %v1520_v8  }
 0x9a3   :  { %1555 = vperm.xlu2 %7213, %v1521_v14  }
 0x9ab   :  { %7216 = vset.pattern.permute.xlu2 %v7553_v28 }
 0x9ac   :  { %1712 = vperm.xlu2 %7216, %v1673_v45  }
 0x9b4   :  { %7219 = vset.pattern.permute.xlu2 %v7554_v43 }
 0x9c4   :  { %v8386_v15 = vpop.permute.xlu2 %1702 }
 0x9c5   :  { %v1720_v50 = vmul.f32 %v8386_v15, %v8270_v42 }
 0x9cc   :  { %v1685_v18 = vpop.permute.xlu2 %1684 }
 0x9cd   :  { %v1696_v20 = vsub.f32 %v8357_v47, %v1685_v18 }
 0x9cf   :  { %1726 = vperm.xlu0 %7214, %v1696_v20  }
 0x9d4   :  { %v1687_v23 = vpop.permute.xlu2 %1686 }
 0x9d5   :  { %v1697_v24 = vsub.f32 %v8382_v10, %v1687_v23 }
 0x9d7   :  { %7215 = vset.pattern.permute.xlu0 %v7553_v28  ;;  %1731 = vperm.xlu1 %7217, %v1697_v24  }
 0x9d8   :  { %1536 = vperm.xlu0 %7215, %v8338_v61   ;;  %v2895_v61 = vld [vmem:[%s10694_s11 + $0x18] sm:$0xf] }
 0x9d9   :  { %6834 = vmatpush.msk.msra.mxu0 %vm1769_vm15, %v2895_v61  ;;  %v7560_v61 = vmov 9  }
 0x9db   :  { %2912 = vmatpush.msra.mxu0 %v2894_v30 }
 0x9dc   :  { %v1689_v19 = vpop.permute.xlu2 %1688 }
 0x9dd   :  { %v1698_v6 = vsub.f32 %v8364_v53, %v1689_v19  ;;  %2913 = vmatpush.msra.mxu0 %v2893_v32 }
 0x9df   :  { %1736 = vperm.xlu2 %7219, %v1698_v6   ;;  %7218 = vset.pattern.permute.xlu1 %v7553_v28  ;;  %v1755_v28 = vld [vmem:[%s10692_s9 + $0x18] sm:$0xf]  ;;  %s10705_s9 = smov 98  }
 0x9e0   :  { %1717 = vperm.xlu0 %7215, %v1674_v0   ;;  %1541 = vperm.xlu1 %7218, %v8341_v17   ;;  %v7556_v17 = vmov 51  }
 0x9e1   :  { %6824 = vmatpush.msk.msrb.mxu2 %vm1769_vm15, %v1755_v28  ;;  %2914 = vmatpush.msra.mxu0 %v2892_v33 }
 0x9e3   :  { %1786 = vmatpush.msrb.mxu2 %v1754_v4 }
 0x9e4   :  { %v1691_v13 = vpop.permute.xlu2 %1690 }
 0x9e5   :  { %v1699_v37 = vsub.f32 %v8374_v59, %v1691_v13  ;;  %1787 = vmatpush.msrb.mxu2 %v1753_v31 }
 0x9e7   :  { %1565 = vperm.xlu2 %7219, %v1523_v35   ;;  %1788 = vmatpush.msrb.mxu2 %v1752_v25 }
 0x9e8   :  { %7220 = vset.pattern.permute.xlu1 %v7554_v43  ;;  %7221 = vset.pattern.permute.xlu0 %v7555_v27  ;;  %v1708_v43 = vpop.permute.xlu1 %1707 }
 0x9e9   :  { %1741 = vperm.xlu1 %7220, %v1699_v37   ;;  %1823 = vperm.xlu0 %7221, %v8357_v47   ;;  %v1721_v42 = vmul.f32 %v1708_v43, %v8280_v60 }
 0x9ec   :  { %v1532_v38 = vpop.permute.xlu2 %1531 }
 0x9ed   :  { %v1545_v0 = vmul.f32 %v1532_v38, %v8280_v60 }
 0x9ef   :  { %7222 = vset.pattern.permute.xlu2 %v7555_v27 }
 0x9f0   :  { %1827 = vperm.xlu2 %7222, %v8382_v10   ;;  %v1561_v51 = vpop.permute.xlu1 %1560 }
 0x9f1   :  { %7223 = vset.pattern.permute.xlu1 %v7555_v27  ;;  %1835 = vperm.xlu0 %7221, %v8374_v59  }
 0x9f2   :  { %1831 = vperm.xlu1 %7223, %v8364_v53  }
 0x9f5   :  { %v1551_v5 = vpop.permute.xlu2 %1550 }
 0x9f6   :  { %v1568_v55 = vadd.f32 %v1551_v5, %v1544_v49 }
 0x9f8   :  { %7224 = vset.pattern.permute.xlu2 %v7556_v17 }
 0x9f9   :  { %1863 = vperm.xlu2 %7224, %v8357_v47   ;;  %7227 = vset.pattern.permute.xlu0 %v7557_v34 }
 0x9fa   :  { %7225 = vset.pattern.permute.xlu1 %v7556_v17  ;;  %1907 = vperm.xlu0 %7227, %v8382_v10  }
 0x9fb   :  { %1867 = vperm.xlu1 %7225, %v8382_v10  }
 0x9fd   :  { %v1556_v21 = vpop.permute.xlu2 %1555 }
 0x9fe   :  { %v1569_v48 = vadd.f32 %v1556_v21, %v1545_v0 }
 0xa01   :  { %1871 = vperm.xlu2 %7224, %v8364_v53  }
 0xa02   :  { %1915 = vperm.xlu0 %7227, %v8374_v59  }
 0xa03   :  { %7226 = vset.pattern.permute.xlu1 %v7557_v34 }
 0xa04   :  { %1903 = vperm.xlu1 %7226, %v8357_v47  }
 0xa06   :  { %v1713_v58 = vpop.permute.xlu2 %1712 }
 0xa07   :  { %v1722_v18 = vmul.f32 %v1713_v58, %v8292_v26 }
 0xa09   :  { %1875 = vperm.xlu2 %7224, %v8374_v59  }
 0xa0a   :  { %7230 = vset.pattern.permute.xlu0 %v7559_v7 }
 0xa0b   :  { %1803 = vperm.xlu0 %7230, %v8357_v47  }
 0xa0c   :  { %1911 = vperm.xlu1 %7226, %v8364_v53  }
 0xa11   :  { %7228 = vset.pattern.permute.xlu2 %v7558_v41 }
 0xa12   :  { %1943 = vperm.xlu2 %7228, %v8357_v47  }
 0xa13   :  { %1815 = vperm.xlu0 %7230, %v8374_v59  }
 0xa14   :  { %7229 = vset.pattern.permute.xlu1 %v7558_v41 }
 0xa15   :  { %1947 = vperm.xlu1 %7229, %v8382_v10  }
 0xa1a   :  { %1951 = vperm.xlu2 %7228, %v8364_v53  }
 0xa1b   :  { %7234 = vset.pattern.permute.xlu0 %v7560_v61 }
 0xa1d   :  { %1955 = vperm.xlu1 %7229, %v8374_v59  }
 0xa22   :  { %7231 = vset.pattern.permute.xlu2 %v7559_v7 }
 0xa23   :  { %1807 = vperm.xlu2 %7231, %v8382_v10  }
 0xa25   :  { %7232 = vset.pattern.permute.xlu1 %v7559_v7 }
 0xa26   :  { %1811 = vperm.xlu1 %7232, %v8364_v53  }
 0xa2b   :  { %7235 = vset.pattern.permute.xlu2 %v7560_v61 }
 0xa2e   :  { %7233 = vset.pattern.permute.xlu1 %v7560_v61 }
 0xa2f   :  { %1983 = vperm.xlu1 %7233, %v8357_v47  }
 0xa39   :  { %v1737_v60 = vpop.permute.xlu2 %1736 }
 0xa3a   :  { %v1746_v23 = vadd.f32 %v1737_v60, %v1722_v18 }
 0xa41   :  { %v1727_v54 = vpop.permute.xlu0 %1726  ;;  %v1566_v35 = vpop.permute.xlu2 %1565 }
 0xa42   :  { %v1744_v57 = vadd.f32 %v1727_v54, %v1720_v50 }
 0xa44   :  { %v8445_v45 = vsel %vm1423_vm6, %v1568_v55, %v1744_v57 }
 0xa45   :  { %6825 = vmatmul.msk.f32.vlgmr.msrb.gmra.mxu2 %vm1756_vm2, %v8445_v45  ;;  %6835 = vmatmul.msk.f32.vlgmr.msra.gmra.mxu0 %vm1756_vm2, %v8445_v45 }
 0xa49   :  { %v1732_v1 = vpop.permute.xlu1 %1731 }
 0xa4a   :  { %v1745_v8 = vadd.f32 %v1732_v1, %v1721_v42  ;;  %v1537_v9 = vpop.permute.xlu0 %1536 }
 0xa4b   :  { %v1546_v14 = vmul.f32 %v1537_v9, %v8292_v26 }
 0xa4c   :  { %v8457_v15 = vsel %vm1423_vm6, %v1569_v48, %v1745_v8 }
 0xa4d   :  { %6826 = vmatmul.msk.f32.gmra.mxu2 %vm1756_vm2, %v8457_v15  ;;  %6836 = vmatmul.msk.f32.gmra.mxu0 %vm1756_vm2, %v8457_v15  ;;  %v1570_v20 = vadd.f32 %v1561_v51, %v1546_v14 }
 0xa4f   :  { %v8465_v19 = vsel %vm1423_vm6, %v1570_v20, %v1746_v23 }
 0xa52   :  { %v1542_v24 = vpop.permute.xlu1 %1541  ;;  %v1718_v6 = vpop.permute.xlu0 %1717 }
 0xa53   :  { %v1547_v12 = vmul.f32 %v1542_v24, %v8302_v40  ;;  %v1723_v13 = vmul.f32 %v1718_v6, %v8302_v40  ;;  %v1828_v40 = vpop.permute.xlu2 %1827 }
 0xa55   :  { %6827 = vmatmul.msk.f32.gmra.mxu2 %vm1756_vm2, %v8465_v19  ;;  %6837 = vmatmul.msk.f32.gmra.mxu0 %vm1756_vm2, %v8465_v19  ;;  %v1571_v26 = vadd.f32 %v1566_v35, %v1547_v12 }
 0xa5b   :  { %v1742_v37 = vpop.permute.xlu1 %1741  ;;  %v1864_v4 = vpop.permute.xlu2 %1863 }
 0xa5c   :  { %v1747_v27 = vadd.f32 %v1742_v37, %v1723_v13  ;;  %v1824_v25 = vpop.permute.xlu0 %1823 }
 0xa5e   :  { %v8474_v28 = vsel %vm1423_vm6, %v1571_v26, %v1747_v27 }
 0xa5f   :  { %6828 = vmatmul.msk.f32.gmra.mxu2 %vm1756_vm2, %v8474_v28  ;;  %6838 = vmatmul.msk.f32.gmra.mxu0 %vm1756_vm2, %v8474_v28 }
 0xa63   :  { %v1872_v31 = vpop.permute.xlu2 %1871 }
 0xa64   :  { %v1832_v17 = vpop.permute.xlu1 %1831  ;;  %v1836_v44 = vpop.permute.xlu0 %1835 }
 0xa6b   :  { %v1876_v34 = vpop.permute.xlu2 %1875 }
 0xa6c   :  { %v1908_v58 = vpop.permute.xlu0 %1907 }
 0xa6d   :  { %v1868_v30 = vpop.permute.xlu1 %1867 }
 0xa73   :  { %v1944_v50 = vpop.permute.xlu2 %1943 }
 0xa74   :  { %v1916_v60 = vpop.permute.xlu0 %1915 }
 0xa76   :  { %v1904_v33 = vpop.permute.xlu1 %1903 }
 0xa7b   :  { %v1952_v24 = vpop.permute.xlu2 %1951 }
 0xa7d   :  { %v1804_v37 = vpop.permute.xlu0 %1803 }
 0xa7e   :  { %v1912_v21 = vpop.permute.xlu1 %1911 }
 0xa85   :  { %v1816_v61 = vpop.permute.xlu0 %1815 }
 0xa87   :  { %v1948_v42 = vpop.permute.xlu1 %1947 }
 0xac2   :  { %v2916_v32 = vpop.f32.mrf.mxu0 }
 0xac8   :  { %v8481_v38 = vpop.f32.mrf.mxu2 }
 0xac9   :  { %v1918_v5 = vmul.f32 %v1904_v33, %v8481_v38  ;;  %v1878_v41 = vmul.f32 %v1864_v4, %v8481_v38  ;;  %v1838_v7 = vmul.f32 %v1824_v25, %v8481_v38  ;;  %v1958_v55 = vmul.f32 %v1944_v50, %v8481_v38 }
 0xaca   :  { %v2919_v43 = vpop.f32.mrf.mxu0 }
 0xacb   :  { %1926 = vrot.lane.b32.xlu0 %v1918_v5, %s10705_s9  ;;  %1886 = vrot.lane.b32.xlu1 %v1878_v41, %s10709_s25 }
 0xacc   :  { %1846 = vrot.lane.b32.xlu2 %v1838_v7, %s10711_s6 }
 0xad0   :  { %v8489_v49 = vpop.f32.mrf.mxu2 }
 0xad1   :  { %v1879_v51 = vmul.f32 %v1868_v30, %v8489_v49  ;;  %v1839_v54 = vmul.f32 %v1828_v40, %v8489_v49  ;;  %v1959_v1 = vmul.f32 %v1948_v42, %v8489_v49  ;;  %v1919_v8 = vmul.f32 %v1908_v58, %v8489_v49 }
 0xad2   :  { %v2922_v57 = vpop.f32.mrf.mxu0 }
 0xad3   :  { %1888 = vrot.lane.b32.xlu0 %v1879_v51, %s10709_s25  ;;  %1848 = vrot.lane.b32.xlu1 %v1839_v54, %s10711_s6 }
 0xad4   :  { %1966 = vrot.lane.b32.xlu2 %v1958_v55, %s10707_s18 }
 0xad8   :  { %v8497_v0 = vpop.f32.mrf.mxu2 }
 0xad9   :  { %v1920_v48 = vmul.f32 %v1912_v21, %v8497_v0  ;;  %v1880_v14 = vmul.f32 %v1872_v31, %v8497_v0  ;;  %v1840_v20 = vmul.f32 %v1832_v17, %v8497_v0  ;;  %v1960_v12 = vmul.f32 %v1952_v24, %v8497_v0 }
 0xada   :  { %v1818_v17 = vmul.f32 %v1804_v37, %v8481_v38 }
 0xadb   :  { %1968 = vrot.lane.b32.xlu1 %v1959_v1, %s10707_s18  ;;  %1930 = vrot.lane.b32.xlu0 %v1920_v48, %s10705_s9 }
 0xadc   :  { %1928 = vrot.lane.b32.xlu2 %v1919_v8, %s10705_s9  ;;  %v2925_v9 = vpop.f32.mrf.mxu0 }
 0xadd   :  { %2964 = vmatpush.msra.mxu1 %v2925_v9 }
 0xadf   :  { %2965 = vmatpush.msra.mxu1 %v2922_v57 }
 0xae1   :  { %2966 = vmatpush.msra.mxu1 %v2919_v43 }
 0xae2   :  { %v8506_v18 = vpop.f32.mrf.mxu2 }
 0xae3   :  { %1890 = vrot.lane.b32.xlu1 %v1880_v14, %s10709_s25  ;;  %2967 = vmatpush.msra.mxu1 %v2916_v32  ;;  %v1921_v23 = vmul.f32 %v1916_v60, %v8506_v18  ;;  %v1881_v6 = vmul.f32 %v1876_v34, %v8506_v18  ;;  %v1821_v8 = vmul.f32 %v1816_v61, %v8506_v18 }
 0xae4   :  { %1850 = vrot.lane.b32.xlu2 %v1840_v20, %s10711_s6 }
 0xae5   :  { %2968 = vmatpush.msra.mxu1 %v8202_v29  ;;  %1932 = vrot.lane.b32.xlu0 %v1921_v23, %s10705_s9  ;;  %v1841_v29 = vmul.f32 %v1836_v44, %v8506_v18 }
 0xae7   :  { %2969 = vmatpush.msra.mxu1 %v8193_v22  ;;  %v1956_v22 = vpop.permute.xlu1 %1955 }
 0xae9   :  { %2970 = vmatpush.msra.mxu1 %v8184_v11  ;;  %v1961_v11 = vmul.f32 %v1956_v22, %v8506_v18 }
 0xaeb   :  { %2971 = vmatpush.msra.mxu1 %v8174_v63  ;;  %1892 = vrot.lane.b32.xlu1 %v1881_v6, %s10709_s25  ;;  %v1808_v63 = vpop.permute.xlu2 %1807 }
 0xaec   :  { %1970 = vrot.lane.b32.xlu2 %v1960_v12, %s10707_s18  ;;  %v1819_v54 = vmul.f32 %v1808_v63, %v8489_v49 }
 0xaed   :  { %1987 = vperm.xlu0 %7234, %v8382_v10  }
 0xaef   :  { %v1812_v35 = vpop.permute.xlu1 %1811 }
 0xaf0   :  { %v1820_v42 = vmul.f32 %v1812_v35, %v8497_v0 }
 0xaf3   :  { %1991 = vperm.xlu1 %7233, %v8364_v53  }
 0xaf4   :  { %1852 = vrot.lane.b32.xlu2 %v1841_v29, %s10711_s6 }
 0xaf7   :  { %v1984_v27 = vpop.permute.xlu1 %1983 }
 0xafc   :  { %1972 = vrot.lane.b32.xlu2 %v1961_v11, %s10707_s18 }
 0xb04   :  { %1995 = vperm.xlu2 %7235, %v8374_v59  }
 0xb26   :  { %v1847_v13 = vpop.permute.xlu2 %1846 }
 0xb27   :  { %v1858_v4 = vadd.f32 %v1847_v13, %v1818_v17 }
 0xb2e   :  { %v1967_v26 = vpop.permute.xlu2 %1966 }
 0xb36   :  { %v1929_v40 = vpop.permute.xlu2 %1928 }
 0xb3d   :  { %v1887_v30 = vpop.permute.xlu1 %1886  ;;  %v1927_v31 = vpop.permute.xlu0 %1926 }
 0xb3e   :  { %v1898_v32 = vadd.f32 %v1887_v30, %v1858_v4  ;;  %v1851_v25 = vpop.permute.xlu2 %1850 }
 0xb3f   :  { %v1860_v9 = vadd.f32 %v1851_v25, %v1820_v42 }
 0xb40   :  { %v1938_v33 = vadd.f32 %v1927_v31, %v1898_v32 }
 0xb42   :  { %v1978_v34 = vadd.f32 %v1967_v26, %v1938_v33 }
 0xb44   :  { %v8529_v5 = vadd.f32 %v1984_v27, %v1978_v34 }
 0xb45   :  { %v1849_v41 = vpop.permute.xlu1 %1848  ;;  %v1889_v7 = vpop.permute.xlu0 %1888 }
 0xb46   :  { %v1971_v43 = vpop.permute.xlu2 %1970  ;;  %2155 = vrot.lane.b32.xlu2 %v8529_v5, %s10703_s19  ;;  %v2019_v44 = vmul.f32 %v8529_v5, %v8529_v5  ;;  %v1859_v55 = vadd.f32 %v1849_v41, %v1819_v54  ;;  %v2003_v17 = vsel %vm2002_vm3, %v8529_v5, 0.0 }
 0xb48   :  { %v1899_v1 = vadd.f32 %v1889_v7, %v1859_v55  ;;  %v2023_v33 = vsel %vm2002_vm3, %v2019_v44, 0.0 }
 0xb4a   :  { %v1939_v14 = vadd.f32 %v1929_v40, %v1899_v1 }
 0xb4d   :  { %v1969_v21 = vpop.permute.xlu1 %1968  ;;  %v1931_v51 = vpop.permute.xlu0 %1930 }
 0xb4e   :  { %2187 = vrot.lane.b32.xlu2 %v2019_v44, %s10703_s19  ;;  %v1853_v50 = vpop.permute.xlu2 %1852  ;;  %v1979_v24 = vadd.f32 %v1969_v21, %v1939_v14 }
 0xb4f   :  { %v1861_v60 = vadd.f32 %v1853_v50, %v1821_v8 }
 0xb55   :  { %v1891_v57 = vpop.permute.xlu1 %1890 }
 0xb56   :  { %v1973_v48 = vpop.permute.xlu2 %1972  ;;  %v1900_v20 = vadd.f32 %v1891_v57, %v1860_v9 }
 0xb57   :  { %v1933_v58 = vpop.permute.xlu0 %1932 }
 0xb58   :  { %v1940_v29 = vadd.f32 %v1931_v51, %v1900_v20 }
 0xb5a   :  { %v1980_v26 = vadd.f32 %v1971_v43, %v1940_v29 }
 0xb5d   :  { %v1893_v23 = vpop.permute.xlu1 %1892 }
 0xb5e   :  { %v1901_v6 = vadd.f32 %v1893_v23, %v1861_v60  ;;  %v1996_v63 = vpop.permute.xlu2 %1995 }
 0xb5f   :  { %v1988_v12 = vpop.permute.xlu0 %1987 }
 0xb60   :  { %v1941_v22 = vadd.f32 %v1933_v58, %v1901_v6  ;;  %v8539_v11 = vadd.f32 %v1988_v12, %v1979_v24  ;;  %v7566_v58 = vmov 160.0  }
 0xb61   :  { %7416 = vrcp.f32 %v7566_v58 }
 0xb62   :  { %2157 = vrot.lane.b32.xlu2 %v8539_v11, %s10703_s19  ;;  %v1981_v13 = vadd.f32 %v1973_v48, %v1941_v22  ;;  %v2020_v35 = vmul.f32 %v8539_v11, %v8539_v11  ;;  %v2004_v27 = vsel %vm2002_vm3, %v8539_v11, 0.0 }
 0xb63   :  { %v2005_v30 = vadd.f32 %v2004_v27, %v2003_v17 }
 0xb64   :  { %v8545_v37 = vadd.f32 %v1996_v63, %v1981_v13  ;;  %v2024_v4 = vsel %vm2002_vm3, %v2020_v35, 0.0 }
 0xb65   :  { %v1992_v61 = vpop.permute.xlu1 %1991  ;;  %v2025_v41 = vadd.f32 %v2024_v4, %v2023_v33 }
 0xb66   :  { %v8549_v40 = vadd.f32 %v1992_v61, %v1980_v26  ;;  %v2022_v25 = vmul.f32 %v8545_v37, %v8545_v37  ;;  %v2008_v7 = vsel %vm2002_vm3, %v8545_v37, 0.0 }
 0xb67   :  { %v7417_v42 = vpop.eup %7416 }
 0xb68   :  { %v2006_v31 = vsel %vm2002_vm3, %v8549_v40, 0.0  ;;  %v2021_v32 = vmul.f32 %v8549_v40, %v8549_v40  ;;  %v2028_v51 = vsel %vm2002_vm3, %v2022_v25, 0.0  ;;  %v2040_v48 = vmul.f32 160.0, %v7417_v42 }
 0xb69   :  { %v2007_v34 = vadd.f32 %v2006_v31, %v2005_v30  ;;  %vm2044_vm4 = vweird.f32 %v7417_v42 }
 0xb6a   :  { %2189 = vrot.lane.b32.xlu2 %v2020_v35, %s10703_s19  ;;  %v2026_v43 = vsel %vm2002_vm3, %v2021_v32, 0.0  ;;  %v2041_v14 = vsub.f32 1.0, %v2040_v48 }
 0xb6b   :  { %v2009_v21 = vadd.f32 %v2008_v7, %v2007_v34  ;;  %v2027_v50 = vadd.f32 %v2026_v43, %v2025_v41 }
 0xb6c   :  { %v2042_v29 = vmul.f32 %v7417_v42, %v2041_v14 }
 0xb6d   :  { %2010 = vadd.xlane.f32.xlu1 %v2009_v21  ;;  %v2029_v54 = vadd.f32 %v2028_v51, %v2027_v50 }
 0xb6e   :  { %v2043_v26 = vadd.f32 %v7417_v42, %v2042_v29 }
 0xb6f   :  { %2030 = vadd.xlane.f32.xlu0 %v2029_v54 }
 0xb70   :  { %v2045_v4 = vsel %vm2044_vm4, %v7417_v42, %v2043_v26  ;;  %vm2579_vm4 = vcmask 7168  }
 0xb72   :  { %2159 = vrot.lane.b32.xlu2 %v8549_v40, %s10703_s19 }
 0xb7a   :  { %2191 = vrot.lane.b32.xlu2 %v2021_v32, %s10703_s19 }
 0xb83   :  { %2193 = vrot.lane.b32.xlu0 %v2022_v25, %s10703_s19 }
 0xb86   :  { %2161 = vrot.lane.b32.xlu1 %v8545_v37, %s10703_s19 }
 0xba0   :  { %v2156_v44 = vpop.permute.xlu2 %2155 }
 0xba1   :  { %v2167_v41 = vsel %vm2002_vm3, %v2156_v44, 0.0 }
 0xba8   :  { %v2188_v55 = vpop.permute.xlu2 %2187 }
 0xba9   :  { %v2199_v32 = vsel %vm2002_vm3, %v2188_v55, 0.0 }
 0xbbc   :  { %v2158_v57 = vpop.permute.xlu2 %2157 }
 0xbbd   :  { %v2168_v33 = vsel %vm2002_vm3, %v2158_v57, 0.0 }
 0xbbe   :  { %v2169_v50 = vadd.f32 %v2168_v33, %v2167_v41 }
 0xbc4   :  { %v2190_v1 = vpop.permute.xlu2 %2189 }
 0xbc5   :  { %v2200_v31 = vsel %vm2002_vm3, %v2190_v1, 0.0 }
 0xbc6   :  { %v2201_v34 = vadd.f32 %v2200_v31, %v2199_v32 }
 0xbcc   :  { %v2160_v24 = vpop.permute.xlu2 %2159 }
 0xbcd   :  { %v2170_v7 = vsel %vm2002_vm3, %v2160_v24, 0.0 }
 0xbce   :  { %v2171_v58 = vadd.f32 %v2170_v7, %v2169_v50 }
 0xbd4   :  { %v2192_v30 = vpop.permute.xlu2 %2191 }
 0xbd5   :  { %v2202_v25 = vsel %vm2002_vm3, %v2192_v30, 0.0 }
 0xbd6   :  { %v2203_v43 = vadd.f32 %v2202_v25, %v2201_v34 }
 0xbe0   :  { %v2011_v8 = vpop.xlane.xlu1 %2010 }
 0xbe1   :  { %v2012_v9 = vrot.slane %v2011_v8, 4 }
 0xbe2   :  { %v2031_v60 = vpop.xlane.xlu0 %2030 }
 0xbe3   :  { %v2013_v20 = vadd.f32 %v2012_v9, %v2011_v8  ;;  %v2032_v23 = vrot.slane %v2031_v60, 4 }
 0xbe5   :  { %v2033_v6 = vadd.f32 %v2032_v23, %v2031_v60  ;;  %v2014_v12 = vrot.slane %v2013_v20, 2 }
 0xbe7   :  { %v2015_v22 = vadd.f32 %v2014_v12, %v2013_v20  ;;  %v2034_v63 = vrot.slane %v2033_v6, 2 }
 0xbe9   :  { %v2016_v13 = vrot.slane %v2015_v22, 1  ;;  %v2035_v35 = vadd.f32 %v2034_v63, %v2033_v6 }
 0xbeb   :  { %v2017_v27 = vadd.f32 %v2016_v13, %v2015_v22  ;;  %v2036_v61 = vrot.slane %v2035_v35, 1 }
 0xbed   :  { %6927 = vpush %v2017_v27  ;;  %v2037_v17 = vadd.f32 %v2036_v61, %v2035_v35 }
 0xbef   :  { %6929 = vpush %v2037_v17 }
 0xbf0   :  { %6931 = vpush %v2045_v4 }
 0xbf5   :  { %v2194_v21 = vpop.permute.xlu0 %2193 }
 0xbf6   :  { %v2204_v51 = vsel %vm2002_vm3, %v2194_v21, 0.0 }
 0xbf7   :  { %v2205_v54 = vadd.f32 %v2204_v51, %v2203_v43 }
 0xbf8   :  { %v2162_v42 = vpop.permute.xlu1 %2161 }
 0xbf9   :  { %v2172_v1 = vsel %vm2002_vm3, %v2162_v42, 0.0  ;;  %2206 = vadd.xlane.f32.xlu1 %v2205_v54 }
 0xbfa   :  { %v2173_v55 = vadd.f32 %v2172_v1, %v2171_v58 }
 0xbfc   :  { %2174 = vadd.xlane.f32.xlu2 %v2173_v55 }
 0xc1e   :  { %s6928_s30 = spop %6927 }
 0xc20   :  { %s6930_s20 = spop %6929 }
 0xc21   :  { %s8580_s23 = spop %6931 }
 0xc22   :  { %s2047_s29 = smul.f32 %s8580_s23, %s6928_s30 }
 0xc23   :  { %s2056_s19 = smul.f32 %s8580_s23, %s6930_s20 }
 0xc24   :  { %s2057_s9 = smul.f32 %s2047_s29, %s2047_s29  ;;  %v2078_v35 = vstv %s2047_s29 }
 0xc26   :  { %s2058_s18 = ssub.f32 %s2056_s19, %s2057_s9 }
 0xc28   :  { %s2059_s25 = smax.f32 %s7528_s22, %s2058_s18 }
 0xc29   :  { %s2060_s6 = sadd.f32 1e-08, %s2059_s25 }
 0xc2b   :  { %v2061_v44 = vstv %s2060_s6 }
 0xc2c   :  { %7418 = vrsqrt.f32 %v2061_v44  ;;  %vm2068_vm7 = vweird.f32 %v2061_v44 }
 0xc32   :  { %v7419_v57 = vpop.eup %7418 }
 0xc33   :  { %v2063_v48 = vmul.f32 %v7419_v57, %v2061_v44  ;;  %vm2069_vm5 = vweird.f32 %v7419_v57 }
 0xc34   :  { %vm2070_vm8 = vmor %vm2068_vm7, %vm2069_vm5 }
 0xc35   :  { %v2064_v8 = vmul.f32 %v7419_v57, %v2063_v48 }
 0xc37   :  { %v2065_v9 = vmul.f32 0.5, %v2064_v8 }
 0xc39   :  { %v2066_v14 = vsub.f32 1.5, %v2065_v9 }
 0xc3b   :  { %v2067_v60 = vmul.f32 %v7419_v57, %v2066_v14 }
 0xc3d   :  { %v2071_v20 = vsel %vm2070_vm8, %v7419_v57, %v2067_v60  ;;  %v7567_v57 = vmov 10  }
 0xc3e   :  { %6933 = vpush %v2071_v20  ;;  %7237 = vset.pattern.permute.xlu2 %v7567_v57  ;;  %7238 = vset.pattern.permute.xlu1 %v7567_v57 }
 0xc3f   :  { %7236 = vset.pattern.permute.xlu0 %v7567_v57 }
 0xc6c   :  { %v2207_v23 = vpop.xlane.xlu1 %2206 }
 0xc6d   :  { %v2208_v24 = vrot.slane %v2207_v23, 4 }
 0xc6f   :  { %v2209_v6 = vadd.f32 %v2208_v24, %v2207_v23  ;;  %s6934_s9 = spop %6933  ;;  %v2175_v12 = vpop.xlane.xlu2 %2174 }
 0xc70   :  { %v2073_v29 = vstv %s6934_s9  ;;  %v2176_v22 = vrot.slane %v2175_v12, 4 }
 0xc71   :  { %v8586_v63 = vmul.f32 %v8357_v47, %v2073_v29  ;;  %v8589_v13 = vmul.f32 %v8364_v53, %v2073_v29  ;;  %v2210_v27 = vrot.slane %v2209_v6, 2  ;;  %v2075_v32 = vmul.f32 %v8382_v10, %v2073_v29 }
 0xc72   :  { %v2177_v26 = vadd.f32 %v2176_v22, %v2175_v12  ;;  %v8598_v43 = vmul.f32 %v8374_v59, %v2073_v29 }
 0xc73   :  { %v2079_v61 = vmul.f32 %v2078_v35, %v8586_v63  ;;  %v2081_v17 = vmul.f32 %v2078_v35, %v8589_v13  ;;  %v2211_v30 = vadd.f32 %v2210_v27, %v2209_v6  ;;  %v2080_v41 = vmul.f32 %v2078_v35, %v2075_v32 }
 0xc74   :  { %v2178_v4 = vrot.slane %v2177_v26, 2  ;;  %v2082_v21 = vmul.f32 %v2078_v35, %v8598_v43 }
 0xc75   :  { %2087 = vrot.lane.b32.xlu0 %v2079_v61, %s7529_s26  ;;  %2091 = vrot.lane.b32.xlu2 %v2081_v17, %s7529_s26  ;;  %v2212_v25 = vrot.slane %v2211_v30, 1 }
 0xc76   :  { %v2179_v31 = vadd.f32 %v2178_v4, %v2177_v26  ;;  %v7568_v26 = vmov 11  }
 0xc77   :  { %v2213_v7 = vadd.f32 %v2212_v25, %v2211_v30 }
 0xc78   :  { %v2180_v33 = vrot.slane %v2179_v31, 1 }
 0xc7a   :  { %v2181_v34 = vadd.f32 %v2180_v33, %v2179_v31 }
 0xc7c   :  { %6935 = vpush %v2181_v34 }
 0xc7d   :  { %2089 = vrot.lane.b32.xlu0 %v2080_v41, %s7529_s26  ;;  %6937 = vpush %v2213_v7 }
 0xc85   :  { %2093 = vrot.lane.b32.xlu0 %v2082_v21, %s7529_s26  ;;  %v7569_v21 = vmov 55  }
 0xcad   :  { %s6936_s25 = spop %6935 }
 0xcae   :  { %s2223_s6 = smul.f32 %s6936_s25, %s8580_s23  ;;  %s6938_s18 = spop %6937 }
 0xcaf   :  { %s2232_s19 = smul.f32 %s6938_s18, %s8580_s23 }
 0xcb0   :  { %s2233_s30 = smul.f32 %s2223_s6, %s2223_s6  ;;  %v2254_v14 = vstv %s2223_s6 }
 0xcb2   :  { %s2234_s20 = ssub.f32 %s2232_s19, %s2233_s30  ;;  %s7578_s19 = smov 126  }
 0xcb3   :  { %s10720_s30 = smov 120  }
 0xcb4   :  { %s2235_s29 = smax.f32 %s7528_s22, %s2234_s20  ;;  %s10718_s20 = smov 127  }
 0xcb5   :  { %s2236_s9 = sadd.f32 1e-08, %s2235_s29 }
 0xcb7   :  { %v2237_v50 = vstv %s2236_s9 }
 0xcb8   :  { %7420 = vrsqrt.f32 %v2237_v50  ;;  %vm2244_vm11 = vweird.f32 %v2237_v50 }
 0xcbe   :  { %v7421_v51 = vpop.eup %7420 }
 0xcbf   :  { %v2239_v54 = vmul.f32 %v7421_v51, %v2237_v50  ;;  %vm2245_vm9 = vweird.f32 %v7421_v51 }
 0xcc0   :  { %vm2246_vm12 = vmor %vm2244_vm11, %vm2245_vm9 }
 0xcc1   :  { %v2240_v58 = vmul.f32 %v7421_v51, %v2239_v54  ;;  %v3875_v54 = vld [vmem:[%s10695_s12] sm:$0xff] }
 0xcc3   :  { %v2241_v42 = vmul.f32 0.5, %v2240_v58  ;;  %v7571_v58 = vmov 57  }
 0xcc5   :  { %v2242_v1 = vsub.f32 1.5, %v2241_v42 }
 0xcc7   :  { %v2243_v55 = vmul.f32 %v7421_v51, %v2242_v1  ;;  %v7572_v1 = vmov 58  }
 0xcc9   :  { %v2247_v44 = vsel %vm2246_vm12, %v7421_v51, %v2243_v55  ;;  %v3876_v51 = vld [vmem:[%s10695_s12 + $0x8] sm:$0x3]  ;;  %v8658_v55 = vld [vmem:[%s10688_s5 + $0x10] sm:$0xff]  ;;  %s10722_s12 = smov 124  }
 0xcca   :  { %6939 = vpush %v2247_v44  ;;  %6844 = vmatpush.msk.msra.mxu2 %vm2346_vm13, %v3876_v51  ;;  %v7575_v51 = vmov 24  }
 0xccc   :  { %3895 = vmatpush.msra.mxu2 %v3875_v54 }
 0xccf   :  { %v2092_v61 = vpop.permute.xlu2 %2091 }
 0xcd0   :  { %v2101_v17 = vsub.f32 %v8364_v53, %v2092_v61 }
 0xce7   :  { %v2088_v23 = vpop.permute.xlu0 %2087 }
 0xce8   :  { %v2099_v22 = vsub.f32 %v8357_v47, %v2088_v23  ;;  %v8675_v23 = vld [vmem:[%s10688_s5 + $0x8] sm:$0xff] }
 0xcef   :  { %v2090_v29 = vpop.permute.xlu0 %2089 }
 0xcf0   :  { %v2100_v27 = vsub.f32 %v8382_v10, %v2090_v29 }
 0xcf7   :  { %v2094_v4 = vpop.permute.xlu0 %2093 }
 0xcf8   :  { %v2102_v41 = vsub.f32 %v8374_v59, %v2094_v4 }
 0xcfb   :  { %s6940_s25 = spop %6939 }
 0xcfc   :  { %v2249_v48 = vstv %s6940_s25 }
 0xcfd   :  { %v2250_v8 = vmul.f32 %v8357_v47, %v2249_v48  ;;  %v2253_v9 = vmul.f32 %v8374_v59, %v2249_v48  ;;  %v2251_v24 = vmul.f32 %v8382_v10, %v2249_v48  ;;  %v2252_v12 = vmul.f32 %v8364_v53, %v2249_v48 }
 0xcfe   :  { %v7573_v48 = vmov 54  }
 0xcff   :  { %v2255_v60 = vmul.f32 %v2254_v14, %v2250_v8  ;;  %v2258_v20 = vmul.f32 %v2254_v14, %v2253_v9  ;;  %2281 = vperm.xlu2 %7237, %v2250_v8   ;;  %v2256_v6 = vmul.f32 %v2254_v14, %v2251_v24  ;;  %v2257_v35 = vmul.f32 %v2254_v14, %v2252_v12 }
 0xd01   :  { %2269 = vrot.lane.b32.xlu1 %v2258_v20, %s7529_s26  ;;  %2263 = vrot.lane.b32.xlu0 %v2255_v60, %s7529_s26  ;;  %v8668_v60 = vld [vmem:[%s10688_s5 + $0x18] sm:$0xff] }
 0xd07   :  { %2286 = vperm.xlu2 %7237, %v2251_v24  }
 0xd09   :  { %2110 = vperm.xlu1 %7238, %v2075_v32   ;;  %2265 = vrot.lane.b32.xlu0 %v2256_v6, %s7529_s26 }
 0xd0f   :  { %7239 = vset.pattern.permute.xlu2 %v7568_v26 }
 0xd10   :  { %2129 = vperm.xlu2 %7239, %v2099_v22  }
 0xd11   :  { %7240 = vset.pattern.permute.xlu1 %v7568_v26  ;;  %2267 = vrot.lane.b32.xlu0 %v2257_v35, %s7529_s26 }
 0xd12   :  { %2134 = vperm.xlu1 %7240, %v2100_v27  }
 0xd18   :  { %2139 = vperm.xlu2 %7239, %v2101_v17  }
 0xd19   :  { %2105 = vperm.xlu0 %7236, %v8586_v63  }
 0xd1a   :  { %7243 = vset.pattern.permute.xlu1 %v7567_v57 }
 0xd1b   :  { %2291 = vperm.xlu1 %7243, %v2252_v12  }
 0xd21   :  { %7241 = vset.pattern.permute.xlu0 %v7568_v26 }
 0xd23   :  { %7245 = vset.pattern.permute.xlu1 %v7568_v26 }
 0xd59   :  { %v2282_v50 = vpop.permute.xlu2 %2281 }
 0xd5a   :  { %v2299_v20 = vmul.f32 %v2282_v50, %v8529_v5  ;;  %v7574_v50 = vmov 12  }
 0xd61   :  { %v2287_v42 = vpop.permute.xlu2 %2286 }
 0xd6a   :  { %v2130_v44 = vpop.permute.xlu2 %2129 }
 0xd73   :  { %v2264_v30 = vpop.permute.xlu0 %2263  ;;  %v2270_v63 = vpop.permute.xlu1 %2269 }
 0xd74   :  { %v2275_v31 = vsub.f32 %v8357_v47, %v2264_v30  ;;  %v2278_v7 = vsub.f32 %v8374_v59, %v2270_v63 }
 0xd76   :  { %2305 = vperm.xlu0 %7241, %v2275_v31  }
 0xd7b   :  { %v2266_v32 = vpop.permute.xlu0 %2265 }
 0xd7c   :  { %v2276_v25 = vsub.f32 %v8382_v10, %v2266_v32 }
 0xd7e   :  { %7242 = vset.pattern.permute.xlu0 %v7567_v57  ;;  %2310 = vperm.xlu2 %7239, %v2276_v25  }
 0xd7f   :  { %2115 = vperm.xlu0 %7242, %v8589_v13   ;;  %v7570_v13 = vmov 56  }
 0xd83   :  { %v2268_v33 = vpop.permute.xlu0 %2267 }
 0xd84   :  { %v2277_v34 = vsub.f32 %v8364_v53, %v2268_v33 }
 0xd86   :  { %7244 = vset.pattern.permute.xlu2 %v7567_v57  ;;  %2315 = vperm.xlu1 %7245, %v2277_v34   ;;  %v2111_v57 = vpop.permute.xlu1 %2110 }
 0xd87   :  { %2296 = vperm.xlu0 %7242, %v2253_v9   ;;  %2120 = vperm.xlu2 %7244, %v8598_v43   ;;  %v2332_v43 = vld [vmem:[%s10693_s10 + $0x8] sm:$0x3]  ;;  %v2124_v22 = vmul.f32 %v2111_v57, %v8539_v11 }
 0xd88   :  { %6829 = vmatpush.msk.msrb.mxu3 %vm2346_vm13, %v2332_v43 }
 0xd8b   :  { %v2106_v8 = vpop.permute.xlu0 %2105 }
 0xd8c   :  { %v2123_v9 = vmul.f32 %v2106_v8, %v8529_v5  ;;  %v2300_v5 = vmul.f32 %v2287_v42, %v8539_v11 }
 0xd8e   :  { %2144 = vperm.xlu1 %7245, %v2102_v41   ;;  %v2135_v14 = vpop.permute.xlu1 %2134  ;;  %v2147_v24 = vadd.f32 %v2130_v44, %v2123_v9  ;;  %v76_v44 = vld [vmem:[%s10685_s2 + $0x20] sm:$0xff] }
 0xd8f   :  { %7246 = vset.pattern.permute.xlu2 %v7568_v26  ;;  %7247 = vset.pattern.permute.xlu0 %v7569_v21  ;;  %v2148_v27 = vadd.f32 %v2135_v14, %v2124_v22 }
 0xd90   :  { %2320 = vperm.xlu2 %7246, %v2278_v7   ;;  %2400 = vperm.xlu0 %7247, %v8357_v47  }
 0xd96   :  { %7248 = vset.pattern.permute.xlu1 %v7569_v21  ;;  %v2292_v26 = vpop.permute.xlu1 %2291 }
 0xd97   :  { %2404 = vperm.xlu1 %7248, %v8382_v10   ;;  %v2301_v11 = vmul.f32 %v2292_v26, %v8549_v40 }
 0xd98   :  { %2412 = vperm.xlu0 %7247, %v8374_v59   ;;  %7249 = vset.pattern.permute.xlu2 %v7569_v21 }
 0xd99   :  { %2408 = vperm.xlu2 %7249, %v8364_v53  }
 0xd9f   :  { %7250 = vset.pattern.permute.xlu1 %v7570_v13 }
 0xda0   :  { %2440 = vperm.xlu1 %7250, %v8357_v47   ;;  %v2331_v47 = vld [vmem:[%s10693_s10] sm:$0xff]  ;;  %7253 = vset.pattern.permute.xlu0 %v7571_v58  ;;  %s10724_s10 = smov 122  }
 0xda1   :  { %7251 = vset.pattern.permute.xlu2 %v7570_v13  ;;  %2365 = vmatpush.msrb.mxu3 %v2331_v47 }
 0xda2   :  { %2444 = vperm.xlu2 %7251, %v8382_v10   ;;  %2484 = vperm.xlu0 %7253, %v8382_v10  }
 0xda8   :  { %2448 = vperm.xlu1 %7250, %v8364_v53   ;;  %v8650_v53 = vld [vmem:[%s10688_s5] sm:$0xff] }
 0xdaa   :  { %7252 = vset.pattern.permute.xlu2 %v7571_v58  ;;  %2492 = vperm.xlu0 %7253, %v8374_v59  }
 0xdab   :  { %2480 = vperm.xlu2 %7252, %v8650_v53  }
 0xdb0   :  { %2452 = vperm.xlu1 %7250, %v8374_v59   ;;  %v2140_v59 = vpop.permute.xlu2 %2139 }
 0xdb2   :  { %7256 = vset.pattern.permute.xlu0 %v7573_v48 }
 0xdb3   :  { %2488 = vperm.xlu2 %7252, %v8658_v55   ;;  %2380 = vperm.xlu0 %7256, %v8650_v53  }
 0xdb8   :  { %7254 = vset.pattern.permute.xlu1 %v7572_v1 }
 0xdb9   :  { %2520 = vperm.xlu1 %7254, %v8650_v53  }
 0xdbb   :  { %7255 = vset.pattern.permute.xlu2 %v7572_v1  ;;  %2392 = vperm.xlu0 %7256, %v8668_v60  }
 0xdbc   :  { %2524 = vperm.xlu2 %7255, %v8382_v10  }
 0xdc1   :  { %2528 = vperm.xlu1 %7254, %v8658_v55  }
 0xdc3   :  { %7260 = vset.pattern.permute.xlu0 %v7574_v50 }
 0xdc4   :  { %2532 = vperm.xlu2 %7255, %v8668_v60   ;;  %2564 = vperm.xlu0 %7260, %v8675_v23  }
 0xdc9   :  { %7257 = vset.pattern.permute.xlu1 %v7573_v48 }
 0xdca   :  { %2384 = vperm.xlu1 %7257, %v8675_v23  }
 0xdcc   :  { %7258 = vset.pattern.permute.xlu2 %v7573_v48  ;;  %7262 = vset.pattern.permute.xlu0 %v7575_v51 }
 0xdcd   :  { %2388 = vperm.xlu2 %7258, %v8658_v55   ;;  %2929 = vperm.xlu0 %7262, %v8650_v53  }
 0xdd2   :  { %7261 = vset.pattern.permute.xlu1 %v7574_v50 }
 0xdd3   :  { %2572 = vperm.xlu1 %7261, %v8668_v60  }
 0xdd5   :  { %7259 = vset.pattern.permute.xlu2 %v7574_v50 }
 0xdd6   :  { %2560 = vperm.xlu2 %7259, %v8650_v53  }
 0xdd8   :  { %v2311_v29 = vpop.permute.xlu2 %2310 }
 0xdd9   :  { %v2324_v35 = vadd.f32 %v2311_v29, %v2300_v5 }
 0xddb   :  { %v8690_v17 = vsel %vm2002_vm3, %v2148_v27, %v2324_v35  ;;  %7263 = vset.pattern.permute.xlu1 %v7575_v51 }
 0xdde   :  { %2568 = vperm.xlu2 %7259, %v8658_v55  }
 0xde1   :  { %v2121_v30 = vpop.permute.xlu2 %2120 }
 0xde2   :  { %v2126_v41 = vmul.f32 %v2121_v30, %v8545_v37 }
 0xde8   :  { %v2306_v10 = vpop.permute.xlu0 %2305 }
 0xde9   :  { %v2323_v6 = vadd.f32 %v2306_v10, %v2299_v20 }
 0xdea   :  { %v2321_v7 = vpop.permute.xlu2 %2320 }
 0xdeb   :  { %v8680_v12 = vsel %vm2002_vm3, %v2147_v24, %v2323_v6 }
 0xdec   :  { %6830 = vmatmul.msk.f32.vlgmr.msrb.gmra.mxu3 %vm2333_vm14, %v8680_v12  ;;  %6845 = vmatmul.msk.f32.vlgmr.msra.gmra.mxu2 %vm2333_vm14, %v8680_v12 }
 0xdf1   :  { %v2116_v61 = vpop.permute.xlu0 %2115 }
 0xdf2   :  { %v2125_v4 = vmul.f32 %v2116_v61, %v8549_v40 }
 0xdf3   :  { %v2409_v54 = vpop.permute.xlu2 %2408 }
 0xdf4   :  { %6831 = vmatmul.msk.f32.gmra.mxu3 %vm2333_vm14, %v8690_v17  ;;  %6846 = vmatmul.msk.f32.gmra.mxu2 %vm2333_vm14, %v8690_v17  ;;  %v2149_v32 = vadd.f32 %v2140_v59, %v2125_v4 }
 0xdf8   :  { %v2316_v31 = vpop.permute.xlu1 %2315 }
 0xdf9   :  { %v2325_v25 = vadd.f32 %v2316_v31, %v2301_v11  ;;  %v2297_v33 = vpop.permute.xlu0 %2296 }
 0xdfa   :  { %v2302_v63 = vmul.f32 %v2297_v33, %v8545_v37  ;;  %v72_v37 = vld [vmem:[%s10685_s2] sm:$0xff] }
 0xdfb   :  { %v8699_v34 = vsel %vm2002_vm3, %v2149_v32, %v2325_v25  ;;  %6839 = vmatmul.msk.f32.vlgmr.msra.gmra.mxu1 %vm521_vm10, %v72_v37 }
 0xdfc   :  { %6832 = vmatmul.msk.f32.gmra.mxu3 %vm2333_vm14, %v8699_v34  ;;  %6847 = vmatmul.msk.f32.gmra.mxu2 %vm2333_vm14, %v8699_v34  ;;  %v2326_v40 = vadd.f32 %v2321_v7, %v2302_v63  ;;  %v2445_v42 = vpop.permute.xlu2 %2444 }
 0xe00   :  { %v2145_v21 = vpop.permute.xlu1 %2144 }
 0xe01   :  { %v2150_v13 = vadd.f32 %v2145_v21, %v2126_v41 }
 0xe02   :  { %v2401_v57 = vpop.permute.xlu0 %2400 }
 0xe03   :  { %v8708_v43 = vsel %vm2002_vm3, %v2150_v13, %v2326_v40  ;;  %6840 = vmatmul.msk.f32.gmra.mxu1 %vm521_vm10, %v76_v44 }
 0xe04   :  { %6833 = vmatmul.msk.f32.gmra.mxu3 %vm2333_vm14, %v8708_v43  ;;  %6848 = vmatmul.msk.f32.gmra.mxu2 %vm2333_vm14, %v8708_v43 }
 0xe05   :  { %v2481_v48 = vpop.permute.xlu2 %2480 }
 0xe09   :  { %v2405_v47 = vpop.permute.xlu1 %2404 }
 0xe0a   :  { %v2413_v24 = vpop.permute.xlu0 %2412 }
 0xe0d   :  { %v2489_v6 = vpop.permute.xlu2 %2488 }
 0xe12   :  { %v2441_v58 = vpop.permute.xlu1 %2440 }
 0xe14   :  { %v2485_v61 = vpop.permute.xlu0 %2484 }
 0xe16   :  { %v2525_v4 = vpop.permute.xlu2 %2524 }
 0xe1a   :  { %v2449_v1 = vpop.permute.xlu1 %2448 }
 0xe1c   :  { %v2493_v33 = vpop.permute.xlu0 %2492 }
 0xe22   :  { %v2453_v8 = vpop.permute.xlu1 %2452 }
 0xe2b   :  { %v2521_v22 = vpop.permute.xlu1 %2520 }
 0xe33   :  { %v2529_v13 = vpop.permute.xlu1 %2528 }
 0xe6f   :  { %v8727_v59 = vpop.f32.mrf.mxu3  ;;  %v3897_v9 = vpop.f32.mrf.mxu2 }
 0xe70   :  { %10752 = vst [vmem:[#allocation5_spill] sm:$0xff] %v8727_v59  ;;  %v2495_v14 = vmul.f32 %v2481_v48, %v8727_v59  ;;  %v2455_v20 = vmul.f32 %v2441_v58, %v8727_v59  ;;  %v2415_v10 = vmul.f32 %v2401_v57, %v8727_v59  ;;  %v2535_v27 = vmul.f32 %v2521_v22, %v8727_v59 }
 0xe72   :  { %2503 = vrot.lane.b32.xlu0 %v2495_v14, %s10724_s10  ;;  %2463 = vrot.lane.b32.xlu2 %v2455_v20, %s10722_s12 }
 0xe73   :  { %2423 = vrot.lane.b32.xlu1 %v2415_v10, %s7578_s19 }
 0xe77   :  { %v8735_v29 = vpop.f32.mrf.mxu3  ;;  %v3900_v5 = vpop.f32.mrf.mxu2 }
 0xe78   :  { %10753 = vst [vmem:[#allocation6_spill] sm:$0xff] %v8735_v29  ;;  %v2456_v35 = vmul.f32 %v2445_v42, %v8735_v29  ;;  %v2416_v26 = vmul.f32 %v2405_v47, %v8735_v29  ;;  %v2536_v31 = vmul.f32 %v2525_v4, %v8735_v29  ;;  %v2496_v25 = vmul.f32 %v2485_v61, %v8735_v29 }
 0xe7a   :  { %2465 = vrot.lane.b32.xlu0 %v2456_v35, %s10722_s12  ;;  %2425 = vrot.lane.b32.xlu2 %v2416_v26, %s7578_s19 }
 0xe7b   :  { %2543 = vrot.lane.b32.xlu1 %v2535_v27, %s10720_s30 }
 0xe7f   :  { %v8743_v30 = vpop.f32.mrf.mxu3  ;;  %v3903_v11 = vpop.f32.mrf.mxu2 }
 0xe80   :  { %v2497_v32 = vmul.f32 %v2489_v6, %v8743_v30  ;;  %v2457_v7 = vmul.f32 %v2449_v1, %v8743_v30  ;;  %v2417_v40 = vmul.f32 %v2409_v54, %v8743_v30  ;;  %v2537_v37 = vmul.f32 %v2529_v13, %v8743_v30  ;;  %v2385_v1 = vpop.permute.xlu1 %2384 }
 0xe81   :  { %v2396_v26 = vmul.f32 %v2385_v1, %v8735_v29 }
 0xe82   :  { %2545 = vrot.lane.b32.xlu2 %v2536_v31, %s10720_s30  ;;  %2507 = vrot.lane.b32.xlu0 %v2497_v32, %s10724_s10 }
 0xe83   :  { %2505 = vrot.lane.b32.xlu1 %v2496_v25, %s10724_s10 }
 0xe87   :  { %v8751_v63 = vpop.f32.mrf.mxu3  ;;  %v3906_v41 = vpop.f32.mrf.mxu2 }
 0xe88   :  { %10754 = vst [vmem:[#allocation7_spill] sm:$0xff] %v8751_v63  ;;  %3962 = vmatpush.msra.mxu3 %v3906_v41  ;;  %v2498_v21 = vmul.f32 %v2493_v33, %v8751_v63  ;;  %v2458_v50 = vmul.f32 %v2453_v8, %v8751_v63  ;;  %v2418_v51 = vmul.f32 %v2413_v24, %v8751_v63  ;;  %v2573_v48 = vpop.permute.xlu1 %2572 }
 0xe8a   :  { %2467 = vrot.lane.b32.xlu2 %v2457_v7, %s10722_s12  ;;  %3963 = vmatpush.msra.mxu3 %v3903_v11 }
 0xe8b   :  { %2427 = vrot.lane.b32.xlu1 %v2417_v40, %s7578_s19  ;;  %2509 = vrot.lane.b32.xlu0 %v2498_v21, %s10724_s10 }
 0xe8c   :  { %3964 = vmatpush.msra.mxu3 %v3900_v5 }
 0xe8e   :  { %3965 = vmatpush.msra.mxu3 %v3897_v9 }
 0xe90   :  { %3966 = vmatpush.msra.mxu3 %v8474_v28  ;;  %v2533_v28 = vpop.permute.xlu2 %2532 }
 0xe91   :  { %v2538_v47 = vmul.f32 %v2533_v28, %v8751_v63 }
 0xe92   :  { %3967 = vmatpush.msra.mxu3 %v8465_v19  ;;  %2469 = vrot.lane.b32.xlu2 %v2458_v50, %s10722_s12  ;;  %v2381_v19 = vpop.permute.xlu0 %2380 }
 0xe93   :  { %2547 = vrot.lane.b32.xlu1 %v2537_v37, %s10720_s30  ;;  %2933 = vperm.xlu0 %7262, %v8675_v23   ;;  %v2395_v8 = vmul.f32 %v2381_v19, %v8727_v59 }
 0xe94   :  { %3968 = vmatpush.msra.mxu3 %v8457_v15 }
 0xe96   :  { %3969 = vmatpush.msra.mxu3 %v8445_v45 }
 0xe98   :  { %v2389_v54 = vpop.permute.xlu2 %2388 }
 0xe99   :  { %v2397_v41 = vmul.f32 %v2389_v54, %v8743_v30 }
 0xe9a   :  { %v2393_v58 = vpop.permute.xlu0 %2392 }
 0xe9b   :  { %2429 = vrot.lane.b32.xlu1 %v2418_v51, %s7578_s19  ;;  %v2398_v1 = vmul.f32 %v2393_v58, %v8751_v63 }
 0xea0   :  { %v2561_v42 = vpop.permute.xlu2 %2560 }
 0xea2   :  { %v2565_v44 = vpop.permute.xlu0 %2564 }
 0xea3   :  { %2549 = vrot.lane.b32.xlu1 %v2538_v47, %s10720_s30 }
 0xea8   :  { %v2569_v57 = vpop.permute.xlu2 %2568 }
 0xeaa   :  { %v8772_v15 = vpop.permute.xlu0 %2929 }
 0xecc   :  { %v2464_v45 = vpop.permute.xlu2 %2463 }
 0xed4   :  { %v2426_v24 = vpop.permute.xlu2 %2425 }
 0xed5   :  { %v2436_v61 = vadd.f32 %v2426_v24, %v2396_v26  ;;  %v80_v24 = vld [vmem:[%s10685_s2 + $0x40] sm:$0xff] }
 0xed6   :  { %6841 = vmatmul.msk.f32.gmra.mxu1 %vm521_vm10, %v80_v24  ;;  %v10715_v24 = vmov 60  }
 0xed7   :  { %7265 = vset.pattern.permute.xlu2 %v10715_v24 }
 0xedc   :  { %v2546_v4 = vpop.permute.xlu2 %2545 }
 0xee4   :  { %v2504_v10 = vpop.permute.xlu0 %2503  ;;  %v2468_v40 = vpop.permute.xlu2 %2467 }
 0xee5   :  { %v2424_v9 = vpop.permute.xlu1 %2423 }
 0xee6   :  { %v2435_v14 = vadd.f32 %v2424_v9, %v2395_v8 }
 0xee8   :  { %v2475_v20 = vadd.f32 %v2464_v45, %v2435_v14 }
 0xeea   :  { %v2515_v6 = vadd.f32 %v2504_v10, %v2475_v20 }
 0xeec   :  { %v2466_v27 = vpop.permute.xlu0 %2465  ;;  %v2470_v8 = vpop.permute.xlu2 %2469 }
 0xeed   :  { %v2544_v5 = vpop.permute.xlu1 %2543  ;;  %v2476_v31 = vadd.f32 %v2466_v27, %v2436_v61 }
 0xeee   :  { %v2555_v22 = vadd.f32 %v2544_v5, %v2515_v6  ;;  %v84_v5 = vld [vmem:[%s10685_s2 + $0x60] sm:$0xff] }
 0xeef   :  { %6842 = vmatmul.msk.f32.gmra.mxu1 %vm521_vm10, %v84_v5 }
 0xef0   :  { %v8775_v35 = vadd.f32 %v2561_v42, %v2555_v22  ;;  %v2973_v22 = vpop.f32.mrf.mxu1 }
 0xef2   :  { %2724 = vrot.lane.b32.xlu1 %v8775_v35, %s10718_s20  ;;  %v2596_v25 = vmul.f32 %v8775_v35, %v8775_v35 }
 0xef4   :  { %v2508_v37 = vpop.permute.xlu0 %2507 }
 0xef5   :  { %v2506_v11 = vpop.permute.xlu1 %2505 }
 0xef6   :  { %v2516_v32 = vadd.f32 %v2506_v11, %v2476_v31 }
 0xef8   :  { %v2556_v33 = vadd.f32 %v2546_v4, %v2516_v32  ;;  %v2976_v26 = vpop.f32.mrf.mxu1  ;;  %v2600_v4 = vsel %vm2579_vm4, %v2596_v25, 0.0 }
 0xefa   :  { %2756 = vrot.lane.b32.xlu1 %v2596_v25, %s10718_s20  ;;  %v8784_v13 = vadd.f32 %v2565_v44, %v2556_v33 }
 0xefc   :  { %v2597_v42 = vmul.f32 %v8784_v13, %v8784_v13 }
 0xefd   :  { %v2428_v7 = vpop.permute.xlu1 %2427 }
 0xefe   :  { %v2437_v21 = vadd.f32 %v2428_v7, %v2397_v41  ;;  %v2601_v61 = vsel %vm2579_vm4, %v2597_v42, 0.0  ;;  %v2581_v7 = vsel %vm2579_vm4, %v8784_v13, 0.0 }
 0xeff   :  { %v2602_v31 = vadd.f32 %v2601_v61, %v2600_v4 }
 0xf00   :  { %v2477_v50 = vadd.f32 %v2468_v40, %v2437_v21  ;;  %v2580_v21 = vsel %vm2579_vm4, %v8775_v35, 0.0 }
 0xf02   :  { %2726 = vrot.lane.b32.xlu1 %v8784_v13, %s10718_s20  ;;  %v2517_v51 = vadd.f32 %v2508_v37, %v2477_v50  ;;  %v2582_v50 = vadd.f32 %v2581_v7, %v2580_v21 }
 0xf05   :  { %v2548_v28 = vpop.permute.xlu1 %2547 }
 0xf06   :  { %v2557_v47 = vadd.f32 %v2548_v28, %v2517_v51 }
 0xf08   :  { %v8788_v19 = vadd.f32 %v2569_v57, %v2557_v47  ;;  %v2510_v57 = vpop.permute.xlu0 %2509 }
 0xf0a   :  { %2758 = vrot.lane.b32.xlu1 %v2597_v42, %s10718_s20  ;;  %v2598_v54 = vmul.f32 %v8788_v19, %v8788_v19  ;;  %v2583_v40 = vsel %vm2579_vm4, %v8788_v19, 0.0 }
 0xf0b   :  { %v2584_v37 = vadd.f32 %v2583_v40, %v2582_v50 }
 0xf0c   :  { %2760 = vrot.lane.b32.xlu0 %v2598_v54, %s10718_s20  ;;  %v2603_v11 = vsel %vm2579_vm4, %v2598_v54, 0.0 }
 0xf0d   :  { %v2430_v44 = vpop.permute.xlu1 %2429  ;;  %v2604_v33 = vadd.f32 %v2603_v11, %v2602_v31 }
 0xf0e   :  { %v2438_v45 = vadd.f32 %v2430_v44, %v2398_v1 }
 0xf10   :  { %v2478_v9 = vadd.f32 %v2470_v8, %v2438_v45  ;;  %v7581_v45 = vmov 32.0  }
 0xf11   :  { %7422 = vrcp.f32 %v7581_v45 }
 0xf12   :  { %2728 = vrot.lane.b32.xlu1 %v8788_v19, %s10718_s20  ;;  %v2518_v14 = vadd.f32 %v2510_v57, %v2478_v9 }
 0xf15   :  { %v2550_v20 = vpop.permute.xlu1 %2549 }
 0xf16   :  { %v2558_v10 = vadd.f32 %v2550_v20, %v2518_v14 }
 0xf18   :  { %v8803_v58 = vadd.f32 %v2573_v48, %v2558_v10  ;;  %v2934_v48 = vpop.permute.xlu0 %2933  ;;  %v7423_v10 = vpop.eup %7422 }
 0xf19   :  { %v8815_v27 = vadd.f32 %v2976_v26, %v2934_v48  ;;  %v2617_v5 = vmul.f32 32.0, %v7423_v10  ;;  %v8852_v26 = vadd.f32 %v2973_v22, %v8772_v15  ;;  %vm2621_vm5 = vweird.f32 %v7423_v10 }
 0xf1a   :  { %2730 = vrot.lane.b32.xlu2 %v8803_v58, %s10718_s20  ;;  %v2599_v6 = vmul.f32 %v8803_v58, %v8803_v58  ;;  %v2585_v25 = vsel %vm2579_vm4, %v8803_v58, 0.0 }
 0xf1b   :  { %10755 = vst [vmem:[#allocation8_spill] sm:$0xff] %v8815_v27  ;;  %v2586_v51 = vadd.f32 %v2585_v25, %v2584_v37  ;;  %v2618_v11 = vsub.f32 1.0, %v2617_v5  ;;  %v3002_v21 = vmul.f32 %v8815_v27, %v8815_v27  ;;  %v2986_v15 = vsel %vm154_vm1, %v8815_v27, 0.0 }
 0xf1c   :  { %2762 = vrot.lane.b32.xlu1 %v2599_v6, %s10718_s20  ;;  %v2605_v32 = vsel %vm2579_vm4, %v2599_v6, 0.0  ;;  %10756 = vst [vmem:[#allocation9_spill] sm:$0xff] %v8852_v26  ;;  %v2985_v37 = vsel %vm154_vm1, %v8852_v26, 0.0 }
 0xf1d   :  { %v2606_v41 = vadd.f32 %v2605_v32, %v2604_v33  ;;  %v3001_v33 = vmul.f32 %v8852_v26, %v8852_v26  ;;  %v2619_v50 = vmul.f32 %v7423_v10, %v2618_v11  ;;  %v3006_v5 = vsel %vm154_vm1, %v3002_v21, 0.0 }
 0xf24   :  { %2941 = vperm.xlu1 %7263, %v8668_v60  }
 0xf2c   :  { %3139 = vrot.lane.b32.xlu1 %v8815_v27, %s7526_s0 }
 0xf2d   :  { %7264 = vset.pattern.permute.xlu1 %v10715_v24 }
 0xf36   :  { %2607 = vadd.xlane.f32.xlu0 %v2606_v41 }
 0xf43   :  { %2587 = vadd.xlane.f32.xlu2 %v2586_v51  ;;  %v3005_v51 = vsel %vm154_vm1, %v3001_v33, 0.0 }
 0xf4a   :  { %2937 = vperm.xlu0 %7262, %v8658_v55  }
 0xf52   :  { %7266 = vset.pattern.permute.xlu0 %v10715_v24 }
 0xf53   :  { %v2979_v9 = vpop.f32.mrf.mxu1 }
 0xf64   :  { %v8832_v28 = vpop.permute.xlu1 %2724 }
 0xf6c   :  { %v8834_v47 = vpop.permute.xlu1 %2756  ;;  %v2982_v61 = vpop.f32.mrf.mxu1 }
 0xf74   :  { %v8836_v42 = vpop.permute.xlu1 %2726  ;;  %v8844_v57 = vpop.permute.xlu2 %2730 }
 0xf7c   :  { %v8838_v54 = vpop.permute.xlu1 %2758 }
 0xf7e   :  { %v8840_v1 = vpop.permute.xlu0 %2760 }
 0xf84   :  { %v8842_v44 = vpop.permute.xlu1 %2728 }
 0xf8e   :  { %v8846_v14 = vpop.permute.xlu1 %2762 }
 0xf96   :  { %v2942_v32 = vpop.permute.xlu1 %2941 }
 0xf97   :  { %v8856_v7 = vadd.f32 %v2982_v61, %v2942_v32  ;;  %v2987_v61 = vadd.f32 %v2986_v15, %v2985_v37 }
 0xf99   :  { %10757 = vst [vmem:[#allocation10_spill] sm:$0xff] %v8856_v7 }
 0xfa9   :  { %v2608_v8 = vpop.xlane.xlu0 %2607 }
 0xfaa   :  { %v2609_v20 = vrot.slane %v2608_v8, 4 }
 0xfac   :  { %v2610_v6 = vadd.f32 %v2609_v20, %v2608_v8  ;;  %v3004_v20 = vmul.f32 %v8856_v7, %v8856_v7 }
 0xfae   :  { %v2611_v4 = vrot.slane %v2610_v6, 2  ;;  %v3010_v15 = vsel %vm154_vm1, %v3004_v20, 0.0 }
 0xfb0   :  { %v2612_v40 = vadd.f32 %v2611_v4, %v2610_v6 }
 0xfb2   :  { %v2613_v6 = vrot.slane %v2612_v40, 1 }
 0xfb6   :  { %v2588_v48 = vpop.xlane.xlu2 %2587 }
 0xfb7   :  { %v2589_v31 = vrot.slane %v2588_v48, 4 }
 0xfb9   :  { %v2590_v41 = vadd.f32 %v2589_v31, %v2588_v48  ;;  %v2620_v48 = vadd.f32 %v7423_v10, %v2619_v50 }
 0xfbb   :  { %v2591_v25 = vrot.slane %v2590_v41, 2  ;;  %v2622_v37 = vsel %vm2621_vm5, %v7423_v10, %v2620_v48  ;;  %v7583_v10 = vmov 61  }
 0xfbc   :  { %v2938_v22 = vpop.permute.xlu0 %2937 }
 0xfbd   :  { %v8865_v45 = vadd.f32 %v2979_v9, %v2938_v22  ;;  %v2592_v8 = vadd.f32 %v2591_v25, %v2590_v41  ;;  %v2990_v9 = vsel %vm154_vm1, %v8856_v7, 0.0  ;;  %v3007_v41 = vadd.f32 %v3006_v5, %v3005_v51 }
 0xfbe   :  { %v2614_v22 = vadd.f32 %v2613_v6, %v2612_v40  ;;  %v2736_v40 = vsel %vm2579_vm4, %v8832_v28, 0.0  ;;  %v2739_v51 = vsel %vm2579_vm4, %v8842_v44, 0.0 }
 0xfbf   :  { %10758 = vst [vmem:[#allocation11_spill] sm:$0xff] %v8865_v45  ;;  %3141 = vrot.lane.b32.xlu1 %v8865_v45, %s7526_s0  ;;  %v2593_v4 = vrot.slane %v2592_v8, 1  ;;  %v2988_v11 = vsel %vm154_vm1, %v8865_v45, 0.0  ;;  %v3003_v31 = vmul.f32 %v8865_v45, %v8865_v45 }
 0xfc0   :  { %v2989_v32 = vadd.f32 %v2988_v11, %v2987_v61 }
 0xfc1   :  { %v2594_v25 = vadd.f32 %v2593_v4, %v2592_v8  ;;  %v3008_v50 = vsel %vm154_vm1, %v3003_v31, 0.0 }
 0xfc2   :  { %v2991_v3 = vadd.f32 %v2990_v9, %v2989_v32  ;;  %v3009_v24 = vadd.f32 %v3008_v50, %v3007_v41  ;;  %v2771_v41 = vsel %vm2579_vm4, %v8840_v1, 0.0 }
 0xfc3   :  { %6941 = vpush %v2594_v25  ;;  %v2773_v25 = vsel %vm2579_vm4, %v8846_v14, 0.0 }
 0xfc4   :  { %6943 = vpush %v2614_v22  ;;  %2992 = vadd.xlane.f32.xlu0 %v2991_v3  ;;  %v3011_v27 = vadd.f32 %v3010_v15, %v3009_v24  ;;  %v7584_v3 = vmov 62   ;;  %v7585_v24 = vmov 63   ;;  %v3140_v22 = vpop.permute.xlu1 %3139 }
 0xfc5   :  { %6945 = vpush %v2622_v37 }
 0xfc6   :  { %3012 = vadd.xlane.f32.xlu2 %v3011_v27  ;;  %v10759_v27 = vmov 60  }
 0xfc7   :  { %3169 = vrot.lane.b32.xlu1 %v3001_v33, %s7526_s0  ;;  %v2737_v33 = vsel %vm2579_vm4, %v8836_v42, 0.0  ;;  %v2741_v42 = vsel %vm2579_vm4, %v8844_v57, 0.0  ;;  %v2769_v57 = vsel %vm2579_vm4, %v8838_v54, 0.0 }
 0xfc8   :  { %v2738_v8 = vadd.f32 %v2737_v33, %v2736_v40 }
 0xfca   :  { %v2740_v5 = vadd.f32 %v2739_v51, %v2738_v8 }
 0xfcc   :  { %v2742_v48 = vadd.f32 %v2741_v42, %v2740_v5 }
 0xfcf   :  { %3173 = vrot.lane.b32.xlu1 %v3003_v31, %s7526_s0  ;;  %v2768_v31 = vsel %vm2579_vm4, %v8834_v47, 0.0 }
 0xfd0   :  { %v2770_v32 = vadd.f32 %v2769_v57, %v2768_v31 }
 0xfd2   :  { %v2772_v50 = vadd.f32 %v2771_v41, %v2770_v32 }
 0xfd4   :  { %v2774_v15 = vadd.f32 %v2773_v25, %v2772_v50 }
 0xfd7   :  { %3348 = vperm.xlu1 %7264, %v8650_v53  }
 0xfd8   :  { %3143 = vrot.lane.b32.xlu0 %v8856_v7, %s7526_s0 }
 0xfde   :  { %3137 = vrot.lane.b32.xlu2 %v8852_v26, %s7526_s0 }
 0xfdf   :  { %7267 = vset.pattern.permute.xlu1 %v7583_v10 }
 0xfe0   :  { %3388 = vperm.xlu1 %7267, %v8650_v53   ;;  %3356 = vperm.xlu0 %7266, %v8658_v55  }
 0xfe6   :  { %3171 = vrot.lane.b32.xlu2 %v3002_v21, %s7526_s0 }
 0xfe8   :  { %7270 = vset.pattern.permute.xlu0 %v7584_v3  ;;  %7269 = vset.pattern.permute.xlu1 %v10759_v27 }
 0xfe9   :  { %3428 = vperm.xlu0 %7270, %v8650_v53  }
 0xfee   :  { %3175 = vrot.lane.b32.xlu2 %v3004_v20, %s7526_s0  ;;  %v7586_v20 = vmov 59  }
 0xff1   :  { %3436 = vperm.xlu0 %7270, %v8658_v55  }
 0xff4   :  { %s6942_s18 = spop %6941 }
 0xff5   :  { %s6944_s29 = spop %6943 }
 0xff6   :  { %s8896_s9 = spop %6945  ;;  %3352 = vperm.xlu2 %7265, %v8675_v23  }
 0xff7   :  { %s8900_s25 = smul.f32 %s8896_s9, %s6942_s18 }
 0xff8   :  { %s2633_s6 = smul.f32 %s8896_s9, %s6944_s29 }
 0xff9   :  { %7276 = vset.pattern.permute.xlu0 %v7585_v24  ;;  %s2634_s20 = smul.f32 %s8900_s25, %s8900_s25 }
 0xffa   :  { %3480 = vperm.xlu0 %7276, %v8668_v60  }
 0xffb   :  { %s2635_s30 = ssub.f32 %s2633_s6, %s2634_s20 }
 0xffd   :  { %s2636_s12 = smax.f32 %s7528_s22, %s2635_s30 }
 0xffe   :  { %7268 = vset.pattern.permute.xlu2 %v7583_v10  ;;  %s2637_s10 = sadd.f32 1e-08, %s2636_s12 }
 0xfff   :  { %3392 = vperm.xlu2 %7268, %v8675_v23  }
0x1000   :  { %v2638_v21 = vstv %s2637_s10 }
0x1001   :  { %7424 = vrsqrt.f32 %v2638_v21  ;;  %vm2645_vm8 = vweird.f32 %v2638_v21 }
0x1002   :  { %7277 = vset.pattern.permute.xlu0 %v7586_v20 }
0x1003   :  { %3328 = vperm.xlu0 %7277, %v8650_v53  }
0x1007   :  { %v7425_v6 = vpop.eup %7424 }
0x1008   :  { %v2640_v61 = vmul.f32 %v7425_v6, %v2638_v21  ;;  %vm2646_vm7 = vweird.f32 %v7425_v6  ;;  %v8950_v21 = vstv %s8900_s25 }
0x1009   :  { %vm2647_vm9 = vmor %vm2645_vm8, %vm2646_vm7 }
0x100a   :  { %2743 = vadd.xlane.f32.xlu1 %v2742_v48  ;;  %v2641_v4 = vmul.f32 %v7425_v6, %v2640_v61 }
0x100b   :  { %3332 = vperm.xlu0 %7277, %v8675_v23  }
0x100c   :  { %v2642_v28 = vmul.f32 0.5, %v2641_v4 }
0x100e   :  { %v2643_v11 = vsub.f32 1.5, %v2642_v28 }
0x1010   :  { %v2644_v44 = vmul.f32 %v7425_v6, %v2643_v11 }
0x1012   :  { %v2648_v9 = vsel %vm2647_vm9, %v7425_v6, %v2644_v44 }
0x1013   :  { %6947 = vpush %v2648_v9  ;;  %3336 = vperm.xlu0 %7277, %v8658_v55  }
0x101b   :  { %3340 = vperm.xlu0 %7277, %v8668_v60  }
0x1023   :  { %3360 = vperm.xlu1 %7269, %v8668_v60  }
0x1028   :  { %2775 = vadd.xlane.f32.xlu2 %v2774_v15 }
0x102b   :  { %7271 = vset.pattern.permute.xlu1 %v7584_v3 }
0x102c   :  { %3432 = vperm.xlu1 %7271, %v8675_v23  }
0x1031   :  { %v3142_v54 = vpop.permute.xlu1 %3141 }
0x1032   :  { %v3152_v11 = vsel %vm154_vm1, %v3142_v54, 0.0 }
0x1034   :  { %7273 = vset.pattern.permute.xlu1 %v7585_v24 }
0x1035   :  { %3472 = vperm.xlu1 %7273, %v8675_v23  }
0x1037   :  { %v8937_v1 = vpop.xlane.xlu0 %2992 }
0x1039   :  { %v3170_v47 = vpop.permute.xlu1 %3169  ;;  %v8962_v5 = vpop.xlane.xlu2 %3012 }
0x103a   :  { %v3181_v32 = vsel %vm154_vm1, %v3170_v47, 0.0 }
0x103d   :  { %3476 = vperm.xlu1 %7273, %v8658_v55  }
0x1040   :  { %3396 = vperm.xlu2 %7268, %v8658_v55  }
0x1041   :  { %v3174_v14 = vpop.permute.xlu1 %3173  ;;  %v3138_v61 = vpop.permute.xlu2 %3137 }
0x1042   :  { %v3149_v4 = vsel %vm154_vm1, %v3138_v61, 0.0 }
0x1044   :  { %s6948_s10 = spop %6947 }
0x1045   :  { %v8939_v37 = vstv %s6948_s10 }
0x1046   :  { %v8943_v27 = vmul.f32 %v8658_v55, %v8939_v37  ;;  %v8947_v33 = vmul.f32 %v8668_v60, %v8939_v37 }
0x1048   :  { %v8954_v40 = vmul.f32 %v8950_v21, %v8943_v27  ;;  %v8958_v51 = vmul.f32 %v8950_v21, %v8947_v33  ;;  %7272 = vset.pattern.permute.xlu2 %v7585_v24 }
0x1049   :  { %3468 = vperm.xlu2 %7272, %v8650_v53   ;;  %v3349_v20 = vpop.permute.xlu1 %3348  ;;  %v3172_v31 = vpop.permute.xlu2 %3171 }
0x104a   :  { %v3144_v8 = vpop.permute.xlu0 %3143  ;;  %v3363_v15 = vmul.f32 %v3349_v20, %v8210_v36 }
0x104b   :  { %v3154_v44 = vsel %vm154_vm1, %v3144_v8, 0.0 }
0x1051   :  { %7274 = vset.pattern.permute.xlu2 %v7583_v10  ;;  %v3150_v10 = vsel %vm154_vm1, %v3140_v22, 0.0  ;;  %v3176_v25 = vpop.permute.xlu2 %3175  ;;  %v3184_v22 = vsel %vm154_vm1, %v3174_v14, 0.0 }
0x1052   :  { %3400 = vperm.xlu2 %7274, %v8668_v60   ;;  %v3357_v6 = vpop.permute.xlu0 %3356  ;;  %v3389_v48 = vpop.permute.xlu1 %3388  ;;  %v3151_v28 = vadd.f32 %v3150_v10, %v3149_v4  ;;  %v3186_v54 = vsel %vm154_vm1, %v3176_v25, 0.0 }
0x1053   :  { %v3365_v42 = vmul.f32 %v3357_v6, %v8234_v52  ;;  %v3403_v24 = vmul.f32 %v3389_v48, %v8210_v36 }
0x1054   :  { %v3153_v9 = vadd.f32 %v3152_v11, %v3151_v28 }
0x1055   :  { %3375 = vrot.lane.b32.xlu0 %v3365_v42, %s7548_s21 }
0x1056   :  { %v3155_v57 = vadd.f32 %v3154_v44, %v3153_v9 }
0x1059   :  { %v3353_v10 = vpop.permute.xlu2 %3352 }
0x105a   :  { %7275 = vset.pattern.permute.xlu2 %v7584_v3  ;;  %v3182_v3 = vsel %vm154_vm1, %v3172_v31, 0.0  ;;  %v3364_v14 = vmul.f32 %v3353_v10, %v8218_v16 }
0x105b   :  { %3440 = vperm.xlu2 %7275, %v8668_v60   ;;  %v3183_v41 = vadd.f32 %v3182_v3, %v3181_v32 }
0x105d   :  { %3411 = vrot.lane.b32.xlu0 %v3403_v24, %s7547_s8  ;;  %v3185_v42 = vadd.f32 %v3184_v22, %v3183_v41 }
0x105f   :  { %v3187_v48 = vadd.f32 %v3186_v54, %v3185_v42  ;;  %v7587_v54 = vmov 15  }
0x1060   :  { %7278 = vset.pattern.permute.xlu0 %v7587_v54  ;;  %7280 = vset.pattern.permute.xlu1 %v7587_v54 }
0x1061   :  { %v3393_v28 = vpop.permute.xlu2 %3392 }
0x1062   :  { %v3404_v41 = vmul.f32 %v3393_v28, %v8218_v16 }
0x1063   :  { %7279 = vset.pattern.permute.xlu2 %v7587_v54 }
0x1067   :  { %3156 = vadd.xlane.f32.xlu1 %v3155_v57 }
0x107d   :  { %v2744_v50 = vpop.xlane.xlu1 %2743 }
0x107e   :  { %v2745_v6 = vrot.slane %v2744_v50, 4 }
0x1080   :  { %v2746_v8 = vadd.f32 %v2745_v6, %v2744_v50  ;;  %3371 = vrot.lane.b32.xlu1 %v3363_v15, %s7548_s21  ;;  %v3429_v50 = vpop.permute.xlu0 %3428 }
0x1082   :  { %v2747_v61 = vrot.slane %v2746_v8, 2 }
0x1084   :  { %3188 = vadd.xlane.f32.xlu2 %v3187_v48  ;;  %v2748_v24 = vadd.f32 %v2747_v61, %v2746_v8  ;;  %v3443_v61 = vmul.f32 %v3429_v50, %v8210_v36 }
0x1086   :  { %v2749_v4 = vrot.slane %v2748_v24, 1 }
0x1088   :  { %v2750_v47 = vadd.f32 %v2749_v4, %v2748_v24 }
0x108a   :  { %6949 = vpush %v2750_v47  ;;  %v3437_v47 = vpop.permute.xlu0 %3436 }
0x108b   :  { %v3445_v10 = vmul.f32 %v3437_v47, %v8234_v52 }
0x1095   :  { %v3361_v11 = vpop.permute.xlu1 %3360 }
0x1096   :  { %v3366_v20 = vmul.f32 %v3361_v11, %v8250_v62 }
0x1098   :  { %3377 = vrot.lane.b32.xlu1 %v3366_v20, %s7548_s21 }
0x109b   :  { %v2776_v44 = vpop.xlane.xlu2 %2775 }
0x109c   :  { %v2777_v9 = vrot.slane %v2776_v44, 4  ;;  %3373 = vrot.lane.b32.xlu2 %v3364_v14, %s7548_s21 }
0x109e   :  { %v2778_v57 = vadd.f32 %v2777_v9, %v2776_v44  ;;  %v3433_v31 = vpop.permute.xlu1 %3432 }
0x109f   :  { %v3444_v3 = vmul.f32 %v3433_v31, %v8218_v16 }
0x10a0   :  { %v2779_v32 = vrot.slane %v2778_v57, 2 }
0x10a1   :  { %3453 = vrot.lane.b32.xlu1 %v3444_v3, %s7550_s24 }
0x10a2   :  { %v2780_v25 = vadd.f32 %v2779_v32, %v2778_v57 }
0x10a3   :  { %v3397_v15 = vpop.permute.xlu2 %3396 }
0x10a4   :  { %v3405_v6 = vmul.f32 %v3397_v15, %v8234_v52  ;;  %3413 = vrot.lane.b32.xlu2 %v3404_v41, %s7547_s8  ;;  %v2781_v22 = vrot.slane %v2780_v25, 1 }
0x10a6   :  { %3415 = vrot.lane.b32.xlu0 %v3405_v6, %s7547_s8  ;;  %v2782_v42 = vadd.f32 %v2781_v22, %v2780_v25 }
0x10a7   :  { %v3473_v8 = vpop.permute.xlu1 %3472 }
0x10a8   :  { %v3485_v48 = vmul.f32 %v3473_v8, %v8218_v16  ;;  %6951 = vpush %v2782_v42  ;;  %v3486_v20 = vmul.f32 %v3473_v8, %v8226_v46 }
0x10aa   :  { %3503 = vrot.lane.b32.xlu1 %v3485_v48, %s7549_s7 }
0x10ab   :  { %v3469_v24 = vpop.permute.xlu2 %3468 }
0x10ac   :  { %v3483_v4 = vmul.f32 %v3469_v24, %v8210_v36  ;;  %3451 = vrot.lane.b32.xlu2 %v3443_v61, %s7550_s24  ;;  %v3484_v28 = vmul.f32 %v3469_v24, %v8216_v39  ;;  %v3481_v39 = vpop.permute.xlu0 %3480 }
0x10ad   :  { %v3489_v3 = vmul.f32 %v3481_v39, %v8250_v62  ;;  %v3490_v32 = vmul.f32 %v3481_v39, %v8257_v2 }
0x10ae   :  { %3499 = vrot.lane.b32.xlu0 %v3483_v4, %s7549_s7 }
0x10af   :  { %v3477_v14 = vpop.permute.xlu1 %3476 }
0x10b0   :  { %v3487_v57 = vmul.f32 %v3477_v14, %v8234_v52  ;;  %v3488_v46 = vmul.f32 %v3477_v14, %v8242_v56  ;;  %v2994_v56 = vrot.slane %v8937_v1, 4 }
0x10b2   :  { %3455 = vrot.lane.b32.xlu1 %v3445_v10, %s7550_s24 }
0x10b3   :  { %v3401_v11 = vpop.permute.xlu2 %3400 }
0x10b4   :  { %3501 = vrot.lane.b32.xlu2 %v3484_v28, %s7549_s7  ;;  %v3406_v44 = vmul.f32 %v3401_v11, %v8250_v62 }
0x10b6   :  { %3505 = vrot.lane.b32.xlu0 %v3486_v20, %s7549_s7 }
0x10bb   :  { %v3441_v9 = vpop.permute.xlu2 %3440 }
0x10bc   :  { %v3446_v31 = vmul.f32 %v3441_v9, %v8250_v62  ;;  %3417 = vrot.lane.b32.xlu2 %v3406_v44, %s7547_s8  ;;  %s6950_s8 = spop %6949 }
0x10bd   :  { %s9021_s21 = smul.f32 %s6950_s8, %s8896_s9 }
0x10be   :  { %3507 = vrot.lane.b32.xlu0 %v3487_v57, %s7549_s7  ;;  %3457 = vrot.lane.b32.xlu1 %v3446_v31, %s7550_s24 }
0x10bf   :  { %s2802_s24 = smul.f32 %s9021_s21, %s9021_s21 }
0x10c4   :  { %3509 = vrot.lane.b32.xlu2 %v3488_v46, %s7549_s7 }
0x10c6   :  { %3528 = vperm.xlu0 %7278, %v8650_v53   ;;  %3511 = vrot.lane.b32.xlu1 %v3489_v3, %s7549_s7  ;;  %v3014_v53 = vrot.slane %v8962_v5, 4 }
0x10cc   :  { %3532 = vperm.xlu2 %7279, %v8675_v23   ;;  %v3015_v23 = vadd.f32 %v3014_v53, %v8962_v5 }
0x10ce   :  { %3540 = vperm.xlu0 %7278, %v8668_v60   ;;  %3536 = vperm.xlu1 %7280, %v8658_v55   ;;  %v3329_v55 = vpop.permute.xlu0 %3328  ;;  %v2995_v60 = vadd.f32 %v2994_v56, %v8937_v1  ;;  %v3016_v50 = vrot.slane %v3015_v23, 2 }
0x10d0   :  { %v2996_v41 = vrot.slane %v2995_v60, 2  ;;  %v3017_v42 = vadd.f32 %v3016_v50, %v3015_v23  ;;  %v3343_v50 = vmul.f32 %v3329_v55, %v8210_v36 }
0x10d2   :  { %v2997_v54 = vadd.f32 %v2996_v41, %v2995_v60  ;;  %v3018_v24 = vrot.slane %v3017_v42, 1 }
0x10d4   :  { %3513 = vrot.lane.b32.xlu2 %v3490_v32, %s7549_s7  ;;  %v2998_v61 = vrot.slane %v2997_v54, 1  ;;  %v3019_v5 = vadd.f32 %v3018_v24, %v3017_v42 }
0x10d6   :  { %v3333_v6 = vpop.permute.xlu0 %3332  ;;  %v2999_v1 = vadd.f32 %v2998_v61, %v2997_v54 }
0x10d7   :  { %v3344_v24 = vmul.f32 %v3333_v6, %v8218_v16 }
0x10d9   :  { %s6952_s12 = spop %6951 }
0x10da   :  { %s2801_s30 = smul.f32 %s6952_s12, %s8896_s9  ;;  %v3157_v11 = vpop.xlane.xlu1 %3156 }
0x10dc   :  { %s2803_s20 = ssub.f32 %s2801_s30, %s2802_s24 }
0x10de   :  { %s2804_s18 = smax.f32 %s7528_s22, %s2803_s20  ;;  %v3337_v10 = vpop.permute.xlu0 %3336 }
0x10df   :  { %s2805_s29 = sadd.f32 1e-08, %s2804_s18 }
0x10e1   :  { %v2806_v2 = vstv %s2805_s29 }
0x10e2   :  { %7426 = vrsqrt.f32 %v2806_v2  ;;  %vm2813_vm12 = vweird.f32 %v2806_v2 }
0x10e6   :  { %v3341_v20 = vpop.permute.xlu0 %3340 }
0x10e7   :  { %v3346_v63 = vmul.f32 %v3341_v20, %v8250_v62 }
0x10e8   :  { %v7427_v25 = vpop.eup %7426 }
0x10e9   :  { %v2808_v15 = vmul.f32 %v7427_v25, %v2806_v2  ;;  %vm2814_vm11 = vweird.f32 %v7427_v25 }
0x10ea   :  { %vm2815_vm5 = vmor %vm2813_vm12, %vm2814_vm11 }
0x10eb   :  { %v2809_v22 = vmul.f32 %v7427_v25, %v2808_v15  ;;  %v3158_v15 = vrot.slane %v3157_v11, 4 }
0x10ed   :  { %v2810_v8 = vmul.f32 0.5, %v2809_v22 }
0x10ee   :  { %v3376_v9 = vpop.permute.xlu0 %3375 }
0x10ef   :  { %v2811_v48 = vsub.f32 1.5, %v2810_v8 }
0x10f1   :  { %v2812_v4 = vmul.f32 %v7427_v25, %v2811_v48 }
0x10f2   :  { %v3372_v44 = vpop.permute.xlu1 %3371 }
0x10f3   :  { %v2816_v47 = vsel %vm2815_vm5, %v7427_v25, %v2812_v4  ;;  %v3383_v54 = vadd.f32 %v3372_v44, %v3343_v50  ;;  %v3159_v4 = vadd.f32 %v3158_v15, %v3157_v11  ;;  %v3345_v50 = vmul.f32 %v3337_v10, %v8234_v52 }
0x10f4   :  { %6953 = vpush %v2816_v47 }
0x10f5   :  { %6955 = vpush %v2999_v1  ;;  %v3160_v7 = vrot.slane %v3159_v4, 2 }
0x10f6   :  { %6957 = vpush %v3019_v5  ;;  %v3412_v46 = vpop.permute.xlu0 %3411 }
0x10f7   :  { %v3189_v28 = vpop.xlane.xlu2 %3188  ;;  %v3423_v5 = vadd.f32 %v3412_v46, %v3383_v54 }
0x10f8   :  { %v3190_v22 = vrot.slane %v3189_v28, 4 }
0x10fa   :  { %v3191_v47 = vadd.f32 %v3190_v22, %v3189_v28 }
0x10fc   :  { %v3192_v29 = vrot.slane %v3191_v47, 2 }
0x10ff   :  { %v3374_v14 = vpop.permute.xlu2 %3373 }
0x1100   :  { %v3384_v1 = vadd.f32 %v3374_v14, %v3344_v24  ;;  %v3385_v14 = vadd.f32 %v3376_v9, %v3345_v50 }
0x1107   :  { %v3414_v57 = vpop.permute.xlu2 %3413 }
0x1108   :  { %v3424_v36 = vadd.f32 %v3414_v57, %v3384_v1 }
0x110a   :  { %v3378_v31 = vpop.permute.xlu1 %3377 }
0x110b   :  { %v3386_v46 = vadd.f32 %v3378_v31, %v3346_v63 }
0x110f   :  { %v3452_v39 = vpop.permute.xlu2 %3451 }
0x1110   :  { %v3463_v55 = vadd.f32 %v3452_v39, %v3423_v5 }
0x1113   :  { %v3454_v3 = vpop.permute.xlu1 %3453 }
0x1114   :  { %v3464_v59 = vadd.f32 %v3454_v3, %v3424_v36 }
0x1117   :  { %v3502_v32 = vpop.permute.xlu2 %3501 }
0x1118   :  { %v3416_v56 = vpop.permute.xlu0 %3415 }
0x111c   :  { %v3504_v53 = vpop.permute.xlu1 %3503 }
0x111f   :  { %v3418_v2 = vpop.permute.xlu2 %3417 }
0x1120   :  { %v3500_v60 = vpop.permute.xlu0 %3499  ;;  %v3426_v22 = vadd.f32 %v3418_v2, %v3386_v46 }
0x1121   :  { %v3515_v26 = vsel %vm112_vm0, %v3500_v60, %v3502_v32  ;;  %v3193_v60 = vadd.f32 %v3192_v29, %v3191_v47 }
0x1122   :  { %v3523_v16 = vadd.f32 %v3515_v26, %v3463_v55 }
0x1124   :  { %v3456_v41 = vpop.permute.xlu1 %3455 }
0x1125   :  { %s9031_s7 = spop %6953 }
0x1126   :  { %s6956_s25 = spop %6955 }
0x1127   :  { %s9034_s6 = smul.f32 %s6956_s25, %s7808_s17  ;;  %s6958_s10 = spop %6957  ;;  %v3510_v23 = vpop.permute.xlu2 %3509 }
0x1128   :  { %s3038_s8 = smul.f32 %s6958_s10, %s7808_s17  ;;  %v3506_v25 = vpop.permute.xlu0 %3505 }
0x1129   :  { %s3039_s24 = smul.f32 %s9034_s6, %s9034_s6  ;;  %v3516_v45 = vsel %vm112_vm0, %v3504_v53, %v3506_v25  ;;  %v3161_v53 = vadd.f32 %v3160_v7, %v3159_v4  ;;  %v3425_v25 = vadd.f32 %v3416_v56, %v3385_v14  ;;  %v3194_v7 = vrot.slane %v3193_v60, 1 }
0x112a   :  { %v3524_v15 = vadd.f32 %v3516_v45, %v3464_v59 }
0x112b   :  { %s3040_s12 = ssub.f32 %s3038_s8, %s3039_s24  ;;  %v3465_v63 = vadd.f32 %v3456_v41, %v3425_v25  ;;  %v3162_v29 = vrot.slane %v3161_v53, 1  ;;  %v3195_v47 = vadd.f32 %v3194_v7, %v3193_v60  ;;  %v9111_v25 = vld [vmem:[%s10688_s5 + $0x18] sm:$0xff] }
0x112d   :  { %s3041_s30 = smax.f32 %s7528_s22, %s3040_s12  ;;  %v3163_v4 = vadd.f32 %v3162_v29, %v3161_v53  ;;  %v9102_v53 = vld [vmem:[%s10688_s5 + $0x10] sm:$0xff] }
0x112e   :  { %s3042_s20 = sadd.f32 1e-08, %s3041_s30 }
0x112f   :  { %v3533_v42 = vpop.permute.xlu2 %3532 }
0x1130   :  { %v3043_v8 = vstv %s3042_s20  ;;  %v3458_v48 = vpop.permute.xlu1 %3457  ;;  %v3508_v61 = vpop.permute.xlu0 %3507  ;;  %v9048_v54 = vadd.f32 %v3533_v42, %v3524_v15 }
0x1131   :  { %7428 = vrsqrt.f32 %v3043_v8  ;;  %v3517_v52 = vsel %vm112_vm0, %v3508_v61, %v3510_v23  ;;  %v3466_v59 = vadd.f32 %v3458_v48, %v3426_v22 }
0x1132   :  { %v3525_v20 = vadd.f32 %v3517_v52, %v3465_v63  ;;  %v3564_v3 = vmul.f32 %v9048_v54, %v9048_v54  ;;  %v3548_v48 = vsel %vm1423_vm6, %v9048_v54, 0.0  ;;  %v9121_v52 = vstv %s9034_s6 }
0x1133   :  { %10763 = vst [vmem:[#allocation15_spill] sm:$0xff] %v9121_v52 }
0x1134   :  { %v3568_v55 = vsel %vm1423_vm6, %v3564_v3, 0.0 }
0x1137   :  { %v7429_v44 = vpop.eup %7428  ;;  %v3514_v32 = vpop.permute.xlu2 %3513 }
0x1138   :  { %v3045_v6 = vmul.f32 %v7429_v44, %v3043_v8  ;;  %v3512_v11 = vpop.permute.xlu1 %3511  ;;  %v3529_v28 = vpop.permute.xlu0 %3528  ;;  %vm3051_vm7 = vweird.f32 %v7429_v44 }
0x1139   :  { %v9046_v57 = vadd.f32 %v3529_v28, %v3523_v16  ;;  %v3518_v62 = vsel %vm112_vm0, %v3512_v11, %v3514_v32  ;;  %vm3050_vm0 = vweird.f32 %v3043_v8  ;;  %v9093_v32 = vld [vmem:[%s10688_s5 + $0x8] sm:$0xff] }
0x113a   :  { %v3046_v39 = vmul.f32 %v7429_v44, %v3045_v6  ;;  %v3526_v9 = vadd.f32 %v3518_v62, %v3466_v59  ;;  %vm3052_vm8 = vmor %vm3050_vm0, %vm3051_vm7 }
0x113b   :  { %3699 = vrot.lane.b32.xlu0 %v9046_v57, %s7551_s28  ;;  %v3563_v45 = vmul.f32 %v9046_v57, %v9046_v57  ;;  %v3547_v31 = vsel %vm1423_vm6, %v9046_v57, 0.0 }
0x113c   :  { %v3047_v26 = vmul.f32 0.5, %v3046_v39  ;;  %v3549_v1 = vadd.f32 %v3548_v48, %v3547_v31 }
0x113d   :  { %v3567_v61 = vsel %vm1423_vm6, %v3563_v45, 0.0 }
0x113e   :  { %v3048_v10 = vsub.f32 1.5, %v3047_v26  ;;  %v3569_v50 = vadd.f32 %v3568_v55, %v3567_v61 }
0x1140   :  { %v3537_v56 = vpop.permute.xlu1 %3536  ;;  %v3541_v2 = vpop.permute.xlu0 %3540  ;;  %v3049_v23 = vmul.f32 %v7429_v44, %v3048_v10 }
0x1141   :  { %v9060_v41 = vadd.f32 %v3537_v56, %v3525_v20  ;;  %v9062_v42 = vadd.f32 %v3541_v2, %v3526_v9 }
0x1142   :  { %v3053_v24 = vsel %vm3052_vm8, %v7429_v44, %v3049_v23 }
0x1143   :  { %6959 = vpush %v3053_v24  ;;  %3701 = vrot.lane.b32.xlu0 %v9048_v54, %s7551_s28  ;;  %v3550_v8 = vsel %vm1423_vm6, %v9060_v41, 0.0  ;;  %v3565_v5 = vmul.f32 %v9060_v41, %v9060_v41  ;;  %v3566_v36 = vmul.f32 %v9062_v42, %v9062_v42  ;;  %v3552_v16 = vsel %vm1423_vm6, %v9062_v42, 0.0 }
0x1144   :  { %6961 = vpush %v3163_v4  ;;  %v3551_v44 = vadd.f32 %v3550_v8, %v3549_v1 }
0x1145   :  { %6963 = vpush %v3195_v47  ;;  %v3570_v6 = vsel %vm1423_vm6, %v3565_v5, 0.0  ;;  %v3572_v14 = vsel %vm1423_vm6, %v3566_v36, 0.0 }
0x1146   :  { %v3553_v11 = vadd.f32 %v3552_v16, %v3551_v44  ;;  %v3571_v28 = vadd.f32 %v3570_v6, %v3569_v50 }
0x1148   :  { %3554 = vadd.xlane.f32.xlu2 %v3553_v11  ;;  %v3573_v46 = vadd.f32 %v3572_v14, %v3571_v28 }
0x114a   :  { %3574 = vadd.xlane.f32.xlu1 %v3573_v46 }
0x114b   :  { %3703 = vrot.lane.b32.xlu0 %v9060_v41, %s7551_s28 }
0x1153   :  { %3731 = vrot.lane.b32.xlu0 %v3563_v45, %s7551_s28 }
0x115b   :  { %3733 = vrot.lane.b32.xlu0 %v3564_v3, %s7551_s28 }
0x1160   :  { %3705 = vrot.lane.b32.xlu2 %v9062_v42, %s7551_s28 }
0x1163   :  { %3737 = vrot.lane.b32.xlu0 %v3566_v36, %s7551_s28  ;;  %3735 = vrot.lane.b32.xlu1 %v3565_v5, %s7551_s28 }
0x1174   :  { %s6960_s18 = spop %6959 }
0x1175   :  { %v9088_v15 = vstv %s6960_s18  ;;  %s6962_s29 = spop %6961 }
0x1176   :  { %v9097_v39 = vmul.f32 %v9093_v32, %v9088_v15  ;;  %v9106_v60 = vmul.f32 %v9102_v53, %v9088_v15  ;;  %v9115_v22 = vmul.f32 %v9111_v25, %v9088_v15  ;;  %s9118_s20 = smul.f32 %s6962_s29, %s7808_s17  ;;  %s6964_s18 = spop %6963 }
0x1177   :  { %s3214_s25 = smul.f32 %s6964_s18, %s7808_s17 }
0x1178   :  { %10760 = vst [vmem:[#allocation12_spill] sm:$0xff] %v9097_v39  ;;  %v9126_v62 = vmul.f32 %v9121_v52, %v9097_v39  ;;  %v9130_v26 = vmul.f32 %v9121_v52, %v9106_v60  ;;  %v9134_v63 = vmul.f32 %v9121_v52, %v9115_v22  ;;  %s3215_s29 = smul.f32 %s9118_s20, %s9118_s20 }
0x1179   :  { %10761 = vst [vmem:[#allocation13_spill] sm:$0xff] %v9106_v60 }
0x117a   :  { %10762 = vst [vmem:[#allocation14_spill] sm:$0xff] %v9115_v22  ;;  %s3216_s10 = ssub.f32 %s3214_s25, %s3215_s29 }
0x117b   :  { %10764 = vst [vmem:[#allocation16_spill] sm:$0xff] %v9126_v62 }
0x117c   :  { %s3217_s8 = smax.f32 %s7528_s22, %s3216_s10 }
0x117d   :  { %s3218_s6 = sadd.f32 1e-08, %s3217_s8 }
0x117f   :  { %v3219_v59 = vstv %s3218_s6 }
0x1180   :  { %7430 = vrsqrt.f32 %v3219_v59  ;;  %vm3226_vm11 = vweird.f32 %v3219_v59 }
0x1186   :  { %v7431_v45 = vpop.eup %7430 }
0x1187   :  { %v3221_v10 = vmul.f32 %v7431_v45, %v3219_v59  ;;  %vm3227_vm9 = vweird.f32 %v7431_v45 }
0x1188   :  { %vm3228_vm12 = vmor %vm3226_vm11, %vm3227_vm9 }
0x1189   :  { %v3222_v29 = vmul.f32 %v7431_v45, %v3221_v10 }
0x118b   :  { %v3223_v7 = vmul.f32 0.5, %v3222_v29  ;;  %v9154_v29 = vstv %s9118_s20 }
0x118c   :  { %10768 = vst [vmem:[#allocation20_spill] sm:$0xff] %v9154_v29 }
0x118d   :  { %v3224_v20 = vsub.f32 1.5, %v3223_v7 }
0x118f   :  { %v3225_v9 = vmul.f32 %v7431_v45, %v3224_v20 }
0x1191   :  { %v3229_v31 = vsel %vm3228_vm12, %v7431_v45, %v3225_v9  ;;  %vm3949_vm12 = vcmask 785408  }
0x1192   :  { %6965 = vpush %v3229_v31 }
0x11ad   :  { %v3700_v3 = vpop.permute.xlu0 %3699 }
0x11ae   :  { %v3711_v1 = vsel %vm1423_vm6, %v3700_v3, 0.0 }
0x11b5   :  { %v3702_v56 = vpop.permute.xlu0 %3701 }
0x11b6   :  { %v3712_v24 = vsel %vm1423_vm6, %v3702_v56, 0.0 }
0x11b7   :  { %v3713_v55 = vadd.f32 %v3712_v24, %v3711_v1 }
0x11bb   :  { %v3555_v2 = vpop.xlane.xlu2 %3554 }
0x11bc   :  { %v3556_v23 = vrot.slane %v3555_v2, 4 }
0x11bd   :  { %v3575_v48 = vpop.xlane.xlu1 %3574  ;;  %v3704_v61 = vpop.permute.xlu0 %3703 }
0x11be   :  { %v3557_v4 = vadd.f32 %v3556_v23, %v3555_v2  ;;  %v3576_v47 = vrot.slane %v3575_v48, 4  ;;  %v3714_v5 = vsel %vm1423_vm6, %v3704_v61, 0.0 }
0x11bf   :  { %v3715_v16 = vadd.f32 %v3714_v5, %v3713_v55 }
0x11c0   :  { %v3577_v8 = vadd.f32 %v3576_v47, %v3575_v48  ;;  %v3558_v36 = vrot.slane %v3557_v4, 2 }
0x11c2   :  { %v3559_v44 = vadd.f32 %v3558_v36, %v3557_v4  ;;  %v3578_v50 = vrot.slane %v3577_v8, 2 }
0x11c3   :  { %s6966_s24 = spop %6965  ;;  %v3706_v6 = vpop.permute.xlu2 %3705 }
0x11c4   :  { %v9142_v11 = vstv %s6966_s24  ;;  %v3716_v28 = vsel %vm1423_vm6, %v3706_v6, 0.0  ;;  %v3560_v14 = vrot.slane %v3559_v44, 1  ;;  %v3579_v46 = vadd.f32 %v3578_v50, %v3577_v8 }
0x11c5   :  { %10765 = vst [vmem:[#allocation17_spill] sm:$0xff] %v9142_v11  ;;  %v9147_v59 = vmul.f32 %v9102_v53, %v9142_v11  ;;  %v9151_v45 = vmul.f32 %v9111_v25, %v9142_v11  ;;  %v3732_v10 = vpop.permute.xlu0 %3731  ;;  %v3717_v7 = vadd.f32 %v3716_v28, %v3715_v16 }
0x11c6   :  { %v3561_v20 = vadd.f32 %v3560_v14, %v3559_v44  ;;  %v3580_v9 = vrot.slane %v3579_v46, 1  ;;  %v3743_v48 = vsel %vm1423_vm6, %v3732_v10, 0.0 }
0x11c7   :  { %10766 = vst [vmem:[#allocation18_spill] sm:$0xff] %v9147_v59  ;;  %v9158_v31 = vmul.f32 %v9154_v29, %v9147_v59  ;;  %v9162_v3 = vmul.f32 %v9154_v29, %v9151_v45  ;;  %3718 = vadd.xlane.f32.xlu0 %v3717_v7 }
0x11c8   :  { %10767 = vst [vmem:[#allocation19_spill] sm:$0xff] %v9151_v45  ;;  %v3581_v56 = vadd.f32 %v3580_v9, %v3579_v46  ;;  %v7588_v46 = vmov 16  }
0x11c9   :  { %10769 = vst [vmem:[#allocation21_spill] sm:$0xff] %v9162_v3  ;;  %7281 = vset.pattern.permute.xlu0 %v7588_v46  ;;  %7283 = vset.pattern.permute.xlu2 %v7588_v46 }
0x11ca   :  { %6967 = vpush %v3561_v20  ;;  %7282 = vset.pattern.permute.xlu1 %v7588_v46 }
0x11cb   :  { %6969 = vpush %v3581_v56 }
0x11cd   :  { %v3734_v2 = vpop.permute.xlu0 %3733 }
0x11ce   :  { %v3744_v23 = vsel %vm1423_vm6, %v3734_v2, 0.0 }
0x11cf   :  { %v3745_v61 = vadd.f32 %v3744_v23, %v3743_v48 }
0x11d5   :  { %v3736_v24 = vpop.permute.xlu1 %3735  ;;  %v3738_v4 = vpop.permute.xlu0 %3737 }
0x11d6   :  { %v3746_v47 = vsel %vm1423_vm6, %v3736_v24, 0.0  ;;  %v3748_v8 = vsel %vm1423_vm6, %v3738_v4, 0.0 }
0x11d7   :  { %v3747_v1 = vadd.f32 %v3746_v47, %v3745_v61  ;;  %v9178_v61 = vld [vmem:[%s10688_s5] sm:$0xff] }
0x11d9   :  { %v3749_v5 = vadd.f32 %v3748_v8, %v3747_v1 }
0x11db   :  { %3750 = vadd.xlane.f32.xlu2 %v3749_v5 }
0x11fb   :  { %s6968_s12 = spop %6967 }
0x11fc   :  { %s9169_s30 = smul.f32 %s6968_s12, %s8324_s1  ;;  %s6970_s20 = spop %6969 }
0x11fd   :  { %s3600_s25 = smul.f32 %s6970_s20, %s8324_s1 }
0x11fe   :  { %s3601_s18 = smul.f32 %s9169_s30, %s9169_s30  ;;  %v3622_v47 = vstv %s9169_s30 }
0x1200   :  { %s3602_s29 = ssub.f32 %s3600_s25, %s3601_s18 }
0x1202   :  { %s3603_s10 = smax.f32 %s7528_s22, %s3602_s29 }
0x1203   :  { %s3604_s8 = sadd.f32 1e-08, %s3603_s10 }
0x1205   :  { %v3605_v36 = vstv %s3604_s8 }
0x1206   :  { %7432 = vrsqrt.f32 %v3605_v36  ;;  %vm3612_vm7 = vweird.f32 %v3605_v36 }
0x120c   :  { %v7433_v55 = vpop.eup %7432 }
0x120d   :  { %v3607_v44 = vmul.f32 %v7433_v55, %v3605_v36  ;;  %vm3613_vm5 = vweird.f32 %v7433_v55 }
0x120e   :  { %vm3614_vm0 = vmor %vm3612_vm7, %vm3613_vm5 }
0x120f   :  { %v3608_v50 = vmul.f32 %v7433_v55, %v3607_v44 }
0x1211   :  { %v3609_v16 = vmul.f32 0.5, %v3608_v50 }
0x1213   :  { %v3610_v6 = vsub.f32 1.5, %v3609_v16 }
0x1215   :  { %v3611_v28 = vmul.f32 %v7433_v55, %v3610_v6 }
0x1217   :  { %v3615_v14 = vsel %vm3614_vm0, %v7433_v55, %v3611_v28 }
0x1218   :  { %6971 = vpush %v3615_v14 }
0x123a   :  { %v3719_v10 = vpop.xlane.xlu0 %3718 }
0x123b   :  { %v3720_v7 = vrot.slane %v3719_v10, 4 }
0x123d   :  { %v3721_v20 = vadd.f32 %v3720_v7, %v3719_v10 }
0x123f   :  { %v3722_v9 = vrot.slane %v3721_v20, 2 }
0x1241   :  { %v3723_v56 = vadd.f32 %v3722_v9, %v3721_v20 }
0x1243   :  { %v3724_v2 = vrot.slane %v3723_v56, 1 }
0x1245   :  { %v3725_v23 = vadd.f32 %v3724_v2, %v3723_v56 }
0x1247   :  { %6973 = vpush %v3725_v23 }
0x1249   :  { %s6972_s6 = spop %6971 }
0x124a   :  { %v3617_v48 = vstv %s6972_s6 }
0x124b   :  { %v9181_v24 = vmul.f32 %v9178_v61, %v3617_v48  ;;  %v3621_v4 = vmul.f32 %v9111_v25, %v3617_v48  ;;  %v3619_v5 = vmul.f32 %v9093_v32, %v3617_v48  ;;  %v9190_v44 = vmul.f32 %v9102_v53, %v3617_v48 }
0x124c   :  { %v7589_v48 = vmov 17  }
0x124d   :  { %v3623_v1 = vmul.f32 %v3622_v47, %v9181_v24  ;;  %v3626_v8 = vmul.f32 %v3622_v47, %v3621_v4  ;;  %3664 = vperm.xlu0 %7281, %v3621_v4   ;;  %v3624_v16 = vmul.f32 %v3622_v47, %v3619_v5  ;;  %v3625_v28 = vmul.f32 %v3622_v47, %v9190_v44 }
0x124e   :  { %v3751_v36 = vpop.xlane.xlu2 %3750 }
0x124f   :  { %3637 = vrot.lane.b32.xlu1 %v3626_v8, %s7529_s26  ;;  %3631 = vrot.lane.b32.xlu2 %v3623_v1, %s7529_s26  ;;  %v3752_v55 = vrot.slane %v3751_v36, 4 }
0x1251   :  { %v3753_v50 = vadd.f32 %v3752_v55, %v3751_v36 }
0x1253   :  { %v3754_v6 = vrot.slane %v3753_v50, 2 }
0x1255   :  { %3633 = vrot.lane.b32.xlu0 %v3624_v16, %s7529_s26  ;;  %v3755_v14 = vadd.f32 %v3754_v6, %v3753_v50 }
0x1257   :  { %3635 = vrot.lane.b32.xlu1 %v3625_v28, %s7529_s26  ;;  %3654 = vperm.xlu2 %7283, %v3619_v5   ;;  %v3756_v46 = vrot.slane %v3755_v14, 1 }
0x1259   :  { %v3757_v10 = vadd.f32 %v3756_v46, %v3755_v14 }
0x125b   :  { %6975 = vpush %v3757_v10 }
0x125f   :  { %7284 = vset.pattern.permute.xlu2 %v7589_v48 }
0x1278   :  { %s6974_s30 = spop %6973 }
0x1279   :  { %s9196_s20 = smul.f32 %s6974_s30, %s8324_s1 }
0x127b   :  { %s3777_s18 = smul.f32 %s9196_s20, %s9196_s20  ;;  %v3798_v46 = vstv %s9196_s20  ;;  %s10770_s20 = smov 64  }
0x128c   :  { %s6976_s25 = spop %6975 }
0x128d   :  { %s3776_s29 = smul.f32 %s6976_s25, %s8324_s1 }
0x128f   :  { %s3778_s10 = ssub.f32 %s3776_s29, %s3777_s18 }
0x1291   :  { %s3779_s8 = smax.f32 %s7528_s22, %s3778_s10 }
0x1292   :  { %s3780_s6 = sadd.f32 1e-08, %s3779_s8  ;;  %s10773_s8 = smov 108  }
0x1294   :  { %v3781_v7 = vstv %s3780_s6  ;;  %s10774_s6 = smov 88  }
0x1295   :  { %7434 = vrsqrt.f32 %v3781_v7  ;;  %vm3788_vm9 = vweird.f32 %v3781_v7 }
0x129b   :  { %v7435_v20 = vpop.eup %7434 }
0x129c   :  { %v3783_v9 = vmul.f32 %v7435_v20, %v3781_v7  ;;  %vm3789_vm8 = vweird.f32 %v7435_v20 }
0x129d   :  { %vm3790_vm11 = vmor %vm3788_vm9, %vm3789_vm8 }
0x129e   :  { %v3784_v56 = vmul.f32 %v7435_v20, %v3783_v9 }
0x12a0   :  { %v3785_v2 = vmul.f32 0.5, %v3784_v56 }
0x12a2   :  { %v3786_v23 = vsub.f32 1.5, %v3785_v2 }
0x12a4   :  { %v3787_v4 = vmul.f32 %v7435_v20, %v3786_v23 }
0x12a6   :  { %v3791_v47 = vsel %vm3790_vm11, %v7435_v20, %v3787_v4  ;;  %v73_v4 = vld [vmem:[%s10685_s2 + $0x8] sm:$0xff] }
0x12a7   :  { %6977 = vpush %v3791_v47  ;;  %v7590_v47 = vmov 27  }
0x12a9   :  { %v3632_v50 = vpop.permute.xlu2 %3631 }
0x12aa   :  { %v3643_v16 = vsub.f32 %v9178_v61, %v3632_v50  ;;  %v7592_v50 = vmov 66  }
0x12bf   :  { %v9202_v1 = vpop.permute.xlu0 %3664 }
0x12c1   :  { %v3638_v8 = vpop.permute.xlu1 %3637 }
0x12c2   :  { %v3646_v5 = vsub.f32 %v9111_v25, %v3638_v8 }
0x12c4   :  { %3688 = vperm.xlu2 %7284, %v3646_v5   ;;  %v7476_v5 = vld [vmem:[%s10685_s2 + $0x40] sm:$0xff] }
0x12c7   :  { %v3634_v36 = vpop.permute.xlu0 %3633 }
0x12c8   :  { %v3644_v55 = vsub.f32 %v9093_v32, %v3634_v36  ;;  %v85_v36 = vld [vmem:[%s10685_s2 + $0x68] sm:$0xff] }
0x12c9   :  { %v3636_v20 = vpop.permute.xlu1 %3635 }
0x12ca   :  { %v3645_v56 = vsub.f32 %v9102_v53, %v3636_v20  ;;  %v77_v20 = vld [vmem:[%s10685_s2 + $0x28] sm:$0xff] }
0x12cc   :  { %3678 = vperm.xlu2 %7284, %v3644_v55   ;;  %v7591_v55 = vmov 65  }
0x12d4   :  { %3673 = vperm.xlu2 %7284, %v3643_v16   ;;  %v7593_v16 = vmov 67  }
0x12d8   :  { %s6978_s24 = spop %6977 }
0x12d9   :  { %v3793_v6 = vstv %s6978_s24  ;;  %s10775_s24 = smov 98  }
0x12da   :  { %v3796_v28 = vmul.f32 %v9102_v53, %v3793_v6  ;;  %v3797_v14 = vmul.f32 %v9111_v25, %v3793_v6  ;;  %v3794_v7 = vmul.f32 %v9178_v61, %v3793_v6  ;;  %v3795_v2 = vmul.f32 %v9093_v32, %v3793_v6 }
0x12dc   :  { %3840 = vperm.xlu1 %7282, %v3797_v14   ;;  %3835 = vperm.xlu0 %7281, %v3796_v28   ;;  %v3802_v10 = vmul.f32 %v3798_v46, %v3797_v14  ;;  %v3801_v9 = vmul.f32 %v3798_v46, %v3796_v28  ;;  %v3800_v23 = vmul.f32 %v3798_v46, %v3795_v2 }
0x12dd   :  { %v3799_v8 = vmul.f32 %v3798_v46, %v3794_v7 }
0x12e4   :  { %3813 = vrot.lane.b32.xlu1 %v3802_v10, %s7529_s26  ;;  %3825 = vperm.xlu0 %7281, %v3794_v7   ;;  %v7477_v10 = vld [vmem:[%s10685_s2] sm:$0xff] }
0x12ec   :  { %3811 = vrot.lane.b32.xlu1 %v3801_v9, %s7529_s26  ;;  %7285 = vset.pattern.permute.xlu0 %v7589_v48 }
0x12ed   :  { %3683 = vperm.xlu0 %7285, %v3645_v56   ;;  %v7478_v56 = vld [vmem:[%s10685_s2 + $0x20] sm:$0xff] }
0x12f4   :  { %3809 = vrot.lane.b32.xlu1 %v3800_v23, %s7529_s26  ;;  %v81_v23 = vld [vmem:[%s10685_s2 + $0x48] sm:$0xff] }
0x12f5   :  { %3931 = vrot.lane.b32.xlu0 %v73_v4, %s10770_s20  ;;  %v3655_v4 = vpop.permute.xlu2 %3654 }
0x12f6   :  { %7289 = vset.pattern.permute.xlu0 %v7590_v47 }
0x12fc   :  { %3807 = vrot.lane.b32.xlu1 %v3799_v8, %s7529_s26 }
0x12fd   :  { %3937 = vrot.lane.b32.xlu0 %v7476_v5, %s10770_s20 }
0x1304   :  { %3659 = vperm.xlu1 %7282, %v9190_v44  }
0x1305   :  { %3943 = vrot.lane.b32.xlu0 %v85_v36, %s10770_s20 }
0x130c   :  { %3830 = vperm.xlu1 %7282, %v3795_v2   ;;  %v7479_v2 = vld [vmem:[%s10685_s2 + $0x60] sm:$0xff] }
0x130d   :  { %3918 = vperm.xlu0 %7289, %v9102_v53  }
0x1314   :  { %3649 = vperm.xlu1 %7282, %v9181_v24  }
0x1315   :  { %7290 = vset.pattern.permute.xlu0 %v7591_v55 }
0x1316   :  { %4350 = vperm.xlu0 %7290, %v9178_v61  }
0x131c   :  { %7286 = vset.pattern.permute.xlu1 %v7589_v48 }
0x131e   :  { %7293 = vset.pattern.permute.xlu0 %v7592_v50  ;;  %v3689_v8 = vpop.permute.xlu2 %3688 }
0x131f   :  { %4390 = vperm.xlu0 %7293, %v9178_v61  }
0x1326   :  { %v3679_v36 = vpop.permute.xlu2 %3678 }
0x1327   :  { %7296 = vset.pattern.permute.xlu0 %v7593_v16 }
0x1328   :  { %4434 = vperm.xlu0 %7296, %v9093_v32  }
0x1330   :  { %4442 = vperm.xlu0 %7296, %v9111_v25  }
0x134e   :  { %v3841_v44 = vpop.permute.xlu1 %3840 }
0x1356   :  { %v3814_v6 = vpop.permute.xlu1 %3813 }
0x1357   :  { %v3822_v28 = vsub.f32 %v9111_v25, %v3814_v6  ;;  %v7595_v6 = vmov 64  }
0x1359   :  { %3864 = vperm.xlu1 %7286, %v3822_v28  }
0x135e   :  { %v3812_v24 = vpop.permute.xlu1 %3811 }
0x135f   :  { %v3821_v14 = vsub.f32 %v9102_v53, %v3812_v24 }
0x1361   :  { %3859 = vperm.xlu2 %7284, %v3821_v14  }
0x1366   :  { %v3810_v48 = vpop.permute.xlu1 %3809 }
0x1367   :  { %v3820_v46 = vsub.f32 %v9093_v32, %v3810_v48  ;;  %v3670_v48 = vmul.f32 %v9202_v1, %v9062_v42 }
0x1369   :  { %3854 = vperm.xlu1 %7286, %v3820_v46   ;;  %3929 = vrot.lane.b32.xlu2 %v7477_v10, %s10770_s20  ;;  %v3846_v46 = vmul.f32 %v3841_v44, %v9062_v42  ;;  %v3668_v42 = vmul.f32 %v3655_v4, %v9048_v54 }
0x136a   :  { %7288 = vset.pattern.permute.xlu2 %v7590_v47 }
0x136e   :  { %v3808_v7 = vpop.permute.xlu1 %3807 }
0x136f   :  { %v3819_v9 = vsub.f32 %v9178_v61, %v3808_v7 }
0x1371   :  { %3849 = vperm.xlu1 %7286, %v3819_v9   ;;  %3935 = vrot.lane.b32.xlu2 %v77_v20, %s10770_s20  ;;  %v3694_v9 = vadd.f32 %v3689_v8, %v3670_v48  ;;  %v3692_v8 = vadd.f32 %v3679_v36, %v3668_v42  ;;  %v7480_v36 = vld [vmem:[%s10694_s11 + $0x18] sm:$0xf] }
0x1376   :  { %v3660_v5 = vpop.permute.xlu1 %3659 }
0x1377   :  { %v3669_v7 = vmul.f32 %v3660_v5, %v9060_v41 }
0x1379   :  { %3933 = vrot.lane.b32.xlu1 %v7478_v56, %s10770_s20  ;;  %3941 = vrot.lane.b32.xlu2 %v7479_v2, %s10770_s20 }
0x137a   :  { %7287 = vset.pattern.permute.xlu1 %v7590_v47  ;;  %v7594_v47 = vmov 68  }
0x1381   :  { %3939 = vrot.lane.b32.xlu1 %v81_v23, %s10770_s20  ;;  %3914 = vperm.xlu2 %7288, %v9093_v32  }
0x1389   :  { %3910 = vperm.xlu1 %7287, %v9178_v61   ;;  %7291 = vset.pattern.permute.xlu2 %v7591_v55 }
0x138a   :  { %4354 = vperm.xlu2 %7291, %v9093_v32  }
0x1391   :  { %3922 = vperm.xlu1 %7287, %v9111_v25  }
0x1392   :  { %7294 = vset.pattern.permute.xlu2 %v7592_v50  ;;  %v3831_v50 = vpop.permute.xlu1 %3830 }
0x1393   :  { %4394 = vperm.xlu2 %7294, %v9093_v32  }
0x1399   :  { %7292 = vset.pattern.permute.xlu1 %v7591_v55  ;;  %v3836_v55 = vpop.permute.xlu0 %3835 }
0x139a   :  { %4358 = vperm.xlu1 %7292, %v9102_v53   ;;  %v3650_v24 = vpop.permute.xlu1 %3649  ;;  %v3845_v10 = vmul.f32 %v3836_v55, %v9060_v41  ;;  %v3844_v41 = vmul.f32 %v3831_v50, %v9048_v54  ;;  %v7481_v50 = vld [vmem:[%s10694_s11 + $0x10] sm:$0xff] }
0x139b   :  { %4398 = vperm.xlu2 %7294, %v9102_v53  }
0x13a1   :  { %v3826_v28 = vpop.permute.xlu0 %3825 }
0x13a2   :  { %4362 = vperm.xlu1 %7292, %v9111_v25  }
0x13a3   :  { %4402 = vperm.xlu2 %7294, %v9111_v25  }
0x13a9   :  { %v3684_v23 = vpop.permute.xlu0 %3683 }
0x13aa   :  { %7295 = vset.pattern.permute.xlu1 %v7593_v16  ;;  %v3674_v16 = vpop.permute.xlu2 %3673 }
0x13ab   :  { %4430 = vperm.xlu1 %7295, %v9178_v61   ;;  %7297 = vset.pattern.permute.xlu2 %v7594_v47 }
0x13ac   :  { %4470 = vperm.xlu2 %7297, %v9178_v61  }
0x13b3   :  { %4438 = vperm.xlu1 %7295, %v9102_v53  }
0x13b4   :  { %4478 = vperm.xlu2 %7297, %v9102_v53  }
0x13bb   :  { %7298 = vset.pattern.permute.xlu1 %v7594_v47  ;;  %v3860_v14 = vpop.permute.xlu2 %3859  ;;  %v3693_v47 = vadd.f32 %v3684_v23, %v3669_v7 }
0x13bc   :  { %4474 = vperm.xlu1 %7298, %v9093_v32   ;;  %7300 = vset.pattern.permute.xlu2 %v7595_v6  ;;  %v3869_v56 = vadd.f32 %v3860_v14, %v3845_v10 }
0x13be   :  { %v3873_v1 = vsel %vm1423_vm6, %v3693_v47, %v3869_v56 }
0x13c3   :  { %v3930_v14 = vpop.permute.xlu2 %3929 }
0x13c4   :  { %4482 = vperm.xlu1 %7298, %v9111_v25  }
0x13cb   :  { %v3865_v20 = vpop.permute.xlu1 %3864 }
0x13cc   :  { %v3870_v2 = vadd.f32 %v3865_v20, %v3846_v46  ;;  %7299 = vset.pattern.permute.xlu1 %v7595_v6  ;;  %v3667_v6 = vmul.f32 %v3650_v24, %v9046_v57  ;;  %v3932_v46 = vpop.permute.xlu0 %3931  ;;  %v7482_v24 = vld [vmem:[%s10694_s11 + $0x8] sm:$0xff]  ;;  %v7483_v20 = vld [vmem:[%s10694_s11] sm:$0xff]  ;;  %s10772_s11 = smov 118  }
0x13cd   :  { %4330 = vperm.xlu1 %7299, %v9178_v61   ;;  %v3945_v4 = vsel %vm521_vm10, %v3930_v14, %v3932_v46 }
0x13ce   :  { %v3874_v59 = vsel %vm1423_vm6, %v3694_v9, %v3870_v2  ;;  %v3691_v10 = vadd.f32 %v3674_v16, %v3667_v6  ;;  %v3936_v16 = vpop.permute.xlu2 %3935 }
0x13cf   :  { %3970 = vmatpush.msra.mxu3 %v3874_v59  ;;  %v3843_v59 = vmul.f32 %v3826_v28, %v9046_v57 }
0x13d1   :  { %3971 = vmatpush.msra.mxu3 %v3873_v1 }
0x13d4   :  { %v3938_v9 = vpop.permute.xlu0 %3937 }
0x13d5   :  { %4334 = vperm.xlu1 %7299, %v9093_v32  }
0x13d6   :  { %v3942_v47 = vpop.permute.xlu2 %3941 }
0x13db   :  { %v3855_v44 = vpop.permute.xlu1 %3854 }
0x13dc   :  { %v3868_v5 = vadd.f32 %v3855_v44, %v3844_v41  ;;  %v3944_v23 = vpop.permute.xlu0 %3943 }
0x13dd   :  { %4338 = vperm.xlu1 %7299, %v9102_v53   ;;  %v3948_v1 = vsel %vm521_vm10, %v3942_v47, %v3944_v23 }
0x13de   :  { %v3872_v55 = vsel %vm1423_vm6, %v3692_v8, %v3868_v5  ;;  %v3915_v6 = vpop.permute.xlu2 %3914 }
0x13df   :  { %3972 = vmatpush.msra.mxu3 %v3872_v55 }
0x13e3   :  { %v3850_v48 = vpop.permute.xlu1 %3849 }
0x13e4   :  { %v3867_v7 = vadd.f32 %v3850_v48, %v3843_v59  ;;  %v3919_v55 = vpop.permute.xlu0 %3918 }
0x13e6   :  { %v3871_v54 = vsel %vm1423_vm6, %v3691_v10, %v3867_v7 }
0x13e7   :  { %3973 = vmatpush.msra.mxu3 %v3871_v54 }
0x13e8   :  { %6849 = vmatmul.msk.f32.vlgmr.msra.gmra.mxu3 %vm3949_vm12, %v3945_v4 }
0x13e9   :  { %6869 = vmatpush.msk.msrb.mxu3 %vm1769_vm15, %v7480_v36 }
0x13eb   :  { %v3934_v57 = vpop.permute.xlu1 %3933  ;;  %6226 = vmatpush.msrb.mxu3 %v7481_v50 }
0x13ec   :  { %v3946_v28 = vsel %vm521_vm10, %v3934_v57, %v3936_v16  ;;  %v4355_v57 = vpop.permute.xlu2 %4354 }
0x13ed   :  { %6227 = vmatpush.msrb.mxu3 %v7482_v24 }
0x13ef   :  { %6228 = vmatpush.msrb.mxu3 %v7483_v20 }
0x13f0   :  { %6850 = vmatmul.msk.f32.gmra.mxu3 %vm3949_vm12, %v3946_v28 }
0x13f3   :  { %v3940_v56 = vpop.permute.xlu1 %3939 }
0x13f4   :  { %v3947_v2 = vsel %vm521_vm10, %v3938_v9, %v3940_v56  ;;  %v4395_v28 = vpop.permute.xlu2 %4394 }
0x13f8   :  { %6851 = vmatmul.msk.f32.gmra.mxu3 %vm3949_vm12, %v3947_v2 }
0x13fb   :  { %v3911_v42 = vpop.permute.xlu1 %3910 }
0x13fc   :  { %v4399_v9 = vpop.permute.xlu2 %4398 }
0x13fd   :  { %v4407_v47 = vmul.f32 %v4399_v9, %v8497_v0 }
0x1400   :  { %6852 = vmatmul.msk.f32.gmra.mxu3 %vm3949_vm12, %v3948_v1 }
0x1403   :  { %v3923_v10 = vpop.permute.xlu1 %3922 }
0x140c   :  { %v4359_v36 = vpop.permute.xlu1 %4358 }
0x140d   :  { %v4367_v24 = vmul.f32 %v4359_v36, %v8497_v0 }
0x1414   :  { %v4363_v50 = vpop.permute.xlu1 %4362 }
0x141d   :  { %v4431_v20 = vpop.permute.xlu1 %4430 }
0x146b   :  { %v3975_v41 = vpop.f32.mrf.mxu3 }
0x146c   :  { %v9312_v44 = vadd.f32 %v3975_v41, %v3911_v42 }
0x146e   :  { %4139 = vrot.lane.b32.xlu0 %v9312_v44, %s7551_s28  ;;  %v4003_v5 = vmul.f32 %v9312_v44, %v9312_v44 }
0x1470   :  { %v4007_v2 = vsel %vm1423_vm6, %v4003_v5, 0.0 }
0x1473   :  { %v3978_v8 = vpop.f32.mrf.mxu3 }
0x1474   :  { %v9319_v14 = vadd.f32 %v3978_v8, %v3915_v6 }
0x1476   :  { %4171 = vrot.lane.b32.xlu0 %v4003_v5, %s7551_s28  ;;  %v4004_v54 = vmul.f32 %v9319_v14, %v9319_v14  ;;  %v3988_v8 = vsel %vm1423_vm6, %v9319_v14, 0.0 }
0x1478   :  { %v4008_v56 = vsel %vm1423_vm6, %v4004_v54, 0.0 }
0x1479   :  { %v4009_v1 = vadd.f32 %v4008_v56, %v4007_v2  ;;  %v4351_v56 = vpop.permute.xlu0 %4350 }
0x147a   :  { %v4365_v2 = vmul.f32 %v4351_v56, %v8481_v38 }
0x147b   :  { %v3981_v59 = vpop.f32.mrf.mxu3 }
0x147c   :  { %v9321_v48 = vadd.f32 %v3981_v59, %v3919_v55  ;;  %v4439_v55 = vpop.permute.xlu1 %4438  ;;  %v3987_v59 = vsel %vm1423_vm6, %v9312_v44, 0.0 }
0x147e   :  { %4141 = vrot.lane.b32.xlu0 %v9319_v14, %s7551_s28  ;;  %v4005_v46 = vmul.f32 %v9321_v48, %v9321_v48  ;;  %v3990_v5 = vsel %vm1423_vm6, %v9321_v48, 0.0 }
0x1480   :  { %4175 = vrot.lane.b32.xlu1 %v4005_v46, %s7551_s28  ;;  %v4010_v23 = vsel %vm1423_vm6, %v4005_v46, 0.0  ;;  %v4403_v46 = vpop.permute.xlu2 %4402 }
0x1481   :  { %v4011_v41 = vadd.f32 %v4010_v23, %v4009_v1  ;;  %v4408_v36 = vmul.f32 %v4403_v46, %v8506_v18  ;;  %v4391_v23 = vpop.permute.xlu0 %4390  ;;  %v4366_v1 = vmul.f32 %v4355_v57, %v8489_v49 }
0x1483   :  { %v3984_v7 = vpop.f32.mrf.mxu3 }
0x1484   :  { %v9328_v4 = vadd.f32 %v3984_v7, %v3923_v10  ;;  %v3989_v10 = vadd.f32 %v3988_v8, %v3987_v59  ;;  %v4405_v8 = vmul.f32 %v4391_v23, %v8481_v38 }
0x1486   :  { %10771 = vst [vmem:[#allocation22_spill] sm:$0xff] %v9328_v4  ;;  %4173 = vrot.lane.b32.xlu0 %v4004_v54, %s7551_s28  ;;  %4145 = vrot.lane.b32.xlu2 %v9328_v4, %s7551_s28  ;;  %v4006_v16 = vmul.f32 %v9328_v4, %v9328_v4  ;;  %v3992_v7 = vsel %vm1423_vm6, %v9328_v4, 0.0  ;;  %v3991_v54 = vadd.f32 %v3990_v5, %v3989_v10 }
0x1487   :  { %v4406_v5 = vmul.f32 %v4395_v28, %v8489_v49  ;;  %v4368_v10 = vmul.f32 %v4363_v50, %v8506_v18 }
0x1488   :  { %v4012_v42 = vsel %vm1423_vm6, %v4006_v16, 0.0  ;;  %v4471_v28 = vpop.permute.xlu2 %4470 }
0x1489   :  { %v4013_v6 = vadd.f32 %v4012_v42, %v4011_v41  ;;  %v4445_v42 = vmul.f32 %v4431_v20, %v8481_v38  ;;  %v4435_v41 = vpop.permute.xlu0 %4434 }
0x148e   :  { %4143 = vrot.lane.b32.xlu0 %v9321_v48, %s7551_s28 }
0x1490   :  { %v4479_v50 = vpop.permute.xlu2 %4478 }
0x1491   :  { %v4443_v59 = vpop.permute.xlu0 %4442  ;;  %v4487_v56 = vmul.f32 %v4479_v50, %v8497_v0 }
0x1492   :  { %v4448_v57 = vmul.f32 %v4443_v59, %v8506_v18 }
0x1496   :  { %4177 = vrot.lane.b32.xlu0 %v4006_v16, %s7551_s28  ;;  %v3993_v16 = vadd.f32 %v3992_v7, %v3991_v54  ;;  %v4446_v7 = vmul.f32 %v4435_v41, %v8489_v49 }
0x149e   :  { %4377 = vrot.lane.b32.xlu0 %v4367_v24, %s10772_s11  ;;  %v4475_v24 = vpop.permute.xlu1 %4474 }
0x149f   :  { %v4486_v9 = vmul.f32 %v4475_v24, %v8489_v49 }
0x14a6   :  { %4417 = vrot.lane.b32.xlu0 %v4407_v47, %s10773_s8  ;;  %v7596_v47 = vmov 18   ;;  %v4483_v20 = vpop.permute.xlu1 %4482 }
0x14a7   :  { %7303 = vset.pattern.permute.xlu1 %v7596_v47  ;;  %7301 = vset.pattern.permute.xlu0 %v7596_v47  ;;  %v4488_v41 = vmul.f32 %v4483_v20, %v8506_v18 }
0x14aa   :  { %4014 = vadd.xlane.f32.xlu1 %v4013_v6  ;;  %v4447_v6 = vmul.f32 %v4439_v55, %v8497_v0 }
0x14ae   :  { %4419 = vrot.lane.b32.xlu0 %v4408_v36, %s10773_s8  ;;  %v9379_v54 = vpop.permute.xlu1 %4330 }
0x14af   :  { %3994 = vadd.xlane.f32.xlu2 %v3993_v16  ;;  %v4485_v16 = vmul.f32 %v4471_v28, %v8481_v38  ;;  %v4345_v52 = vmul.f32 %v9379_v54, %v8481_v38 }
0x14b6   :  { %4495 = vrot.lane.b32.xlu0 %v4486_v9, %s10774_s6  ;;  %v9384_v24 = vpop.permute.xlu1 %4334 }
0x14b7   :  { %v4346_v60 = vmul.f32 %v9384_v24, %v8489_v49 }
0x14c3   :  { %4373 = vrot.lane.b32.xlu1 %v4365_v2, %s10772_s11  ;;  %v9389_v2 = vpop.permute.xlu1 %4338 }
0x14c4   :  { %v4347_v49 = vmul.f32 %v9389_v2, %v8497_v0 }
0x14c7   :  { %4342 = vperm.xlu2 %7300, %v9111_v25  }
0x14cb   :  { %4375 = vrot.lane.b32.xlu1 %v4366_v1, %s10772_s11 }
0x14cf   :  { %4453 = vrot.lane.b32.xlu2 %v4445_v42, %s10775_s24 }
0x14d0   :  { %7302 = vset.pattern.permute.xlu2 %v7596_v47 }
0x14d3   :  { %4413 = vrot.lane.b32.xlu1 %v4405_v8, %s10773_s8 }
0x14d7   :  { %4457 = vrot.lane.b32.xlu2 %v4447_v6, %s10775_s24 }
0x14db   :  { %4415 = vrot.lane.b32.xlu1 %v4406_v5, %s10773_s8 }
0x14df   :  { %4459 = vrot.lane.b32.xlu2 %v4448_v57, %s10775_s24 }
0x14e0   :  { %v4140_v46 = vpop.permute.xlu0 %4139  ;;  %v4146_v47 = vpop.permute.xlu2 %4145 }
0x14e1   :  { %v4151_v23 = vsel %vm1423_vm6, %v4140_v46, 0.0  ;;  %v4156_v59 = vsel %vm1423_vm6, %v4146_v47, 0.0 }
0x14e3   :  { %4379 = vrot.lane.b32.xlu1 %v4368_v10, %s10772_s11 }
0x14e7   :  { %4514 = vperm.xlu2 %7302, %v9093_v32  }
0x14e8   :  { %v4172_v55 = vpop.permute.xlu0 %4171 }
0x14eb   :  { %4455 = vrot.lane.b32.xlu1 %v4446_v7, %s10775_s24  ;;  %v4183_v7 = vsel %vm1423_vm6, %v4172_v55, 0.0 }
0x14f0   :  { %v4142_v36 = vpop.permute.xlu0 %4141 }
0x14f1   :  { %v4152_v32 = vsel %vm1423_vm6, %v4142_v36, 0.0 }
0x14f2   :  { %v4153_v1 = vadd.f32 %v4152_v32, %v4151_v23  ;;  %v4176_v10 = vpop.permute.xlu1 %4175 }
0x14f3   :  { %4493 = vrot.lane.b32.xlu1 %v4485_v16, %s10774_s6  ;;  %v4186_v36 = vsel %vm1423_vm6, %v4176_v10, 0.0 }
0x14f8   :  { %v4174_v9 = vpop.permute.xlu0 %4173 }
0x14f9   :  { %v4184_v57 = vsel %vm1423_vm6, %v4174_v9, 0.0 }
0x14fa   :  { %v4185_v46 = vadd.f32 %v4184_v57, %v4183_v7 }
0x14fb   :  { %4497 = vrot.lane.b32.xlu1 %v4487_v56, %s10774_s6 }
0x14fc   :  { %v4187_v16 = vadd.f32 %v4186_v36, %v4185_v46 }
0x1500   :  { %v4144_v42 = vpop.permute.xlu0 %4143 }
0x1501   :  { %v4154_v8 = vsel %vm1423_vm6, %v4144_v42, 0.0 }
0x1502   :  { %v4155_v6 = vadd.f32 %v4154_v8, %v4153_v1 }
0x1503   :  { %4499 = vrot.lane.b32.xlu1 %v4488_v41, %s10774_s6  ;;  %s10776_s6 = smov 123  }
0x1504   :  { %v4157_v5 = vadd.f32 %v4156_v59, %v4155_v6 }
0x1506   :  { %4158 = vadd.xlane.f32.xlu0 %v4157_v5 }
0x1508   :  { %v4178_v28 = vpop.permute.xlu0 %4177 }
0x1509   :  { %v4188_v20 = vsel %vm1423_vm6, %v4178_v28, 0.0 }
0x150a   :  { %v4189_v50 = vadd.f32 %v4188_v20, %v4187_v16 }
0x150b   :  { %4522 = vperm.xlu1 %7303, %v9111_v25  }
0x1510   :  { %4190 = vadd.xlane.f32.xlu2 %v4189_v50  ;;  %v4378_v28 = vpop.permute.xlu0 %4377 }
0x1518   :  { %v4418_v16 = vpop.permute.xlu0 %4417 }
0x151a   :  { %4510 = vperm.xlu0 %7301, %v9178_v61  }
0x151d   :  { %v4015_v56 = vpop.xlane.xlu1 %4014 }
0x151e   :  { %v4016_v32 = vrot.slane %v4015_v56, 4 }
0x1520   :  { %v4017_v9 = vadd.f32 %v4016_v32, %v4015_v56  ;;  %v4420_v56 = vpop.permute.xlu0 %4419 }
0x1522   :  { %v3995_v23 = vpop.xlane.xlu2 %3994  ;;  %v4018_v47 = vrot.slane %v4017_v9, 2 }
0x1523   :  { %v3996_v1 = vrot.slane %v3995_v23, 4 }
0x1524   :  { %v4019_v42 = vadd.f32 %v4018_v47, %v4017_v9 }
0x1525   :  { %v3997_v55 = vadd.f32 %v3996_v1, %v3995_v23 }
0x1526   :  { %v4020_v6 = vrot.slane %v4019_v42, 1 }
0x1527   :  { %v3998_v41 = vrot.slane %v3997_v55, 2 }
0x1528   :  { %4518 = vperm.xlu2 %7302, %v9102_v53   ;;  %v4021_v5 = vadd.f32 %v4020_v6, %v4019_v42  ;;  %v4496_v1 = vpop.permute.xlu0 %4495 }
0x1529   :  { %v3999_v8 = vadd.f32 %v3998_v41, %v3997_v55 }
0x152a   :  { %v4343_v36 = vpop.permute.xlu2 %4342 }
0x152b   :  { %v4000_v25 = vrot.slane %v3999_v8, 1 }
0x152d   :  { %v4001_v59 = vadd.f32 %v4000_v25, %v3999_v8 }
0x152f   :  { %6979 = vpush %v4001_v59 }
0x1530   :  { %6981 = vpush %v4021_v5 }
0x1532   :  { %v4454_v50 = vpop.permute.xlu2 %4453 }
0x1535   :  { %v4374_v57 = vpop.permute.xlu1 %4373 }
0x1536   :  { %v4385_v11 = vadd.f32 %v4374_v57, %v4345_v52 }
0x153a   :  { %v4458_v32 = vpop.permute.xlu2 %4457 }
0x153d   :  { %v4376_v10 = vpop.permute.xlu1 %4375 }
0x153e   :  { %v4386_v3 = vadd.f32 %v4376_v10, %v4346_v60 }
0x1542   :  { %v4460_v42 = vpop.permute.xlu2 %4459 }
0x1545   :  { %v4414_v7 = vpop.permute.xlu1 %4413 }
0x1546   :  { %v4425_v10 = vadd.f32 %v4414_v7, %v4385_v11 }
0x154a   :  { %v4515_v62 = vpop.permute.xlu2 %4514 }
0x154d   :  { %v4416_v46 = vpop.permute.xlu1 %4415 }
0x154e   :  { %v4426_v29 = vadd.f32 %v4416_v46, %v4386_v3 }
0x1555   :  { %v4380_v20 = vpop.permute.xlu1 %4379 }
0x155d   :  { %v4456_v53 = vpop.permute.xlu1 %4455 }
0x1560   :  { %s6980_s12 = spop %6979 }
0x1561   :  { %s9404_s30 = smul.f32 %s6980_s12, %s8324_s1  ;;  %s6982_s18 = spop %6981 }
0x1562   :  { %s4040_s25 = smul.f32 %s6982_s18, %s8324_s1 }
0x1563   :  { %s4041_s29 = smul.f32 %s9404_s30, %s9404_s30 }
0x1565   :  { %s4042_s10 = ssub.f32 %s4040_s25, %s4041_s29  ;;  %v4494_v23 = vpop.permute.xlu1 %4493 }
0x1567   :  { %s4043_s11 = smax.f32 %s7528_s22, %s4042_s10 }
0x1568   :  { %s4044_s8 = sadd.f32 1e-08, %s4043_s11 }
0x156a   :  { %v4045_v9 = vstv %s4044_s8 }
0x156b   :  { %7436 = vrsqrt.f32 %v4045_v9  ;;  %vm4052_vm5 = vweird.f32 %v4045_v9 }
0x156d   :  { %v4498_v8 = vpop.permute.xlu1 %4497 }
0x1571   :  { %v7437_v47 = vpop.eup %7436 }
0x1572   :  { %v4047_v55 = vmul.f32 %v7437_v47, %v4045_v9  ;;  %vm4053_vm15 = vweird.f32 %v7437_v47  ;;  %v4466_v9 = vadd.f32 %v4456_v53, %v4426_v29  ;;  %v4465_v29 = vadd.f32 %v4454_v50, %v4425_v10 }
0x1573   :  { %vm4054_vm7 = vmor %vm4052_vm5, %vm4053_vm15 }
0x1574   :  { %v4048_v41 = vmul.f32 %v7437_v47, %v4047_v55  ;;  %v4348_v55 = vmul.f32 %v4343_v36, %v8506_v18  ;;  %v4506_v18 = vadd.f32 %v4496_v1, %v4466_v9  ;;  %v4505_v52 = vadd.f32 %v4494_v23, %v4465_v29 }
0x1575   :  { %v2823_v29 = vstv %s9021_s21 }
0x1576   :  { %v4049_v6 = vmul.f32 0.5, %v4048_v41  ;;  %v4500_v41 = vpop.permute.xlu1 %4499  ;;  %v9417_v38 = vadd.f32 %v4515_v62, %v4506_v18  ;;  %v2651_v18 = vmul.f32 %v9178_v61, %v8939_v37 }
0x1578   :  { %v4050_v25 = vsub.f32 1.5, %v4049_v6  ;;  %v4546_v62 = vmul.f32 %v9417_v38, %v9417_v38 }
0x1579   :  { %v4159_v59 = vpop.xlane.xlu0 %4158 }
0x157a   :  { %v4160_v5 = vrot.slane %v4159_v59, 4  ;;  %v4051_v4 = vmul.f32 %v7437_v47, %v4050_v25  ;;  %v4388_v25 = vadd.f32 %v4380_v20, %v4348_v55 }
0x157c   :  { %v4161_v39 = vadd.f32 %v4160_v5, %v4159_v59  ;;  %v4055_v22 = vsel %vm4054_vm7, %v7437_v47, %v4051_v4  ;;  %v4387_v4 = vadd.f32 %v4378_v28, %v4347_v49  ;;  %v4428_v47 = vadd.f32 %v4420_v56, %v4388_v25 }
0x157d   :  { %6983 = vpush %v4055_v22  ;;  %vm4858_vm7 = vcmask 15360  }
0x157e   :  { %v4162_v45 = vrot.slane %v4161_v39, 2  ;;  %v4427_v3 = vadd.f32 %v4418_v16, %v4387_v4  ;;  %v4468_v54 = vadd.f32 %v4460_v42, %v4428_v47  ;;  %v4523_v0 = vpop.permute.xlu1 %4522  ;;  %v9463_v47 = vstv %s9404_s30 }
0x1580   :  { %v4163_v6 = vadd.f32 %v4162_v45, %v4161_v39  ;;  %v4467_v39 = vadd.f32 %v4458_v32, %v4427_v3  ;;  %v4508_v57 = vadd.f32 %v4500_v41, %v4468_v54  ;;  %v4530_v32 = vsel %vm2002_vm3, %v9417_v38, 0.0 }
0x1581   :  { %v4550_v41 = vsel %vm2002_vm3, %v4546_v62, 0.0 }
0x1582   :  { %v4164_v24 = vrot.slane %v4163_v6, 1  ;;  %v4507_v36 = vadd.f32 %v4498_v8, %v4467_v39  ;;  %v9421_v53 = vadd.f32 %v4523_v0, %v4508_v57  ;;  %v2818_v39 = vstv %s9031_s7 }
0x1583   :  { %v4191_v59 = vpop.xlane.xlu2 %4190 }
0x1584   :  { %v4192_v60 = vrot.slane %v4191_v59, 4  ;;  %v4165_v22 = vadd.f32 %v4164_v24, %v4163_v6  ;;  %v4548_v5 = vmul.f32 %v9421_v53, %v9421_v53  ;;  %v4534_v9 = vsel %vm2002_vm3, %v9421_v53, 0.0 }
0x1586   :  { %v4193_v46 = vadd.f32 %v4192_v60, %v4191_v59  ;;  %6985 = vpush %v4165_v22  ;;  %v4554_v4 = vsel %vm2002_vm3, %v4548_v5, 0.0 }
0x1588   :  { %v4194_v45 = vrot.slane %v4193_v46, 2 }
0x158a   :  { %v4195_v2 = vadd.f32 %v4194_v45, %v4193_v46  ;;  %v2656_v46 = vmul.f32 %v8950_v21, %v2651_v18  ;;  %v9476_v45 = vmul.f32 %v9178_v61, %v2818_v39 }
0x158b   :  { %v4519_v28 = vpop.permute.xlu2 %4518 }
0x158c   :  { %v9419_v20 = vadd.f32 %v4519_v28, %v4507_v36  ;;  %v4511_v11 = vpop.permute.xlu0 %4510  ;;  %v4196_v7 = vrot.slane %v4195_v2, 1  ;;  %v2824_v54 = vmul.f32 %v2823_v29, %v9476_v45  ;;  %v9489_v36 = vld [vmem:[%s10688_s5 + $0x8] sm:$0xff] }
0x158d   :  { %v9423_v16 = vadd.f32 %v4511_v11, %v4505_v52  ;;  %v9501_v52 = vmul.f32 %v9489_v36, %v2818_v39 }
0x158e   :  { %v4197_v56 = vadd.f32 %v4196_v7, %v4195_v2  ;;  %v4547_v1 = vmul.f32 %v9419_v20, %v9419_v20  ;;  %v4532_v8 = vsel %vm2002_vm3, %v9419_v20, 0.0 }
0x158f   :  { %4681 = vrot.lane.b32.xlu1 %v9423_v16, %s10776_s6  ;;  %v4529_v50 = vsel %vm2002_vm3, %v9423_v16, 0.0  ;;  %v4545_v23 = vmul.f32 %v9423_v16, %v9423_v16  ;;  %v2825_v57 = vmul.f32 %v2823_v29, %v9501_v52 }
0x1590   :  { %6987 = vpush %v4197_v56  ;;  %v4531_v42 = vadd.f32 %v4530_v32, %v4529_v50  ;;  %v4552_v49 = vsel %vm2002_vm3, %v4547_v1, 0.0 }
0x1591   :  { %v4549_v55 = vsel %vm2002_vm3, %v4545_v23, 0.0 }
0x1592   :  { %v4533_v6 = vadd.f32 %v4532_v8, %v4531_v42  ;;  %v4551_v25 = vadd.f32 %v4550_v41, %v4549_v55 }
0x1594   :  { %v4535_v24 = vadd.f32 %v4534_v9, %v4533_v6  ;;  %v4553_v59 = vadd.f32 %v4552_v49, %v4551_v25 }
0x1596   :  { %4536 = vadd.xlane.f32.xlu0 %v4535_v24  ;;  %v4555_v60 = vadd.f32 %v4554_v4, %v4553_v59 }
0x1597   :  { %4683 = vrot.lane.b32.xlu1 %v9417_v38, %s10776_s6 }
0x1598   :  { %4556 = vadd.xlane.f32.xlu2 %v4555_v60  ;;  %v9531_v60 = vld [vmem:[%s10688_s5] sm:$0xff] }
0x159f   :  { %4685 = vrot.lane.b32.xlu1 %v9419_v20, %s10776_s6 }
0x15a7   :  { %4713 = vrot.lane.b32.xlu1 %v4545_v23, %s10776_s6  ;;  %v9518_v23 = vld [vmem:[%s10688_s5 + $0x18] sm:$0xff] }
0x15aa   :  { %4687 = vrot.lane.b32.xlu0 %v9421_v53, %s10776_s6 }
0x15ae   :  { %s6984_s24 = spop %6983 }
0x15af   :  { %v9454_v22 = vstv %s6984_s24  ;;  %4715 = vrot.lane.b32.xlu1 %v4546_v62, %s10776_s6 }
0x15b0   :  { %v9459_v10 = vmul.f32 %v9178_v61, %v9454_v22  ;;  %4717 = vrot.lane.b32.xlu2 %v4547_v1, %s10776_s6  ;;  %v9493_v61 = vmul.f32 %v9489_v36, %v8939_v37  ;;  %v9521_v1 = vmul.f32 %v9518_v23, %v2818_v39 }
0x15b2   :  { %v9469_v3 = vmul.f32 %v9463_v47, %v9459_v10  ;;  %v2657_v0 = vmul.f32 %v8950_v21, %v9493_v61  ;;  %v9508_v21 = vld [vmem:[%s10688_s5 + $0x10] sm:$0xff]  ;;  %v2827_v8 = vmul.f32 %v2823_v29, %v9521_v1 }
0x15b3   :  { %v9511_v11 = vmul.f32 %v9508_v21, %v2818_v39 }
0x15b5   :  { %v2826_v56 = vmul.f32 %v2823_v29, %v9511_v11 }
0x15b7   :  { %4719 = vrot.lane.b32.xlu1 %v4548_v5, %s10776_s6  ;;  %s6986_s12 = spop %6985 }
0x15b8   :  { %2664 = vrot.lane.b32.xlu2 %v2656_v46, %s7529_s26  ;;  %s9480_s30 = smul.f32 %s6986_s12, %s8324_s1 }
0x15ba   :  { %s4217_s18 = smul.f32 %s9480_s30, %s9480_s30  ;;  %v9538_v46 = vstv %s9480_s30  ;;  %s7598_s30 = smov 116  }
0x15c0   :  { %2832 = vrot.lane.b32.xlu2 %v2824_v54, %s7529_s26 }
0x15c1   :  { %s6988_s25 = spop %6987 }
0x15c2   :  { %s4216_s21 = smul.f32 %s6988_s25, %s8324_s1  ;;  %s7597_s25 = smov 115  }
0x15c4   :  { %s4218_s10 = ssub.f32 %s4216_s21, %s4217_s18 }
0x15c6   :  { %s4219_s11 = smax.f32 %s7528_s22, %s4218_s10 }
0x15c7   :  { %s4220_s8 = sadd.f32 1e-08, %s4219_s11 }
0x15c8   :  { %2666 = vrot.lane.b32.xlu2 %v2657_v0, %s7529_s26 }
0x15c9   :  { %v4221_v2 = vstv %s4220_s8 }
0x15ca   :  { %7438 = vrsqrt.f32 %v4221_v2  ;;  %vm4228_vm8 = vweird.f32 %v4221_v2 }
0x15d0   :  { %v7439_v28 = vpop.eup %7438  ;;  %2834 = vrot.lane.b32.xlu2 %v2825_v57, %s7529_s26 }
0x15d1   :  { %v4223_v37 = vmul.f32 %v7439_v28, %v4221_v2  ;;  %vm4229_vm0 = vweird.f32 %v7439_v28 }
0x15d2   :  { %vm4230_vm9 = vmor %vm4228_vm8, %vm4229_vm0 }
0x15d3   :  { %v4224_v7 = vmul.f32 %v7439_v28, %v4223_v37 }
0x15d5   :  { %v4225_v62 = vmul.f32 0.5, %v4224_v7 }
0x15d7   :  { %v4226_v50 = vsub.f32 1.5, %v4225_v62 }
0x15d8   :  { %2836 = vrot.lane.b32.xlu2 %v2826_v56, %s7529_s26 }
0x15d9   :  { %v4227_v32 = vmul.f32 %v7439_v28, %v4226_v50 }
0x15db   :  { %v4231_v42 = vsel %vm4230_vm9, %v7439_v28, %v4227_v32 }
0x15dc   :  { %6989 = vpush %v4231_v42 }
0x15e0   :  { %2838 = vrot.lane.b32.xlu2 %v2827_v8, %s7529_s26 }
0x15e8   :  { %2684 = vrot.lane.b32.xlu2 %v2651_v18, %s7597_s25 }
0x1601   :  { %v4682_v5 = vpop.permute.xlu1 %4681 }
0x1602   :  { %v4693_v50 = vsel %vm2002_vm3, %v4682_v5, 0.0 }
0x1609   :  { %v4684_v55 = vpop.permute.xlu1 %4683  ;;  %v4537_v41 = vpop.xlane.xlu0 %4536 }
0x160a   :  { %v4538_v6 = vrot.slane %v4537_v41, 4  ;;  %v4694_v56 = vsel %vm2002_vm3, %v4684_v55, 0.0 }
0x160b   :  { %v4557_v25 = vpop.xlane.xlu2 %4556  ;;  %v4695_v8 = vadd.f32 %v4694_v56, %v4693_v50 }
0x160c   :  { %v4539_v9 = vadd.f32 %v4538_v6, %v4537_v41  ;;  %v4558_v49 = vrot.slane %v4557_v25, 4 }
0x160d   :  { %s6990_s7 = spop %6989 }
0x160e   :  { %v4559_v24 = vadd.f32 %v4558_v49, %v4557_v25  ;;  %v9526_v59 = vstv %s6990_s7  ;;  %v4540_v4 = vrot.slane %v4539_v9, 2 }
0x160f   :  { %v9535_v18 = vmul.f32 %v9531_v60, %v9526_v59 }
0x1610   :  { %v4541_v39 = vadd.f32 %v4540_v4, %v4539_v9  ;;  %v4560_v29 = vrot.slane %v4559_v24, 2 }
0x1611   :  { %v9542_v54 = vmul.f32 %v9538_v46, %v9535_v18  ;;  %v4686_v0 = vpop.permute.xlu1 %4685 }
0x1612   :  { %v4542_v2 = vrot.slane %v4541_v39, 1  ;;  %v4561_v57 = vadd.f32 %v4560_v29, %v4559_v24  ;;  %v4696_v32 = vsel %vm2002_vm3, %v4686_v0, 0.0 }
0x1613   :  { %v4718_v28 = vpop.permute.xlu2 %4717  ;;  %v4697_v6 = vadd.f32 %v4696_v32, %v4695_v8 }
0x1614   :  { %v4543_v37 = vadd.f32 %v4542_v2, %v4541_v39  ;;  %v4562_v7 = vrot.slane %v4561_v57, 1  ;;  %v4728_v0 = vsel %vm2002_vm3, %v4718_v28, 0.0 }
0x1616   :  { %6991 = vpush %v4543_v37  ;;  %v4563_v62 = vadd.f32 %v4562_v7, %v4561_v57 }
0x1618   :  { %6993 = vpush %v4563_v62 }
0x1619   :  { %v4714_v42 = vpop.permute.xlu1 %4713 }
0x161a   :  { %v4725_v55 = vsel %vm2002_vm3, %v4714_v42, 0.0 }
0x161b   :  { %v2665_v41 = vpop.permute.xlu2 %2664 }
0x161c   :  { %v4688_v25 = vpop.permute.xlu0 %4687 }
0x161d   :  { %v4698_v9 = vsel %vm2002_vm3, %v4688_v25, 0.0 }
0x161e   :  { %v4699_v49 = vadd.f32 %v4698_v9, %v4697_v6 }
0x1620   :  { %4700 = vadd.xlane.f32.xlu1 %v4699_v49 }
0x1621   :  { %v4716_v24 = vpop.permute.xlu1 %4715 }
0x1622   :  { %v4726_v4 = vsel %vm2002_vm3, %v4716_v24, 0.0 }
0x1623   :  { %v2833_v39 = vpop.permute.xlu2 %2832  ;;  %v4727_v5 = vadd.f32 %v4726_v4, %v4725_v55 }
0x1624   :  { %v2844_v29 = vsub.f32 %v9531_v60, %v2833_v39 }
0x1625   :  { %v4729_v57 = vadd.f32 %v4728_v0, %v4727_v5 }
0x1626   :  { %2872 = vrot.lane.b32.xlu2 %v2844_v29, %s7597_s25 }
0x1629   :  { %v4720_v2 = vpop.permute.xlu1 %4719 }
0x162a   :  { %v4730_v37 = vsel %vm2002_vm3, %v4720_v2, 0.0  ;;  %v4857_v2 = vld [vmem:[%s10696_s13] sm:$0x3] }
0x162b   :  { %v4731_v7 = vadd.f32 %v4730_v37, %v4729_v57  ;;  %v2667_v62 = vpop.permute.xlu2 %2666  ;;  %6854 = vmatpush.msk.msrb.mxu0 %vm2346_vm13, %v4857_v2 }
0x162c   :  { %v2677_v56 = vsub.f32 %v9489_v36, %v2667_v62 }
0x162d   :  { %4732 = vadd.xlane.f32.xlu0 %v4731_v7 }
0x162e   :  { %2706 = vrot.lane.b32.xlu2 %v2677_v56, %s7551_s28 }
0x1633   :  { %v2835_v50 = vpop.permute.xlu2 %2834 }
0x1636   :  { %2856 = vrot.lane.b32.xlu2 %v9511_v11, %s7598_s30  ;;  %v2676_v11 = vsub.f32 %v9531_v60, %v2665_v41 }
0x1639   :  { %2668 = vrot.lane.b32.xlu1 %v8954_v40, %s7529_s26 }
0x163b   :  { %v2837_v28 = vpop.permute.xlu2 %2836 }
0x163c   :  { %v2846_v41 = vsub.f32 %v9508_v21, %v2837_v28 }
0x163e   :  { %2690 = vrot.lane.b32.xlu2 %v8947_v33, %s7597_s25  ;;  %v2845_v33 = vsub.f32 %v9489_v36, %v2835_v50 }
0x1641   :  { %2670 = vrot.lane.b32.xlu0 %v8958_v51, %s7529_s26  ;;  %2852 = vrot.lane.b32.xlu1 %v9476_v45, %s7598_s30 }
0x1643   :  { %v2839_v32 = vpop.permute.xlu2 %2838 }
0x1644   :  { %v2847_v42 = vsub.f32 %v9518_v23, %v2839_v32 }
0x1646   :  { %2878 = vrot.lane.b32.xlu2 %v2847_v42, %s7597_s25 }
0x1647   :  { %s6992_s10 = spop %6991 }
0x1648   :  { %s9570_s11 = smul.f32 %s6992_s10, %s8580_s23 }
0x1649   :  { %2704 = vrot.lane.b32.xlu0 %v2676_v11, %s7551_s28  ;;  %s6994_s8 = spop %6993  ;;  %2686 = vrot.lane.b32.xlu1 %v9493_v61, %s7597_s25 }
0x164a   :  { %s4583_s1 = smul.f32 %s9570_s11, %s9570_s11  ;;  %v4604_v39 = vstv %s9570_s11 }
0x164b   :  { %s4582_s24 = smul.f32 %s6994_s8, %s8580_s23 }
0x164d   :  { %s4584_s12 = ssub.f32 %s4582_s24, %s4583_s1 }
0x164f   :  { %s4585_s18 = smax.f32 %s7528_s22, %s4584_s12 }
0x1650   :  { %s4586_s7 = sadd.f32 1e-08, %s4585_s18 }
0x1651   :  { %2854 = vrot.lane.b32.xlu0 %v9501_v52, %s7598_s30  ;;  %2874 = vrot.lane.b32.xlu1 %v2845_v33, %s7597_s25  ;;  %v2685_v33 = vpop.permute.xlu2 %2684 }
0x1652   :  { %v4587_v40 = vstv %s4586_s7 }
0x1653   :  { %7440 = vrsqrt.f32 %v4587_v40  ;;  %vm4594_vm15 = vweird.f32 %v4587_v40 }
0x1659   :  { %v7441_v51 = vpop.eup %7440  ;;  %2688 = vrot.lane.b32.xlu0 %v8943_v27, %s7597_s25 }
0x165a   :  { %v4589_v45 = vmul.f32 %v7441_v51, %v4587_v40  ;;  %vm4595_vm11 = vweird.f32 %v7441_v51 }
0x165b   :  { %vm4596_vm5 = vmor %vm4594_vm15, %vm4595_vm11 }
0x165c   :  { %v4590_v61 = vmul.f32 %v7441_v51, %v4589_v45 }
0x165e   :  { %v4591_v8 = vmul.f32 0.5, %v4590_v61 }
0x1660   :  { %v4592_v6 = vsub.f32 1.5, %v4591_v8 }
0x1661   :  { %2876 = vrot.lane.b32.xlu0 %v2846_v41, %s7597_s25 }
0x1662   :  { %v4593_v25 = vmul.f32 %v7441_v51, %v4592_v6  ;;  %v2696_v6 = vmul.f32 %v2685_v33, %v8775_v35 }
0x1664   :  { %v4597_v52 = vsel %vm4596_vm5, %v7441_v51, %v4593_v25 }
0x1665   :  { %6995 = vpush %v4597_v52 }
0x1680   :  { %v2873_v25 = vpop.permute.xlu2 %2872 }
0x1693   :  { %v4701_v9 = vpop.xlane.xlu1 %4700 }
0x1694   :  { %v4702_v49 = vrot.slane %v4701_v9, 4 }
0x1696   :  { %v4703_v24 = vadd.f32 %v4702_v49, %v4701_v9  ;;  %s6996_s29 = spop %6995 }
0x1697   :  { %v4599_v27 = vstv %s6996_s29 }
0x1698   :  { %v9588_v4 = vmul.f32 %v9508_v21, %v4599_v27  ;;  %v4704_v55 = vrot.slane %v4703_v24, 2  ;;  %v9604_v61 = vmul.f32 %v9489_v36, %v4599_v27  ;;  %v9607_v8 = vmul.f32 %v9518_v23, %v4599_v27 }
0x169a   :  { %v4607_v29 = vmul.f32 %v4604_v39, %v9588_v4  ;;  %v4705_v5 = vadd.f32 %v4704_v55, %v4703_v24  ;;  %v4606_v52 = vmul.f32 %v4604_v39, %v9604_v61  ;;  %v4608_v24 = vmul.f32 %v4604_v39, %v9607_v8 }
0x169c   :  { %4617 = vrot.lane.b32.xlu2 %v4607_v29, %s7529_s26  ;;  %v4706_v0 = vrot.slane %v4705_v5, 1 }
0x169e   :  { %v4707_v57 = vadd.f32 %v4706_v0, %v4705_v5 }
0x16a0   :  { %v4733_v37 = vpop.xlane.xlu0 %4732  ;;  %6997 = vpush %v4707_v57 }
0x16a1   :  { %v4734_v7 = vrot.slane %v4733_v37, 4 }
0x16a3   :  { %v4735_v62 = vadd.f32 %v4734_v7, %v4733_v37  ;;  %v2707_v37 = vpop.permute.xlu2 %2706 }
0x16a5   :  { %v4736_v56 = vrot.slane %v4735_v62, 2 }
0x16a7   :  { %v4737_v50 = vadd.f32 %v4736_v56, %v4735_v62 }
0x16a9   :  { %v4738_v28 = vrot.slane %v4737_v50, 1 }
0x16ab   :  { %v2669_v32 = vpop.permute.xlu1 %2668  ;;  %v4739_v42 = vadd.f32 %v4738_v28, %v4737_v50 }
0x16ac   :  { %v2678_v11 = vsub.f32 %v9508_v21, %v2669_v32 }
0x16ad   :  { %6999 = vpush %v4739_v42 }
0x16ae   :  { %2708 = vrot.lane.b32.xlu1 %v2678_v11, %s7551_s28 }
0x16b3   :  { %v2853_v40 = vpop.permute.xlu1 %2852  ;;  %v2671_v51 = vpop.permute.xlu0 %2670 }
0x16b4   :  { %v2679_v45 = vsub.f32 %v9518_v23, %v2671_v51  ;;  %v2864_v41 = vmul.f32 %v2853_v40, %v8775_v35  ;;  %v9621_v35 = vmul.f32 %v9531_v60, %v4599_v27  ;;  %v2857_v51 = vpop.permute.xlu2 %2856 }
0x16b6   :  { %2858 = vrot.lane.b32.xlu1 %v9521_v1, %s7598_s30  ;;  %2710 = vrot.lane.b32.xlu0 %v2679_v45, %s7551_s28  ;;  %v2884_v1 = vadd.f32 %v2873_v25, %v2864_v41  ;;  %v4605_v2 = vmul.f32 %v4604_v39, %v9621_v35  ;;  %v7599_v45 = vmov 19  }
0x16b7   :  { %7305 = vset.pattern.permute.xlu1 %v7599_v45  ;;  %7304 = vset.pattern.permute.xlu2 %v7599_v45 }
0x16b8   :  { %7306 = vset.pattern.permute.xlu0 %v7599_v45  ;;  %v7600_v45 = vmov 20  }
0x16bb   :  { %v2687_v9 = vpop.permute.xlu1 %2686  ;;  %v2705_v49 = vpop.permute.xlu0 %2704 }
0x16bc   :  { %v2716_v55 = vadd.f32 %v2705_v49, %v2696_v6  ;;  %v2697_v5 = vmul.f32 %v2687_v9, %v8784_v13  ;;  %v2866_v6 = vmul.f32 %v2857_v51, %v8788_v19 }
0x16be   :  { %4619 = vrot.lane.b32.xlu1 %v4608_v24, %s7529_s26  ;;  %4615 = vrot.lane.b32.xlu0 %v4606_v52, %s7529_s26  ;;  %v9616_v29 = vsel %vm2579_vm4, %v2716_v55, %v2884_v1  ;;  %v2717_v62 = vadd.f32 %v2707_v37, %v2697_v5  ;;  %v2691_v52 = vpop.permute.xlu2 %2690 }
0x16bf   :  { %6855 = vmatmul.msk.f32.vlgmr.msrb.gmra.mxu0 %vm4858_vm7, %v9616_v29 }
0x16c3   :  { %v2855_v0 = vpop.permute.xlu0 %2854  ;;  %v2875_v7 = vpop.permute.xlu1 %2874 }
0x16c4   :  { %v2865_v57 = vmul.f32 %v2855_v0, %v8784_v13  ;;  %v2699_v0 = vmul.f32 %v2691_v52, %v8803_v58  ;;  %v7604_v52 = vmov 73  }
0x16c6   :  { %v2885_v56 = vadd.f32 %v2875_v7, %v2865_v57  ;;  %4613 = vrot.lane.b32.xlu1 %v4605_v2, %s7529_s26  ;;  %v2879_v57 = vpop.permute.xlu2 %2878 }
0x16c8   :  { %v2889_v50 = vsel %vm2579_vm4, %v2717_v62, %v2885_v56 }
0x16c9   :  { %6856 = vmatmul.msk.f32.gmra.mxu0 %vm4858_vm7, %v2889_v50 }
0x16cb   :  { %v2689_v40 = vpop.permute.xlu0 %2688 }
0x16cc   :  { %v2698_v25 = vmul.f32 %v2689_v40, %v8788_v19 }
0x16d1   :  { %s6998_s13 = spop %6997 }
0x16d2   :  { %s9630_s28 = smul.f32 %s6998_s13, %s8580_s23 }
0x16d3   :  { %v2877_v41 = vpop.permute.xlu0 %2876 }
0x16d4   :  { %s4759_s30 = smul.f32 %s9630_s28, %s9630_s28  ;;  %v2886_v49 = vadd.f32 %v2877_v41, %v2866_v6  ;;  %v7601_v41 = vmov 30   ;;  %v7602_v6 = vmov 70  }
0x16de   :  { %s7000_s10 = spop %6999 }
0x16df   :  { %s4758_s11 = smul.f32 %s7000_s10, %s8580_s23  ;;  %s10778_s10 = smov 122  }
0x16e1   :  { %s4760_s8 = ssub.f32 %s4758_s11, %s4759_s30  ;;  %s10779_s11 = smov 124  }
0x16e3   :  { %s4761_s1 = smax.f32 %s7528_s22, %s4760_s8 }
0x16e4   :  { %s4762_s24 = sadd.f32 1e-08, %s4761_s1 }
0x16e6   :  { %v4763_v13 = vstv %s4762_s24 }
0x16e7   :  { %7442 = vrsqrt.f32 %v4763_v13  ;;  %vm4770_vm8 = vweird.f32 %v4763_v13 }
0x16ed   :  { %v7443_v27 = vpop.eup %7442 }
0x16ee   :  { %v4765_v39 = vmul.f32 %v7443_v27, %v4763_v13  ;;  %vm4771_vm0 = vweird.f32 %v7443_v27 }
0x16ef   :  { %vm4772_vm9 = vmor %vm4770_vm8, %vm4771_vm0 }
0x16f0   :  { %v4766_v28 = vmul.f32 %v7443_v27, %v4765_v39 }
0x16f2   :  { %v4767_v32 = vmul.f32 0.5, %v4766_v28 }
0x16f4   :  { %v4768_v42 = vsub.f32 1.5, %v4767_v32 }
0x16f6   :  { %v4769_v11 = vmul.f32 %v7443_v27, %v4768_v42  ;;  %v4618_v40 = vpop.permute.xlu2 %4617 }
0x16f7   :  { %v4627_v51 = vsub.f32 %v9508_v21, %v4618_v40 }
0x16f8   :  { %v4773_v33 = vsel %vm4772_vm9, %v7443_v27, %v4769_v11  ;;  %v4780_v27 = vstv %s9630_s28 }
0x16f9   :  { %7001 = vpush %v4773_v33 }
0x1720   :  { %v2709_v9 = vpop.permute.xlu1 %2708 }
0x1721   :  { %v2718_v24 = vadd.f32 %v2709_v9, %v2698_v25  ;;  %v7603_v25 = vmov 72  }
0x1723   :  { %v2890_v1 = vsel %vm2579_vm4, %v2718_v24, %v2886_v49 }
0x1724   :  { %6857 = vmatmul.msk.f32.gmra.mxu0 %vm4858_vm7, %v2890_v1 }
0x1728   :  { %v2859_v55 = vpop.permute.xlu1 %2858  ;;  %v2711_v5 = vpop.permute.xlu0 %2710 }
0x1729   :  { %v2867_v2 = vmul.f32 %v2859_v55, %v8803_v58  ;;  %v2719_v7 = vadd.f32 %v2711_v5, %v2699_v0 }
0x172a   :  { %s7002_s12 = spop %7001 }
0x172b   :  { %v2887_v37 = vadd.f32 %v2879_v57, %v2867_v2  ;;  %v4775_v19 = vstv %s7002_s12  ;;  %s10783_s12 = smov 127  }
0x172c   :  { %v4777_v62 = vmul.f32 %v9489_v36, %v4775_v19  ;;  %v4778_v56 = vmul.f32 %v9508_v21, %v4775_v19  ;;  %v4779_v13 = vmul.f32 %v9518_v23, %v4775_v19  ;;  %v4776_v58 = vmul.f32 %v9531_v60, %v4775_v19 }
0x172d   :  { %v2891_v39 = vsel %vm2579_vm4, %v2719_v7, %v2887_v37  ;;  %v7489_v7 = vld [vmem:[%s10685_s2 + $0x8] sm:$0xff] }
0x172e   :  { %v4782_v28 = vmul.f32 %v4780_v27, %v4777_v62  ;;  %v4783_v32 = vmul.f32 %v4780_v27, %v4778_v56  ;;  %v4784_v42 = vmul.f32 %v4780_v27, %v4779_v13  ;;  %6858 = vmatmul.msk.f32.gmra.mxu0 %vm4858_vm7, %v2891_v39  ;;  %5854 = vmatpush.msrb.mxu2 %v2891_v39 }
0x172f   :  { %v4781_v11 = vmul.f32 %v4780_v27, %v4776_v58 }
0x1730   :  { %4793 = vrot.lane.b32.xlu1 %v4783_v32, %s7529_s26  ;;  %4791 = vrot.lane.b32.xlu2 %v4782_v28, %s7529_s26  ;;  %v4620_v33 = vpop.permute.xlu1 %4619  ;;  %v7606_v32 = vmov 69  }
0x1731   :  { %4795 = vrot.lane.b32.xlu0 %v4784_v42, %s7529_s26  ;;  %5855 = vmatpush.msrb.mxu2 %v2890_v1 }
0x1733   :  { %5856 = vmatpush.msrb.mxu2 %v2889_v50  ;;  %v4616_v50 = vpop.permute.xlu0 %4615 }
0x1735   :  { %5857 = vmatpush.msrb.mxu2 %v9616_v29  ;;  %v4628_v29 = vsub.f32 %v9518_v23, %v4620_v33 }
0x1738   :  { %4822 = vperm.xlu1 %7305, %v4779_v13   ;;  %4646 = vperm.xlu2 %7304, %v9607_v8   ;;  %v4626_v8 = vsub.f32 %v9489_v36, %v4616_v50  ;;  %v7491_v13 = vld [vmem:[%s10685_s2 + $0x48] sm:$0xff] }
0x1739   :  { %4789 = vrot.lane.b32.xlu0 %v4781_v11, %s7529_s26 }
0x173c   :  { %v4891_v9 = vpop.f32.mrf.mxu0 }
0x1740   :  { %4817 = vperm.xlu1 %7305, %v4778_v56   ;;  %4812 = vperm.xlu2 %7304, %v4777_v62   ;;  %v7490_v56 = vld [vmem:[%s10685_s2 + $0x68] sm:$0xff] }
0x1741   :  { %4641 = vperm.xlu0 %7306, %v9588_v4   ;;  %v4614_v4 = vpop.permute.xlu1 %4613 }
0x1746   :  { %v4894_v49 = vpop.f32.mrf.mxu0 }
0x1748   :  { %4636 = vperm.xlu1 %7305, %v9604_v61   ;;  %4631 = vperm.xlu2 %7304, %v9621_v35   ;;  %v4625_v61 = vsub.f32 %v9531_v60, %v4614_v4  ;;  %v7488_v35 = vld [vmem:[%s10685_s2 + $0x28] sm:$0xff] }
0x1749   :  { %4807 = vperm.xlu0 %7306, %v4776_v58  }
0x1750   :  { %7309 = vset.pattern.permute.xlu1 %v7600_v45  ;;  %7307 = vset.pattern.permute.xlu2 %v7600_v45 }
0x1751   :  { %7308 = vset.pattern.permute.xlu0 %v7600_v45  ;;  %4670 = vperm.xlu2 %7307, %v4628_v29  }
0x1752   :  { %4665 = vperm.xlu0 %7308, %v4627_v51   ;;  %4660 = vperm.xlu1 %7309, %v4626_v8  }
0x175a   :  { %4921 = vrot.lane.b32.xlu0 %v7488_v35, %s7526_s0  ;;  %4655 = vperm.xlu1 %7309, %v4625_v61  }
0x175b   :  { %7310 = vset.pattern.permute.xlu0 %v7601_v41 }
0x1762   :  { %4904 = vperm.xlu0 %7310, %v9531_v60  }
0x176a   :  { %7314 = vset.pattern.permute.xlu0 %v7602_v6 }
0x176b   :  { %5335 = vperm.xlu0 %7314, %v9508_v21  }
0x1773   :  { %7318 = vset.pattern.permute.xlu0 %v7603_v25 }
0x1774   :  { %5407 = vperm.xlu0 %7318, %v9531_v60  }
0x177c   :  { %7321 = vset.pattern.permute.xlu0 %v7604_v52 }
0x177d   :  { %5451 = vperm.xlu0 %7321, %v9489_v36  }
0x178a   :  { %v4792_v2 = vpop.permute.xlu2 %4791 }
0x178b   :  { %v4802_v57 = vsub.f32 %v9489_v36, %v4792_v2 }
0x17a1   :  { %v4897_v5 = vpop.f32.mrf.mxu0 }
0x17a2   :  { %v4794_v24 = vpop.permute.xlu1 %4793 }
0x17a3   :  { %v4803_v1 = vsub.f32 %v9508_v21, %v4794_v24  ;;  %v4796_v55 = vpop.permute.xlu0 %4795 }
0x17a4   :  { %v4804_v0 = vsub.f32 %v9518_v23, %v4796_v55 }
0x17a5   :  { %4841 = vperm.xlu1 %7309, %v4803_v1  }
0x17a6   :  { %4846 = vperm.xlu2 %7307, %v4804_v0  }
0x17ab   :  { %v4900_v37 = vpop.f32.mrf.mxu0  ;;  %v4790_v19 = vpop.permute.xlu0 %4789 }
0x17ac   :  { %4939 = vmatpush.msrb.mxu1 %v4900_v37  ;;  %v4801_v62 = vsub.f32 %v9531_v60, %v4790_v19 }
0x17ad   :  { %4919 = vrot.lane.b32.xlu1 %v7489_v7, %s7526_s0 }
0x17ae   :  { %4836 = vperm.xlu2 %7307, %v4802_v57   ;;  %7312 = vset.pattern.permute.xlu1 %v7601_v41 }
0x17af   :  { %4940 = vmatpush.msrb.mxu1 %v4897_v5 }
0x17b1   :  { %4941 = vmatpush.msrb.mxu1 %v4894_v49 }
0x17b3   :  { %4942 = vmatpush.msrb.mxu1 %v4891_v9  ;;  %v4642_v50 = vpop.permute.xlu0 %4641 }
0x17b5   :  { %4943 = vmatpush.msrb.mxu1 %v8708_v43  ;;  %4925 = vrot.lane.b32.xlu1 %v7490_v56, %s7526_s0  ;;  %v7605_v43 = vmov 71  }
0x17b6   :  { %4831 = vperm.xlu2 %7307, %v4801_v62  }
0x17b7   :  { %4944 = vmatpush.msrb.mxu1 %v8699_v34  ;;  %v4823_v34 = vpop.permute.xlu1 %4822 }
0x17b8   :  { %v4828_v11 = vmul.f32 %v4823_v34, %v9421_v53 }
0x17b9   :  { %4945 = vmatpush.msrb.mxu1 %v8690_v17 }
0x17bb   :  { %4946 = vmatpush.msrb.mxu1 %v8680_v12  ;;  %v4647_v12 = vpop.permute.xlu2 %4646  ;;  %v4808_v45 = vpop.permute.xlu0 %4807 }
0x17bc   :  { %v4652_v58 = vmul.f32 %v4647_v12, %v9421_v53  ;;  %v4825_v9 = vmul.f32 %v4808_v45, %v9423_v16 }
0x17bd   :  { %4912 = vperm.xlu1 %7312, %v9508_v21  }
0x17be   :  { %4923 = vrot.lane.b32.xlu2 %v7491_v13, %s7526_s0 }
0x17bf   :  { %7311 = vset.pattern.permute.xlu2 %v7601_v41  ;;  %v4818_v39 = vpop.permute.xlu1 %4817 }
0x17c0   :  { %v4827_v41 = vmul.f32 %v4818_v39, %v9419_v20 }
0x17c3   :  { %v4813_v17 = vpop.permute.xlu2 %4812 }
0x17c4   :  { %v4666_v61 = vpop.permute.xlu0 %4665  ;;  %v4826_v35 = vmul.f32 %v4813_v17, %v9417_v38 }
0x17c5   :  { %7315 = vset.pattern.permute.xlu1 %v7605_v43 }
0x17c6   :  { %4908 = vperm.xlu2 %7311, %v9489_v36   ;;  %5367 = vperm.xlu1 %7315, %v9531_v60  }
0x17c7   :  { %v4637_v42 = vpop.permute.xlu1 %4636 }
0x17cb   :  { %v4632_v27 = vpop.permute.xlu2 %4631 }
0x17cc   :  { %v4649_v55 = vmul.f32 %v4632_v27, %v9423_v16  ;;  %v4922_v7 = vpop.permute.xlu0 %4921 }
0x17ce   :  { %4916 = vperm.xlu2 %7311, %v9518_v23   ;;  %7317 = vset.pattern.permute.xlu1 %v7602_v6 }
0x17cf   :  { %5339 = vperm.xlu1 %7317, %v9518_v23   ;;  %v4661_v8 = vpop.permute.xlu1 %4660 }
0x17d3   :  { %v4671_v28 = vpop.permute.xlu2 %4670 }
0x17d4   :  { %v4676_v40 = vadd.f32 %v4671_v28, %v4652_v58  ;;  %v4905_v62 = vpop.permute.xlu0 %4904 }
0x17d6   :  { %7313 = vset.pattern.permute.xlu2 %v7602_v6  ;;  %v4651_v6 = vmul.f32 %v4642_v50, %v9419_v20 }
0x17d7   :  { %5327 = vperm.xlu2 %7313, %v9531_v60   ;;  %7319 = vset.pattern.permute.xlu1 %v7603_v25  ;;  %v4656_v4 = vpop.permute.xlu1 %4655 }
0x17d8   :  { %5411 = vperm.xlu1 %7319, %v9489_v36   ;;  %v4675_v49 = vadd.f32 %v4666_v61, %v4651_v6  ;;  %v4673_v57 = vadd.f32 %v4656_v4, %v4649_v55  ;;  %v10777_v4 = vld [vmem:[#allocation5_spill] sm:$0xff]  ;;  %v10780_v55 = vld [vmem:[#allocation7_spill] sm:$0xff] }
0x17df   :  { %5331 = vperm.xlu2 %7313, %v9489_v36  }
0x17e0   :  { %5415 = vperm.xlu1 %7319, %v9508_v21  }
0x17e7   :  { %7316 = vset.pattern.permute.xlu2 %v7605_v43 }
0x17e8   :  { %5371 = vperm.xlu2 %7316, %v9489_v36   ;;  %5419 = vperm.xlu1 %7319, %v9518_v23  }
0x17f0   :  { %5375 = vperm.xlu2 %7316, %v9508_v21   ;;  %7322 = vset.pattern.permute.xlu1 %v7604_v52 }
0x17f1   :  { %5459 = vperm.xlu1 %7322, %v9518_v23  }
0x17f8   :  { %5379 = vperm.xlu2 %7316, %v9518_v23  }
0x17f9   :  { %7323 = vset.pattern.permute.xlu1 %v7606_v32 }
0x17fa   :  { %5307 = vperm.xlu1 %7323, %v9531_v60  }
0x1800   :  { %v4847_v33 = vpop.permute.xlu2 %4846  ;;  %7320 = vset.pattern.permute.xlu2 %v7604_v52 }
0x1801   :  { %v4852_v29 = vadd.f32 %v4847_v33, %v4828_v11  ;;  %5447 = vperm.xlu2 %7320, %v9531_v60   ;;  %v5336_v33 = vpop.permute.xlu0 %5335 }
0x1802   :  { %5311 = vperm.xlu1 %7323, %v9489_v36   ;;  %v4650_v36 = vmul.f32 %v4637_v42, %v9417_v38 }
0x1803   :  { %v4856_v51 = vsel %vm2002_vm3, %v4676_v40, %v4852_v29 }
0x1804   :  { %4947 = vmatpush.msrb.mxu1 %v4856_v51  ;;  %v4674_v5 = vadd.f32 %v4661_v8, %v4650_v36  ;;  %v5344_v51 = vmul.f32 %v5336_v33, %v8743_v30 }
0x1808   :  { %v4837_v53 = vpop.permute.xlu2 %4836 }
0x1809   :  { %5455 = vperm.xlu2 %7320, %v9508_v21   ;;  %v4850_v24 = vadd.f32 %v4837_v53, %v4826_v35  ;;  %v5408_v8 = vpop.permute.xlu0 %5407 }
0x180a   :  { %5315 = vperm.xlu1 %7323, %v9508_v21   ;;  %v5422_v61 = vmul.f32 %v5408_v8, %v10777_v4 }
0x180b   :  { %v4854_v37 = vsel %vm2002_vm3, %v4674_v5, %v4850_v24 }
0x1810   :  { %v4832_v25 = vpop.permute.xlu2 %4831 }
0x1811   :  { %7324 = vset.pattern.permute.xlu2 %v7606_v32  ;;  %v4849_v0 = vadd.f32 %v4832_v25, %v4825_v9 }
0x1813   :  { %v4853_v38 = vsel %vm2002_vm3, %v4673_v57, %v4849_v0  ;;  %v5452_v57 = vpop.permute.xlu0 %5451 }
0x1817   :  { %v4842_v52 = vpop.permute.xlu1 %4841 }
0x1818   :  { %v4851_v1 = vadd.f32 %v4842_v52, %v4827_v41  ;;  %v4924_v19 = vpop.permute.xlu2 %4923 }
0x181a   :  { %v4855_v2 = vsel %vm2002_vm3, %v4675_v49, %v4851_v1 }
0x181b   :  { %4948 = vmatpush.msrb.mxu1 %v4855_v2 }
0x181d   :  { %4949 = vmatpush.msrb.mxu1 %v4854_v37  ;;  %v7607_v37 = vmov 21  }
0x181e   :  { %7327 = vset.pattern.permute.xlu1 %v7607_v37  ;;  %7326 = vset.pattern.permute.xlu0 %v7607_v37 }
0x181f   :  { %v4920_v20 = vpop.permute.xlu1 %4919  ;;  %4950 = vmatpush.msrb.mxu1 %v4853_v38  ;;  %v10781_v38 = vld [vmem:[#allocation6_spill] sm:$0xff] }
0x1820   :  { %6859 = vmatmul.msk.f32.vlgmr.msrb.gmra.mxu1 %vm3949_vm12, %v4920_v20  ;;  %v4909_v43 = vpop.permute.xlu2 %4908  ;;  %v5463_v20 = vmul.f32 %v5452_v57, %v10781_v38 }
0x1827   :  { %v4926_v16 = vpop.permute.xlu1 %4925 }
0x1828   :  { %6860 = vmatmul.msk.f32.gmra.mxu1 %vm3949_vm12, %v4922_v7  ;;  %v4917_v34 = vpop.permute.xlu2 %4916 }
0x182f   :  { %v4913_v40 = vpop.permute.xlu1 %4912 }
0x1830   :  { %6861 = vmatmul.msk.f32.gmra.mxu1 %vm3949_vm12, %v4924_v19 }
0x1831   :  { %v5328_v28 = vpop.permute.xlu2 %5327 }
0x1838   :  { %6862 = vmatmul.msk.f32.gmra.mxu1 %vm3949_vm12, %v4926_v16  ;;  %v5368_v41 = vpop.permute.xlu1 %5367 }
0x1839   :  { %v5332_v50 = vpop.permute.xlu2 %5331 }
0x1841   :  { %v5340_v49 = vpop.permute.xlu1 %5339 }
0x1842   :  { %v5372_v53 = vpop.permute.xlu2 %5371 }
0x184a   :  { %v5376_v35 = vpop.permute.xlu2 %5375  ;;  %v5412_v7 = vpop.permute.xlu1 %5411 }
0x184b   :  { %v5384_v6 = vmul.f32 %v5376_v35, %v8743_v30 }
0x1852   :  { %v5380_v25 = vpop.permute.xlu2 %5379 }
0x1853   :  { %v5385_v5 = vmul.f32 %v5380_v25, %v10780_v55 }
0x185b   :  { %v5448_v19 = vpop.permute.xlu2 %5447 }
0x1863   :  { %v5456_v33 = vpop.permute.xlu2 %5455 }
0x189d   :  { %v4952_v56 = vpop.f32.mrf.mxu1 }
0x189e   :  { %v9728_v13 = vadd.f32 %v4952_v56, %v4905_v62 }
0x18a0   :  { %5116 = vrot.lane.b32.xlu2 %v9728_v13, %s10776_s6  ;;  %v4980_v17 = vmul.f32 %v9728_v13, %v9728_v13  ;;  %v4964_v52 = vsel %vm2002_vm3, %v9728_v13, 0.0 }
0x18a2   :  { %v4984_v62 = vsel %vm2002_vm3, %v4980_v17, 0.0 }
0x18a5   :  { %v4955_v12 = vpop.f32.mrf.mxu1 }
0x18a6   :  { %v9735_v39 = vadd.f32 %v4955_v12, %v4909_v43 }
0x18a8   :  { %5148 = vrot.lane.b32.xlu2 %v4980_v17, %s10776_s6  ;;  %v4981_v58 = vmul.f32 %v9735_v39, %v9735_v39  ;;  %v4965_v36 = vsel %vm2002_vm3, %v9735_v39, 0.0  ;;  %v5343_v17 = vmul.f32 %v5332_v50, %v10781_v38  ;;  %v5383_v50 = vmul.f32 %v5372_v53, %v10781_v38 }
0x18a9   :  { %v4966_v24 = vadd.f32 %v4965_v36, %v4964_v52  ;;  %v5345_v36 = vmul.f32 %v5340_v49, %v10780_v55 }
0x18aa   :  { %v4985_v16 = vsel %vm2002_vm3, %v4981_v58, 0.0 }
0x18ab   :  { %v4986_v43 = vadd.f32 %v4985_v16, %v4984_v62 }
0x18ad   :  { %v4958_v27 = vpop.f32.mrf.mxu1 }
0x18ae   :  { %v9749_v29 = vadd.f32 %v4958_v27, %v4913_v40  ;;  %v5342_v40 = vmul.f32 %v5328_v28, %v10777_v4 }
0x18b0   :  { %5118 = vrot.lane.b32.xlu2 %v9735_v39, %s10776_s6  ;;  %v4982_v45 = vmul.f32 %v9749_v29, %v9749_v29  ;;  %v4967_v9 = vsel %vm2002_vm3, %v9749_v29, 0.0 }
0x18b1   :  { %v4968_v0 = vadd.f32 %v4967_v9, %v4966_v24 }
0x18b2   :  { %v4987_v56 = vsel %vm2002_vm3, %v4982_v45, 0.0 }
0x18b3   :  { %v4988_v27 = vadd.f32 %v4987_v56, %v4986_v43 }
0x18b5   :  { %v4961_v32 = vpop.f32.mrf.mxu1 }
0x18b6   :  { %v9739_v42 = vadd.f32 %v4961_v32, %v4917_v34  ;;  %v5416_v34 = vpop.permute.xlu1 %5415 }
0x18b8   :  { %5122 = vrot.lane.b32.xlu1 %v9739_v42, %s10776_s6  ;;  %5150 = vrot.lane.b32.xlu2 %v4981_v58, %s10776_s6  ;;  %v4983_v11 = vmul.f32 %v9739_v42, %v9739_v42  ;;  %v4969_v1 = vsel %vm2002_vm3, %v9739_v42, 0.0 }
0x18b9   :  { %v4970_v2 = vadd.f32 %v4969_v1, %v4968_v0  ;;  %v5462_v0 = vmul.f32 %v5448_v19, %v10777_v4 }
0x18ba   :  { %5154 = vrot.lane.b32.xlu0 %v4983_v11, %s10776_s6  ;;  %v4989_v12 = vsel %vm2002_vm3, %v4983_v11, 0.0  ;;  %v5424_v11 = vmul.f32 %v5416_v34, %v8743_v30 }
0x18bb   :  { %v4990_v32 = vadd.f32 %v4989_v12, %v4988_v27 }
0x18c0   :  { %5120 = vrot.lane.b32.xlu2 %v9749_v29, %s10776_s6 }
0x18c2   :  { %5354 = vrot.lane.b32.xlu0 %v5344_v51, %s7578_s19  ;;  %v5420_v51 = vpop.permute.xlu1 %5419 }
0x18c3   :  { %v5425_v28 = vmul.f32 %v5420_v51, %v10780_v55 }
0x18c8   :  { %5152 = vrot.lane.b32.xlu2 %v4982_v45, %s10776_s6  ;;  %s10782_s6 = smov 120  }
0x18ca   :  { %5430 = vrot.lane.b32.xlu0 %v5422_v61, %s10778_s10  ;;  %v5460_v8 = vpop.permute.xlu1 %5459 }
0x18d0   :  { %5319 = vperm.xlu2 %7324, %v9518_v23  }
0x18d2   :  { %v9789_v61 = vpop.permute.xlu1 %5307 }
0x18d8   :  { %5394 = vrot.lane.b32.xlu2 %v5384_v6, %s10779_s11 }
0x18d9   :  { %7325 = vset.pattern.permute.xlu2 %v7607_v37 }
0x18da   :  { %v9794_v6 = vpop.permute.xlu1 %5311 }
0x18e0   :  { %5396 = vrot.lane.b32.xlu2 %v5385_v5, %s10779_s11 }
0x18e2   :  { %4971 = vadd.xlane.f32.xlu1 %v4970_v2  ;;  %v9799_v52 = vpop.permute.xlu1 %5315 }
0x18e8   :  { %5472 = vrot.lane.b32.xlu2 %v5463_v20, %s10782_s6 }
0x18f0   :  { %5487 = vperm.xlu2 %7325, %v9531_v60   ;;  %v5382_v60 = vmul.f32 %v5368_v41, %v10777_v4  ;;  %v5423_v41 = vmul.f32 %v5412_v7, %v10781_v38  ;;  %v5464_v7 = vmul.f32 %v5456_v33, %v8743_v30  ;;  %v9821_v33 = vld [vmem:[%s10688_s5 + $0x8] sm:$0xff] }
0x18f4   :  { %4991 = vadd.xlane.f32.xlu0 %v4990_v32  ;;  %v5465_v32 = vmul.f32 %v5460_v8, %v10780_v55 }
0x18fa   :  { %v5117_v58 = vpop.permute.xlu2 %5116 }
0x18fb   :  { %5350 = vrot.lane.b32.xlu1 %v5342_v40, %s7578_s19  ;;  %v5128_v53 = vsel %vm2002_vm3, %v5117_v58, 0.0 }
0x1902   :  { %v5149_v45 = vpop.permute.xlu2 %5148 }
0x1903   :  { %5352 = vrot.lane.b32.xlu1 %v5343_v17, %s7578_s19  ;;  %v5160_v56 = vsel %vm2002_vm3, %v5149_v45, 0.0 }
0x1908   :  { %5434 = vrot.lane.b32.xlu0 %v5424_v11, %s10778_s10 }
0x190a   :  { %v5119_v35 = vpop.permute.xlu2 %5118 }
0x190b   :  { %5390 = vrot.lane.b32.xlu1 %v5382_v60, %s10779_s11  ;;  %v5129_v24 = vsel %vm2002_vm3, %v5119_v35, 0.0 }
0x190c   :  { %v5130_v5 = vadd.f32 %v5129_v24, %v5128_v53 }
0x1910   :  { %5436 = vrot.lane.b32.xlu0 %v5425_v28, %s10778_s10 }
0x1912   :  { %v5151_v25 = vpop.permute.xlu2 %5150 }
0x1913   :  { %5392 = vrot.lane.b32.xlu1 %v5383_v50, %s10779_s11  ;;  %v5161_v16 = vsel %vm2002_vm3, %v5151_v25, 0.0 }
0x1914   :  { %v5162_v19 = vadd.f32 %v5161_v16, %v5160_v56 }
0x191a   :  { %v5121_v9 = vpop.permute.xlu2 %5120 }
0x191b   :  { %5356 = vrot.lane.b32.xlu1 %v5345_v36, %s7578_s19  ;;  %v5131_v1 = vsel %vm2002_vm3, %v5121_v9, 0.0 }
0x191c   :  { %v5132_v49 = vadd.f32 %v5131_v1, %v5130_v5 }
0x1922   :  { %v5153_v20 = vpop.permute.xlu2 %5152 }
0x1923   :  { %5432 = vrot.lane.b32.xlu1 %v5423_v41, %s10778_s10  ;;  %v5163_v43 = vsel %vm2002_vm3, %v5153_v20, 0.0 }
0x1924   :  { %v5164_v34 = vadd.f32 %v5163_v43, %v5162_v19 }
0x192a   :  { %v5123_v2 = vpop.permute.xlu1 %5122  ;;  %v5320_v53 = vpop.permute.xlu2 %5319 }
0x192b   :  { %v5133_v57 = vsel %vm2002_vm3, %v5123_v2, 0.0  ;;  %5470 = vrot.lane.b32.xlu1 %v5462_v0, %s10782_s6 }
0x192c   :  { %v5134_v37 = vadd.f32 %v5133_v57, %v5132_v49  ;;  %v5155_v62 = vpop.permute.xlu0 %5154  ;;  %v5322_v57 = vmul.f32 %v9789_v61, %v10777_v4 }
0x192d   :  { %v5165_v12 = vsel %vm2002_vm3, %v5155_v62, 0.0 }
0x192e   :  { %5135 = vadd.xlane.f32.xlu2 %v5134_v37  ;;  %v5166_v27 = vadd.f32 %v5165_v12, %v5164_v34 }
0x1932   :  { %v5395_v5 = vpop.permute.xlu2 %5394 }
0x1933   :  { %5474 = vrot.lane.b32.xlu1 %v5464_v7, %s10782_s6 }
0x1934   :  { %v9824_v40 = vpop.permute.xlu0 %5354 }
0x193a   :  { %5167 = vadd.xlane.f32.xlu0 %v5166_v27  ;;  %v5397_v49 = vpop.permute.xlu2 %5396 }
0x193b   :  { %5476 = vrot.lane.b32.xlu1 %v5465_v32, %s10782_s6 }
0x193c   :  { %v5431_v60 = vpop.permute.xlu0 %5430 }
0x1942   :  { %v5473_v7 = vpop.permute.xlu2 %5472 }
0x1943   :  { %5499 = vperm.xlu1 %7327, %v9518_v23  }
0x1946   :  { %5495 = vperm.xlu2 %7325, %v9508_v21  }
0x194a   :  { %v5488_v12 = vpop.permute.xlu2 %5487 }
0x194e   :  { %5491 = vperm.xlu0 %7326, %v9821_v33  }
0x1955   :  { %v4972_v51 = vpop.xlane.xlu1 %4971 }
0x1956   :  { %v4973_v58 = vrot.slane %v4972_v51, 4 }
0x1958   :  { %v4974_v17 = vadd.f32 %v4973_v58, %v4972_v51 }
0x195a   :  { %v4975_v8 = vrot.slane %v4974_v17, 2 }
0x195c   :  { %v4976_v11 = vadd.f32 %v4975_v8, %v4974_v17 }
0x195e   :  { %v4977_v45 = vrot.slane %v4976_v11, 1 }
0x1960   :  { %v4978_v28 = vadd.f32 %v4977_v45, %v4976_v11  ;;  %v5324_v45 = vmul.f32 %v9799_v52, %v8743_v30 }
0x1962   :  { %7003 = vpush %v4978_v28 }
0x1967   :  { %v4992_v23 = vpop.xlane.xlu0 %4991 }
0x1968   :  { %v4993_v21 = vrot.slane %v4992_v23, 4 }
0x196a   :  { %v4994_v35 = vadd.f32 %v4993_v21, %v4992_v23  ;;  %v5323_v21 = vmul.f32 %v9794_v6, %v10781_v38 }
0x196c   :  { %v4995_v50 = vrot.slane %v4994_v35, 2 }
0x196d   :  { %v5351_v36 = vpop.permute.xlu1 %5350 }
0x196e   :  { %v4996_v25 = vadd.f32 %v4995_v50, %v4994_v35  ;;  %v5362_v20 = vadd.f32 %v5351_v36, %v5322_v57  ;;  %v5364_v36 = vadd.f32 %v9824_v40, %v5324_v45 }
0x1970   :  { %v4997_v41 = vrot.slane %v4996_v25, 1 }
0x1972   :  { %v4998_v9 = vadd.f32 %v4997_v41, %v4996_v25 }
0x1974   :  { %7005 = vpush %v4998_v9 }
0x1975   :  { %v5353_v24 = vpop.permute.xlu1 %5352 }
0x1976   :  { %v5363_v9 = vadd.f32 %v5353_v24, %v5323_v21 }
0x197a   :  { %v5435_v62 = vpop.permute.xlu0 %5434 }
0x197d   :  { %v5391_v1 = vpop.permute.xlu1 %5390 }
0x197e   :  { %v5402_v16 = vadd.f32 %v5391_v1, %v5362_v20 }
0x1980   :  { %v5442_v56 = vadd.f32 %v5431_v60, %v5402_v16  ;;  %v5325_v60 = vmul.f32 %v5320_v53, %v10780_v55 }
0x1982   :  { %v5437_v4 = vpop.permute.xlu0 %5436 }
0x1985   :  { %v5393_v0 = vpop.permute.xlu1 %5392 }
0x1986   :  { %v5403_v20 = vadd.f32 %v5393_v0, %v5363_v9 }
0x198d   :  { %v5357_v2 = vpop.permute.xlu1 %5356 }
0x198e   :  { %v5365_v25 = vadd.f32 %v5357_v2, %v5325_v60 }
0x1990   :  { %v5405_v30 = vadd.f32 %v5397_v49, %v5365_v25 }
0x1993   :  { %s7004_s1 = spop %7003 }
0x1994   :  { %s9831_s24 = smul.f32 %s7004_s1, %s8580_s23 }
0x1995   :  { %v5433_v37 = vpop.permute.xlu1 %5432 }
0x1996   :  { %s5018_s18 = smul.f32 %s9831_s24, %s9831_s24  ;;  %v5443_v55 = vadd.f32 %v5433_v37, %v5403_v20  ;;  %v9886_v20 = vld [vmem:[%s10688_s5] sm:$0xff] }
0x1998   :  { %v5483_v24 = vadd.f32 %v5473_v7, %v5443_v55 }
0x199d   :  { %v5471_v43 = vpop.permute.xlu1 %5470 }
0x199e   :  { %v5482_v19 = vadd.f32 %v5471_v43, %v5442_v56  ;;  %v5404_v56 = vadd.f32 %v5395_v5, %v5364_v36 }
0x19a0   :  { %v9828_v34 = vadd.f32 %v5488_v12, %v5482_v19  ;;  %v5444_v53 = vadd.f32 %v5435_v62, %v5404_v56  ;;  %v9895_v56 = vld [vmem:[%s10688_s5 + $0x10] sm:$0xff] }
0x19a1   :  { %v5136_v61 = vpop.xlane.xlu2 %5135 }
0x19a2   :  { %5650 = vrot.lane.b32.xlu1 %v9828_v34, %s10783_s12  ;;  %v5137_v32 = vrot.slane %v5136_v61, 4  ;;  %v5506_v7 = vsel %vm2579_vm4, %v9828_v34, 0.0 }
0x19a4   :  { %v5138_v8 = vadd.f32 %v5137_v32, %v5136_v61  ;;  %v5445_v61 = vadd.f32 %v5437_v4, %v5405_v30  ;;  %v5522_v4 = vmul.f32 %v9828_v34, %v9828_v34 }
0x19a5   :  { %s7006_s7 = spop %7005  ;;  %v5475_v27 = vpop.permute.xlu1 %5474 }
0x19a6   :  { %s5017_s29 = smul.f32 %s7006_s7, %s8580_s23  ;;  %v5139_v28 = vrot.slane %v5138_v8, 2  ;;  %v5484_v12 = vadd.f32 %v5475_v27, %v5444_v53 }
0x19a8   :  { %s5019_s25 = ssub.f32 %s5017_s29, %s5018_s18  ;;  %v5140_v57 = vadd.f32 %v5139_v28, %v5138_v8  ;;  %v5526_v28 = vsel %vm2579_vm4, %v5522_v4, 0.0 }
0x19a9   :  { %v5496_v38 = vpop.permute.xlu2 %5495 }
0x19aa   :  { %s5020_s21 = smax.f32 %s7528_s22, %s5019_s25  ;;  %v5141_v19 = vrot.slane %v5140_v57, 1  ;;  %v9845_v32 = vadd.f32 %v5496_v38, %v5484_v12 }
0x19ab   :  { %s5021_s13 = sadd.f32 1e-08, %s5020_s21 }
0x19ac   :  { %v5142_v49 = vadd.f32 %v5141_v19, %v5140_v57  ;;  %v5524_v8 = vmul.f32 %v9845_v32, %v9845_v32  ;;  %v5509_v45 = vsel %vm2579_vm4, %v9845_v32, 0.0 }
0x19ad   :  { %v5022_v51 = vstv %s5021_s13  ;;  %v5168_v58 = vpop.xlane.xlu0 %5167  ;;  %v5477_v35 = vpop.permute.xlu1 %5476 }
0x19ae   :  { %7444 = vrsqrt.f32 %v5022_v51  ;;  %v5169_v17 = vrot.slane %v5168_v58, 4  ;;  %vm5029_vm11 = vweird.f32 %v5022_v51  ;;  %v5485_v0 = vadd.f32 %v5477_v35, %v5445_v61 }
0x19af   :  { %v5529_v36 = vsel %vm2579_vm4, %v5524_v8, 0.0 }
0x19b0   :  { %v5170_v11 = vadd.f32 %v5169_v17, %v5168_v58 }
0x19b2   :  { %v5171_v50 = vrot.slane %v5170_v11, 2 }
0x19b4   :  { %v7445_v23 = vpop.eup %7444  ;;  %v5172_v16 = vadd.f32 %v5171_v50, %v5170_v11 }
0x19b5   :  { %v5024_v41 = vmul.f32 %v7445_v23, %v5022_v51  ;;  %vm5030_vm12 = vweird.f32 %v7445_v23  ;;  %v5500_v2 = vpop.permute.xlu1 %5499 }
0x19b6   :  { %v5173_v6 = vrot.slane %v5172_v16, 1  ;;  %vm5031_vm15 = vmor %vm5029_vm11, %vm5030_vm12  ;;  %v9847_v58 = vadd.f32 %v5500_v2, %v5485_v0 }
0x19b7   :  { %v5025_v1 = vmul.f32 %v7445_v23, %v5024_v41 }
0x19b8   :  { %v5174_v37 = vadd.f32 %v5173_v6, %v5172_v16  ;;  %v5525_v60 = vmul.f32 %v9847_v58, %v9847_v58  ;;  %v5511_v50 = vsel %vm2579_vm4, %v9847_v58, 0.0 }
0x19b9   :  { %v5026_v52 = vmul.f32 0.5, %v5025_v1 }
0x19ba   :  { %v5531_v9 = vsel %vm2579_vm4, %v5525_v60, 0.0 }
0x19bb   :  { %v5027_v43 = vsub.f32 1.5, %v5026_v52  ;;  %v9905_v52 = vstv %s9831_s24 }
0x19bd   :  { %v5028_v40 = vmul.f32 %v7445_v23, %v5027_v43 }
0x19bf   :  { %v5032_v5 = vsel %vm5031_vm15, %v7445_v23, %v5028_v40 }
0x19c0   :  { %7007 = vpush %v5032_v5  ;;  %v5492_v62 = vpop.permute.xlu0 %5491 }
0x19c1   :  { %7009 = vpush %v5142_v49  ;;  %v9849_v17 = vadd.f32 %v5492_v62, %v5483_v24 }
0x19c2   :  { %7011 = vpush %v5174_v37 }
0x19c3   :  { %5652 = vrot.lane.b32.xlu1 %v9849_v17, %s10783_s12  ;;  %v5507_v27 = vsel %vm2579_vm4, %v9849_v17, 0.0  ;;  %v5523_v51 = vmul.f32 %v9849_v17, %v9849_v17 }
0x19c4   :  { %v5508_v11 = vadd.f32 %v5507_v27, %v5506_v7 }
0x19c5   :  { %v5527_v23 = vsel %vm2579_vm4, %v5523_v51, 0.0 }
0x19c6   :  { %v5510_v21 = vadd.f32 %v5509_v45, %v5508_v11  ;;  %v5528_v35 = vadd.f32 %v5527_v23, %v5526_v28 }
0x19c8   :  { %v5512_v25 = vadd.f32 %v5511_v50, %v5510_v21  ;;  %v5530_v41 = vadd.f32 %v5529_v36, %v5528_v35 }
0x19ca   :  { %5513 = vadd.xlane.f32.xlu2 %v5512_v25  ;;  %v5532_v1 = vadd.f32 %v5531_v9, %v5530_v41 }
0x19cb   :  { %5654 = vrot.lane.b32.xlu1 %v9845_v32, %s10783_s12 }
0x19cc   :  { %5533 = vadd.xlane.f32.xlu0 %v5532_v1 }
0x19d3   :  { %5682 = vrot.lane.b32.xlu1 %v5522_v4, %s10783_s12 }
0x19db   :  { %5684 = vrot.lane.b32.xlu1 %v5523_v51, %s10783_s12 }
0x19e0   :  { %5686 = vrot.lane.b32.xlu0 %v5524_v8, %s10783_s12 }
0x19e2   :  { %5656 = vrot.lane.b32.xlu2 %v9847_v58, %s10783_s12 }
0x19e3   :  { %5688 = vrot.lane.b32.xlu1 %v5525_v60, %s10783_s12 }
0x19f1   :  { %s7008_s28 = spop %7007 }
0x19f2   :  { %v9881_v57 = vstv %s7008_s28  ;;  %s7010_s30 = spop %7009 }
0x19f3   :  { %v9890_v16 = vmul.f32 %v9886_v20, %v9881_v57  ;;  %v9899_v30 = vmul.f32 %v9895_v56, %v9881_v57  ;;  %s9902_s8 = smul.f32 %s7010_s30, %s8580_s23  ;;  %s7012_s1 = spop %7011 }
0x19f4   :  { %s5193_s18 = smul.f32 %s7012_s1, %s8580_s23 }
0x19f5   :  { %v9910_v55 = vmul.f32 %v9905_v52, %v9890_v16  ;;  %v9914_v53 = vmul.f32 %v9905_v52, %v9899_v30  ;;  %s5194_s7 = smul.f32 %s9902_s8, %s9902_s8 }
0x19f7   :  { %s5195_s29 = ssub.f32 %s5193_s18, %s5194_s7 }
0x19f9   :  { %s5196_s25 = smax.f32 %s7528_s22, %s5195_s29  ;;  %s7608_s29 = smov 106  }
0x19fa   :  { %s5197_s21 = sadd.f32 1e-08, %s5196_s25 }
0x19fc   :  { %v5198_v43 = vstv %s5197_s21 }
0x19fd   :  { %7446 = vrsqrt.f32 %v5198_v43  ;;  %vm5205_vm0 = vweird.f32 %v5198_v43 }
0x1a03   :  { %v7447_v19 = vpop.eup %7446 }
0x1a04   :  { %v5200_v38 = vmul.f32 %v7447_v19, %v5198_v43  ;;  %vm5206_vm5 = vweird.f32 %v7447_v19 }
0x1a05   :  { %vm5207_vm8 = vmor %vm5205_vm0, %vm5206_vm5 }
0x1a06   :  { %v5201_v6 = vmul.f32 %v7447_v19, %v5200_v38 }
0x1a08   :  { %v5202_v12 = vmul.f32 0.5, %v5201_v6 }
0x1a0a   :  { %v5203_v61 = vsub.f32 1.5, %v5202_v12 }
0x1a0c   :  { %v5204_v40 = vmul.f32 %v7447_v19, %v5203_v61 }
0x1a0e   :  { %v5208_v2 = vsel %vm5207_vm8, %v7447_v19, %v5204_v40 }
0x1a0f   :  { %7013 = vpush %v5208_v2 }
0x1a14   :  { %v5651_v24 = vpop.permute.xlu1 %5650 }
0x1a15   :  { %v5662_v51 = vsel %vm2579_vm4, %v5651_v24, 0.0 }
0x1a35   :  { %v5653_v0 = vpop.permute.xlu1 %5652 }
0x1a36   :  { %v5663_v4 = vsel %vm2579_vm4, %v5653_v0, 0.0 }
0x1a37   :  { %v5664_v11 = vadd.f32 %v5663_v4, %v5662_v51 }
0x1a3d   :  { %v5655_v5 = vpop.permute.xlu1 %5654  ;;  %v5514_v49 = vpop.xlane.xlu2 %5513 }
0x1a3e   :  { %v5515_v37 = vrot.slane %v5514_v49, 4  ;;  %v5665_v8 = vsel %vm2579_vm4, %v5655_v5, 0.0 }
0x1a3f   :  { %v5534_v62 = vpop.xlane.xlu0 %5533  ;;  %v5666_v28 = vadd.f32 %v5665_v8, %v5664_v11 }
0x1a40   :  { %v5516_v7 = vadd.f32 %v5515_v37, %v5514_v49  ;;  %v5535_v27 = vrot.slane %v5534_v62, 4  ;;  %s9927_s23 = spop %7013 }
0x1a42   :  { %v5536_v45 = vadd.f32 %v5535_v27, %v5534_v62  ;;  %v5517_v60 = vrot.slane %v5516_v7, 2 }
0x1a44   :  { %v5518_v35 = vadd.f32 %v5517_v60, %v5516_v7  ;;  %v5537_v50 = vrot.slane %v5536_v45, 2 }
0x1a45   :  { %v5683_v23 = vpop.permute.xlu1 %5682  ;;  %v5657_v21 = vpop.permute.xlu2 %5656 }
0x1a46   :  { %v5667_v36 = vsel %vm2579_vm4, %v5657_v21, 0.0  ;;  %v5519_v41 = vrot.slane %v5518_v35, 1  ;;  %v5538_v9 = vadd.f32 %v5537_v50, %v5536_v45  ;;  %v5694_v12 = vsel %vm2579_vm4, %v5683_v23, 0.0 }
0x1a47   :  { %v5668_v25 = vadd.f32 %v5667_v36, %v5666_v28 }
0x1a48   :  { %v5520_v1 = vadd.f32 %v5519_v41, %v5518_v35  ;;  %v5539_v43 = vrot.slane %v5538_v9, 1 }
0x1a49   :  { %5669 = vadd.xlane.f32.xlu1 %v5668_v25 }
0x1a4a   :  { %7015 = vpush %v5520_v1  ;;  %v5540_v19 = vadd.f32 %v5539_v43, %v5538_v9  ;;  %v9940_v9 = vld [vmem:[%s10688_s5 + $0x18] sm:$0xff] }
0x1a4c   :  { %7017 = vpush %v5540_v19 }
0x1a4d   :  { %v5685_v38 = vpop.permute.xlu1 %5684 }
0x1a4e   :  { %v5695_v6 = vsel %vm2579_vm4, %v5685_v38, 0.0 }
0x1a4f   :  { %v5696_v61 = vadd.f32 %v5695_v6, %v5694_v12 }
0x1a52   :  { %v5687_v40 = vpop.permute.xlu0 %5686 }
0x1a53   :  { %v5697_v2 = vsel %vm2579_vm4, %v5687_v40, 0.0 }
0x1a54   :  { %v5698_v24 = vadd.f32 %v5697_v2, %v5696_v61 }
0x1a55   :  { %v5689_v0 = vpop.permute.xlu1 %5688 }
0x1a56   :  { %v5699_v5 = vsel %vm2579_vm4, %v5689_v0, 0.0 }
0x1a57   :  { %v5700_v49 = vadd.f32 %v5699_v5, %v5698_v24 }
0x1a59   :  { %5701 = vadd.xlane.f32.xlu0 %v5700_v49 }
0x1a7b   :  { %s7016_s24 = spop %7015 }
0x1a7c   :  { %s9930_s13 = smul.f32 %s7016_s24, %s8896_s9 }
0x1a7d   :  { %s7018_s28 = spop %7017 }
0x1a7e   :  { %s5560_s30 = smul.f32 %s9930_s13, %s9930_s13  ;;  %v5581_v43 = vstv %s9930_s13 }
0x1a7f   :  { %s5559_s10 = smul.f32 %s7018_s28, %s8896_s9 }
0x1a81   :  { %s5561_s11 = ssub.f32 %s5559_s10, %s5560_s30 }
0x1a83   :  { %s5562_s6 = smax.f32 %s7528_s22, %s5561_s11 }
0x1a84   :  { %s5563_s19 = sadd.f32 1e-08, %s5562_s6 }
0x1a86   :  { %v5564_v37 = vstv %s5563_s19  ;;  %s7609_s19 = smov 107  }
0x1a87   :  { %7448 = vrsqrt.f32 %v5564_v37  ;;  %vm5571_vm12 = vweird.f32 %v5564_v37 }
0x1a8d   :  { %v7449_v62 = vpop.eup %7448 }
0x1a8e   :  { %v5566_v4 = vmul.f32 %v7449_v62, %v5564_v37  ;;  %vm5572_vm9 = vweird.f32 %v7449_v62 }
0x1a8f   :  { %vm5573_vm11 = vmor %vm5571_vm12, %vm5572_vm9 }
0x1a90   :  { %v5567_v7 = vmul.f32 %v7449_v62, %v5566_v4 }
0x1a92   :  { %v5568_v27 = vmul.f32 0.5, %v5567_v7 }
0x1a94   :  { %v5569_v51 = vsub.f32 1.5, %v5568_v27 }
0x1a96   :  { %v5570_v8 = vmul.f32 %v7449_v62, %v5569_v51 }
0x1a98   :  { %v5574_v11 = vsel %vm5573_vm11, %v7449_v62, %v5570_v8 }
0x1a99   :  { %7019 = vpush %v5574_v11 }
0x1abc   :  { %v5670_v45 = vpop.xlane.xlu1 %5669 }
0x1abd   :  { %v5671_v60 = vrot.slane %v5670_v45, 4 }
0x1abf   :  { %v5672_v28 = vadd.f32 %v5671_v60, %v5670_v45 }
0x1ac1   :  { %v5673_v23 = vrot.slane %v5672_v28, 2 }
0x1ac3   :  { %v5674_v21 = vadd.f32 %v5673_v23, %v5672_v28 }
0x1ac5   :  { %v5675_v35 = vrot.slane %v5674_v21, 1 }
0x1ac7   :  { %v5676_v50 = vadd.f32 %v5675_v35, %v5674_v21 }
0x1ac9   :  { %7021 = vpush %v5676_v50 }
0x1aca   :  { %s7020_s1 = spop %7019 }
0x1acb   :  { %v5576_v36 = vstv %s7020_s1  ;;  %s7610_s1 = smov 105  }
0x1acc   :  { %v5702_v25 = vpop.xlane.xlu0 %5701  ;;  %v5578_v41 = vmul.f32 %v9821_v33, %v5576_v36  ;;  %v9943_v1 = vmul.f32 %v9940_v9, %v5576_v36  ;;  %v5579_v40 = vmul.f32 %v9895_v56, %v5576_v36  ;;  %v5577_v49 = vmul.f32 %v9886_v20, %v5576_v36 }
0x1acd   :  { %v5703_v19 = vrot.slane %v5702_v25, 4 }
0x1ace   :  { %v5583_v38 = vmul.f32 %v5581_v43, %v5578_v41  ;;  %v5585_v6 = vmul.f32 %v5581_v43, %v9943_v1  ;;  %v5584_v0 = vmul.f32 %v5581_v43, %v5579_v40  ;;  %v5582_v37 = vmul.f32 %v5581_v43, %v5577_v49 }
0x1acf   :  { %v5704_v12 = vadd.f32 %v5703_v19, %v5702_v25 }
0x1ad0   :  { %5596 = vrot.lane.b32.xlu2 %v5585_v6, %s7529_s26  ;;  %5592 = vrot.lane.b32.xlu1 %v5583_v38, %s7529_s26 }
0x1ad1   :  { %v5705_v61 = vrot.slane %v5704_v12, 2 }
0x1ad3   :  { %v5706_v2 = vadd.f32 %v5705_v61, %v5704_v12 }
0x1ad5   :  { %v5707_v24 = vrot.slane %v5706_v2, 1 }
0x1ad7   :  { %v5708_v5 = vadd.f32 %v5707_v24, %v5706_v2 }
0x1ad8   :  { %5594 = vrot.lane.b32.xlu2 %v5584_v0, %s7529_s26  ;;  %5614 = vrot.lane.b32.xlu1 %v5579_v40, %s7608_s29 }
0x1ad9   :  { %7023 = vpush %v5708_v5 }
0x1ae0   :  { %5590 = vrot.lane.b32.xlu2 %v5582_v37, %s7529_s26 }
0x1afa   :  { %s7022_s25 = spop %7021 }
0x1afb   :  { %s5718_s21 = smul.f32 %s7022_s25, %s8896_s9  ;;  %s7617_s25 = smov 95  }
0x1afd   :  { %s5728_s24 = smul.f32 %s5718_s21, %s5718_s21  ;;  %v5749_v35 = vstv %s5718_s21  ;;  %s7618_s21 = smov 93  }
0x1b0a   :  { %s7024_s13 = spop %7023 }
0x1b0b   :  { %s5727_s28 = smul.f32 %s7024_s13, %s8896_s9  ;;  %s7616_s13 = smov 94  }
0x1b0d   :  { %s5729_s30 = ssub.f32 %s5727_s28, %s5728_s24 }
0x1b0f   :  { %s5730_s10 = smax.f32 %s7528_s22, %s5729_s30 }
0x1b10   :  { %s5731_s11 = sadd.f32 1e-08, %s5730_s10 }
0x1b12   :  { %v5732_v62 = vstv %s5731_s11 }
0x1b13   :  { %7450 = vrsqrt.f32 %v5732_v62  ;;  %vm5739_vm5 = vweird.f32 %v5732_v62 }
0x1b19   :  { %v7451_v4 = vpop.eup %7450 }
0x1b1a   :  { %v5734_v7 = vmul.f32 %v7451_v4, %v5732_v62  ;;  %vm5740_vm15 = vweird.f32 %v7451_v4 }
0x1b1b   :  { %vm5741_vm0 = vmor %vm5739_vm5, %vm5740_vm15 }
0x1b1c   :  { %v5735_v27 = vmul.f32 %v7451_v4, %v5734_v7 }
0x1b1e   :  { %v5736_v51 = vmul.f32 0.5, %v5735_v27 }
0x1b20   :  { %v5737_v8 = vsub.f32 1.5, %v5736_v51 }
0x1b22   :  { %v5738_v11 = vmul.f32 %v7451_v4, %v5737_v8 }
0x1b24   :  { %v5742_v45 = vsel %vm5741_vm0, %v7451_v4, %v5738_v11 }
0x1b25   :  { %7025 = vpush %v5742_v45 }
0x1b2a   :  { %v5597_v12 = vpop.permute.xlu2 %5596 }
0x1b2b   :  { %v5605_v61 = vsub.f32 %v9940_v9, %v5597_v12 }
0x1b32   :  { %v5595_v40 = vpop.permute.xlu2 %5594 }
0x1b33   :  { %v5604_v2 = vsub.f32 %v9895_v56, %v5595_v40 }
0x1b42   :  { %v5593_v25 = vpop.permute.xlu1 %5592 }
0x1b43   :  { %v5603_v19 = vsub.f32 %v9821_v33, %v5593_v25 }
0x1b4a   :  { %v5615_v8 = vpop.permute.xlu1 %5614 }
0x1b56   :  { %s7026_s6 = spop %7025 }
0x1b57   :  { %v5744_v60 = vstv %s7026_s6 }
0x1b58   :  { %v5745_v28 = vmul.f32 %v9886_v20, %v5744_v60  ;;  %v5746_v23 = vmul.f32 %v9821_v33, %v5744_v60  ;;  %v5748_v21 = vmul.f32 %v9940_v9, %v5744_v60  ;;  %v5747_v43 = vmul.f32 %v9895_v56, %v5744_v60 }
0x1b5a   :  { %v5750_v50 = vmul.f32 %v5749_v35, %v5745_v28  ;;  %v5753_v36 = vmul.f32 %v5749_v35, %v5748_v21  ;;  %5780 = vrot.lane.b32.xlu1 %v5746_v23, %s7609_s19  ;;  %v5752_v38 = vmul.f32 %v5749_v35, %v5747_v43  ;;  %v5751_v6 = vmul.f32 %v5749_v35, %v5746_v23 }
0x1b5c   :  { %5764 = vrot.lane.b32.xlu2 %v5753_v36, %s7529_s26  ;;  %5758 = vrot.lane.b32.xlu0 %v5750_v50, %s7529_s26 }
0x1b62   :  { %5632 = vrot.lane.b32.xlu1 %v5603_v19, %s7610_s1 }
0x1b64   :  { %5762 = vrot.lane.b32.xlu2 %v5752_v38, %s7529_s26  ;;  %5612 = vrot.lane.b32.xlu0 %v5578_v41, %s7608_s29  ;;  %v5591_v41 = vpop.permute.xlu2 %5590 }
0x1b65   :  { %v5602_v37 = vsub.f32 %v9886_v20, %v5591_v41 }
0x1b6c   :  { %5760 = vrot.lane.b32.xlu2 %v5751_v6, %s7529_s26  ;;  %5778 = vrot.lane.b32.xlu0 %v5745_v28, %s7609_s19 }
0x1b74   :  { %5616 = vrot.lane.b32.xlu2 %v9943_v1, %s7608_s29  ;;  %5636 = vrot.lane.b32.xlu0 %v5605_v61, %s7610_s1  ;;  %v5624_v61 = vmul.f32 %v5615_v8, %v9845_v32  ;;  %v74_v8 = vld [vmem:[%s10685_s2 + $0x10] sm:$0xff] }
0x1b7c   :  { %5784 = vrot.lane.b32.xlu2 %v5748_v21, %s7609_s19 }
0x1b84   :  { %5782 = vrot.lane.b32.xlu2 %v5747_v43, %s7609_s19 }
0x1b8c   :  { %5610 = vrot.lane.b32.xlu2 %v5577_v49, %s7608_s29 }
0x1b94   :  { %5634 = vrot.lane.b32.xlu2 %v5604_v2, %s7610_s1 }
0x1bb6   :  { %v5765_v24 = vpop.permute.xlu2 %5764 }
0x1bb7   :  { %v5773_v0 = vsub.f32 %v9940_v9, %v5765_v24 }
0x1bb9   :  { %5804 = vrot.lane.b32.xlu1 %v5773_v0, %s7608_s29 }
0x1bbe   :  { %v5763_v5 = vpop.permute.xlu2 %5762 }
0x1bbf   :  { %v5772_v1 = vsub.f32 %v9895_v56, %v5763_v5 }
0x1bc1   :  { %5630 = vrot.lane.b32.xlu1 %v5602_v37, %s7610_s1  ;;  %5802 = vrot.lane.b32.xlu0 %v5772_v1, %s7608_s29 }
0x1bc6   :  { %v5761_v62 = vpop.permute.xlu2 %5760 }
0x1bc7   :  { %v5771_v49 = vsub.f32 %v9821_v33, %v5761_v62 }
0x1bc9   :  { %5800 = vrot.lane.b32.xlu2 %v5771_v49, %s7608_s29  ;;  %v7611_v49 = vmov 33  }
0x1bca   :  { %7329 = vset.pattern.permute.xlu1 %v7611_v49  ;;  %7330 = vset.pattern.permute.xlu0 %v7611_v49 }
0x1bcb   :  { %5823 = vperm.xlu1 %7329, %v9821_v33   ;;  %7328 = vset.pattern.permute.xlu2 %v7611_v49 }
0x1bcc   :  { %v5781_v60 = vpop.permute.xlu1 %5780 }
0x1bcd   :  { %v5791_v40 = vmul.f32 %v5781_v60, %v9849_v17  ;;  %v86_v60 = vld [vmem:[%s10685_s2 + $0x70] sm:$0xff] }
0x1bce   :  { %v5759_v4 = vpop.permute.xlu0 %5758  ;;  %v5617_v27 = vpop.permute.xlu2 %5616 }
0x1bcf   :  { %v5770_v7 = vsub.f32 %v9886_v20, %v5759_v4  ;;  %v5625_v36 = vmul.f32 %v5617_v27, %v9847_v58 }
0x1bd1   :  { %5798 = vrot.lane.b32.xlu0 %v5770_v7, %s7608_s29  ;;  %5819 = vperm.xlu2 %7328, %v9886_v20  }
0x1bd4   :  { %v5633_v21 = vpop.permute.xlu1 %5632 }
0x1bd6   :  { %v5785_v51 = vpop.permute.xlu2 %5784  ;;  %v5613_v11 = vpop.permute.xlu0 %5612 }
0x1bd7   :  { %v5793_v25 = vmul.f32 %v5785_v51, %v9847_v58  ;;  %v5623_v2 = vmul.f32 %v5613_v11, %v9849_v17 }
0x1bd9   :  { %v5643_v58 = vadd.f32 %v5633_v21, %v5623_v2  ;;  %5827 = vperm.xlu0 %7330, %v9895_v56   ;;  %5831 = vperm.xlu2 %7328, %v9940_v9  }
0x1bde   :  { %v5783_v45 = vpop.permute.xlu2 %5782  ;;  %v5779_v28 = vpop.permute.xlu0 %5778 }
0x1bdf   :  { %v5792_v41 = vmul.f32 %v5783_v45, %v9845_v32  ;;  %v5790_v17 = vmul.f32 %v5779_v28, %v9828_v34  ;;  %v78_v45 = vld [vmem:[%s10685_s2 + $0x30] sm:$0xff] }
0x1be6   :  { %v5611_v23 = vpop.permute.xlu2 %5610  ;;  %v5637_v35 = vpop.permute.xlu0 %5636 }
0x1be7   :  { %v5645_v19 = vadd.f32 %v5637_v35, %v5625_v36  ;;  %v5622_v4 = vmul.f32 %v5611_v23, %v9828_v34  ;;  %v82_v34 = vld [vmem:[%s10685_s2 + $0x50] sm:$0xff] }
0x1bee   :  { %v5635_v50 = vpop.permute.xlu2 %5634 }
0x1bef   :  { %v5644_v0 = vadd.f32 %v5635_v50, %v5624_v61 }
0x1c23   :  { %v5801_v12 = vpop.permute.xlu2 %5800 }
0x1c24   :  { %v5811_v5 = vadd.f32 %v5801_v12, %v5791_v40 }
0x1c26   :  { %v5815_v62 = vsel %vm2579_vm4, %v5643_v58, %v5811_v5 }
0x1c2b   :  { %v5805_v43 = vpop.permute.xlu1 %5804  ;;  %v5820_v28 = vpop.permute.xlu2 %5819 }
0x1c2c   :  { %v5813_v38 = vadd.f32 %v5805_v43, %v5793_v25 }
0x1c2e   :  { %v5817_v6 = vsel %vm2579_vm4, %v5645_v19, %v5813_v38 }
0x1c2f   :  { %5858 = vmatpush.msrb.mxu2 %v5817_v6 }
0x1c33   :  { %v5803_v24 = vpop.permute.xlu0 %5802  ;;  %v5631_v32 = vpop.permute.xlu1 %5630 }
0x1c34   :  { %v5812_v37 = vadd.f32 %v5803_v24, %v5792_v41  ;;  %v5642_v27 = vadd.f32 %v5631_v32, %v5622_v4  ;;  %v5832_v24 = vpop.permute.xlu2 %5831 }
0x1c36   :  { %v5816_v1 = vsel %vm2579_vm4, %v5644_v0, %v5812_v37 }
0x1c37   :  { %5859 = vmatpush.msrb.mxu2 %v5816_v1 }
0x1c39   :  { %5860 = vmatpush.msrb.mxu2 %v5815_v62 }
0x1c3d   :  { %v5824_v36 = vpop.permute.xlu1 %5823 }
0x1c43   :  { %v5799_v7 = vpop.permute.xlu0 %5798 }
0x1c44   :  { %v5810_v51 = vadd.f32 %v5799_v7, %v5790_v17 }
0x1c46   :  { %v5814_v11 = vsel %vm2579_vm4, %v5642_v27, %v5810_v51 }
0x1c47   :  { %5861 = vmatpush.msrb.mxu2 %v5814_v11 }
0x1c48   :  { %6864 = vmatmul.msk.f32.vlgmr.msrb.gmra.mxu2 %vm521_vm10, %v74_v8  ;;  %v10054_v8 = vstv %s9927_s23 }
0x1c49   :  { %v10060_v11 = vmul.f32 %v9886_v20, %v10054_v8 }
0x1c4b   :  { %v5828_v25 = vpop.permute.xlu0 %5827 }
0x1c50   :  { %6865 = vmatmul.msk.f32.gmra.mxu2 %vm521_vm10, %v78_v45  ;;  %v10063_v45 = vstv %s9902_s8 }
0x1c58   :  { %6866 = vmatmul.msk.f32.gmra.mxu2 %vm521_vm10, %v82_v34  ;;  %v5216_v34 = vmul.f32 %v10063_v45, %v10060_v11 }
0x1c60   :  { %6867 = vmatmul.msk.f32.gmra.mxu2 %vm521_vm10, %v86_v60  ;;  %v10072_v60 = vmul.f32 %v9821_v33, %v9881_v57 }
0x1ccb   :  { %v5863_v23 = vpop.f32.mrf.mxu2 }
0x1ccc   :  { %v10013_v21 = vadd.f32 %v5863_v23, %v5820_v28  ;;  %v7612_v28 = vmov 31   ;;  %v10080_v23 = vmul.f32 %v9821_v33, %v9526_v59 }
0x1ccd   :  { %7331 = vset.pattern.permute.xlu2 %v7612_v28 }
0x1cce   :  { %6019 = vrot.lane.b32.xlu0 %v10013_v21, %s10783_s12  ;;  %v5891_v50 = vmul.f32 %v10013_v21, %v10013_v21  ;;  %v5875_v40 = vsel %vm2579_vm4, %v10013_v21, 0.0 }
0x1cd0   :  { %v5895_v58 = vsel %vm2579_vm4, %v5891_v50, 0.0 }
0x1cd3   :  { %v5866_v35 = vpop.f32.mrf.mxu2 }
0x1cd4   :  { %v10020_v43 = vadd.f32 %v5866_v35, %v5824_v36  ;;  %v4240_v35 = vmul.f32 %v9538_v46, %v10080_v23 }
0x1cd6   :  { %6051 = vrot.lane.b32.xlu0 %v5891_v50, %s10783_s12  ;;  %v5892_v6 = vmul.f32 %v10020_v43, %v10020_v43  ;;  %v5876_v12 = vsel %vm2579_vm4, %v10020_v43, 0.0  ;;  %v10088_v50 = vmul.f32 %v9895_v56, %v9526_v59 }
0x1cd7   :  { %v5877_v5 = vadd.f32 %v5876_v12, %v5875_v40 }
0x1cd8   :  { %v5896_v41 = vsel %vm2579_vm4, %v5892_v6, 0.0  ;;  %v4241_v36 = vmul.f32 %v9538_v46, %v10088_v50 }
0x1cd9   :  { %v5897_v49 = vadd.f32 %v5896_v41, %v5895_v58 }
0x1cdb   :  { %v5869_v19 = vpop.f32.mrf.mxu2 }
0x1cdc   :  { %v10022_v38 = vadd.f32 %v5869_v19, %v5828_v25  ;;  %v10095_v25 = vmul.f32 %v9940_v9, %v9454_v22 }
0x1cde   :  { %6021 = vrot.lane.b32.xlu0 %v10020_v43, %s10783_s12  ;;  %v5893_v61 = vmul.f32 %v10022_v38, %v10022_v38  ;;  %v5878_v2 = vsel %vm2579_vm4, %v10022_v38, 0.0  ;;  %v4066_v19 = vmul.f32 %v9463_v47, %v10095_v25 }
0x1cdf   :  { %v5879_v62 = vadd.f32 %v5878_v2, %v5877_v5 }
0x1ce0   :  { %v5898_v1 = vsel %vm2579_vm4, %v5893_v61, 0.0 }
0x1ce1   :  { %v5899_v7 = vadd.f32 %v5898_v1, %v5897_v49 }
0x1ce3   :  { %v5872_v0 = vpop.f32.mrf.mxu2 }
0x1ce4   :  { %v10037_v37 = vadd.f32 %v5872_v0, %v5832_v24 }
0x1ce6   :  { %6023 = vrot.lane.b32.xlu0 %v10022_v38, %s10783_s12  ;;  %v5880_v32 = vsel %vm2579_vm4, %v10037_v37, 0.0  ;;  %v5894_v17 = vmul.f32 %v10037_v37, %v10037_v37 }
0x1ce7   :  { %v5881_v4 = vadd.f32 %v5880_v32, %v5879_v62 }
0x1ce8   :  { %v5900_v27 = vsel %vm2579_vm4, %v5894_v17, 0.0 }
0x1ce9   :  { %5882 = vadd.xlane.f32.xlu1 %v5881_v4  ;;  %v5901_v51 = vadd.f32 %v5900_v27, %v5899_v7 }
0x1ceb   :  { %5902 = vadd.xlane.f32.xlu2 %v5901_v51 }
0x1cee   :  { %6025 = vrot.lane.b32.xlu0 %v10037_v37, %s10783_s12 }
0x1cf6   :  { %6057 = vrot.lane.b32.xlu0 %v5894_v17, %s10783_s12 }
0x1d02   :  { %6053 = vrot.lane.b32.xlu1 %v5892_v6, %s10783_s12 }
0x1d03   :  { %6055 = vrot.lane.b32.xlu2 %v5893_v61, %s10783_s12 }
0x1d0b   :  { %5048 = vrot.lane.b32.xlu2 %v9910_v55, %s7529_s26  ;;  %v5041_v55 = vmul.f32 %v9905_v52, %v10072_v60 }
0x1d13   :  { %5224 = vrot.lane.b32.xlu2 %v5216_v34, %s7529_s26 }
0x1d1b   :  { %4247 = vrot.lane.b32.xlu2 %v9542_v54, %s7529_s26  ;;  %v7613_v54 = vmov 28  }
0x1d1c   :  { %7332 = vset.pattern.permute.xlu1 %v7613_v54 }
0x1d23   :  { %5050 = vrot.lane.b32.xlu2 %v5041_v55, %s7529_s26 }
0x1d2b   :  { %4249 = vrot.lane.b32.xlu2 %v4240_v35, %s7529_s26 }
0x1d33   :  { %4251 = vrot.lane.b32.xlu2 %v4241_v36, %s7529_s26 }
0x1d3b   :  { %4077 = vrot.lane.b32.xlu2 %v4066_v19, %s7529_s26 }
0x1d40   :  { %v6020_v6 = vpop.permute.xlu0 %6019 }
0x1d41   :  { %v6031_v24 = vsel %vm2579_vm4, %v6020_v6, 0.0  ;;  %v10109_v6 = vmul.f32 %v9821_v33, %v10054_v8 }
0x1d43   :  { %5066 = vperm.xlu2 %7331, %v9890_v16  }
0x1d48   :  { %v6052_v12 = vpop.permute.xlu0 %6051 }
0x1d4b   :  { %7333 = vset.pattern.permute.xlu2 %v7613_v54 }
0x1d4c   :  { %4265 = vperm.xlu2 %7333, %v9535_v18  }
0x1d50   :  { %v6022_v61 = vpop.permute.xlu0 %6021 }
0x1d51   :  { %v6032_v2 = vsel %vm2579_vm4, %v6022_v61, 0.0 }
0x1d52   :  { %v6033_v58 = vadd.f32 %v6032_v2, %v6031_v24  ;;  %v6063_v2 = vsel %vm2579_vm4, %v6052_v12, 0.0  ;;  %v5217_v24 = vmul.f32 %v10063_v45, %v10109_v6  ;;  %v10123_v12 = vmul.f32 %v9940_v9, %v9881_v57 }
0x1d58   :  { %v6024_v40 = vpop.permute.xlu0 %6023 }
0x1d59   :  { %v6034_v0 = vsel %vm2579_vm4, %v6024_v40, 0.0 }
0x1d5a   :  { %v6035_v16 = vadd.f32 %v6034_v0, %v6033_v58 }
0x1d5c   :  { %v5883_v41 = vpop.xlane.xlu1 %5882 }
0x1d5d   :  { %v5884_v5 = vrot.slane %v5883_v41, 4 }
0x1d5e   :  { %v5903_v1 = vpop.xlane.xlu2 %5902 }
0x1d5f   :  { %v5885_v62 = vadd.f32 %v5884_v5, %v5883_v41  ;;  %v5904_v49 = vrot.slane %v5903_v1, 4 }
0x1d60   :  { %v6026_v32 = vpop.permute.xlu0 %6025 }
0x1d61   :  { %v5905_v17 = vadd.f32 %v5904_v49, %v5903_v1  ;;  %v6036_v4 = vsel %vm2579_vm4, %v6026_v32, 0.0  ;;  %v5886_v18 = vrot.slane %v5885_v62, 2  ;;  %v7614_v49 = vmov 32  }
0x1d62   :  { %v6037_v7 = vadd.f32 %v6036_v4, %v6035_v16  ;;  %7334 = vset.pattern.permute.xlu0 %v7614_v49  ;;  %v5043_v32 = vmul.f32 %v9905_v52, %v10123_v12 }
0x1d63   :  { %v5887_v27 = vadd.f32 %v5886_v18, %v5885_v62  ;;  %v5906_v51 = vrot.slane %v5905_v17, 2  ;;  %v10141_v18 = vmul.f32 %v9821_v33, %v9454_v22 }
0x1d64   :  { %6038 = vadd.xlane.f32.xlu0 %v6037_v7 }
0x1d65   :  { %v5888_v34 = vrot.slane %v5887_v27, 1  ;;  %v5907_v55 = vadd.f32 %v5906_v51, %v5905_v17  ;;  %v10130_v17 = vmul.f32 %v9940_v9, %v9526_v59  ;;  %v4064_v59 = vmul.f32 %v9463_v47, %v10141_v18 }
0x1d66   :  { %v6056_v61 = vpop.permute.xlu2 %6055 }
0x1d67   :  { %v5889_v35 = vadd.f32 %v5888_v34, %v5887_v27  ;;  %v5908_v36 = vrot.slane %v5907_v55, 1  ;;  %v6066_v58 = vsel %vm2579_vm4, %v6056_v61, 0.0  ;;  %v4242_v4 = vmul.f32 %v9538_v46, %v10130_v17 }
0x1d68   :  { %v6058_v0 = vpop.permute.xlu0 %6057  ;;  %v10164_v27 = vmul.f32 %v9895_v56, %v9454_v22 }
0x1d69   :  { %7027 = vpush %v5889_v35  ;;  %v5909_v19 = vadd.f32 %v5908_v36, %v5907_v55  ;;  %v6068_v62 = vsel %vm2579_vm4, %v6058_v0, 0.0  ;;  %v10172_v35 = vmul.f32 %v9940_v9, %v10054_v8 }
0x1d6b   :  { %7029 = vpush %v5909_v19 }
0x1d6e   :  { %v5049_v57 = vpop.permute.xlu2 %5048 }
0x1d6f   :  { %v5060_v52 = vsub.f32 %v9886_v20, %v5049_v57 }
0x1d74   :  { %v6054_v40 = vpop.permute.xlu1 %6053 }
0x1d75   :  { %v6064_v41 = vsel %vm2579_vm4, %v6054_v40, 0.0 }
0x1d76   :  { %v6065_v5 = vadd.f32 %v6064_v41, %v6063_v2  ;;  %v5225_v33 = vpop.permute.xlu2 %5224 }
0x1d78   :  { %v6067_v1 = vadd.f32 %v6066_v58, %v6065_v5  ;;  %5226 = vrot.lane.b32.xlu0 %v5217_v24, %s7529_s26 }
0x1d7a   :  { %v6069_v16 = vadd.f32 %v6068_v62, %v6067_v1 }
0x1d7c   :  { %6070 = vadd.xlane.f32.xlu1 %v6069_v16 }
0x1d7e   :  { %v4248_v34 = vpop.permute.xlu2 %4247 }
0x1d7f   :  { %v4259_v19 = vsub.f32 %v9886_v20, %v4248_v34 }
0x1d80   :  { %5052 = vrot.lane.b32.xlu0 %v9914_v53, %s7529_s26  ;;  %v7615_v53 = vmov 29  }
0x1d81   :  { %7337 = vset.pattern.permute.xlu2 %v7615_v53 }
0x1d88   :  { %5054 = vrot.lane.b32.xlu0 %v5043_v32, %s7529_s26 }
0x1d90   :  { %4253 = vrot.lane.b32.xlu0 %v4242_v4, %s7529_s26 }
0x1d95   :  { %4071 = vrot.lane.b32.xlu1 %v9469_v3, %s7529_s26  ;;  %v10154_v3 = vmul.f32 %v9895_v56, %v10054_v8  ;;  %v5236_v8 = vsub.f32 %v9886_v20, %v5225_v33 }
0x1d97   :  { %v5218_v46 = vmul.f32 %v10063_v45, %v10154_v3 }
0x1d98   :  { %5090 = vperm.xlu0 %7334, %v5060_v52  }
0x1d9a   :  { %s7028_s12 = spop %7027 }
0x1d9b   :  { %s10146_s8 = smul.f32 %s7028_s12, %s8896_s9 }
0x1d9c   :  { %s7030_s23 = spop %7029 }
0x1d9d   :  { %s5929_s30 = smul.f32 %s10146_s8, %s10146_s8  ;;  %4073 = vrot.lane.b32.xlu1 %v4064_v59, %s7529_s26  ;;  %v10198_v32 = vstv %s10146_s8 }
0x1d9e   :  { %s5928_s10 = smul.f32 %s7030_s23, %s8896_s9 }
0x1da0   :  { %s5930_s11 = ssub.f32 %s5928_s10, %s5929_s30  ;;  %7335 = vset.pattern.permute.xlu0 %v7612_v28 }
0x1da1   :  { %5242 = vperm.xlu0 %7335, %v10060_v11   ;;  %v4065_v11 = vmul.f32 %v9463_v47, %v10164_v27  ;;  %s6863_s10 = sld [smem:[#allocation2 + $0x3]] }
0x1da2   :  { %s5931_s6 = smax.f32 %s7528_s22, %s5930_s11 }
0x1da3   :  { %s5932_s19 = sadd.f32 1e-08, %s5931_s6 }
0x1da5   :  { %v5933_v7 = vstv %s5932_s19  ;;  %5228 = vrot.lane.b32.xlu1 %v5218_v46, %s7529_s26 }
0x1da6   :  { %7452 = vrsqrt.f32 %v5933_v7  ;;  %vm5940_vm9 = vweird.f32 %v5933_v7 }
0x1da9   :  { %5076 = vperm.xlu0 %7335, %v9899_v30   ;;  %v5219_v30 = vmul.f32 %v10063_v45, %v10172_v35 }
0x1dac   :  { %v7453_v51 = vpop.eup %7452 }
0x1dad   :  { %v5935_v55 = vmul.f32 %v7453_v51, %v5933_v7  ;;  %4075 = vrot.lane.b32.xlu1 %v4065_v11, %s7529_s26  ;;  %vm5941_vm8 = vweird.f32 %v7453_v51 }
0x1dae   :  { %vm5942_vm12 = vmor %vm5940_vm9, %vm5941_vm8 }
0x1daf   :  { %v5936_v36 = vmul.f32 %v7453_v51, %v5935_v55 }
0x1db1   :  { %7345 = vset.pattern.permute.xlu0 %v7615_v53  ;;  %v5937_v22 = vmul.f32 0.5, %v5936_v36 }
0x1db2   :  { %4289 = vperm.xlu0 %7345, %v4259_v19   ;;  %v5051_v19 = vpop.permute.xlu2 %5050 }
0x1db3   :  { %v5938_v47 = vsub.f32 1.5, %v5937_v22 }
0x1db5   :  { %5230 = vrot.lane.b32.xlu1 %v5219_v30, %s7529_s26  ;;  %v5939_v61 = vmul.f32 %v7453_v51, %v5938_v47 }
0x1db7   :  { %v5943_v40 = vsel %vm5942_vm12, %v7453_v51, %v5939_v61 }
0x1db8   :  { %7031 = vpush %v5943_v40 }
0x1dba   :  { %v4250_v61 = vpop.permute.xlu2 %4249 }
0x1dbd   :  { %4089 = vperm.xlu1 %7332, %v9459_v10  }
0x1dc5   :  { %7336 = vset.pattern.permute.xlu1 %v7614_v49 }
0x1dc6   :  { %5266 = vperm.xlu1 %7336, %v5236_v8  }
0x1dce   :  { %7338 = vset.pattern.permute.xlu1 %v7612_v28 }
0x1dcf   :  { %5071 = vperm.xlu1 %7338, %v10072_v60   ;;  %v10190_v60 = vld [vmem:[%s10688_s5 + $0x8] sm:$0xff] }
0x1dd7   :  { %v6039_v45 = vpop.xlane.xlu0 %6038  ;;  %7340 = vset.pattern.permute.xlu1 %v7613_v54 }
0x1dd8   :  { %v6040_v2 = vrot.slane %v6039_v45, 4  ;;  %4270 = vperm.xlu1 %7340, %v10080_v23  }
0x1dda   :  { %v6041_v41 = vadd.f32 %v6040_v2, %v6039_v45  ;;  %v5061_v45 = vsub.f32 %v10190_v60, %v5051_v19  ;;  %v6243_v2 = vld [vmem:[%s10697_s14 + $0x8] sm:$0x3] }
0x1ddb   :  { %6874 = vmatpush.msk.msra.mxu0 %vm2346_vm13, %v6243_v2 }
0x1ddc   :  { %v6042_v24 = vrot.slane %v6041_v41, 2 }
0x1dde   :  { %v6043_v0 = vadd.f32 %v6042_v24, %v6041_v41  ;;  %v10234_v24 = vpop.permute.xlu2 %4251 }
0x1de0   :  { %v6044_v10 = vrot.slane %v6043_v0, 1  ;;  %7342 = vset.pattern.permute.xlu1 %v7614_v49 }
0x1de2   :  { %v6045_v5 = vadd.f32 %v6044_v10, %v6043_v0  ;;  %v4260_v10 = vsub.f32 %v10190_v60, %v4250_v61 }
0x1de4   :  { %7033 = vpush %v6045_v5 }
0x1de9   :  { %s7032_s1 = spop %7031 }
0x1dea   :  { %v5945_v58 = vstv %s7032_s1  ;;  %v5227_v1 = vpop.permute.xlu0 %5226 }
0x1deb   :  { %v5947_v62 = vmul.f32 %v10190_v60, %v5945_v58  ;;  %v10194_v23 = vmul.f32 %v9895_v56, %v5945_v58  ;;  %v5949_v16 = vmul.f32 %v9940_v9, %v5945_v58  ;;  %v5237_v4 = vsub.f32 %v10190_v60, %v5227_v1  ;;  %v10248_v1 = vpop.permute.xlu2 %4077 }
0x1ded   :  { %v5952_v57 = vmul.f32 %v10198_v32, %v5947_v62  ;;  %v10204_v52 = vmul.f32 %v10198_v32, %v10194_v23  ;;  %v10207_v59 = vmul.f32 %v10198_v32, %v5949_v16  ;;  %5271 = vperm.xlu1 %7342, %v5237_v4  }
0x1def   :  { %5961 = vrot.lane.b32.xlu0 %v5952_v57, %s7529_s26  ;;  %v6071_v56 = vpop.xlane.xlu1 %6070 }
0x1df0   :  { %v6072_v46 = vrot.slane %v6071_v56, 4 }
0x1df2   :  { %v6073_v33 = vadd.f32 %v6072_v46, %v6071_v56  ;;  %v10212_v22 = vpop.permute.xlu0 %5052 }
0x1df4   :  { %v6074_v7 = vrot.slane %v6073_v33, 2 }
0x1df5   :  { %7343 = vset.pattern.permute.xlu1 %v7615_v53 }
0x1df6   :  { %v6075_v11 = vadd.f32 %v6074_v7, %v6073_v33 }
0x1df8   :  { %v6076_v51 = vrot.slane %v6075_v11, 1 }
0x1dfa   :  { %v6077_v34 = vadd.f32 %v6076_v51, %v6075_v11  ;;  %v10217_v40 = vpop.permute.xlu0 %5054  ;;  %v10263_v11 = vstv %s6863_s10 }
0x1dfc   :  { %7035 = vpush %v6077_v34 }
0x1e02   :  { %v10236_v0 = vpop.permute.xlu0 %4253 }
0x1e07   :  { %v4072_v55 = vpop.permute.xlu1 %4071 }
0x1e08   :  { %v4083_v36 = vsub.f32 %v9886_v20, %v4072_v55 }
0x1e0a   :  { %4113 = vperm.xlu2 %7337, %v4083_v36  }
0x1e0f   :  { %v4074_v30 = vpop.permute.xlu1 %4073 }
0x1e10   :  { %v4084_v47 = vsub.f32 %v10190_v60, %v4074_v30 }
0x1e12   :  { %7339 = vset.pattern.permute.xlu2 %v7612_v28  ;;  %4118 = vperm.xlu1 %7343, %v4084_v47  }
0x1e13   :  { %5247 = vperm.xlu2 %7339, %v10109_v6   ;;  %v6242_v6 = vld [vmem:[%s10697_s14] sm:$0xff] }
0x1e14   :  { %6274 = vmatpush.msra.mxu0 %v6242_v6 }
0x1e15   :  { %s7034_s14 = spop %7033 }
0x1e16   :  { %s10246_s28 = smul.f32 %s7034_s14, %s8896_s9 }
0x1e17   :  { %v10219_v8 = vpop.permute.xlu1 %5228 }
0x1e18   :  { %s6097_s12 = smul.f32 %s10246_s28, %s10246_s28 }
0x1e1a   :  { %7346 = vset.pattern.permute.xlu1 %v7612_v28 }
0x1e1b   :  { %7341 = vset.pattern.permute.xlu2 %v7614_v49  ;;  %5252 = vperm.xlu1 %7346, %v10154_v3   ;;  %v5946_v3 = vmul.f32 %v9886_v20, %v5945_v58  ;;  %v5091_v20 = vpop.permute.xlu0 %5090 }
0x1e1c   :  { %5095 = vperm.xlu2 %7341, %v5061_v45  }
0x1e1d   :  { %v5951_v4 = vmul.f32 %v10198_v32, %v5946_v3 }
0x1e1f   :  { %v10232_v41 = vpop.permute.xlu1 %4075 }
0x1e23   :  { %5979 = vrot.lane.b32.xlu1 %v5946_v3, %s7616_s13  ;;  %v5243_v57 = vpop.permute.xlu0 %5242 }
0x1e24   :  { %7344 = vset.pattern.permute.xlu2 %v7615_v53  ;;  %7348 = vset.pattern.permute.xlu1 %v7614_v49  ;;  %v5260_v46 = vmul.f32 %v5243_v57, %v9728_v13 }
0x1e25   :  { %4294 = vperm.xlu2 %7344, %v4260_v10  }
0x1e27   :  { %v10243_v5 = vpop.permute.xlu1 %5230 }
0x1e2b   :  { %5981 = vrot.lane.b32.xlu1 %v5947_v62, %s7616_s13  ;;  %v5067_v62 = vpop.permute.xlu2 %5066  ;;  %v10272_v45 = vpop.permute.xlu0 %5076 }
0x1e2d   :  { %s7036_s8 = spop %7035  ;;  %5985 = vrot.lane.b32.xlu2 %v5949_v16, %s7616_s13  ;;  %v5084_v16 = vmul.f32 %v5067_v62, %v9728_v13 }
0x1e2e   :  { %s6096_s23 = smul.f32 %s7036_s8, %s8896_s9  ;;  %7347 = vset.pattern.permute.xlu2 %v7613_v54  ;;  %s6853_s9 = sld [smem:[#allocation2 + $0x2]] }
0x1e2f   :  { %v4090_v58 = vpop.permute.xlu1 %4089  ;;  %v5108_v7 = vadd.f32 %v5091_v20, %v5084_v16 }
0x1e30   :  { %s6098_s30 = ssub.f32 %s6096_s23, %s6097_s12  ;;  %v4107_v3 = vmul.f32 %v4090_v58, %v9312_v44 }
0x1e32   :  { %s6099_s11 = smax.f32 %s7528_s22, %s6098_s30 }
0x1e33   :  { %s6100_s6 = sadd.f32 1e-08, %s6099_s11  ;;  %5983 = vrot.lane.b32.xlu1 %v10194_v23, %s7616_s13  ;;  %v4266_v2 = vpop.permute.xlu2 %4265 }
0x1e34   :  { %v4283_v6 = vmul.f32 %v4266_v2, %v9312_v44  ;;  %v10276_v62 = vstv %s6853_s9 }
0x1e35   :  { %v6101_v56 = vstv %s6100_s6  ;;  %5959 = vrot.lane.b32.xlu2 %v5951_v4, %s7529_s26 }
0x1e36   :  { %7454 = vrsqrt.f32 %v6101_v56  ;;  %vm6108_vm5 = vweird.f32 %v6101_v56 }
0x1e38   :  { %v5267_v33 = vpop.permute.xlu1 %5266 }
0x1e39   :  { %v5284_v51 = vadd.f32 %v5267_v33, %v5260_v46 }
0x1e3b   :  { %v5288_v32 = vsel %vm2002_vm3, %v5108_v7, %v5284_v51 }
0x1e3c   :  { %v7455_v34 = vpop.eup %7454  ;;  %vm5293_vm11 = vcmp.gt.f32.partialorder %v5288_v32, 0.0  ;;  %v5298_v23 = vmul.f32 %v10263_v11, %v5288_v32 }
0x1e3d   :  { %v6103_v55 = vmul.f32 %v7455_v34, %v6101_v56  ;;  %5963 = vrot.lane.b32.xlu2 %v10204_v52, %s7529_s26  ;;  %vm6109_vm15 = vweird.f32 %v7455_v34  ;;  %v4290_v52 = vpop.permute.xlu0 %4289 }
0x1e3e   :  { %v5302_v36 = vsel %vm5293_vm11, %v5288_v32, %v5298_v23  ;;  %vm6110_vm0 = vmor %vm6108_vm5, %vm6109_vm15  ;;  %v4307_v4 = vadd.f32 %v4290_v52, %v4283_v6 }
0x1e3f   :  { %6875 = vmatmul.msk.f32.vlgmr.msra.gmra.mxu0 %vm2333_vm14, %v5302_v36  ;;  %v6104_v19 = vmul.f32 %v7455_v34, %v6103_v55 }
0x1e41   :  { %v6105_v13 = vmul.f32 0.5, %v6104_v19  ;;  %v5072_v10 = vpop.permute.xlu1 %5071  ;;  %v10288_v19 = vld [vmem:[%s10688_s5] sm:$0xff] }
0x1e42   :  { %v5085_v44 = vmul.f32 %v5072_v10, %v9735_v39 }
0x1e43   :  { %v6106_v30 = vsub.f32 1.5, %v6105_v13 }
0x1e45   :  { %5965 = vrot.lane.b32.xlu2 %v10207_v59, %s7529_s26  ;;  %v6107_v47 = vmul.f32 %v7455_v34, %v6106_v30 }
0x1e47   :  { %v6111_v61 = vsel %vm6110_vm0, %v7455_v34, %v6107_v47 }
0x1e48   :  { %7037 = vpush %v6111_v61  ;;  %v6118_v61 = vstv %s10246_s28 }
0x1e4a   :  { %v4271_v33 = vpop.permute.xlu1 %4270 }
0x1e4b   :  { %v4284_v6 = vmul.f32 %v4271_v33, %v9319_v14 }
0x1e5f   :  { %v5272_v58 = vpop.permute.xlu1 %5271 }
0x1e64   :  { %v4114_v20 = vpop.permute.xlu2 %4113 }
0x1e65   :  { %v4131_v59 = vadd.f32 %v4114_v20, %v4107_v3 }
0x1e67   :  { %v4311_v57 = vsel %vm1423_vm6, %v4131_v59, %v4307_v4 }
0x1e68   :  { %vm4316_vm8 = vcmp.gt.f32.partialorder %v4311_v57, 0.0  ;;  %v4321_v56 = vmul.f32 %v10276_v62, %v4311_v57 }
0x1e6a   :  { %v4325_v16 = vsel %vm4316_vm8, %v4311_v57, %v4321_v56 }
0x1e6b   :  { %6870 = vmatmul.msk.f32.vlgmr.msrb.gmra.mxu3 %vm1756_vm2, %v4325_v16 }
0x1e6d   :  { %v5248_v46 = vpop.permute.xlu2 %5247 }
0x1e6e   :  { %v5261_v7 = vmul.f32 %v5248_v46, %v9735_v39  ;;  %v10294_v39 = vld [vmem:[%s10688_s5 + $0x10] sm:$0xff] }
0x1e6f   :  { %v5062_v4 = vsub.f32 %v10294_v39, %v10212_v22  ;;  %v4085_v56 = vsub.f32 %v10294_v39, %v10232_v41 }
0x1e70   :  { %v5285_v32 = vadd.f32 %v5272_v58, %v5261_v7  ;;  %v5238_v58 = vsub.f32 %v10294_v39, %v10219_v8 }
0x1e76   :  { %v5096_v51 = vpop.permute.xlu2 %5095 }
0x1e77   :  { %v5109_v34 = vadd.f32 %v5096_v51, %v5085_v44  ;;  %v5962_v51 = vpop.permute.xlu0 %5961 }
0x1e79   :  { %s7038_s19 = spop %7037  ;;  %v5289_v23 = vsel %vm2002_vm3, %v5109_v34, %v5285_v32  ;;  %v5972_v32 = vsub.f32 %v10190_v60, %v5962_v51 }
0x1e7a   :  { %v6113_v55 = vstv %s7038_s19  ;;  %vm5294_vm9 = vcmp.gt.f32.partialorder %v5289_v23, 0.0  ;;  %v5299_v36 = vmul.f32 %v10263_v11, %v5289_v23 }
0x1e7b   :  { %v6114_v13 = vmul.f32 %v10288_v19, %v6113_v55  ;;  %v6116_v30 = vmul.f32 %v10294_v39, %v6113_v55  ;;  %v6117_v47 = vmul.f32 %v9940_v9, %v6113_v55  ;;  %v6115_v20 = vmul.f32 %v10190_v60, %v6113_v55 }
0x1e7c   :  { %v5303_v2 = vsel %vm5294_vm9, %v5289_v23, %v5299_v36 }
0x1e7d   :  { %v6121_v52 = vmul.f32 %v6118_v61, %v6116_v30  ;;  %6147 = vrot.lane.b32.xlu2 %v6114_v13, %s7617_s25  ;;  %6153 = vrot.lane.b32.xlu1 %v6117_v47, %s7617_s25  ;;  %v6122_v59 = vmul.f32 %v6118_v61, %v6117_v47  ;;  %v6119_v46 = vmul.f32 %v6118_v61, %v6114_v13 }
0x1e7e   :  { %6876 = vmatmul.msk.f32.gmra.mxu0 %vm2333_vm14, %v5303_v2  ;;  %v6120_v7 = vmul.f32 %v6118_v61, %v6115_v20 }
0x1e7f   :  { %6131 = vrot.lane.b32.xlu0 %v6121_v52, %s7529_s26  ;;  %v4295_v3 = vpop.permute.xlu2 %4294  ;;  %v10348_v52 = vld [vmem:[%s10688_s5 + $0x18] sm:$0xff] }
0x1e80   :  { %v10302_v10 = vadd.f32 %v4295_v3, %v4284_v6 }
0x1e85   :  { %6149 = vrot.lane.b32.xlu2 %v6115_v20, %s7617_s25  ;;  %5100 = vperm.xlu1 %7348, %v5062_v4   ;;  %v4261_v4 = vsub.f32 %v10294_v39, %v10234_v24 }
0x1e87   :  { %6133 = vrot.lane.b32.xlu0 %v6122_v59, %s7529_s26  ;;  %v10308_v57 = vpop.permute.xlu2 %5985 }
0x1e8d   :  { %6151 = vrot.lane.b32.xlu2 %v6116_v30, %s7617_s25  ;;  %7351 = vset.pattern.permute.xlu1 %v7615_v53 }
0x1e8f   :  { %v5960_v16 = vpop.permute.xlu2 %5959  ;;  %4123 = vperm.xlu0 %7345, %v4085_v56  }
0x1e90   :  { %v5971_v33 = vsub.f32 %v10288_v19, %v5960_v16  ;;  %v5239_v16 = vsub.f32 %v10348_v52, %v10243_v5 }
0x1e95   :  { %6127 = vrot.lane.b32.xlu2 %v6119_v46, %s7529_s26 }
0x1e97   :  { %v5964_v22 = vpop.permute.xlu2 %5963  ;;  %5999 = vrot.lane.b32.xlu0 %v5971_v33, %s7618_s21 }
0x1e98   :  { %7350 = vset.pattern.permute.xlu0 %v7613_v54  ;;  %v5973_v34 = vsub.f32 %v10294_v39, %v5964_v22 }
0x1e9d   :  { %6129 = vrot.lane.b32.xlu2 %v6120_v7, %s7529_s26 }
0x1e9f   :  { %v5966_v44 = vpop.permute.xlu2 %5965  ;;  %4094 = vperm.xlu0 %7350, %v10141_v18  }
0x1ea0   :  { %v5974_v41 = vsub.f32 %v9940_v9, %v5966_v44  ;;  %v4119_v9 = vpop.permute.xlu1 %4118 }
0x1ea2   :  { %6005 = vrot.lane.b32.xlu1 %v5974_v41, %s7618_s21 }
0x1ea5   :  { %4099 = vperm.xlu2 %7347, %v10164_v27  }
0x1ea8   :  { %v5253_v18 = vpop.permute.xlu1 %5252 }
0x1ea9   :  { %v5262_v22 = vmul.f32 %v5253_v18, %v9749_v29 }
0x1ead   :  { %7349 = vset.pattern.permute.xlu2 %v7614_v49 }
0x1eae   :  { %5276 = vperm.xlu2 %7349, %v5238_v58  }
0x1eb0   :  { %v5980_v23 = vpop.permute.xlu1 %5979 }
0x1eb1   :  { %v5991_v24 = vmul.f32 %v5980_v23, %v10013_v21 }
0x1eb6   :  { %6001 = vrot.lane.b32.xlu2 %v5972_v32, %s7618_s21 }
0x1eb7   :  { %7352 = vset.pattern.permute.xlu2 %v7612_v28 }
0x1eb8   :  { %v10336_v36 = vpop.permute.xlu1 %5981 }
0x1ebe   :  { %6003 = vrot.lane.b32.xlu2 %v5973_v34, %s7618_s21  ;;  %v10391_v34 = vmul.f32 %v10288_v19, %v9088_v15  ;;  %v10786_v15 = vld [vmem:[#allocation20_spill] sm:$0xff] }
0x1ec6   :  { %5081 = vperm.xlu2 %7352, %v10123_v12  }
0x1ece   :  { %7354 = vset.pattern.permute.xlu2 %v7613_v54 }
0x1ecf   :  { %4104 = vperm.xlu2 %7354, %v10095_v25   ;;  %v10341_v25 = vpop.permute.xlu1 %5983 }
0x1ed7   :  { %v10329_v27 = vpop.permute.xlu2 %6147  ;;  %7356 = vset.pattern.permute.xlu2 %v7614_v49 }
0x1edf   :  { %v10332_v8 = vpop.permute.xlu2 %6149 }
0x1ee7   :  { %v10334_v55 = vpop.permute.xlu2 %6151 }
0x1eef   :  { %v6128_v13 = vpop.permute.xlu2 %6127  ;;  %v10352_v3 = vpop.permute.xlu1 %6153 }
0x1ef0   :  { %v6139_v12 = vsub.f32 %v10288_v19, %v6128_v13  ;;  %v10787_v13 = vld [vmem:[#allocation19_spill] sm:$0xff] }
0x1ef1   :  { %v6132_v30 = vpop.permute.xlu0 %6131 }
0x1ef2   :  { %v6141_v54 = vsub.f32 %v10294_v39, %v6132_v30  ;;  %6167 = vrot.lane.b32.xlu1 %v6139_v12, %s7616_s13  ;;  %v10788_v12 = vld [vmem:[#allocation21_spill] sm:$0xff]  ;;  %v10789_v30 = vld [vmem:[#allocation14_spill] sm:$0xff] }
0x1ef4   :  { %6171 = vrot.lane.b32.xlu0 %v6141_v54, %s7616_s13  ;;  %v10790_v54 = vld [vmem:[#allocation12_spill] sm:$0xff] }
0x1ef7   :  { %v6130_v47 = vpop.permute.xlu2 %6129  ;;  %v5101_v33 = vpop.permute.xlu1 %5100 }
0x1ef8   :  { %v6140_v61 = vsub.f32 %v10190_v60, %v6130_v47 }
0x1ef9   :  { %v6134_v2 = vpop.permute.xlu0 %6133 }
0x1efa   :  { %v6142_v6 = vsub.f32 %v10348_v52, %v6134_v2  ;;  %6169 = vrot.lane.b32.xlu1 %v6140_v61, %s7616_s13 }
0x1efc   :  { %6173 = vrot.lane.b32.xlu2 %v6142_v6, %s7616_s13  ;;  %4275 = vperm.xlu0 %7350, %v10088_v50   ;;  %v5086_v50 = vmul.f32 %v10272_v45, %v9749_v29  ;;  %v7619_v45 = vmov 25   ;;  %v10792_v6 = vld [vmem:[#allocation13_spill] sm:$0xff] }
0x1efe   :  { %v5110_v44 = vadd.f32 %v5101_v33, %v5086_v50  ;;  %v5994_v50 = vmul.f32 %v10308_v57, %v10037_v37 }
0x1eff   :  { %v4100_v20 = vpop.permute.xlu2 %4099 }
0x1f00   :  { %v4109_v59 = vmul.f32 %v4100_v20, %v9321_v48 }
0x1f01   :  { %v4124_v56 = vpop.permute.xlu0 %4123 }
0x1f02   :  { %v10361_v46 = vadd.f32 %v4124_v56, %v4109_v59  ;;  %4299 = vperm.xlu1 %7351, %v4261_v4   ;;  %v10793_v4 = vld [vmem:[#allocation18_spill] sm:$0xff]  ;;  %v6288_v59 = vld [vmem:[%s10698_s15] sm:$0x3]  ;;  %s6868_s15 = sld [smem:[#allocation2 + $0x4]] }
0x1f03   :  { %6879 = vmatpush.msk.msra.mxu1 %vm2346_vm13, %v6288_v59 }
0x1f04   :  { %4280 = vperm.xlu0 %7350, %v10130_v17   ;;  %5281 = vperm.xlu2 %7356, %v5239_v16   ;;  %v4262_v17 = vsub.f32 %v10348_v52, %v10236_v0  ;;  %v7620_v16 = vmov 26  }
0x1f08   :  { %v5277_v7 = vpop.permute.xlu2 %5276 }
0x1f09   :  { %v5286_v41 = vadd.f32 %v5277_v7, %v5262_v22  ;;  %v6000_v58 = vpop.permute.xlu0 %5999  ;;  %v6162_v22 = vmul.f32 %v10352_v3, %v10037_v37 }
0x1f0a   :  { %v10368_v51 = vadd.f32 %v6000_v58, %v5991_v24  ;;  %7353 = vset.pattern.permute.xlu1 %v7612_v28 }
0x1f0b   :  { %5257 = vperm.xlu1 %7353, %v10172_v35   ;;  %v5290_v5 = vsel %vm2002_vm3, %v5110_v44, %v5286_v41  ;;  %v5063_v35 = vsub.f32 %v10348_v52, %v10217_v40 }
0x1f0c   :  { %3075 = vrot.lane.b32.xlu0 %v9134_v63, %s7529_s26  ;;  %7358 = vset.pattern.permute.xlu2 %v7615_v53  ;;  %vm5295_vm12 = vcmp.gt.f32.partialorder %v5290_v5, 0.0  ;;  %v5300_v29 = vmul.f32 %v10263_v11, %v5290_v5 }
0x1f0d   :  { %4304 = vperm.xlu2 %7358, %v4262_v17   ;;  %7360 = vset.pattern.permute.xlu0 %v7619_v45  ;;  %v6159_v17 = vmul.f32 %v10329_v27, %v10013_v21 }
0x1f0e   :  { %v5304_v28 = vsel %vm5295_vm12, %v5290_v5, %v5300_v29 }
0x1f0f   :  { %6877 = vmatmul.msk.f32.gmra.mxu0 %vm2333_vm14, %v5304_v28 }
0x1f10   :  { %v6002_v47 = vpop.permute.xlu2 %6001 }
0x1f11   :  { %v4095_v0 = vpop.permute.xlu0 %4094 }
0x1f12   :  { %v4108_v32 = vmul.f32 %v4095_v0, %v9319_v14  ;;  %v10784_v14 = vld [vmem:[#allocation17_spill] sm:$0xff]  ;;  %v6192_v0 = vstv %s6868_s15 }
0x1f13   :  { %7355 = vset.pattern.permute.xlu1 %v7614_v49  ;;  %v10398_v49 = vmul.f32 %v10190_v60, %v10784_v14 }
0x1f14   :  { %v4132_v63 = vadd.f32 %v4119_v9, %v4108_v32  ;;  %5105 = vperm.xlu1 %7355, %v5063_v35   ;;  %3249 = vrot.lane.b32.xlu0 %v9158_v31, %s7529_s26  ;;  %v10785_v9 = vld [vmem:[#allocation15_spill] sm:$0xff]  ;;  %v6006_v33 = vpop.permute.xlu1 %6005  ;;  %v5992_v32 = vmul.f32 %v10336_v36, %v10020_v43 }
0x1f15   :  { %3073 = vrot.lane.b32.xlu2 %v9130_v26, %s7529_s26  ;;  %v3061_v26 = vmul.f32 %v10785_v9, %v10391_v34  ;;  %v3238_v23 = vmul.f32 %v10786_v15, %v10398_v49  ;;  %v6014_v7 = vadd.f32 %v6006_v33, %v5994_v50 }
0x1f16   :  { %v4312_v18 = vsel %vm1423_vm6, %v4132_v63, %v10302_v10  ;;  %7359 = vset.pattern.permute.xlu2 %v7619_v45  ;;  %v4086_v10 = vsub.f32 %v10348_v52, %v10248_v1  ;;  %v10791_v1 = vld [vmem:[#allocation16_spill] sm:$0xff]  ;;  %v6160_v63 = vmul.f32 %v10332_v8, %v10020_v43  ;;  %v6012_v27 = vadd.f32 %v6002_v47, %v5992_v32 }
0x1f17   :  { %vm4317_vm11 = vcmp.gt.f32.partialorder %v4312_v18, 0.0  ;;  %v4322_v40 = vmul.f32 %v10276_v62, %v4312_v18 }
0x1f18   :  { %v6004_v2 = vpop.permute.xlu2 %6003 }
0x1f19   :  { %v4326_v31 = vsel %vm4317_vm11, %v4312_v18, %v4322_v40  ;;  %v5993_v40 = vmul.f32 %v10341_v25, %v10022_v38 }
0x1f1a   :  { %6871 = vmatmul.msk.f32.gmra.mxu3 %vm1756_vm2, %v4326_v31 }
0x1f1b   :  { %v6013_v8 = vadd.f32 %v6004_v2, %v5993_v40 }
0x1f1c   :  { %7357 = vset.pattern.permute.xlu1 %v7615_v53  ;;  %3069 = vrot.lane.b32.xlu0 %v3061_v26, %s7529_s26  ;;  %v10421_v53 = vmul.f32 %v10288_v19, %v10784_v14  ;;  %v6161_v14 = vmul.f32 %v10334_v55, %v10022_v38 }
0x1f1d   :  { %4128 = vperm.xlu1 %7357, %v4086_v10   ;;  %3247 = vrot.lane.b32.xlu2 %v3238_v23, %s7529_s26 }
0x1f1e   :  { %v3237_v61 = vmul.f32 %v10786_v15, %v10421_v53 }
0x1f20   :  { %v10427_v20 = vpop.permute.xlu2 %5081 }
0x1f24   :  { %3278 = vperm.xlu0 %7360, %v10787_v13  }
0x1f25   :  { %3251 = vrot.lane.b32.xlu1 %v10788_v12, %s7529_s26  ;;  %3102 = vperm.xlu2 %7359, %v10789_v30  }
0x1f26   :  { %7361 = vset.pattern.permute.xlu1 %v7619_v45 }
0x1f29   :  { %v10434_v56 = vpop.permute.xlu2 %4104 }
0x1f2c   :  { %3092 = vperm.xlu0 %7360, %v10790_v54  }
0x1f2d   :  { %3071 = vrot.lane.b32.xlu1 %v10791_v1, %s7529_s26  ;;  %7362 = vset.pattern.permute.xlu2 %v7620_v16 }
0x1f34   :  { %7365 = vset.pattern.permute.xlu0 %v7620_v16 }
0x1f35   :  { %3245 = vrot.lane.b32.xlu1 %v3237_v61, %s7529_s26 }
0x1f3d   :  { %3097 = vperm.xlu1 %7361, %v10792_v6  }
0x1f45   :  { %3273 = vperm.xlu1 %7361, %v10793_v4  }
0x1f4d   :  { %7363 = vset.pattern.permute.xlu1 %v7620_v16 }
0x1f56   :  { %v6174_v24 = vpop.permute.xlu2 %6173 }
0x1f57   :  { %v6182_v44 = vadd.f32 %v6174_v24, %v6162_v22 }
0x1f59   :  { %v6186_v41 = vsel %vm2579_vm4, %v6014_v7, %v6182_v44 }
0x1f5e   :  { %v5282_v58 = vpop.permute.xlu2 %5281 }
0x1f64   :  { %v6168_v5 = vpop.permute.xlu1 %6167 }
0x1f65   :  { %v6179_v29 = vadd.f32 %v6168_v5, %v6159_v17 }
0x1f66   :  { %v6172_v28 = vpop.permute.xlu0 %6171 }
0x1f67   :  { %v6183_v57 = vsel %vm2579_vm4, %v10368_v51, %v6179_v29  ;;  %v10448_v35 = vpop.permute.xlu2 %4304  ;;  %v6181_v26 = vadd.f32 %v6172_v28, %v6161_v14 }
0x1f68   :  { %vm6188_vm13 = vcmp.gt.f32.partialorder %v6183_v57, 0.0  ;;  %v6193_v37 = vmul.f32 %v6192_v0, %v6183_v57 }
0x1f69   :  { %v6185_v10 = vsel %vm2579_vm4, %v6013_v8, %v6181_v26 }
0x1f6a   :  { %v6197_v3 = vsel %vm6188_vm13, %v6183_v57, %v6193_v37  ;;  %v6195_v12 = vmul.f32 %v6192_v0, %v6185_v10  ;;  %vm6190_vm0 = vcmp.gt.f32.partialorder %v6185_v10, 0.0 }
0x1f6b   :  { %6880 = vmatmul.msk.f32.vlgmr.msra.gmra.mxu1 %vm4858_vm7, %v6197_v3 }
0x1f6c   :  { %v6170_v21 = vpop.permute.xlu1 %6169 }
0x1f6d   :  { %v6180_v18 = vadd.f32 %v6170_v21, %v6160_v63 }
0x1f6e   :  { %v4276_v51 = vpop.permute.xlu0 %4275 }
0x1f6f   :  { %v3074_v31 = vpop.permute.xlu2 %3073  ;;  %v6184_v9 = vsel %vm2579_vm4, %v6012_v27, %v6180_v18  ;;  %v4285_v23 = vmul.f32 %v4276_v51, %v9321_v48  ;;  %v6199_v48 = vsel %vm6190_vm0, %v6185_v10, %v6195_v12  ;;  %vm6191_vm4 = vcmp.gt.f32.partialorder %v6186_v41, 0.0  ;;  %v83_v27 = vld [vmem:[%s10685_s2 + $0x58] sm:$0xff]  ;;  %v7501_v18 = vld [vmem:[%s10685_s2 + $0x50] sm:$0xff] }
0x1f70   :  { %v3083_v36 = vsub.f32 %v10294_v39, %v3074_v31  ;;  %vm6189_vm15 = vcmp.gt.f32.partialorder %v6184_v9, 0.0  ;;  %v6194_v43 = vmul.f32 %v6192_v0, %v6184_v9  ;;  %v75_v51 = vld [vmem:[%s10685_s2 + $0x18] sm:$0xff] }
0x1f71   :  { %v87_v31 = vld [vmem:[%s10685_s2 + $0x78] sm:$0xff] }
0x1f72   :  { %3121 = vperm.xlu1 %7363, %v3083_v36   ;;  %v6198_v15 = vsel %vm6189_vm15, %v6184_v9, %v6194_v43  ;;  %v7503_v9 = vld [vmem:[%s10685_s2 + $0x70] sm:$0xff] }
0x1f73   :  { %6881 = vmatmul.msk.f32.gmra.mxu1 %vm4858_vm7, %v6198_v15  ;;  %v7384_v26 = vpack.i.bf16 %v87_v31, %v7503_v9 }
0x1f74   :  { %v4300_v55 = vpop.permute.xlu1 %4299 }
0x1f75   :  { %v4309_v13 = vadd.f32 %v4300_v55, %v4285_v23  ;;  %v6276_v55 = vpop.f32.mrf.mxu0 }
0x1f76   :  { %v4281_v38 = vpop.permute.xlu0 %4280 }
0x1f77   :  { %v4313_v25 = vsel %vm1423_vm6, %v10361_v46, %v4309_v13  ;;  %v6196_v46 = vmul.f32 %v6192_v0, %v6186_v41  ;;  %v3248_v14 = vpop.permute.xlu2 %3247 }
0x1f78   :  { %vm4318_vm5 = vcmp.gt.f32.partialorder %v4313_v25, 0.0  ;;  %v4323_v30 = vmul.f32 %v10276_v62, %v4313_v25 }
0x1f79   :  { %v6200_v6 = vsel %vm6191_vm4, %v6186_v41, %v6196_v46 }
0x1f7a   :  { %7366 = vset.pattern.permute.xlu1 %v7619_v45  ;;  %v4327_v54 = vsel %vm4318_vm5, %v4313_v25, %v4323_v30 }
0x1f7b   :  { %3087 = vperm.xlu1 %7366, %v10391_v34   ;;  %6872 = vmatmul.msk.f32.gmra.mxu3 %vm1756_vm2, %v4327_v54  ;;  %v5087_v34 = vmul.f32 %v10427_v20, %v9739_v42  ;;  %v6230_v54 = vpop.f32.mrf.mxu3 }
0x1f7c   :  { %6882 = vmatmul.msk.f32.gmra.mxu1 %vm4858_vm7, %v6199_v48 }
0x1f7d   :  { %v5258_v1 = vpop.permute.xlu1 %5257  ;;  %v6279_v25 = vpop.f32.mrf.mxu0 }
0x1f7e   :  { %v3076_v47 = vpop.permute.xlu0 %3075  ;;  %v5263_v2 = vmul.f32 %v5258_v1, %v9739_v42 }
0x1f7f   :  { %v3084_v61 = vsub.f32 %v10348_v52, %v3076_v47  ;;  %v3103_v43 = vpop.permute.xlu2 %3102 }
0x1f80   :  { %v5287_v33 = vadd.f32 %v5282_v58, %v5263_v2 }
0x1f81   :  { %3126 = vperm.xlu2 %7362, %v3084_v61  }
0x1f83   :  { %3263 = vperm.xlu1 %7366, %v10421_v53   ;;  %v10794_v53 = vld [vmem:[#allocation22_spill] sm:$0xff] }
0x1f84   :  { %6883 = vmatmul.msk.f32.gmra.mxu1 %vm4858_vm7, %v6200_v6  ;;  %v4286_v44 = vmul.f32 %v4281_v38, %v10794_v53  ;;  %v4110_v42 = vmul.f32 %v10434_v56, %v10794_v53  ;;  %v7500_v56 = vld [vmem:[%s10685_s2 + $0x30] sm:$0xff] }
0x1f85   :  { %v10796_v53 = vld [vmem:[#allocation11_spill] sm:$0xff] }
0x1f86   :  { %v3250_v4 = vpop.permute.xlu0 %3249  ;;  %v5106_v59 = vpop.permute.xlu1 %5105  ;;  %v4310_v5 = vadd.f32 %v10448_v35, %v4286_v44 }
0x1f87   :  { %v3259_v50 = vsub.f32 %v10294_v39, %v3250_v4  ;;  %v5111_v22 = vadd.f32 %v5106_v59, %v5087_v34 }
0x1f89   :  { %3297 = vperm.xlu0 %7365, %v3259_v50   ;;  %v5291_v24 = vsel %vm2002_vm3, %v5111_v22, %v5287_v33  ;;  %v7621_v33 = vmov 36   ;;  %v10795_v50 = vld [vmem:[#allocation10_spill] sm:$0xff] }
0x1f8a   :  { %vm5296_vm8 = vcmp.gt.f32.partialorder %v5291_v24, 0.0  ;;  %v5301_v7 = vmul.f32 %v10263_v11, %v5291_v24  ;;  %v79_v11 = vld [vmem:[%s10685_s2 + $0x38] sm:$0xff] }
0x1f8b   :  { %7368 = vset.pattern.permute.xlu1 %v7620_v16  ;;  %v7374_v57 = vpack.i.bf16 %v79_v11, %v7500_v56 }
0x1f8c   :  { %v5305_v41 = vsel %vm5296_vm8, %v5291_v24, %v5301_v7  ;;  %v6282_v1 = vpop.f32.mrf.mxu0  ;;  %v3108_v7 = vmul.f32 %v3103_v43, %v10795_v50 }
0x1f8d   :  { %6878 = vmatmul.msk.f32.gmra.mxu0 %vm2333_vm14, %v5305_v41 }
0x1f8e   :  { %v3070_v20 = vpop.permute.xlu0 %3069 }
0x1f8f   :  { %v3081_v58 = vsub.f32 %v10288_v19, %v3070_v20  ;;  %v4129_v17 = vpop.permute.xlu1 %4128 }
0x1f90   :  { %v4134_v29 = vadd.f32 %v4129_v17, %v4110_v42 }
0x1f91   :  { %3111 = vperm.xlu0 %7365, %v3081_v58  }
0x1f92   :  { %v4314_v28 = vsel %vm1423_vm6, %v4134_v29, %v4310_v5  ;;  %v10797_v5 = vld [vmem:[#allocation8_spill] sm:$0xff] }
0x1f93   :  { %vm4319_vm3 = vcmp.gt.f32.partialorder %v4314_v28, 0.0  ;;  %v4324_v0 = vmul.f32 %v10276_v62, %v4314_v28 }
0x1f95   :  { %v4328_v37 = vsel %vm4319_vm3, %v4314_v28, %v4324_v0 }
0x1f96   :  { %6873 = vmatmul.msk.f32.gmra.mxu3 %vm1756_vm2, %v4328_v37  ;;  %v3279_v12 = vpop.permute.xlu0 %3278  ;;  %v10798_v37 = vld [vmem:[#allocation9_spill] sm:$0xff] }
0x1f97   :  { %v3252_v35 = vpop.permute.xlu1 %3251  ;;  %v3284_v22 = vmul.f32 %v3279_v12, %v10795_v50 }
0x1f98   :  { %v3260_v3 = vsub.f32 %v10348_v52, %v3252_v35 }
0x1f99   :  { %7375 = vrot.lane.b32.xlu0 %v7374_v57, %s10770_s20 }
0x1f9a   :  { %3302 = vperm.xlu2 %7362, %v3260_v3   ;;  %7389 = vset.pattern.permute.xlu0 %v7621_v33 }
0x1f9d   :  { %v6233_v61 = vpop.f32.mrf.mxu3 }
0x1f9e   :  { %v3093_v46 = vpop.permute.xlu0 %3092 }
0x1f9f   :  { %v3072_v32 = vpop.permute.xlu1 %3071 }
0x1fa0   :  { %v3082_v21 = vsub.f32 %v10190_v60, %v3072_v32 }
0x1fa1   :  { %6334 = vperm.xlu0 %7389, %v10288_v19  }
0x1fa2   :  { %7364 = vset.pattern.permute.xlu2 %v7619_v45  ;;  %v7379_v45 = vpack.i.bf16 %v83_v27, %v7501_v18 }
0x1fa3   :  { %3268 = vperm.xlu2 %7364, %v10398_v49   ;;  %v3258_v49 = vsub.f32 %v10190_v60, %v3248_v14 }
0x1fa7   :  { %v3246_v62 = vpop.permute.xlu1 %3245 }
0x1fa8   :  { %v3257_v63 = vsub.f32 %v10288_v19, %v3246_v62 }
0x1faa   :  { %3287 = vperm.xlu1 %7368, %v3257_v63  }
0x1fab   :  { %7367 = vset.pattern.permute.xlu2 %v7620_v16  ;;  %v7502_v16 = vld [vmem:[%s10685_s2 + $0x10] sm:$0xff]  ;;  %s6843_s2 = sld [smem:[#allocation2 + $0x1]] }
0x1fac   :  { %3116 = vperm.xlu2 %7367, %v3082_v21   ;;  %v7369_v40 = vpack.i.bf16 %v75_v51, %v7502_v16 }
0x1faf   :  { %v3098_v8 = vpop.permute.xlu1 %3097 }
0x1fb0   :  { %v3107_v20 = vmul.f32 %v3098_v8, %v10796_v53 }
0x1fb1   :  { %v3318_v57 = vstv %s6843_s2 }
0x1fb2   :  { %7380 = vrot.lane.b32.xlu1 %v7379_v45, %s10770_s20 }
0x1fb3   :  { %7390 = vset.pattern.permute.xlu1 %v7621_v33 }
0x1fb4   :  { %3292 = vperm.xlu2 %7367, %v3258_v49  }
0x1fb7   :  { %v3274_v10 = vpop.permute.xlu1 %3273 }
0x1fb8   :  { %v3283_v44 = vmul.f32 %v3274_v10, %v10796_v53 }
0x1fba   :  { %6338 = vperm.xlu1 %7390, %v10190_v60   ;;  %v3106_v60 = vmul.f32 %v3093_v46, %v10797_v5 }
0x1fbc   :  { %7370 = vrot.lane.b32.xlu2 %v7369_v40, %s10770_s20 }
0x1fbd   :  { %7391 = vset.pattern.permute.xlu2 %v7621_v33 }
0x1fc2   :  { %6346 = vperm.xlu1 %7390, %v10348_v52  }
0x1fc4   :  { %7385 = vrot.lane.b32.xlu2 %v7384_v26, %s10770_s20 }
0x1fcc   :  { %6342 = vperm.xlu2 %7391, %v10294_v39  }
0x1fdb   :  { %v3127_v23 = vpop.permute.xlu2 %3126 }
0x1fdc   :  { %v3132_v58 = vadd.f32 %v3127_v23, %v3108_v7 }
0x1fe4   :  { %v3122_v30 = vpop.permute.xlu1 %3121 }
0x1fe5   :  { %v3131_v28 = vadd.f32 %v3122_v30, %v3107_v20 }
0x1fe8   :  { %v6321_v36 = vpop.f32.mrf.mxu1 }
0x1fed   :  { %v3088_v2 = vpop.permute.xlu1 %3087 }
0x1fee   :  { %v3105_v32 = vmul.f32 %v3088_v2, %v10798_v37 }
0x1ff0   :  { %v6324_v15 = vpop.f32.mrf.mxu1 }
0x1ff4   :  { %v3303_v13 = vpop.permute.xlu2 %3302 }
0x1ff5   :  { %v3264_v24 = vpop.permute.xlu1 %3263  ;;  %v3308_v41 = vadd.f32 %v3303_v13, %v3284_v22 }
0x1ff6   :  { %v3281_v35 = vmul.f32 %v3264_v24, %v10798_v37 }
0x1ff7   :  { %v3312_v56 = vsel %vm154_vm1, %v3132_v58, %v3308_v41 }
0x1ff8   :  { %v3322_v18 = vmul.f32 %v3318_v57, %v3312_v56  ;;  %vm3317_vm6 = vcmp.gt.f32.partialorder %v3312_v56, 0.0 }
0x1ff9   :  { %v6327_v38 = vpop.f32.mrf.mxu1 }
0x1ffa   :  { %v3326_v40 = vsel %vm3317_vm6, %v3312_v56, %v3322_v18 }
0x1ffb   :  { %v3298_v4 = vpop.permute.xlu0 %3297 }
0x1ffc   :  { %v3307_v17 = vadd.f32 %v3298_v4, %v3283_v44 }
0x1ffd   :  { %v3269_v47 = vpop.permute.xlu2 %3268 }
0x1ffe   :  { %v6236_v59 = vpop.f32.mrf.mxu3  ;;  %v3282_v29 = vmul.f32 %v3269_v47, %v10797_v5  ;;  %v3311_v21 = vsel %vm154_vm1, %v3131_v28, %v3307_v17 }
0x1fff   :  { %v3321_v49 = vmul.f32 %v3318_v57, %v3311_v21  ;;  %vm3316_vm2 = vcmp.gt.f32.partialorder %v3311_v21, 0.0 }
0x2001   :  { %v6330_v48 = vpop.f32.mrf.mxu1 }
0x2002   :  { %6377 = vmatpush.msra.mxu2 %v6330_v48 }
0x2003   :  { %v3112_v3 = vpop.permute.xlu0 %3111 }
0x2004   :  { %6378 = vmatpush.msra.mxu2 %v6327_v38  ;;  %v3129_v45 = vadd.f32 %v3112_v3, %v3105_v32 }
0x2006   :  { %6379 = vmatpush.msra.mxu2 %v6324_v15  ;;  %v3117_v34 = vpop.permute.xlu2 %3116 }
0x2007   :  { %v3130_v62 = vadd.f32 %v3117_v34, %v3106_v60 }
0x2008   :  { %6380 = vmatpush.msra.mxu2 %v6321_v36  ;;  %v3325_v36 = vsel %vm3316_vm2, %v3311_v21, %v3321_v49 }
0x200a   :  { %v6285_v6 = vpop.f32.mrf.mxu0 }
0x200b   :  { %6381 = vmatpush.msra.mxu2 %v6285_v6 }
0x200d   :  { %6382 = vmatpush.msra.mxu2 %v6282_v1 }
0x200e   :  { %v3293_v42 = vpop.permute.xlu2 %3292 }
0x200f   :  { %6383 = vmatpush.msra.mxu2 %v6279_v25  ;;  %v3306_v0 = vadd.f32 %v3293_v42, %v3282_v29 }
0x2011   :  { %6384 = vmatpush.msra.mxu2 %v6276_v55  ;;  %v3310_v14 = vsel %vm154_vm1, %v3130_v62, %v3306_v0  ;;  %v7376_v55 = vpop.permute.xlu0 %7375 }
0x2012   :  { %v3320_v31 = vmul.f32 %v3318_v57, %v3310_v14  ;;  %vm3315_vm14 = vcmp.gt.f32.partialorder %v3310_v14, 0.0  ;;  %v7378_v10 = vunpack.i.h.bf16 %v7376_v55  ;;  %v7377_v13 = vunpack.i.l.bf16 %v7376_v55 }
0x2014   :  { %v3324_v8 = vsel %vm3315_vm14, %v3310_v14, %v3320_v31  ;;  %v6370_v38 = vsel %vm521_vm10, %v7377_v13, %v7378_v10 }
0x2016   :  { %v7371_v51 = vpop.permute.xlu2 %7370 }
0x2017   :  { %v7373_v9 = vunpack.i.h.bf16 %v7371_v51  ;;  %v7372_v26 = vunpack.i.l.bf16 %v7371_v51 }
0x2019   :  { %v6239_v11 = vpop.f32.mrf.mxu3  ;;  %v6369_v15 = vsel %vm521_vm10, %v7372_v26, %v7373_v9  ;;  %v6335_v46 = vpop.permute.xlu0 %6334 }
0x201a   :  { %6385 = vmatpush.msra.mxu2 %v6239_v11 }
0x201c   :  { %6386 = vmatpush.msra.mxu2 %v6236_v59  ;;  %v3288_v63 = vpop.permute.xlu1 %3287 }
0x201d   :  { %v3305_v27 = vadd.f32 %v3288_v63, %v3281_v35 }
0x201e   :  { %6387 = vmatpush.msra.mxu2 %v6233_v61  ;;  %v7386_v48 = vpop.permute.xlu2 %7385 }
0x201f   :  { %v3309_v16 = vsel %vm154_vm1, %v3129_v45, %v3305_v27  ;;  %v7388_v1 = vunpack.i.h.bf16 %v7386_v48  ;;  %v7387_v47 = vunpack.i.l.bf16 %v7386_v48 }
0x2020   :  { %6388 = vmatpush.msra.mxu2 %v6230_v54  ;;  %v3319_v43 = vmul.f32 %v3318_v57, %v3309_v16  ;;  %vm3314_vm7 = vcmp.gt.f32.partialorder %v3309_v16, 0.0 }
0x2021   :  { %v6372_v61 = vsel %vm521_vm10, %v7387_v47, %v7388_v1 }
0x2022   :  { %6389 = vmatpush.msra.mxu2 %v3326_v40  ;;  %v3323_v23 = vsel %vm3314_vm7, %v3309_v16, %v3319_v43 }
0x2024   :  { %6390 = vmatpush.msra.mxu2 %v3325_v36  ;;  %v7381_v25 = vpop.permute.xlu1 %7380 }
0x2025   :  { %v7383_v12 = vunpack.i.h.bf16 %v7381_v25  ;;  %v7382_v30 = vunpack.i.l.bf16 %v7381_v25 }
0x2026   :  { %6391 = vmatpush.msra.mxu2 %v3324_v8  ;;  %v6343_v33 = vpop.permute.xlu2 %6342 }
0x2027   :  { %v6371_v54 = vsel %vm521_vm10, %v7382_v30, %v7383_v12 }
0x2028   :  { %6392 = vmatpush.msra.mxu2 %v3323_v23 }
0x2029   :  { %6393 = vmatmul.f32.vlgmr.msra.gmra.mxu2 %v6369_v15 }
0x202c   :  { %v6339_v59 = vpop.permute.xlu1 %6338 }
0x2031   :  { %6396 = vmatmul.f32.gmra.mxu2 %v6370_v38 }
0x2034   :  { %v6347_v58 = vpop.permute.xlu1 %6346 }
0x2039   :  { %6399 = vmatmul.f32.gmra.mxu2 %v6371_v54 }
0x2041   :  { %6402 = vmatmul.f32.gmra.mxu2 %v6372_v61 }
0x20ac   :  { %v6394_v2 = vpop.f32.mrf.mxu2 }
0x20ad   :  { %v10545_v6 = vadd.f32 %v6394_v2, %v6335_v46 }
0x20af   :  { %6558 = vrot.lane.b32.xlu1 %v10545_v6, %s7526_s0  ;;  %v6422_v4 = vmul.f32 %v10545_v6, %v10545_v6  ;;  %v6406_v41 = vsel %vm154_vm1, %v10545_v6, 0.0 }
0x20b1   :  { %v6426_v60 = vsel %vm154_vm1, %v6422_v4, 0.0 }
0x20b4   :  { %v6397_v34 = vpop.f32.mrf.mxu2 }
0x20b5   :  { %v10552_v50 = vadd.f32 %v6397_v34, %v6339_v59 }
0x20b7   :  { %6590 = vrot.lane.b32.xlu1 %v6422_v4, %s7526_s0  ;;  %v6423_v7 = vmul.f32 %v10552_v50, %v10552_v50  ;;  %v6407_v53 = vsel %vm154_vm1, %v10552_v50, 0.0 }
0x20b8   :  { %v6408_v5 = vadd.f32 %v6407_v53, %v6406_v41 }
0x20b9   :  { %v6427_v20 = vsel %vm154_vm1, %v6423_v7, 0.0 }
0x20ba   :  { %v6428_v0 = vadd.f32 %v6427_v20, %v6426_v60 }
0x20bc   :  { %v6400_v22 = vpop.f32.mrf.mxu2 }
0x20bd   :  { %v10554_v24 = vadd.f32 %v6400_v22, %v6343_v33 }
0x20bf   :  { %6560 = vrot.lane.b32.xlu1 %v10552_v50, %s7526_s0  ;;  %v6424_v44 = vmul.f32 %v10554_v24, %v10554_v24  ;;  %v6409_v42 = vsel %vm154_vm1, %v10554_v24, 0.0 }
0x20c0   :  { %v6410_v28 = vadd.f32 %v6409_v42, %v6408_v5 }
0x20c1   :  { %v6429_v11 = vsel %vm154_vm1, %v6424_v44, 0.0 }
0x20c2   :  { %v6430_v35 = vadd.f32 %v6429_v11, %v6428_v0 }
0x20c4   :  { %v6403_v17 = vpop.f32.mrf.mxu2 }
0x20c5   :  { %v10569_v29 = vadd.f32 %v6403_v17, %v6347_v58  ;;  %v7622_v58 = vmov 37  }
0x20c6   :  { %7394 = vset.pattern.permute.xlu0 %v7622_v58  ;;  %7393 = vset.pattern.permute.xlu2 %v7622_v58 }
0x20c7   :  { %6592 = vrot.lane.b32.xlu1 %v6423_v7, %s7526_s0  ;;  %v6411_v56 = vsel %vm154_vm1, %v10569_v29, 0.0  ;;  %v6425_v57 = vmul.f32 %v10569_v29, %v10569_v29 }
0x20c8   :  { %v6412_v37 = vadd.f32 %v6411_v56, %v6410_v28  ;;  %7392 = vset.pattern.permute.xlu1 %v7622_v58 }
0x20c9   :  { %v6431_v3 = vsel %vm154_vm1, %v6425_v57, 0.0 }
0x20ca   :  { %6413 = vadd.xlane.f32.xlu2 %v6412_v37  ;;  %v6432_v32 = vadd.f32 %v6431_v3, %v6430_v35  ;;  %v10604_v3 = vld [vmem:[%s10688_s5 + $0x8] sm:$0xff] }
0x20cc   :  { %6433 = vadd.xlane.f32.xlu0 %v6432_v32 }
0x20cf   :  { %6562 = vrot.lane.b32.xlu1 %v10554_v24, %s7526_s0 }
0x20d7   :  { %6596 = vrot.lane.b32.xlu1 %v6425_v57, %s7526_s0 }
0x20e0   :  { %6594 = vrot.lane.b32.xlu0 %v6424_v44, %s7526_s0 }
0x20e2   :  { %6564 = vrot.lane.b32.xlu2 %v10569_v29, %s7526_s0 }
0x2121   :  { %v6559_v62 = vpop.permute.xlu1 %6558 }
0x2122   :  { %v6570_v31 = vsel %vm154_vm1, %v6559_v62, 0.0 }
0x2129   :  { %v6591_v63 = vpop.permute.xlu1 %6590 }
0x212a   :  { %v6602_v1 = vsel %vm154_vm1, %v6591_v63, 0.0 }
0x2131   :  { %v6561_v21 = vpop.permute.xlu1 %6560 }
0x2132   :  { %v6571_v49 = vsel %vm154_vm1, %v6561_v21, 0.0 }
0x2133   :  { %v6572_v43 = vadd.f32 %v6571_v49, %v6570_v31 }
0x2139   :  { %v6593_v27 = vpop.permute.xlu1 %6592 }
0x213a   :  { %v6603_v48 = vsel %vm154_vm1, %v6593_v27, 0.0 }
0x213b   :  { %v6604_v47 = vadd.f32 %v6603_v48, %v6602_v1 }
0x213d   :  { %v6414_v18 = vpop.xlane.xlu2 %6413 }
0x213e   :  { %v6415_v45 = vrot.slane %v6414_v18, 4 }
0x213f   :  { %v6434_v14 = vpop.xlane.xlu0 %6433 }
0x2140   :  { %v6416_v51 = vadd.f32 %v6415_v45, %v6414_v18  ;;  %v6435_v16 = vrot.slane %v6434_v14, 4 }
0x2141   :  { %v6563_v40 = vpop.permute.xlu1 %6562 }
0x2142   :  { %v6417_v9 = vrot.slane %v6416_v51, 2  ;;  %v6436_v26 = vadd.f32 %v6435_v16, %v6434_v14  ;;  %v6573_v36 = vsel %vm154_vm1, %v6563_v40, 0.0 }
0x2143   :  { %v6574_v23 = vadd.f32 %v6573_v36, %v6572_v43 }
0x2144   :  { %v6437_v8 = vrot.slane %v6436_v26, 2  ;;  %v6418_v15 = vadd.f32 %v6417_v9, %v6416_v51 }
0x2145   :  { %v6565_v55 = vpop.permute.xlu2 %6564 }
0x2146   :  { %v6575_v10 = vsel %vm154_vm1, %v6565_v55, 0.0  ;;  %v6419_v13 = vrot.slane %v6418_v15, 1  ;;  %v6438_v38 = vadd.f32 %v6437_v8, %v6436_v26 }
0x2147   :  { %v6576_v25 = vadd.f32 %v6575_v10, %v6574_v23 }
0x2148   :  { %v6420_v12 = vadd.f32 %v6419_v13, %v6418_v15  ;;  %v6439_v30 = vrot.slane %v6438_v38, 1 }
0x2149   :  { %6577 = vadd.xlane.f32.xlu1 %v6576_v25  ;;  %v6597_v61 = vpop.permute.xlu1 %6596 }
0x214a   :  { %7039 = vpush %v6420_v12  ;;  %v6440_v54 = vadd.f32 %v6439_v30, %v6438_v38  ;;  %v6607_v4 = vsel %vm154_vm1, %v6597_v61, 0.0  ;;  %v7505_v38 = vld [vmem:[%s10688_s5] sm:$0xff] }
0x214c   :  { %7041 = vpush %v6440_v54 }
0x2152   :  { %v6595_v46 = vpop.permute.xlu0 %6594 }
0x2153   :  { %v6605_v2 = vsel %vm154_vm1, %v6595_v46, 0.0 }
0x2154   :  { %v6606_v34 = vadd.f32 %v6605_v2, %v6604_v47  ;;  %v7506_v47 = vld [vmem:[%s10688_s5 + $0x10] sm:$0xff] }
0x2156   :  { %v6608_v59 = vadd.f32 %v6607_v4, %v6606_v34  ;;  %v7623_v4 = vmov 38  }
0x2158   :  { %6609 = vadd.xlane.f32.xlu0 %v6608_v59 }
0x217b   :  { %s7040_s0 = spop %7039 }
0x217c   :  { %s10594_s20 = smul.f32 %s7040_s0, %s7808_s17 }
0x217d   :  { %s7042_s14 = spop %7041 }
0x217e   :  { %s6460_s13 = smul.f32 %s10594_s20, %s10594_s20  ;;  %v6481_v49 = vstv %s10594_s20 }
0x217f   :  { %s6459_s28 = smul.f32 %s7042_s14, %s7808_s17 }
0x2181   :  { %s6461_s15 = ssub.f32 %s6459_s28, %s6460_s13 }
0x2183   :  { %s6462_s12 = smax.f32 %s7528_s22, %s6461_s15 }
0x2184   :  { %s6463_s8 = sadd.f32 1e-08, %s6462_s12 }
0x2186   :  { %v6464_v33 = vstv %s6463_s8 }
0x2187   :  { %7456 = vrsqrt.f32 %v6464_v33  ;;  %vm6471_vm12 = vweird.f32 %v6464_v33 }
0x218d   :  { %v7457_v22 = vpop.eup %7456 }
0x218e   :  { %v6466_v7 = vmul.f32 %v7457_v22, %v6464_v33  ;;  %vm6472_vm9 = vweird.f32 %v7457_v22 }
0x218f   :  { %vm6473_vm11 = vmor %vm6471_vm12, %vm6472_vm9 }
0x2190   :  { %v6467_v53 = vmul.f32 %v7457_v22, %v6466_v7 }
0x2192   :  { %v6468_v44 = vmul.f32 0.5, %v6467_v53 }
0x2194   :  { %v6469_v41 = vsub.f32 1.5, %v6468_v44 }
0x2196   :  { %v6470_v42 = vmul.f32 %v7457_v22, %v6469_v41 }
0x2198   :  { %v6474_v20 = vsel %vm6473_vm11, %v7457_v22, %v6470_v42 }
0x2199   :  { %7043 = vpush %v6474_v20 }
0x21bc   :  { %v6578_v17 = vpop.xlane.xlu1 %6577 }
0x21bd   :  { %v6579_v5 = vrot.slane %v6578_v17, 4 }
0x21bf   :  { %v6580_v60 = vadd.f32 %v6579_v5, %v6578_v17  ;;  %v10799_v5 = vmov 0  }
0x21c1   :  { %v6581_v11 = vrot.slane %v6580_v60, 2 }
0x21c3   :  { %v6582_v28 = vadd.f32 %v6581_v11, %v6580_v60 }
0x21c5   :  { %v6583_v0 = vrot.slane %v6582_v28, 1 }
0x21c7   :  { %v6584_v56 = vadd.f32 %v6583_v0, %v6582_v28  ;;  %v7507_v0 = vld [vmem:[%s10688_s5 + $0x18] sm:$0xff]  ;;  %s6884_s5 = sld [smem:[#allocation2 + $0x5]] }
0x21c9   :  { %7045 = vpush %v6584_v56 }
0x21ca   :  { %s7044_s23 = spop %7043 }
0x21cb   :  { %v6476_v57 = vstv %s7044_s23  ;;  %v6610_v37 = vpop.xlane.xlu0 %6609 }
0x21cc   :  { %v6477_v35 = vmul.f32 %v10288_v19, %v6476_v57  ;;  %v6478_v32 = vmul.f32 %v10604_v3, %v6476_v57  ;;  %v6480_v62 = vmul.f32 %v10348_v52, %v6476_v57  ;;  %v6611_v63 = vrot.slane %v6610_v37, 4 }
0x21cd   :  { %v6479_v19 = vmul.f32 %v10294_v39, %v6476_v57 }
0x21ce   :  { %6523 = vperm.xlu0 %7394, %v6480_v62   ;;  %v6612_v21 = vadd.f32 %v6611_v63, %v6610_v37  ;;  %6513 = vperm.xlu2 %7393, %v6478_v32   ;;  %v6482_v51 = vmul.f32 %v6481_v49, %v6477_v35  ;;  %v6483_v16 = vmul.f32 %v6481_v49, %v6478_v32 }
0x21cf   :  { %6508 = vperm.xlu1 %7392, %v6477_v35   ;;  %v6484_v40 = vmul.f32 %v6481_v49, %v6479_v19  ;;  %v6485_v31 = vmul.f32 %v6481_v49, %v6480_v62 }
0x21d0   :  { %v6613_v27 = vrot.slane %v6612_v21, 2 }
0x21d2   :  { %v6614_v18 = vadd.f32 %v6613_v27, %v6612_v21 }
0x21d4   :  { %v6615_v45 = vrot.slane %v6614_v18, 1 }
0x21d6   :  { %6518 = vperm.xlu2 %7393, %v6479_v19   ;;  %v6616_v14 = vadd.f32 %v6615_v45, %v6614_v18  ;;  %v6750_v19 = vld [vmem:[%s10687_s4] sm:$0xff] }
0x21d8   :  { %7047 = vpush %v6616_v14 }
0x21de   :  { %6490 = vrot.lane.b32.xlu2 %v6482_v51, %s7529_s26 }
0x21e6   :  { %6492 = vrot.lane.b32.xlu2 %v6483_v16, %s7529_s26 }
0x21ee   :  { %6494 = vrot.lane.b32.xlu2 %v6484_v40, %s7529_s26 }
0x21f6   :  { %6496 = vrot.lane.b32.xlu2 %v6485_v31, %s7529_s26 }
0x21fa   :  { %s7046_s11 = spop %7045 }
0x21fb   :  { %s6626_s6 = smul.f32 %s7046_s11, %s7808_s17 }
0x21fd   :  { %s6636_s9 = smul.f32 %s6626_s6, %s6626_s6  ;;  %v6657_v30 = vstv %s6626_s6 }
0x2209   :  { %s7048_s19 = spop %7047 }
0x220a   :  { %s6635_s1 = smul.f32 %s7048_s19, %s7808_s17 }
0x220c   :  { %s6637_s18 = ssub.f32 %s6635_s1, %s6636_s9 }
0x220e   :  { %s6638_s7 = smax.f32 %s7528_s22, %s6637_s18 }
0x220f   :  { %s6639_s29 = sadd.f32 1e-08, %s6638_s7 }
0x2211   :  { %v6640_v39 = vstv %s6639_s29 }
0x2212   :  { %7458 = vrsqrt.f32 %v6640_v39  ;;  %vm6647_vm15 = vweird.f32 %v6640_v39 }
0x2218   :  { %v7459_v9 = vpop.eup %7458 }
0x2219   :  { %v6642_v26 = vmul.f32 %v7459_v9, %v6640_v39  ;;  %vm6648_vm13 = vweird.f32 %v7459_v9 }
0x221a   :  { %vm6649_vm5 = vmor %vm6647_vm15, %vm6648_vm13 }
0x221b   :  { %v6643_v36 = vmul.f32 %v7459_v9, %v6642_v26 }
0x221d   :  { %v6644_v43 = vmul.f32 0.5, %v6643_v36 }
0x221f   :  { %v6645_v8 = vsub.f32 1.5, %v6644_v43 }
0x2221   :  { %v6646_v15 = vmul.f32 %v7459_v9, %v6645_v8 }
0x2223   :  { %v6650_v23 = vsel %vm6649_vm5, %v7459_v9, %v6646_v15 }
0x2224   :  { %7049 = vpush %v6650_v23 }
0x2228   :  { %v10617_v55 = vpop.permute.xlu2 %6513 }
0x2229   :  { %v6527_v31 = vmul.f32 %v10617_v55, %v10552_v50 }
0x2230   :  { %v10619_v10 = vpop.permute.xlu2 %6518 }
0x2231   :  { %v6528_v51 = vmul.f32 %v10619_v10, %v10554_v24 }
0x2238   :  { %v6491_v54 = vpop.permute.xlu2 %6490 }
0x2239   :  { %v6502_v53 = vsub.f32 %v7505_v38, %v6491_v54 }
0x2240   :  { %v6493_v59 = vpop.permute.xlu2 %6492  ;;  %v6524_v63 = vpop.permute.xlu0 %6523 }
0x2241   :  { %v6503_v22 = vsub.f32 %v10604_v3, %v6493_v59  ;;  %v6509_v60 = vpop.permute.xlu1 %6508  ;;  %v6529_v39 = vmul.f32 %v6524_v63, %v10569_v29 }
0x2242   :  { %v6526_v15 = vmul.f32 %v6509_v60, %v10545_v6 }
0x2248   :  { %v6495_v33 = vpop.permute.xlu2 %6494 }
0x2249   :  { %v6504_v41 = vsub.f32 %v7506_v47, %v6495_v33 }
0x2250   :  { %v6497_v7 = vpop.permute.xlu2 %6496 }
0x2251   :  { %v6505_v44 = vsub.f32 %v10348_v52, %v6497_v7  ;;  %v7508_v7 = vld [vmem:[%s10751_s27] sm:$0xff] }
0x2255   :  { %s7050_s17 = spop %7049 }
0x2256   :  { %v6652_v13 = vstv %s7050_s17 }
0x2257   :  { %v6653_v25 = vmul.f32 %v7505_v38, %v6652_v13  ;;  %v6654_v12 = vmul.f32 %v10604_v3, %v6652_v13  ;;  %v6655_v61 = vmul.f32 %v7506_v47, %v6652_v13  ;;  %v6656_v46 = vmul.f32 %v10348_v52, %v6652_v13 }
0x2259   :  { %v6658_v48 = vmul.f32 %v6657_v30, %v6653_v25  ;;  %v6659_v1 = vmul.f32 %v6657_v30, %v6654_v12  ;;  %6689 = vperm.xlu0 %7394, %v6654_v12   ;;  %v6660_v2 = vmul.f32 %v6657_v30, %v6655_v61  ;;  %v6661_v34 = vmul.f32 %v6657_v30, %v6656_v46 }
0x225b   :  { %6668 = vrot.lane.b32.xlu1 %v6659_v1, %s7529_s26  ;;  %6666 = vrot.lane.b32.xlu2 %v6658_v48, %s7529_s26 }
0x2261   :  { %7397 = vset.pattern.permute.xlu0 %v7623_v4 }
0x2263   :  { %6672 = vrot.lane.b32.xlu1 %v6661_v34, %s7529_s26  ;;  %6670 = vrot.lane.b32.xlu2 %v6660_v2, %s7529_s26  ;;  %v6748_v2 = vld [vmem:[%s10686_s3] sm:$0xff] }
0x226b   :  { %6694 = vperm.xlu1 %7392, %v6655_v61   ;;  %6684 = vperm.xlu2 %7393, %v6653_v25  }
0x2273   :  { %7396 = vset.pattern.permute.xlu1 %v7623_v4  ;;  %6699 = vperm.xlu2 %7393, %v6656_v46  }
0x2274   :  { %6537 = vperm.xlu1 %7396, %v6503_v22  }
0x227b   :  { %7395 = vset.pattern.permute.xlu2 %v7623_v4  ;;  %v6749_v4 = vld [vmem:[%s10686_s3 + $0x8] sm:$0xff] }
0x227c   :  { %6532 = vperm.xlu2 %7395, %v6502_v53   ;;  %6547 = vperm.xlu1 %7396, %v6505_v44  }
0x2284   :  { %6542 = vperm.xlu2 %7395, %v6504_v41  }
0x22b5   :  { %v6667_v42 = vpop.permute.xlu2 %6666 }
0x22b6   :  { %v6678_v20 = vsub.f32 %v7505_v38, %v6667_v42  ;;  %v6739_v38 = vstv %s6884_s5 }
0x22b8   :  { %6708 = vperm.xlu0 %7397, %v6678_v20   ;;  %v7509_v20 = vld [vmem:[%s10751_s27 + $0x8] sm:$0xff] }
0x22bd   :  { %v6671_v58 = vpop.permute.xlu2 %6670 }
0x22be   :  { %v6680_v17 = vsub.f32 %v7506_v47, %v6671_v58 }
0x22c0   :  { %6718 = vperm.xlu2 %7395, %v6680_v17   ;;  %7399 = vset.pattern.permute.xlu0 %v10799_v5 }
0x22c5   :  { %v6685_v57 = vpop.permute.xlu2 %6684 }
0x22c6   :  { %v6702_v26 = vmul.f32 %v6685_v57, %v10545_v6 }
0x22c8   :  { %7398 = vset.pattern.permute.xlu2 %v10799_v5 }
0x22c9   :  { %6754 = vperm.xlu2 %7398, %v6750_v19  }
0x22cb   :  { %v6690_v18 = vpop.permute.xlu0 %6689 }
0x22cc   :  { %v6703_v16 = vmul.f32 %v6690_v18, %v10552_v50 }
0x22cd   :  { %v6669_v11 = vpop.permute.xlu1 %6668  ;;  %v6700_v35 = vpop.permute.xlu2 %6699 }
0x22ce   :  { %v6679_v28 = vsub.f32 %v10604_v3, %v6669_v11  ;;  %v6751_v3 = vld [vmem:[%s10687_s4 + $0x8] sm:$0xff]  ;;  %v6705_v36 = vmul.f32 %v6700_v35, %v10569_v29 }
0x22cf   :  { %6759 = vperm.xlu0 %7399, %v6751_v3  }
0x22d0   :  { %6713 = vperm.xlu1 %7396, %v6679_v28  }
0x22d5   :  { %v6673_v52 = vpop.permute.xlu1 %6672 }
0x22d6   :  { %v6681_v56 = vsub.f32 %v7507_v0, %v6673_v52  ;;  %v6533_v62 = vpop.permute.xlu2 %6532 }
0x22d7   :  { %v6550_v50 = vadd.f32 %v6533_v62, %v6526_v15 }
0x22d8   :  { %6723 = vperm.xlu1 %7396, %v6681_v56  }
0x22dd   :  { %v6695_v37 = vpop.permute.xlu1 %6694 }
0x22de   :  { %v6543_v27 = vpop.permute.xlu2 %6542  ;;  %v6704_v49 = vmul.f32 %v6695_v37, %v10554_v24 }
0x22df   :  { %v6552_v43 = vadd.f32 %v6543_v27, %v6528_v51 }
0x22e6   :  { %v6538_v32 = vpop.permute.xlu1 %6537 }
0x22e7   :  { %v6551_v23 = vadd.f32 %v6538_v32, %v6527_v31 }
0x22ee   :  { %v6548_v21 = vpop.permute.xlu1 %6547 }
0x22ef   :  { %v6553_v13 = vadd.f32 %v6548_v21, %v6529_v39 }
0x231a   :  { %v6719_v14 = vpop.permute.xlu2 %6718 }
0x231b   :  { %v6728_v40 = vadd.f32 %v6719_v14, %v6704_v49 }
0x231d   :  { %v6732_v12 = vsel %vm154_vm1, %v6552_v43, %v6728_v40 }
0x231e   :  { %v6742_v29 = vmul.f32 %v6739_v38, %v6732_v12  ;;  %vm6737_vm4 = vcmp.gt.f32.partialorder %v6732_v12, 0.0 }
0x2320   :  { %v6746_v47 = vsel %vm6737_vm4, %v6732_v12, %v6742_v29 }
0x2323   :  { %v6755_v59 = vpop.permute.xlu2 %6754 }
0x232a   :  { %v6709_v9 = vpop.permute.xlu0 %6708 }
0x232b   :  { %v6726_v10 = vadd.f32 %v6709_v9, %v6702_v26 }
0x232d   :  { %v6730_v48 = vsel %vm154_vm1, %v6550_v50, %v6726_v10 }
0x232e   :  { %v6740_v61 = vmul.f32 %v6739_v38, %v6730_v48  ;;  %vm6735_vm3 = vcmp.gt.f32.partialorder %v6730_v48, 0.0 }
0x2330   :  { %v6744_v34 = vsel %vm6735_vm3, %v6730_v48, %v6740_v61 }
0x2341   :  { %v6760_v44 = vpop.permute.xlu0 %6759 }
0x2342   :  { %v6714_v45 = vpop.permute.xlu1 %6713 }
0x2343   :  { %v6727_v8 = vadd.f32 %v6714_v45, %v6703_v16 }
0x2345   :  { %v6731_v30 = vsel %vm154_vm1, %v6551_v23, %v6727_v8 }
0x2346   :  { %v6741_v1 = vmul.f32 %v6739_v38, %v6731_v30  ;;  %vm6736_vm8 = vcmp.gt.f32.partialorder %v6731_v30, 0.0 }
0x2348   :  { %v6745_v46 = vsel %vm6736_vm8, %v6731_v30, %v6741_v1 }
0x234a   :  { %v6724_v24 = vpop.permute.xlu1 %6723 }
0x234b   :  { %v6729_v25 = vadd.f32 %v6724_v24, %v6705_v36 }
0x234d   :  { %v6733_v55 = vsel %vm154_vm1, %v6553_v13, %v6729_v25 }
0x234e   :  { %v6743_v54 = vmul.f32 %v6739_v38, %v6733_v55  ;;  %vm6738_vm0 = vcmp.gt.f32.partialorder %v6733_v55, 0.0 }
0x2350   :  { %v6747_v6 = vsel %vm6738_vm0, %v6733_v55, %v6743_v54 }
0x2351   :  { %6780 = vmatpush.msra.mxu3 %v6747_v6 }
0x2353   :  { %6781 = vmatpush.msra.mxu3 %v6746_v47 }
0x2355   :  { %6782 = vmatpush.msra.mxu3 %v6745_v46 }
0x2357   :  { %6783 = vmatpush.msra.mxu3 %v6744_v34 }
0x2358   :  { %6885 = vmatmul.msk.f32.vlgmr.msra.gmra.mxu3 %vm154_vm1, %v6748_v2 }
0x2360   :  { %6886 = vmatmul.msk.f32.gmra.mxu3 %vm154_vm1, %v6749_v4 }
0x23db   :  { %v6785_v33 = vpop.f32.mrf.mxu3 }
0x23dc   :  { %v6786_v22 = vadd.f32 %v6785_v33, %v6755_v59 }
0x23de   :  { %v6791_v53 = vadd.f32 %v7508_v7, %v6786_v22 }
0x23e0   :  { %6793 = vst.msk [vmem:[%s10699_s16] sm:$0xff] %vm521_vm10, %v6791_v53 }
0x23e3   :  { %v6788_v41 = vpop.f32.mrf.mxu3 }
0x23e4   :  { %v6789_v42 = vadd.f32 %v6788_v41, %v6760_v44 }
0x23e6   :  { %v6792_v58 = vadd.f32 %v7509_v20, %v6789_v42 }
0x23e8   :  { %6794 = vst.msk [vmem:[%s10699_s16 + $0x8] sm:$0xff] %vm521_vm10, %v6792_v58 }
0x23e9   :  { %6799 = vsyncpa [#allocation3], 1 }

</bundles_post_ra>
